<compile_context>
chip_gen: v5e
topology: v5e:2x2
jax: 0.10.0
libtpu: 0.0.40
codegen_flags: <defaults>
</compile_context>

<pallas_src>
import jax
import jax.numpy as jnp
from jax.experimental import pallas as pl
from jax.experimental.pallas import tpu as pltpu

EPS = 1e-5
_PARALLEL = pltpu.CompilerParams(dimension_semantics=("parallel",))


# ----------------------------- kernels ------------------------------------ #

def _fc1_kernel(x_ref, w1_ref, b1_ref, h1_ref, stats_ref):
    """h1 = ReLU(x @ W1 + b1); also emit per-tile [sum; sumsq] over rows."""
    # TODO(synk): for dims >= ~1024 add a K-axis grid with a VMEM f32
    # accumulator (init via pl.when(k == 0)) so the x tile stays bounded under
    # v7x's 64 MiB VMEM without shrinking TILE_N.
    h = jnp.dot(x_ref[...], w1_ref[...], preferred_element_type=jnp.float32)
    h = jnp.maximum(h + b1_ref[...], 0.0)                    # (T, 128) f32
    h_bf = h.astype(jnp.bfloat16)
    h1_ref[...] = h_bf                                       # bf16 intermediate
    hs = h_bf.astype(jnp.float32)                            # stats on stored values
    s = jnp.sum(hs, axis=0, keepdims=True)                   # (1, 128)
    ss = jnp.sum(hs * hs, axis=0, keepdims=True)             # (1, 128)
    stats_ref[...] = jnp.concatenate([s, ss], axis=0)[None]  # (1, 2, 128)


def _fc2_kernel(h1_ref, w2_ref, b2_ref, h2_ref, stats_ref):
    """h2 = ReLU(h1 @ W2' + b2')   (BN1 pre-folded into W2'/b2')."""
    h = jnp.dot(h1_ref[...], w2_ref[...], preferred_element_type=jnp.float32)
    h = jnp.maximum(h + b2_ref[...], 0.0)                    # (T, 32) f32
    h2_ref[...] = h
    s = jnp.sum(h, axis=0, keepdims=True)                    # (1, 32)
    ss = jnp.sum(h * h, axis=0, keepdims=True)               # (1, 32)
    stats_ref[...] = jnp.concatenate([s, ss], axis=0)[None]  # (1, 2, 32)


def _head_kernel(h2_ref, w3_ref, b3_ref, out_ref):
    """out = sigmoid(h2 @ w3' + b3'), stored as a lane-dense (1, T) row.

    w3' is padded to 8 sublanes (row 0 holds the real weights). Contracting
    both operands on their last dim is w3_row @ h2^T on the MXU, which yields
    the per-row logits already laid out along lanes.
    """
    z = jax.lax.dot_general(
        w3_ref[...], h2_ref[...],
        dimension_numbers=(((1,), (1,)), ((), ())),
        preferred_element_type=jnp.float32)                  # (8, T)
    out_ref[...] = jax.nn.sigmoid(z[0:1, :] + b3_ref[0, 0])  # (1, T)


# ----------------------------- wrapper ------------------------------------ #

def _pick_tile_n(n, d):
    """Largest row tile in {1024,512,256,128} dividing N whose double-buffered
    bf16 x stream stays comfortably inside v7x's 64 MiB VMEM."""
    x_stream_budget = 8 * 1024 * 1024
    for t in (1024, 512, 256, 128):
        if n % t == 0 and 2 * t * d * 2 <= x_stream_budget:
            return t
    # Fallback: single whole-array tile (always layout-legal).
    # TODO(synk): for ragged N, pad rows to a tile multiple and mask them out
    # of the batch statistics instead of falling back to one big tile.
    return n


def _bn_scale_shift(s, ss, n, gamma, beta):
    """Training-mode BN as an affine map: BN(h) = h * scale + shift."""
    mu = s / n
    var = jnp.maximum(ss / n - mu * mu, 0.0)   # biased batch variance
    scale = gamma * jax.lax.rsqrt(var + EPS)
    shift = beta - mu * scale
    return scale, shift


def pixel_classifier_forward(x, params):
    w1, b1, g1, be1, w2, b2, g2, be2, w3, b3 = params
    n, d = x.shape
    tile = _pick_tile_n(n, d)
    g = n // tile
    grid = (g,)

    # ---- pass 1: Linear(d,128) + ReLU, plus per-tile BN1 partial stats ----
    h1, st1 = pl.pallas_call(
        _fc1_kernel,
        grid=grid,
        in_specs=[
            pl.BlockSpec((tile, d), lambda i: (i, 0)),       # x tile (streamed, bf16)
            pl.BlockSpec((d, 128), lambda i: (0, 0)),        # W1 (VMEM-resident)
            pl.BlockSpec((1, 128), lambda i: (0, 0)),        # b1
        ],
        out_specs=(
            pl.BlockSpec((tile, 128), lambda i: (i, 0)),     # h1 tile
            pl.BlockSpec((1, 2, 128), lambda i: (i, 0, 0)),  # per-tile [sum; sumsq]
        ),
        out_shape=(
            jax.ShapeDtypeStruct((n, 128), jnp.bfloat16),
            jax.ShapeDtypeStruct((g, 2, 128), jnp.float32),
        ),
        compiler_params=_PARALLEL,
    )(x.astype(jnp.bfloat16), w1.astype(jnp.bfloat16), b1)

    # ---- fold BN1 (batch stats) into the second linear (tiny glue math) ----
    sc1, sh1 = _bn_scale_shift(jnp.sum(st1[:, 0, :], 0), jnp.sum(st1[:, 1, :], 0),
                               n, g1.reshape(-1), be1.reshape(-1))
    w2f = (sc1[:, None] * w2).astype(jnp.bfloat16)           # (128, 32)
    b2f = sh1[None, :] @ w2 + b2                             # (1, 32) f32

    # ---- pass 2: BN1 + Linear(128,32) + ReLU, plus BN2 partial stats ----
    h2, st2 = pl.pallas_call(
        _fc2_kernel,
        grid=grid,
        in_specs=[
            pl.BlockSpec((tile, 128), lambda i: (i, 0)),
            pl.BlockSpec((128, 32), lambda i: (0, 0)),
            pl.BlockSpec((1, 32), lambda i: (0, 0)),
        ],
        out_specs=(
            pl.BlockSpec((tile, 32), lambda i: (i, 0)),
            pl.BlockSpec((1, 2, 32), lambda i: (i, 0, 0)),
        ),
        out_shape=(
            jax.ShapeDtypeStruct((n, 32), jnp.float32),
            jax.ShapeDtypeStruct((g, 2, 32), jnp.float32),
        ),
        compiler_params=_PARALLEL,
    )(h1, w2f, b2f)

    # ---- fold BN2 into the 32->1 head ----
    sc2, sh2 = _bn_scale_shift(jnp.sum(st2[:, 0, :], 0), jnp.sum(st2[:, 1, :], 0),
                               n, g2.reshape(-1), be2.reshape(-1))
    w3v = w3.reshape(-1)                                              # (32,)
    w3f = jnp.zeros((8, 32), jnp.float32).at[0, :].set(sc2 * w3v)     # padded row
    b3f = (jnp.sum(sh2 * w3v) + b3.reshape(())).reshape(1, 1)         # scalar

    # ---- pass 3: BN2 + Linear(32,1) + Sigmoid, lane-dense output ----
    out_rows = pl.pallas_call(
        _head_kernel,
        grid=grid,
        in_specs=[
            pl.BlockSpec((tile, 32), lambda i: (i, 0)),
            pl.BlockSpec((8, 32), lambda i: (0, 0)),
            pl.BlockSpec(memory_space=pltpu.MemorySpace.SMEM),        # b3 scalar
        ],
        out_specs=pl.BlockSpec((1, tile), lambda i: (0, i)),
        out_shape=jax.ShapeDtypeStruct((1, n), jnp.float32),
        compiler_params=_PARALLEL,
    )(h2, w3f, b3f)

    return out_rows.reshape(n, 1)


# ----------------------------- init & reference ---------------------------- #

def init_params(dims, key):
    """init_weights(init_type='normal', gain=0.02): Linear W ~ N(0, 0.02),
    biases = 0; BatchNorm1d gamma = 1, beta = 0 (PyTorch defaults)."""
    k1, k2, k3 = jax.random.split(key, 3)
    gain = 0.02
    w1 = gain * jax.random.normal(k1, (dims, 128), jnp.float32)
    b1 = jnp.zeros((1, 128), jnp.float32)
    g1 = jnp.ones((1, 128), jnp.float32)
    be1 = jnp.zeros((1, 128), jnp.float32)
    w2 = gain * jax.random.normal(k2, (128, 32), jnp.float32)
    b2 = jnp.zeros((1, 32), jnp.float32)
    g2 = jnp.ones((1, 32), jnp.float32)
    be2 = jnp.zeros((1, 32), jnp.float32)
    w3 = gain * jax.random.normal(k3, (32, 1), jnp.float32)
    b3 = jnp.zeros((1, 1), jnp.float32)
    return (w1, b1, g1, be1, w2, b2, g2, be2, w3, b3)


def reference_forward(x, params):
    """Pure-JAX f32 reference (training-mode BN) for a sanity check."""
    w1, b1, g1, be1, w2, b2, g2, be2, w3, b3 = params
    h = jnp.maximum(x @ w1 + b1, 0.0)
    mu = jnp.mean(h, axis=0, keepdims=True)
    var = jnp.mean((h - mu) ** 2, axis=0, keepdims=True)
    h = g1 * (h - mu) / jnp.sqrt(var + EPS) + be1
    h = jnp.maximum(h @ w2 + b2, 0.0)
    mu = jnp.mean(h, axis=0, keepdims=True)
    var = jnp.mean((h - mu) ** 2, axis=0, keepdims=True)
    h = g2 * (h - mu) / jnp.sqrt(var + EPS) + be2
    return jax.nn.sigmoid(h @ w3 + b3)


if __name__ == "__main__":
    dims = 256    # feature dimension per pixel
    N = 4096      # number of pixels -> 4 row-tiles of 1024

    key = jax.random.PRNGKey(0)
    kx, kp = jax.random.split(key)
    x = jax.random.normal(kx, (N, dims), jnp.float32)
    params = init_params(dims, kp)

    fwd = jax.jit(pixel_classifier_forward)
    out = jax.block_until_ready(fwd(x, params))

    ref = reference_forward(x, params)
    assert out.shape == (N, 1)
    max_err = float(jnp.max(jnp.abs(out - ref)))
    # bf16 x/W1/h1/W2 streams vs full-f32 reference -> small numeric delta.
    assert max_err < 5e-3, f"max abs err vs f32 reference: {max_err}"
    print("KERNEL_OK")
</pallas_src>

<mosaic_0001>
module attributes {stable_mosaic.version = 11 : i64} {
  func.func @_fc1_kernel(%arg0: i32, %arg1: memref<1024x256xbf16, #tpu.memory_space<vmem>>, %arg2: memref<256x128xbf16, #tpu.memory_space<vmem>>, %arg3: memref<1x128xf32, #tpu.memory_space<vmem>>, %arg4: memref<1024x128xbf16, #tpu.memory_space<vmem>>, %arg5: memref<1x2x128xf32, #tpu.memory_space<vmem>>) attributes {dimension_semantics = [#tpu.dimension_semantics<parallel>], iteration_bounds = array<i64: 4>, scalar_prefetch = 0 : i64, scratch_operands = 0 : i64, tpu.core_type = #tpu.core_type<tc>, window_params = [{transform_indices = @transform_0, window_bounds = array<i64: 1024, 256>}, {pipeline_mode = #tpu.pipeline_mode<synchronous>, transform_indices = @transform_1, window_bounds = array<i64: 256, 128>}, {pipeline_mode = #tpu.pipeline_mode<synchronous>, transform_indices = @transform_2, window_bounds = array<i64: 1, 128>}, {transform_indices = @transform_3, window_bounds = array<i64: 1024, 128>}, {transform_indices = @transform_4, window_bounds = array<i64: 1, 2, 128>}]} {
    %c0 = arith.constant 0 : index
    %c0_0 = arith.constant 0 : index
    %0 = vector.load %arg1[%c0, %c0_0] : memref<1024x256xbf16, #tpu.memory_space<vmem>>, vector<1024x256xbf16>
    %c0_1 = arith.constant 0 : index
    %c0_2 = arith.constant 0 : index
    %1 = vector.load %arg2[%c0_1, %c0_2] : memref<256x128xbf16, #tpu.memory_space<vmem>>, vector<256x128xbf16>
    %cst = arith.constant dense<0.000000e+00> : vector<1024x128xf32>
    %2 = tpu.matmul %0, %1, %cst {dimension_numbers = #tpu.dot_dimension_numbers<[1], [0], [0], [1], [0, 0, 1, 1], [], []>} : vector<1024x256xbf16>, vector<256x128xbf16>, vector<1024x128xf32> -> vector<1024x128xf32>
    %c0_3 = arith.constant 0 : index
    %c0_4 = arith.constant 0 : index
    %3 = vector.load %arg3[%c0_3, %c0_4] : memref<1x128xf32, #tpu.memory_space<vmem>>, vector<1x128xf32>
    %4 = vector.broadcast %3 : vector<1x128xf32> to vector<1024x128xf32>
    %5 = arith.addf %2, %4 : vector<1024x128xf32>
    %cst_5 = arith.constant 0.000000e+00 : f32
    %6 = vector.broadcast %cst_5 : f32 to vector<1024x128xf32>
    %7 = arith.maximumf %5, %6 : vector<1024x128xf32>
    %8 = arith.truncf %7 : vector<1024x128xf32> to vector<1024x128xbf16>
    %c0_6 = arith.constant 0 : index
    %c0_7 = arith.constant 0 : index
    %9 = vector.load %arg4[%c0_6, %c0_7] : memref<1024x128xbf16, #tpu.memory_space<vmem>>, vector<1024x128xbf16>
    tpu.vector_store %arg4[%c0_6, %c0_7], %8 {strides = array<i32>} : memref<1024x128xbf16, #tpu.memory_space<vmem>>, vector<1024x128xbf16>,
    %10 = arith.extf %8 : vector<1024x128xbf16> to vector<1024x128xf32>
    %cst_8 = arith.constant dense<0.000000e+00> : vector<128xf32>
    %11 = vector.multi_reduction <add>, %10, %cst_8 [0] : vector<1024x128xf32> to vector<128xf32>
    %12 = vector.shape_cast %11 : vector<128xf32> to vector<1x128xf32>
    %13 = arith.mulf %10, %10 : vector<1024x128xf32>
    %cst_9 = arith.constant dense<0.000000e+00> : vector<128xf32>
    %14 = vector.multi_reduction <add>, %13, %cst_9 [0] : vector<1024x128xf32> to vector<128xf32>
    %15 = vector.shape_cast %14 : vector<128xf32> to vector<1x128xf32>
    %16 = tpu.concatenate %12, %15 in 0 : vector<1x128xf32>, vector<1x128xf32> -> vector<2x128xf32>
    %17 = vector.shape_cast %16 : vector<2x128xf32> to vector<1x2x128xf32>
    %c0_10 = arith.constant 0 : index
    %c0_11 = arith.constant 0 : index
    %c0_12 = arith.constant 0 : index
    %18 = vector.load %arg5[%c0_10, %c0_11, %c0_12] : memref<1x2x128xf32, #tpu.memory_space<vmem>>, vector<1x2x128xf32>
    tpu.vector_store %arg5[%c0_10, %c0_11, %c0_12], %17 {strides = array<i32>} : memref<1x2x128xf32, #tpu.memory_space<vmem>>, vector<1x2x128xf32>,
    return
  }
  func.func @transform_0(%arg0: i32) -> (i32, i32) {
    %c0_i32 = arith.constant 0 : i32
    %c0_i32_0 = arith.constant 0 : i32
    return %arg0, %c0_i32 : i32, i32
  }
  func.func @transform_1(%arg0: i32) -> (i32, i32) {
    %c0_i32 = arith.constant 0 : i32
    %c0_i32_0 = arith.constant 0 : i32
    %c0_i32_1 = arith.constant 0 : i32
    return %c0_i32, %c0_i32_0 : i32, i32
  }
  func.func @transform_2(%arg0: i32) -> (i32, i32) {
    %c0_i32 = arith.constant 0 : i32
    %c0_i32_0 = arith.constant 0 : i32
    %c0_i32_1 = arith.constant 0 : i32
    return %c0_i32, %c0_i32_0 : i32, i32
  }
  func.func @transform_3(%arg0: i32) -> (i32, i32) {
    %c0_i32 = arith.constant 0 : i32
    %c0_i32_0 = arith.constant 0 : i32
    return %arg0, %c0_i32 : i32, i32
  }
  func.func @transform_4(%arg0: i32) -> (i32, i32, i32) {
    %c0_i32 = arith.constant 0 : i32
    %c0_i32_0 = arith.constant 0 : i32
    %c0_i32_1 = arith.constant 0 : i32
    return %arg0, %c0_i32, %c0_i32_0 : i32, i32, i32
  }
}

module attributes {stable_mosaic.version = 11 : i64} {
  func.func @_fc2_kernel(%arg0: i32, %arg1: memref<1024x128xbf16, #tpu.memory_space<vmem>>, %arg2: memref<128x32xbf16, #tpu.memory_space<vmem>>, %arg3: memref<1x32xf32, #tpu.memory_space<vmem>>, %arg4: memref<1024x32xf32, #tpu.memory_space<vmem>>, %arg5: memref<1x2x32xf32, #tpu.memory_space<vmem>>) attributes {dimension_semantics = [#tpu.dimension_semantics<parallel>], iteration_bounds = array<i64: 4>, scalar_prefetch = 0 : i64, scratch_operands = 0 : i64, tpu.core_type = #tpu.core_type<tc>, window_params = [{transform_indices = @transform_0, window_bounds = array<i64: 1024, 128>}, {pipeline_mode = #tpu.pipeline_mode<synchronous>, transform_indices = @transform_1, window_bounds = array<i64: 128, 32>}, {pipeline_mode = #tpu.pipeline_mode<synchronous>, transform_indices = @transform_2, window_bounds = array<i64: 1, 32>}, {transform_indices = @transform_3, window_bounds = array<i64: 1024, 32>}, {transform_indices = @transform_4, window_bounds = array<i64: 1, 2, 32>}]} {
    %c0 = arith.constant 0 : index
    %c0_0 = arith.constant 0 : index
    %0 = vector.load %arg1[%c0, %c0_0] : memref<1024x128xbf16, #tpu.memory_space<vmem>>, vector<1024x128xbf16>
    %c0_1 = arith.constant 0 : index
    %c0_2 = arith.constant 0 : index
    %1 = vector.load %arg2[%c0_1, %c0_2] : memref<128x32xbf16, #tpu.memory_space<vmem>>, vector<128x32xbf16>
    %cst = arith.constant dense<0.000000e+00> : vector<1024x32xf32>
    %2 = tpu.matmul %0, %1, %cst {dimension_numbers = #tpu.dot_dimension_numbers<[1], [0], [0], [1], [0, 0, 1, 1], [], []>} : vector<1024x128xbf16>, vector<128x32xbf16>, vector<1024x32xf32> -> vector<1024x32xf32>
    %c0_3 = arith.constant 0 : index
    %c0_4 = arith.constant 0 : index
    %3 = vector.load %arg3[%c0_3, %c0_4] : memref<1x32xf32, #tpu.memory_space<vmem>>, vector<1x32xf32>
    %4 = vector.broadcast %3 : vector<1x32xf32> to vector<1024x32xf32>
    %5 = arith.addf %2, %4 : vector<1024x32xf32>
    %cst_5 = arith.constant 0.000000e+00 : f32
    %6 = vector.broadcast %cst_5 : f32 to vector<1024x32xf32>
    %7 = arith.maximumf %5, %6 : vector<1024x32xf32>
    %c0_6 = arith.constant 0 : index
    %c0_7 = arith.constant 0 : index
    %8 = vector.load %arg4[%c0_6, %c0_7] : memref<1024x32xf32, #tpu.memory_space<vmem>>, vector<1024x32xf32>
    tpu.vector_store %arg4[%c0_6, %c0_7], %7 {strides = array<i32>} : memref<1024x32xf32, #tpu.memory_space<vmem>>, vector<1024x32xf32>,
    %cst_8 = arith.constant dense<0.000000e+00> : vector<32xf32>
    %9 = vector.multi_reduction <add>, %7, %cst_8 [0] : vector<1024x32xf32> to vector<32xf32>
    %10 = vector.shape_cast %9 : vector<32xf32> to vector<1x32xf32>
    %11 = arith.mulf %7, %7 : vector<1024x32xf32>
    %cst_9 = arith.constant dense<0.000000e+00> : vector<32xf32>
    %12 = vector.multi_reduction <add>, %11, %cst_9 [0] : vector<1024x32xf32> to vector<32xf32>
    %13 = vector.shape_cast %12 : vector<32xf32> to vector<1x32xf32>
    %14 = tpu.concatenate %10, %13 in 0 : vector<1x32xf32>, vector<1x32xf32> -> vector<2x32xf32>
    %15 = vector.shape_cast %14 : vector<2x32xf32> to vector<1x2x32xf32>
    %c0_10 = arith.constant 0 : index
    %c0_11 = arith.constant 0 : index
    %c0_12 = arith.constant 0 : index
    %16 = vector.load %arg5[%c0_10, %c0_11, %c0_12] : memref<1x2x32xf32, #tpu.memory_space<vmem>>, vector<1x2x32xf32>
    tpu.vector_store %arg5[%c0_10, %c0_11, %c0_12], %15 {strides = array<i32>} : memref<1x2x32xf32, #tpu.memory_space<vmem>>, vector<1x2x32xf32>,
    return
  }
  func.func @transform_0(%arg0: i32) -> (i32, i32) {
    %c0_i32 = arith.constant 0 : i32
    %c0_i32_0 = arith.constant 0 : i32
    return %arg0, %c0_i32 : i32, i32
  }
  func.func @transform_1(%arg0: i32) -> (i32, i32) {
    %c0_i32 = arith.constant 0 : i32
    %c0_i32_0 = arith.constant 0 : i32
    %c0_i32_1 = arith.constant 0 : i32
    return %c0_i32, %c0_i32_0 : i32, i32
  }
  func.func @transform_2(%arg0: i32) -> (i32, i32) {
    %c0_i32 = arith.constant 0 : i32
    %c0_i32_0 = arith.constant 0 : i32
    %c0_i32_1 = arith.constant 0 : i32
    return %c0_i32, %c0_i32_0 : i32, i32
  }
  func.func @transform_3(%arg0: i32) -> (i32, i32) {
    %c0_i32 = arith.constant 0 : i32
    %c0_i32_0 = arith.constant 0 : i32
    return %arg0, %c0_i32 : i32, i32
  }
  func.func @transform_4(%arg0: i32) -> (i32, i32, i32) {
    %c0_i32 = arith.constant 0 : i32
    %c0_i32_0 = arith.constant 0 : i32
    %c0_i32_1 = arith.constant 0 : i32
    return %arg0, %c0_i32, %c0_i32_0 : i32, i32, i32
  }
}

module attributes {stable_mosaic.version = 11 : i64} {
  func.func @_head_kernel(%arg0: i32, %arg1: memref<1024x32xf32, #tpu.memory_space<vmem>>, %arg2: memref<8x32xf32, #tpu.memory_space<vmem>>, %arg3: memref<1x1xf32, #tpu.memory_space<smem>>, %arg4: memref<1x1024xf32, #tpu.memory_space<vmem>>) attributes {dimension_semantics = [#tpu.dimension_semantics<parallel>], iteration_bounds = array<i64: 4>, scalar_prefetch = 0 : i64, scratch_operands = 0 : i64, tpu.core_type = #tpu.core_type<tc>, window_params = [{transform_indices = @transform_0, window_bounds = array<i64: 1024, 32>}, {pipeline_mode = #tpu.pipeline_mode<synchronous>, transform_indices = @transform_1, window_bounds = array<i64: 8, 32>}, {transform_indices = @transform_2, window_bounds = array<i64: 1, 1>}, {transform_indices = @transform_3, window_bounds = array<i64: 1, 1024>}]} {
    %c0 = arith.constant 0 : index
    %c0_0 = arith.constant 0 : index
    %0 = vector.load %arg2[%c0, %c0_0] : memref<8x32xf32, #tpu.memory_space<vmem>>, vector<8x32xf32>
    %c0_1 = arith.constant 0 : index
    %c0_2 = arith.constant 0 : index
    %1 = vector.load %arg1[%c0_1, %c0_2] : memref<1024x32xf32, #tpu.memory_space<vmem>>, vector<1024x32xf32>
    %cst = arith.constant dense<0.000000e+00> : vector<8x1024xf32>
    %2 = tpu.matmul %0, %1, %cst {dimension_numbers = #tpu.dot_dimension_numbers<[1], [1], [0], [0], [0, 0, 1, 0], [], []>} : vector<8x32xf32>, vector<1024x32xf32>, vector<8x1024xf32> -> vector<8x1024xf32>
    %3 = vector.extract_strided_slice %2 {offsets = [0, 0], sizes = [1, 1024], strides = [1, 1]} : vector<8x1024xf32> to vector<1x1024xf32>
    %c0_3 = arith.constant 0 : index
    %c0_4 = arith.constant 0 : index
    %4 = memref.load %arg3[%c0_3, %c0_4] : memref<1x1xf32, #tpu.memory_space<smem>>
    %5 = vector.broadcast %4 : f32 to vector<1x1024xf32>
    %6 = arith.addf %3, %5 : vector<1x1024xf32>
    %7 = arith.negf %6 : vector<1x1024xf32>
    %8 = math.exp %7 : vector<1x1024xf32>
    %cst_5 = arith.constant 1.000000e+00 : f32
    %9 = vector.broadcast %cst_5 : f32 to vector<1x1024xf32>
    %10 = arith.addf %9, %8 : vector<1x1024xf32>
    %11 = arith.divf %9, %10 : vector<1x1024xf32>
    %c0_6 = arith.constant 0 : index
    %c0_7 = arith.constant 0 : index
    %12 = vector.load %arg4[%c0_6, %c0_7] : memref<1x1024xf32, #tpu.memory_space<vmem>>, vector<1x1024xf32>
    tpu.vector_store %arg4[%c0_6, %c0_7], %11 {strides = array<i32>} : memref<1x1024xf32, #tpu.memory_space<vmem>>, vector<1x1024xf32>,
    return
  }
  func.func @transform_0(%arg0: i32) -> (i32, i32) {
    %c0_i32 = arith.constant 0 : i32
    %c0_i32_0 = arith.constant 0 : i32
    return %arg0, %c0_i32 : i32, i32
  }
  func.func @transform_1(%arg0: i32) -> (i32, i32) {
    %c0_i32 = arith.constant 0 : i32
    %c0_i32_0 = arith.constant 0 : i32
    %c0_i32_1 = arith.constant 0 : i32
    return %c0_i32, %c0_i32_0 : i32, i32
  }
  func.func @transform_2(%arg0: i32) -> (i32, i32) {
    %c0_i32 = arith.constant 0 : i32
    %c0_i32_0 = arith.constant 0 : i32
    %c0_i32_1 = arith.constant 0 : i32
    return %c0_i32, %c0_i32_0 : i32, i32
  }
  func.func @transform_3(%arg0: i32) -> (i32, i32) {
    %c0_i32 = arith.constant 0 : i32
    %c0_i32_0 = arith.constant 0 : i32
    return %c0_i32, %arg0 : i32, i32
  }
}

</mosaic_0001>

<bundles_post_ra>
// kernel: pixel_classifier_forward.5
= control target key start
LH: loop header
LB: loop body
LE: loop exit
PB: predicated region body
PF: predicated region fallthrough
CT: control target
= control target key end

     0   :  { %s1962_s0 = inlined_call_operand.vmem [shape: f32[4096,32], index: 0, kind: input, shape index: {}]   ;;  %s1963_s1 = inlined_call_operand.vmem [shape: f32[8,32], index: 1, kind: input, shape index: {}]   ;;  %s1964_s2 = inlined_call_operand.<no memory space> [shape: f32[1,1], index: 2, kind: input, shape index: {}]   ;;  %s1965_s3 = inlined_call_operand.hbm [shape: f32[1,4096], index: 3, kind: output, shape index: {}]  }
   0x1   :  { %8 = sst [smem:[#allocation2]] %s1964_s2 }
   0x2   :  { %9 = vsyncpa [#allocation4], 0 }
   0x3   :  { %11 = vsyncpa [#allocation4 + $0x1], 0  ;;  %s1431_s14 = smov 0   ;;  %s1433_s15 = smov 0  }
   0x4   :  { %s1435_s16 = smov 0   ;;  %s1437_s17 = smov 0  }
   0x5 LB: > { %s1452_s2 = sadd.s32 4294967295, %s1406_s17   ;;  %s1118_s18 = sadd.s32 4294967294, %s1406_s17   ;;  %s1406_s17 = sphi %s1437_s17, %s1985_s17   ;;  %s1402_s16 = sphi %s1435_s16, %s1984_s16   ;;  %s1398_s15 = sphi %s1433_s15, %s1983_s15   ;;  %s1394_s14 = sphi %s1431_s14, %s1982_s14  }
   0x6   : > { %s1456_s19 = sadd.s32 1, %s1406_s17   ;;  %s92_s20 = sadd.s32 1, %s1402_s16 }
   0x7   : > { %s89_s21 = ssub.s32 %s1406_s17, %s1456_s19  ;;  %p102_p0 = scmp.ne.s32.totalorder %s1402_s16, %s1398_s15 }
   0x8   : > { %p90_p1 = scmp.eq.s32.totalorder %s89_s21, 0  ;;  %p103_p2 = scmp.eq.s32.totalorder %s1452_s2, 3 }
   0x9   : > { %p108_p3 = scmp.ne.s32.totalorder %s1398_s15, %s1394_s14  ;;  %p109_p4 = scmp.eq.s32.totalorder %s1118_s18, 3 }
   0xa   : > { %s1467_s22 = scalar_select %p90_p1, %s1402_s16, %s92_s20  }
   0xb   : > { %p1469_p5 = por %p103_p2, %p102_p0  ;;  %p1473_p6 = por %p109_p4, %p108_p3 }
   0xc   : > { %p1121_p7 = scmp.ge.s32.totalorder %s1406_s17, 1  ;;  %p142_p8 = scmp.lt.s32.totalorder %s1406_s17, 5 }
   0xe   : > { %p143_p9 = pnand %p1121_p7, %p142_p8 }
   0xf   : > { %s1123_s25 = sshll.u32 (!%p143_p9), %s1452_s2, 7  ;;  %s850_s5 = sld [smem:[#allocation2]] (!%p143_p9) }
  0x10   : > { %146 = sbr.rel (%p143_p9) target bundleno = 325 (0x145), region = 32  ;;  %p167_p10 = scmp.lt.s32.totalorder (!%p143_p9), %s1123_s25, 511 }
  0x11   : > { %s163_s6 = sand.u32 (!%p143_p9), 1, %s1398_s15   ;;  %s1270_s8 = sshll.u32 (!%p143_p9), %s1452_s2, 3 }
  0x12   : > { %s1920_s7 = sshll.u32 (!%p143_p9), %s163_s6, 3  ;;  %s1054_s11 = scalar_lea.hbm (!%p143_p9), %s1965_s3, %s1270_s8 }
  0x13   : > { %s165_s12 = scalar_lea.vmem (!%p143_p9), [#allocation3], %s1920_s7  ;;  %s1058_s2 = sshll.u32 (!%p143_p9), %s1054_s11, 4  ;;  %s1059_s2 = int_to_ptr.hbm [resolvable:$true] %s1058_s2 }
  0x14   : > { %s1056_s13 = sshll.u32 (!%p143_p9), %s165_s12, 4  ;;  %s1044_s18 = scalar_lea.sflag (!%p143_p9), [#allocation4], %s163_s6  ;;  %s1057_s13 = int_to_ptr.vmem [resolvable:$true] %s1056_s13 }
  0x15   : > { %s1987_s25 = smov (!%p167_p10, %s1123_s25), 511  ;;  %vm302_vm0 = vcmask 261120   ;;  %s1358_s20 = sshra.s32 %s1059_s2, 4  ;;  %s1359_s20 = int_to_ptr.hbm [resolvable:$true] %s1358_s20 }
  0x16   : > { %s1124_s26 = sshll.u32 %s1987_s25, 3  ;;  %s1360_s21 = scalar_lea.hbm %s1359_s20, 8 }
  0x17   : > { %s1483_s29 = scalar_lea.vmem %s1962_s0, %s1124_s26  ;;  %p1361_p11 = scmp.ne.s32.totalorder %s1359_s20, %s1360_s21 }
  0x18   : > { %v189_v0 = vld [vmem:[%s1483_s29 + $0x78] sm:$0xff]  ;;  %v188_v4 = vld [vmem:[%s1483_s29 + $0x70] sm:$0xff]  ;;  %v187_v8 = vld [vmem:[%s1483_s29 + $0x68] sm:$0xff]  ;;  %s1364_s27 = scalar_lea.hbm %s1965_s3, 32  ;;  %p1365_p0 = scmp.lt.s32.totalorder %s1359_s20, %s1965_s3 }
  0x19   : > { %v205_v1 = vld [vmem:[%s1483_s29 + $0xf8] sm:$0xff]  ;;  %1125 = vmatpush.xpose.msk.msra.mxu0 %vm302_vm0, %v189_v0  ;;  %v204_v5 = vld [vmem:[%s1483_s29 + $0xf0] sm:$0xff]  ;;  %v203_v9 = vld [vmem:[%s1483_s29 + $0xe8] sm:$0xff]  ;;  %p1362_p12 = pnand %p1361_p11, %p1469_p5  ;;  %p1366_p1 = scmp.lt.s32.totalorder %s1364_s27, %s1360_s21 }
  0x1a   : > { %v221_v2 = vld [vmem:[%s1483_s29 + $0x178] sm:$0xff]  ;;  %1142 = vmatpush.xpose.msk.msra.mxu1 %vm302_vm0, %v205_v1  ;;  %v220_v6 = vld [vmem:[%s1483_s29 + $0x170] sm:$0xff]  ;;  %v219_v10 = vld [vmem:[%s1483_s29 + $0x168] sm:$0xff] }
  0x1b   : > { %v237_v3 = vld [vmem:[%s1483_s29 + $0x1f8] sm:$0xff]  ;;  %1159 = vmatpush.xpose.msk.msra.mxu2 %vm302_vm0, %v221_v2  ;;  %v236_v7 = vld [vmem:[%s1483_s29 + $0x1f0] sm:$0xff]  ;;  %v235_v11 = vld [vmem:[%s1483_s29 + $0x1e8] sm:$0xff]  ;;  %p1363_p13 = pneg %p1362_p12  ;;  %p1367_p2 = por %p1366_p1, %p1365_p0 }
  0x1c   : > { %1176 = vmatpush.xpose.msk.msra.mxu3 %vm302_vm0, %v237_v3  ;;  %v186_v12 = vld [vmem:[%s1483_s29 + $0x60] sm:$0xff]  ;;  %v185_v16 = vld [vmem:[%s1483_s29 + $0x58] sm:$0xff]  ;;  %v184_v20 = vld [vmem:[%s1483_s29 + $0x50] sm:$0xff] }
  0x1d   : > { %1126 = vmatpush.xpose.msk.msra.mxu0 %vm302_vm0, %v188_v4  ;;  %v202_v13 = vld [vmem:[%s1483_s29 + $0xe0] sm:$0xff]  ;;  %v201_v17 = vld [vmem:[%s1483_s29 + $0xd8] sm:$0xff]  ;;  %v200_v21 = vld [vmem:[%s1483_s29 + $0xd0] sm:$0xff]  ;;  %p1368_p3 = pnand %p1367_p2, %p1363_p13 }
  0x1e   : > { %1143 = vmatpush.xpose.msk.msra.mxu1 %vm302_vm0, %v204_v5  ;;  %v218_v14 = vld [vmem:[%s1483_s29 + $0x160] sm:$0xff]  ;;  %v217_v18 = vld [vmem:[%s1483_s29 + $0x158] sm:$0xff]  ;;  %v216_v22 = vld [vmem:[%s1483_s29 + $0x150] sm:$0xff] }
  0x1f   : > { %1160 = vmatpush.xpose.msk.msra.mxu2 %vm302_vm0, %v220_v6  ;;  %v234_v15 = vld [vmem:[%s1483_s29 + $0x1e0] sm:$0xff]  ;;  %v233_v19 = vld [vmem:[%s1483_s29 + $0x1d8] sm:$0xff]  ;;  %v232_v23 = vld [vmem:[%s1483_s29 + $0x1d0] sm:$0xff] }
  0x20   : > { %1177 = vmatpush.xpose.msk.msra.mxu3 %vm302_vm0, %v236_v7  ;;  %v183_v24 = vld [vmem:[%s1483_s29 + $0x48] sm:$0xff]  ;;  %v182_v28 = vld [vmem:[%s1483_s29 + $0x40] sm:$0xff]  ;;  %v181_v32 = vld [vmem:[%s1483_s29 + $0x38] sm:$0xff] }
  0x21   : > { %1127 = vmatpush.xpose.msk.msra.mxu0 %vm302_vm0, %v187_v8  ;;  %v199_v25 = vld [vmem:[%s1483_s29 + $0xc8] sm:$0xff]  ;;  %v198_v29 = vld [vmem:[%s1483_s29 + $0xc0] sm:$0xff]  ;;  %v197_v33 = vld [vmem:[%s1483_s29 + $0xb8] sm:$0xff] }
  0x22   : > { %1144 = vmatpush.xpose.msk.msra.mxu1 %vm302_vm0, %v203_v9  ;;  %v215_v26 = vld [vmem:[%s1483_s29 + $0x148] sm:$0xff]  ;;  %v214_v30 = vld [vmem:[%s1483_s29 + $0x140] sm:$0xff]  ;;  %v213_v34 = vld [vmem:[%s1483_s29 + $0x138] sm:$0xff] }
  0x23   : > { %1161 = vmatpush.xpose.msk.msra.mxu2 %vm302_vm0, %v219_v10  ;;  %v231_v27 = vld [vmem:[%s1483_s29 + $0x1c8] sm:$0xff]  ;;  %v230_v31 = vld [vmem:[%s1483_s29 + $0x1c0] sm:$0xff]  ;;  %v229_v35 = vld [vmem:[%s1483_s29 + $0x1b8] sm:$0xff] }
  0x24   : > { %1178 = vmatpush.xpose.msk.msra.mxu3 %vm302_vm0, %v235_v11  ;;  %v180_v36 = vld [vmem:[%s1483_s29 + $0x30] sm:$0xff]  ;;  %v179_v40 = vld [vmem:[%s1483_s29 + $0x28] sm:$0xff]  ;;  %v178_v44 = vld [vmem:[%s1483_s29 + $0x20] sm:$0xff] }
  0x25   : > { %1128 = vmatpush.xpose.msk.msra.mxu0 %vm302_vm0, %v186_v12  ;;  %v196_v37 = vld [vmem:[%s1483_s29 + $0xb0] sm:$0xff]  ;;  %v195_v41 = vld [vmem:[%s1483_s29 + $0xa8] sm:$0xff]  ;;  %v194_v45 = vld [vmem:[%s1483_s29 + $0xa0] sm:$0xff] }
  0x26   : > { %1145 = vmatpush.xpose.msk.msra.mxu1 %vm302_vm0, %v202_v13  ;;  %v212_v38 = vld [vmem:[%s1483_s29 + $0x130] sm:$0xff]  ;;  %v211_v42 = vld [vmem:[%s1483_s29 + $0x128] sm:$0xff]  ;;  %v210_v46 = vld [vmem:[%s1483_s29 + $0x120] sm:$0xff] }
  0x27   : > { %1162 = vmatpush.xpose.msk.msra.mxu2 %vm302_vm0, %v218_v14  ;;  %v228_v39 = vld [vmem:[%s1483_s29 + $0x1b0] sm:$0xff]  ;;  %v227_v43 = vld [vmem:[%s1483_s29 + $0x1a8] sm:$0xff]  ;;  %v226_v47 = vld [vmem:[%s1483_s29 + $0x1a0] sm:$0xff] }
  0x28   : > { %1179 = vmatpush.xpose.msk.msra.mxu3 %vm302_vm0, %v234_v15  ;;  %v177_v48 = vld [vmem:[%s1483_s29 + $0x18] sm:$0xff]  ;;  %v176_v52 = vld [vmem:[%s1483_s29 + $0x10] sm:$0xff]  ;;  %v175_v56 = vld [vmem:[%s1483_s29 + $0x8] sm:$0xff] }
  0x29   : > { %1129 = vmatpush.xpose.msk.msra.mxu0 %vm302_vm0, %v185_v16  ;;  %v193_v49 = vld [vmem:[%s1483_s29 + $0x98] sm:$0xff]  ;;  %v192_v53 = vld [vmem:[%s1483_s29 + $0x90] sm:$0xff]  ;;  %v191_v57 = vld [vmem:[%s1483_s29 + $0x88] sm:$0xff] }
  0x2a   : > { %1146 = vmatpush.xpose.msk.msra.mxu1 %vm302_vm0, %v201_v17  ;;  %v209_v50 = vld [vmem:[%s1483_s29 + $0x118] sm:$0xff]  ;;  %v208_v54 = vld [vmem:[%s1483_s29 + $0x110] sm:$0xff]  ;;  %v207_v58 = vld [vmem:[%s1483_s29 + $0x108] sm:$0xff] }
  0x2b   : > { %1163 = vmatpush.xpose.msk.msra.mxu2 %vm302_vm0, %v217_v18  ;;  %v225_v51 = vld [vmem:[%s1483_s29 + $0x198] sm:$0xff]  ;;  %v224_v55 = vld [vmem:[%s1483_s29 + $0x190] sm:$0xff]  ;;  %v223_v59 = vld [vmem:[%s1483_s29 + $0x188] sm:$0xff] }
  0x2c   : > { %1180 = vmatpush.xpose.msk.msra.mxu3 %vm302_vm0, %v233_v19  ;;  %v174_v60 = vld [vmem:[%s1483_s29] sm:$0xff]  ;;  %v253_v0 = vld [vmem:[%s1483_s29 + $0x278] sm:$0xff]  ;;  %v252_v4 = vld [vmem:[%s1483_s29 + $0x270] sm:$0xff] }
  0x2d   : > { %1130 = vmatpush.xpose.msk.msra.mxu0 %vm302_vm0, %v184_v20  ;;  %v190_v61 = vld [vmem:[%s1483_s29 + $0x80] sm:$0xff]  ;;  %v269_v1 = vld [vmem:[%s1483_s29 + $0x2f8] sm:$0xff]  ;;  %v268_v5 = vld [vmem:[%s1483_s29 + $0x2f0] sm:$0xff] }
  0x2e   : > { %1147 = vmatpush.xpose.msk.msra.mxu1 %vm302_vm0, %v200_v21  ;;  %v206_v62 = vld [vmem:[%s1483_s29 + $0x100] sm:$0xff]  ;;  %v285_v2 = vld [vmem:[%s1483_s29 + $0x378] sm:$0xff]  ;;  %v284_v6 = vld [vmem:[%s1483_s29 + $0x370] sm:$0xff] }
  0x2f   : > { %1164 = vmatpush.xpose.msk.msra.mxu2 %vm302_vm0, %v216_v22  ;;  %v222_v63 = vld [vmem:[%s1483_s29 + $0x180] sm:$0xff]  ;;  %v301_v3 = vld [vmem:[%s1483_s29 + $0x3f8] sm:$0xff]  ;;  %v300_v7 = vld [vmem:[%s1483_s29 + $0x3f0] sm:$0xff] }
  0x30   : > { %1181 = vmatpush.xpose.msk.msra.mxu3 %vm302_vm0, %v232_v23  ;;  %v251_v8 = vld [vmem:[%s1483_s29 + $0x268] sm:$0xff]  ;;  %v1634_v10 = vld [vmem:[%s1963_s1] sm:$0xff]  ;;  %v249_v17 = vld [vmem:[%s1483_s29 + $0x258] sm:$0xff] }
  0x31   : > { %1131 = vmatpush.xpose.msk.msra.mxu0 %vm302_vm0, %v183_v24  ;;  %v267_v9 = vld [vmem:[%s1483_s29 + $0x2e8] sm:$0xff]  ;;  %v250_v13 = vld [vmem:[%s1483_s29 + $0x260] sm:$0xff]  ;;  %v265_v18 = vld [vmem:[%s1483_s29 + $0x2d8] sm:$0xff] }
  0x32   : > { %1148 = vmatpush.xpose.msk.msra.mxu1 %vm302_vm0, %v199_v25  ;;  %v283_v11 = vld [vmem:[%s1483_s29 + $0x368] sm:$0xff]  ;;  %v266_v14 = vld [vmem:[%s1483_s29 + $0x2e0] sm:$0xff]  ;;  %v281_v19 = vld [vmem:[%s1483_s29 + $0x358] sm:$0xff] }
  0x33   : > { %1165 = vmatpush.xpose.msk.msra.mxu2 %vm302_vm0, %v215_v26  ;;  %v299_v12 = vld [vmem:[%s1483_s29 + $0x3e8] sm:$0xff]  ;;  %v282_v15 = vld [vmem:[%s1483_s29 + $0x360] sm:$0xff]  ;;  %v297_v20 = vld [vmem:[%s1483_s29 + $0x3d8] sm:$0xff] }
  0x34   : > { %1182 = vmatpush.xpose.msk.msra.mxu3 %vm302_vm0, %v231_v27  ;;  %v298_v16 = vld [vmem:[%s1483_s29 + $0x3e0] sm:$0xff]  ;;  %v248_v21 = vld [vmem:[%s1483_s29 + $0x250] sm:$0xff]  ;;  %v247_v25 = vld [vmem:[%s1483_s29 + $0x248] sm:$0xff] }
  0x35   : > { %1132 = vmatpush.xpose.msk.msra.mxu0 %vm302_vm0, %v182_v28  ;;  %v264_v22 = vld [vmem:[%s1483_s29 + $0x2d0] sm:$0xff]  ;;  %v263_v26 = vld [vmem:[%s1483_s29 + $0x2c8] sm:$0xff] }
  0x36   : > { %1149 = vmatpush.xpose.msk.msra.mxu1 %vm302_vm0, %v198_v29  ;;  %v280_v23 = vld [vmem:[%s1483_s29 + $0x350] sm:$0xff]  ;;  %v279_v27 = vld [vmem:[%s1483_s29 + $0x348] sm:$0xff]  ;;  %v246_v29 = vld [vmem:[%s1483_s29 + $0x240] sm:$0xff] }
  0x37   : > { %1166 = vmatpush.xpose.msk.msra.mxu2 %vm302_vm0, %v214_v30  ;;  %v296_v24 = vld [vmem:[%s1483_s29 + $0x3d0] sm:$0xff]  ;;  %v295_v28 = vld [vmem:[%s1483_s29 + $0x3c8] sm:$0xff]  ;;  %v262_v30 = vld [vmem:[%s1483_s29 + $0x2c0] sm:$0xff] }
  0x38   : > { %1183 = vmatpush.xpose.msk.msra.mxu3 %vm302_vm0, %v230_v31  ;;  %v278_v31 = vld [vmem:[%s1483_s29 + $0x340] sm:$0xff] }
  0x39   : > { %1133 = vmatpush.xpose.msk.msra.mxu0 %vm302_vm0, %v181_v32  ;;  %v294_v32 = vld [vmem:[%s1483_s29 + $0x3c0] sm:$0xff] }
  0x3a   : > { %1150 = vmatpush.xpose.msk.msra.mxu1 %vm302_vm0, %v197_v33  ;;  %v245_v33 = vld [vmem:[%s1483_s29 + $0x238] sm:$0xff] }
  0x3b   : > { %1167 = vmatpush.xpose.msk.msra.mxu2 %vm302_vm0, %v213_v34  ;;  %v261_v34 = vld [vmem:[%s1483_s29 + $0x2b8] sm:$0xff] }
  0x3c   : > { %1184 = vmatpush.xpose.msk.msra.mxu3 %vm302_vm0, %v229_v35  ;;  %v277_v35 = vld [vmem:[%s1483_s29 + $0x338] sm:$0xff] }
  0x3d   : > { %1134 = vmatpush.xpose.msk.msra.mxu0 %vm302_vm0, %v180_v36  ;;  %v293_v36 = vld [vmem:[%s1483_s29 + $0x3b8] sm:$0xff] }
  0x3e   : > { %1151 = vmatpush.xpose.msk.msra.mxu1 %vm302_vm0, %v196_v37  ;;  %v244_v37 = vld [vmem:[%s1483_s29 + $0x230] sm:$0xff] }
  0x3f   : > { %1168 = vmatpush.xpose.msk.msra.mxu2 %vm302_vm0, %v212_v38  ;;  %v260_v38 = vld [vmem:[%s1483_s29 + $0x2b0] sm:$0xff] }
  0x40   : > { %1185 = vmatpush.xpose.msk.msra.mxu3 %vm302_vm0, %v228_v39  ;;  %v276_v39 = vld [vmem:[%s1483_s29 + $0x330] sm:$0xff] }
  0x41   : > { %1135 = vmatpush.xpose.msk.msra.mxu0 %vm302_vm0, %v179_v40  ;;  %v292_v40 = vld [vmem:[%s1483_s29 + $0x3b0] sm:$0xff] }
  0x42   : > { %1152 = vmatpush.xpose.msk.msra.mxu1 %vm302_vm0, %v195_v41  ;;  %v243_v41 = vld [vmem:[%s1483_s29 + $0x228] sm:$0xff] }
  0x43   : > { %1169 = vmatpush.xpose.msk.msra.mxu2 %vm302_vm0, %v211_v42  ;;  %v259_v42 = vld [vmem:[%s1483_s29 + $0x2a8] sm:$0xff] }
  0x44   : > { %1186 = vmatpush.xpose.msk.msra.mxu3 %vm302_vm0, %v227_v43  ;;  %v275_v43 = vld [vmem:[%s1483_s29 + $0x328] sm:$0xff] }
  0x45   : > { %1136 = vmatpush.xpose.msk.msra.mxu0 %vm302_vm0, %v178_v44  ;;  %v291_v44 = vld [vmem:[%s1483_s29 + $0x3a8] sm:$0xff] }
  0x46   : > { %1153 = vmatpush.xpose.msk.msra.mxu1 %vm302_vm0, %v194_v45  ;;  %v242_v45 = vld [vmem:[%s1483_s29 + $0x220] sm:$0xff] }
  0x47   : > { %1170 = vmatpush.xpose.msk.msra.mxu2 %vm302_vm0, %v210_v46  ;;  %v258_v46 = vld [vmem:[%s1483_s29 + $0x2a0] sm:$0xff] }
  0x48   : > { %1187 = vmatpush.xpose.msk.msra.mxu3 %vm302_vm0, %v226_v47  ;;  %v274_v47 = vld [vmem:[%s1483_s29 + $0x320] sm:$0xff] }
  0x49   : > { %1137 = vmatpush.xpose.msk.msra.mxu0 %vm302_vm0, %v177_v48  ;;  %v290_v48 = vld [vmem:[%s1483_s29 + $0x3a0] sm:$0xff] }
  0x4a   : > { %1154 = vmatpush.xpose.msk.msra.mxu1 %vm302_vm0, %v193_v49  ;;  %v241_v49 = vld [vmem:[%s1483_s29 + $0x218] sm:$0xff] }
  0x4b   : > { %1171 = vmatpush.xpose.msk.msra.mxu2 %vm302_vm0, %v209_v50  ;;  %v257_v50 = vld [vmem:[%s1483_s29 + $0x298] sm:$0xff] }
  0x4c   : > { %1188 = vmatpush.xpose.msk.msra.mxu3 %vm302_vm0, %v225_v51  ;;  %v273_v51 = vld [vmem:[%s1483_s29 + $0x318] sm:$0xff] }
  0x4d   : > { %1138 = vmatpush.xpose.msk.msra.mxu0 %vm302_vm0, %v176_v52  ;;  %v289_v52 = vld [vmem:[%s1483_s29 + $0x398] sm:$0xff] }
  0x4e   : > { %1155 = vmatpush.xpose.msk.msra.mxu1 %vm302_vm0, %v192_v53  ;;  %v240_v53 = vld [vmem:[%s1483_s29 + $0x210] sm:$0xff] }
  0x4f   : > { %1172 = vmatpush.xpose.msk.msra.mxu2 %vm302_vm0, %v208_v54  ;;  %v256_v54 = vld [vmem:[%s1483_s29 + $0x290] sm:$0xff] }
  0x50   : > { %1189 = vmatpush.xpose.msk.msra.mxu3 %vm302_vm0, %v224_v55  ;;  %v272_v55 = vld [vmem:[%s1483_s29 + $0x310] sm:$0xff] }
  0x51   : > { %1139 = vmatpush.xpose.msk.msra.mxu0 %vm302_vm0, %v175_v56  ;;  %v288_v56 = vld [vmem:[%s1483_s29 + $0x390] sm:$0xff] }
  0x52   : > { %1156 = vmatpush.xpose.msk.msra.mxu1 %vm302_vm0, %v191_v57  ;;  %v239_v57 = vld [vmem:[%s1483_s29 + $0x208] sm:$0xff] }
  0x53   : > { %1173 = vmatpush.xpose.msk.msra.mxu2 %vm302_vm0, %v207_v58  ;;  %v255_v58 = vld [vmem:[%s1483_s29 + $0x288] sm:$0xff] }
  0x54   : > { %1190 = vmatpush.xpose.msk.msra.mxu3 %vm302_vm0, %v223_v59  ;;  %v271_v59 = vld [vmem:[%s1483_s29 + $0x308] sm:$0xff] }
  0x55   : > { %1140 = vmatpush.xpose.msk.msra.mxu0 %vm302_vm0, %v174_v60  ;;  %v287_v60 = vld [vmem:[%s1483_s29 + $0x388] sm:$0xff] }
  0x56   : > { %1157 = vmatpush.xpose.msk.msra.mxu1 %vm302_vm0, %v190_v61  ;;  %v238_v61 = vld [vmem:[%s1483_s29 + $0x200] sm:$0xff] }
  0x57   : > { %1174 = vmatpush.xpose.msk.msra.mxu2 %vm302_vm0, %v206_v62  ;;  %v254_v62 = vld [vmem:[%s1483_s29 + $0x280] sm:$0xff] }
  0x58   : > { %1191 = vmatpush.xpose.msk.msra.mxu3 %vm302_vm0, %v222_v63  ;;  %1141 = vmatmul.msk.f32.vlgmr.msra.gmra.mxu0 %vm302_vm0, %v1634_v10  ;;  %v270_v63 = vld [vmem:[%s1483_s29 + $0x300] sm:$0xff] }
  0x59   : > { %1193 = vmatpush.xpose.msk.msrb.mxu0 %vm302_vm0, %v253_v0  ;;  %1158 = vmatmul.msk.f32.vlgmr.msra.gmra.mxu1 %vm302_vm0, %v1634_v10  ;;  %v286_v0 = vld [vmem:[%s1483_s29 + $0x380] sm:$0xff] }
  0x5a   : > { %1210 = vmatpush.xpose.msk.msrb.mxu1 %vm302_vm0, %v269_v1  ;;  %1175 = vmatmul.msk.f32.vlgmr.msra.gmra.mxu2 %vm302_vm0, %v1634_v10 }
  0x5b   : > { %1227 = vmatpush.xpose.msk.msrb.mxu2 %vm302_vm0, %v285_v2  ;;  %1192 = vmatmul.msk.f32.vlgmr.msra.gmra.mxu3 %vm302_vm0, %v1634_v10  ;;  %v851_v2 = vstv %s850_s5 }
  0x5c   : > { %1244 = vmatpush.xpose.msk.msrb.mxu3 %vm302_vm0, %v301_v3 }
  0x5d   : > { %1194 = vmatpush.xpose.msk.msrb.mxu0 %vm302_vm0, %v252_v4 }
  0x5e   : > { %1211 = vmatpush.xpose.msk.msrb.mxu1 %vm302_vm0, %v268_v5 }
  0x5f   : > { %1228 = vmatpush.xpose.msk.msrb.mxu2 %vm302_vm0, %v284_v6 }
  0x60   : > { %1245 = vmatpush.xpose.msk.msrb.mxu3 %vm302_vm0, %v300_v7 }
  0x61   : > { %1195 = vmatpush.xpose.msk.msrb.mxu0 %vm302_vm0, %v251_v8 }
  0x62   : > { %1212 = vmatpush.xpose.msk.msrb.mxu1 %vm302_vm0, %v267_v9 }
  0x63   : > { %1229 = vmatpush.xpose.msk.msrb.mxu2 %vm302_vm0, %v283_v11 }
  0x64   : > { %1246 = vmatpush.xpose.msk.msrb.mxu3 %vm302_vm0, %v299_v12 }
  0x65   : > { %1196 = vmatpush.xpose.msk.msrb.mxu0 %vm302_vm0, %v250_v13 }
  0x66   : > { %1213 = vmatpush.xpose.msk.msrb.mxu1 %vm302_vm0, %v266_v14 }
  0x67   : > { %1230 = vmatpush.xpose.msk.msrb.mxu2 %vm302_vm0, %v282_v15 }
  0x68   : > { %1247 = vmatpush.xpose.msk.msrb.mxu3 %vm302_vm0, %v298_v16 }
  0x69   : > { %1197 = vmatpush.xpose.msk.msrb.mxu0 %vm302_vm0, %v249_v17 }
  0x6a   : > { %1214 = vmatpush.xpose.msk.msrb.mxu1 %vm302_vm0, %v265_v18 }
  0x6b   : > { %1231 = vmatpush.xpose.msk.msrb.mxu2 %vm302_vm0, %v281_v19 }
  0x6c   : > { %1248 = vmatpush.xpose.msk.msrb.mxu3 %vm302_vm0, %v297_v20 }
  0x6d   : > { %1198 = vmatpush.xpose.msk.msrb.mxu0 %vm302_vm0, %v248_v21 }
  0x6e   : > { %1215 = vmatpush.xpose.msk.msrb.mxu1 %vm302_vm0, %v264_v22 }
  0x6f   : > { %1232 = vmatpush.xpose.msk.msrb.mxu2 %vm302_vm0, %v280_v23 }
  0x70   : > { %1249 = vmatpush.xpose.msk.msrb.mxu3 %vm302_vm0, %v296_v24 }
  0x71   : > { %1199 = vmatpush.xpose.msk.msrb.mxu0 %vm302_vm0, %v247_v25 }
  0x72   : > { %1216 = vmatpush.xpose.msk.msrb.mxu1 %vm302_vm0, %v263_v26 }
  0x73   : > { %1233 = vmatpush.xpose.msk.msrb.mxu2 %vm302_vm0, %v279_v27 }
  0x74   : > { %1250 = vmatpush.xpose.msk.msrb.mxu3 %vm302_vm0, %v295_v28 }
  0x75   : > { %1200 = vmatpush.xpose.msk.msrb.mxu0 %vm302_vm0, %v246_v29 }
  0x76   : > { %1217 = vmatpush.xpose.msk.msrb.mxu1 %vm302_vm0, %v262_v30 }
  0x77   : > { %1234 = vmatpush.xpose.msk.msrb.mxu2 %vm302_vm0, %v278_v31 }
  0x78   : > { %1251 = vmatpush.xpose.msk.msrb.mxu3 %vm302_vm0, %v294_v32 }
  0x79   : > { %1201 = vmatpush.xpose.msk.msrb.mxu0 %vm302_vm0, %v245_v33 }
  0x7a   : > { %1218 = vmatpush.xpose.msk.msrb.mxu1 %vm302_vm0, %v261_v34 }
  0x7b   : > { %1235 = vmatpush.xpose.msk.msrb.mxu2 %vm302_vm0, %v277_v35 }
  0x7c   : > { %1252 = vmatpush.xpose.msk.msrb.mxu3 %vm302_vm0, %v293_v36 }
  0x7d   : > { %1202 = vmatpush.xpose.msk.msrb.mxu0 %vm302_vm0, %v244_v37 }
  0x7e   : > { %1219 = vmatpush.xpose.msk.msrb.mxu1 %vm302_vm0, %v260_v38 }
  0x7f   : > { %1236 = vmatpush.xpose.msk.msrb.mxu2 %vm302_vm0, %v276_v39 }
  0x80   : > { %1253 = vmatpush.xpose.msk.msrb.mxu3 %vm302_vm0, %v292_v40 }
  0x81   : > { %1203 = vmatpush.xpose.msk.msrb.mxu0 %vm302_vm0, %v243_v41 }
  0x82   : > { %1220 = vmatpush.xpose.msk.msrb.mxu1 %vm302_vm0, %v259_v42 }
  0x83   : > { %1237 = vmatpush.xpose.msk.msrb.mxu2 %vm302_vm0, %v275_v43 }
  0x84   : > { %1254 = vmatpush.xpose.msk.msrb.mxu3 %vm302_vm0, %v291_v44 }
  0x85   : > { %1204 = vmatpush.xpose.msk.msrb.mxu0 %vm302_vm0, %v242_v45 }
  0x86   : > { %1221 = vmatpush.xpose.msk.msrb.mxu1 %vm302_vm0, %v258_v46 }
  0x87   : > { %1238 = vmatpush.xpose.msk.msrb.mxu2 %vm302_vm0, %v274_v47 }
  0x88   : > { %1255 = vmatpush.xpose.msk.msrb.mxu3 %vm302_vm0, %v290_v48 }
  0x89   : > { %1205 = vmatpush.xpose.msk.msrb.mxu0 %vm302_vm0, %v241_v49 }
  0x8a   : > { %1222 = vmatpush.xpose.msk.msrb.mxu1 %vm302_vm0, %v257_v50 }
  0x8b   : > { %1239 = vmatpush.xpose.msk.msrb.mxu2 %vm302_vm0, %v273_v51 }
  0x8c   : > { %1256 = vmatpush.xpose.msk.msrb.mxu3 %vm302_vm0, %v289_v52 }
  0x8d   : > { %1206 = vmatpush.xpose.msk.msrb.mxu0 %vm302_vm0, %v240_v53 }
  0x8e   : > { %1223 = vmatpush.xpose.msk.msrb.mxu1 %vm302_vm0, %v256_v54 }
  0x8f   : > { %1240 = vmatpush.xpose.msk.msrb.mxu2 %vm302_vm0, %v272_v55 }
  0x90   : > { %1257 = vmatpush.xpose.msk.msrb.mxu3 %vm302_vm0, %v288_v56 }
  0x91   : > { %1207 = vmatpush.xpose.msk.msrb.mxu0 %vm302_vm0, %v239_v57 }
  0x92   : > { %1224 = vmatpush.xpose.msk.msrb.mxu1 %vm302_vm0, %v255_v58 }
  0x93   : > { %1241 = vmatpush.xpose.msk.msrb.mxu2 %vm302_vm0, %v271_v59 }
  0x94   : > { %1258 = vmatpush.xpose.msk.msrb.mxu3 %vm302_vm0, %v287_v60 }
  0x95   : > { %1208 = vmatpush.xpose.msk.msrb.mxu0 %vm302_vm0, %v238_v61 }
  0x96   : > { %1225 = vmatpush.xpose.msk.msrb.mxu1 %vm302_vm0, %v254_v62 }
  0x97   : > { %1242 = vmatpush.xpose.msk.msrb.mxu2 %vm302_vm0, %v270_v63 }
  0x98   : > { %1259 = vmatpush.xpose.msk.msrb.mxu3 %vm302_vm0, %v286_v0  ;;  %1209 = vmatmul.msk.f32.vlgmr.msrb.gmra.mxu0 %vm302_vm0, %v1634_v10 }
  0x99   : > { %1226 = vmatmul.msk.f32.vlgmr.msrb.gmra.mxu1 %vm302_vm0, %v1634_v10 }
  0x9a   : > { %1243 = vmatmul.msk.f32.vlgmr.msrb.gmra.mxu2 %vm302_vm0, %v1634_v10 }
  0x9b   : > { %1260 = vmatmul.msk.f32.vlgmr.msrb.gmra.mxu3 %vm302_vm0, %v1634_v10 }
  0xd5   : > { %v707_v4 = vpop.f32.mrf.mxu0 }
  0xd6   : > { %v727_v1 = vpop.f32.mrf.mxu1  ;;  %v852_v8 = vadd.f32 %v851_v2, %v707_v4 }
  0xd7   : > { %v853_v5 = vadd.f32 %v851_v2, %v727_v1 }
  0xd8   : > { %v1261_v13 = vmul.f32 -1.442695, %v852_v8 }
  0xd9   : > { %v1262_v9 = vmul.f32 -1.442695, %v853_v5 }
  0xdb   : > { %1312 = vpow2.f32 %v1262_v9 }
  0xdd   : > { %v747_v3 = vpop.f32.mrf.mxu2 }
  0xde   : > { %v854_v6 = vadd.f32 %v851_v2, %v747_v3  ;;  %v767_v7 = vpop.f32.mrf.mxu3 }
  0xdf   : > { %v855_v11 = vadd.f32 %v851_v2, %v767_v7 }
  0xe0   : > { %v1263_v12 = vmul.f32 -1.442695, %v854_v6 }
  0xe1   : > { %v1264_v14 = vmul.f32 -1.442695, %v855_v11  ;;  %v1313_v15 = vpop.eup %1312 }
  0xe2   : > { %1314 = vpow2.f32 %v1263_v12  ;;  %v1762_v17 = vadd.f32 1.0, %v1313_v15 }
  0xe3   : > { %1316 = vpow2.f32 %v1261_v13 }
  0xe4   : > { %1318 = vpow2.f32 %v1264_v14  ;;  %vm912_vm1 = vweird.f32 %v1762_v17  ;;  %v918_v50 = vand.u32 2147483648, %v1762_v17  ;;  %v916_v53 = vand.u32 2147483647, %v1762_v17 }
  0xe5   : > { %1320 = vrcp.f32 %v1762_v17 }
  0xe6   : > { %v919_v59 = vor.u32 1.1754944e-38, %v918_v50  ;;  %vm917_vm12 = vcmp.eq.f32.partialorder %v916_v53, 8.507059e+37 }
  0xe8   : > { %v1315_v10 = vpop.eup %1314 }
  0xe9   : > { %v1317_v16 = vpop.eup %1316  ;;  %v1764_v19 = vadd.f32 1.0, %v1315_v10 }
  0xea   : > { %v1319_v18 = vpop.eup %1318  ;;  %v1766_v20 = vadd.f32 1.0, %v1317_v16 }
  0xeb   : > { %v1769_v21 = vadd.f32 1.0, %v1319_v18  ;;  %1322 = vrcp.f32 %v1764_v19  ;;  %v1774_v24 = vpop.eup %1320  ;;  %vm927_vm3 = vweird.f32 %v1764_v19  ;;  %v933_v55 = vand.u32 2147483648, %v1764_v19 }
  0xec   : > { %1324 = vrcp.f32 %v1766_v20  ;;  %v908_v31 = vmul.f32 %v1774_v24, %v1762_v17  ;;  %vm913_vm2 = vweird.f32 %v1774_v24  ;;  %vm897_vm5 = vweird.f32 %v1766_v20 }
  0xed   : > { %1326 = vrcp.f32 %v1769_v21  ;;  %vm1812_vm7 = vmor %vm912_vm1, %vm913_vm2  ;;  %v931_v61 = vand.u32 2147483647, %v1764_v19  ;;  %v903_v62 = vand.u32 2147483648, %v1766_v20  ;;  %vm942_vm9 = vweird.f32 %v1769_v21 }
  0xee   : > { %v909_v37 = vsub.f32 1.0, %v908_v31  ;;  %v946_v1 = vand.u32 2147483647, %v1769_v21  ;;  %v901_v3 = vand.u32 2147483647, %v1766_v20  ;;  %v934_v5 = vor.u32 1.1754944e-38, %v933_v55 }
  0xef   : > { %v948_v6 = vand.u32 2147483648, %v1769_v21  ;;  %v904_v10 = vor.u32 1.1754944e-38, %v903_v62  ;;  %vm932_vm15 = vcmp.eq.f32.partialorder %v931_v61, 8.507059e+37 }
  0xf0   : > { %v910_v47 = vmul.f32 %v1774_v24, %v909_v37  ;;  %vm902_vm14 = vcmp.eq.f32.partialorder %v901_v3, 8.507059e+37  ;;  %vm947_vm0 = vcmp.eq.f32.partialorder %v946_v1, 8.507059e+37 }
  0xf1   : > { %v1776_v27 = vpop.eup %1322 }
  0xf2   : > { %v1778_v28 = vpop.eup %1324  ;;  %v923_v33 = vmul.f32 %v1776_v27, %v1764_v19  ;;  %vm928_vm4 = vweird.f32 %v1776_v27  ;;  %v911_v56 = vadd.f32 %v1774_v24, %v910_v47 }
  0xf3   : > { %v1782_v32 = vpop.eup %1326  ;;  %v893_v34 = vmul.f32 %v1778_v28, %v1766_v20  ;;  %vm898_vm6 = vweird.f32 %v1778_v28  ;;  %vm1819_vm8 = vmor %vm927_vm3, %vm928_vm4 }
  0xf4   : > { %v938_v38 = vmul.f32 %v1782_v32, %v1769_v21  ;;  %v924_v41 = vsub.f32 1.0, %v923_v33  ;;  %vm943_vm10 = vweird.f32 %v1782_v32  ;;  %vm1835_vm11 = vmor %vm897_vm5, %vm898_vm6  ;;  %v915_v13 = vsel %vm1812_vm7, %v1774_v24, %v911_v56 }
  0xf5   : > { %v894_v42 = vsub.f32 1.0, %v893_v34  ;;  %vm1857_vm13 = vmor %vm942_vm9, %vm943_vm10  ;;  %vm1027_vm6 = vcmask 1040384  }
  0xf6   : > { %v939_v48 = vsub.f32 1.0, %v938_v38  ;;  %v925_v51 = vmul.f32 %v1776_v27, %v924_v41 }
  0xf7   : > { %v895_v54 = vmul.f32 %v1778_v28, %v894_v42 }
  0xf8   : > { %v940_v57 = vmul.f32 %v1782_v32, %v939_v48  ;;  %v926_v60 = vadd.f32 %v1776_v27, %v925_v51 }
  0xfa   : > { %v941_v11 = vadd.f32 %v1782_v32, %v940_v57  ;;  %v930_v16 = vsel %vm1819_vm8, %v1776_v27, %v926_v60 }
  0xfc   : > { %v945_v27 = vsel %vm1857_vm13, %v1782_v32, %v941_v11 }
 0x115   : > { %v787_v22 = vpop.f32.mrf.mxu0 }
 0x116   : > { %v807_v23 = vpop.f32.mrf.mxu1  ;;  %v856_v25 = vadd.f32 %v851_v2, %v787_v22  ;;  %v1867_v22 = vsel %vm917_vm12, %v919_v59, %v915_v13 }
 0x117   : > { %v857_v26 = vadd.f32 %v851_v2, %v807_v23  ;;  %v949_v23 = vor.u32 1.1754944e-38, %v948_v6 }
 0x118   : > { %v1265_v29 = vmul.f32 -1.442695, %v856_v25 }
 0x119   : > { %v1266_v30 = vmul.f32 -1.442695, %v857_v26  ;;  %v1872_v26 = vsel %vm932_vm15, %v934_v5, %v930_v16 }
 0x11a   : > { %1328 = vpow2.f32 %v1265_v29 }
 0x11b   : > { %1330 = vpow2.f32 %v1266_v30  ;;  %v1020_v30 = vrot.slane %v1867_v22, 7 }
 0x11d   : > { %v827_v35 = vpop.f32.mrf.mxu2 }
 0x11e   : > { %v847_v36 = vpop.f32.mrf.mxu3  ;;  %v858_v39 = vadd.f32 %v851_v2, %v827_v35 }
 0x11f   : > { %v859_v40 = vadd.f32 %v851_v2, %v847_v36  ;;  %v896_v2 = vadd.f32 %v1778_v28, %v895_v54 }
 0x120   : > { %v1267_v43 = vmul.f32 -1.442695, %v858_v39  ;;  %v1329_v45 = vpop.eup %1328  ;;  %v950_v39 = vsel %vm947_vm0, %v949_v23, %v945_v27 }
 0x121   : > { %v1268_v44 = vmul.f32 -1.442695, %v859_v40  ;;  %v1331_v46 = vpop.eup %1330  ;;  %v1792_v49 = vadd.f32 1.0, %v1329_v45  ;;  %v900_v19 = vsel %vm1835_vm11, %v1778_v28, %v896_v2  ;;  %v1021_v40 = vrot.slane %v1872_v26, 6 }
 0x122   : > { %1332 = vpow2.f32 %v1267_v43  ;;  %v1796_v52 = vadd.f32 1.0, %v1331_v46  ;;  %v1870_v25 = vsel %vm902_vm14, %v904_v10, %v900_v19  ;;  %v1022_v61 = vrot.slane %v950_v39, 5 }
 0x123   : > { %1334 = vpow2.f32 %v1268_v44  ;;  %v963_v28 = vand.u32 2147483648, %v1792_v49  ;;  %vm957_vm1 = vweird.f32 %v1792_v49  ;;  %v961_v33 = vand.u32 2147483647, %v1792_v49 }
 0x124   : > { %1336 = vrcp.f32 %v1792_v49  ;;  %vm972_vm3 = vweird.f32 %v1796_v52  ;;  %v976_v37 = vand.u32 2147483647, %v1796_v52  ;;  %v978_v38 = vand.u32 2147483648, %v1796_v52 }
 0x125   : > { %1338 = vrcp.f32 %v1796_v52  ;;  %v964_v42 = vor.u32 1.1754944e-38, %v963_v28  ;;  %vm1905_vm9 = vcmp.eq.f32.partialorder %v961_v33, 8.507059e+37 }
 0x126   : > { %v979_v53 = vor.u32 1.1754944e-38, %v978_v38  ;;  %vm977_vm10 = vcmp.eq.f32.partialorder %v976_v37, 8.507059e+37 }
 0x128   : > { %v1333_v63 = vpop.eup %1332 }
 0x129   : > { %v1335_v4 = vpop.eup %1334  ;;  %v1829_v7 = vadd.f32 1.0, %v1333_v63 }
 0x12a   : > { %v1839_v9 = vpop.eup %1336  ;;  %v1842_v12 = vadd.f32 1.0, %v1335_v4 }
 0x12b   : > { %v1847_v14 = vpop.eup %1338  ;;  %v953_v15 = vmul.f32 %v1839_v9, %v1792_v49  ;;  %1340 = vrcp.f32 %v1829_v7  ;;  %vm958_vm2 = vweird.f32 %v1839_v9  ;;  %v991_v46 = vand.u32 2147483647, %v1829_v7 }
 0x12c   : > { %v968_v18 = vmul.f32 %v1847_v14, %v1796_v52  ;;  %1342 = vrcp.f32 %v1842_v12  ;;  %vm973_vm4 = vweird.f32 %v1847_v14  ;;  %vm1891_vm5 = vmor %vm957_vm1, %vm958_vm2  ;;  %v993_v47 = vand.u32 2147483648, %v1829_v7 }
 0x12d   : > { %v954_v20 = vsub.f32 1.0, %v953_v15  ;;  %vm1898_vm7 = vmor %vm972_vm3, %vm973_vm4  ;;  %v1006_v54 = vand.u32 2147483647, %v1842_v12  ;;  %v1008_v55 = vand.u32 2147483648, %v1842_v12  ;;  %vm987_vm11 = vweird.f32 %v1829_v7 }
 0x12e   : > { %v969_v21 = vsub.f32 1.0, %v968_v18  ;;  %v994_v58 = vor.u32 1.1754944e-38, %v993_v47  ;;  %vm1002_vm14 = vweird.f32 %v1842_v12  ;;  %vm992_vm15 = vcmp.eq.f32.partialorder %v991_v46, 8.507059e+37 }
 0x12f   : > { %v955_v24 = vmul.f32 %v1839_v9, %v954_v20  ;;  %v1009_v0 = vor.u32 1.1754944e-38, %v1008_v55  ;;  %vm1007_vm1 = vcmp.eq.f32.partialorder %v1006_v54, 8.507059e+37  ;;  %vm1029_vm2 = vcmask 1042434  }
 0x130   : > { %v970_v29 = vmul.f32 %v1847_v14, %v969_v21  ;;  %vm1033_vm3 = vcmask 1044484   ;;  %vm1035_vm4 = vcmask 1046534  }
 0x131   : > { %v1341_v31 = vpop.eup %1340  ;;  %v956_v34 = vadd.f32 %v1839_v9, %v955_v24 }
 0x132   : > { %v971_v32 = vadd.f32 %v1847_v14, %v970_v29  ;;  %v983_v35 = vmul.f32 %v1341_v31, %v1829_v7  ;;  %v1343_v36 = vpop.eup %1342  ;;  %vm988_vm8 = vweird.f32 %v1341_v31  ;;  %v1028_v7 = vsel %vm1027_vm6, %v1870_v25, %v1020_v30 }
 0x133   : > { %v998_v44 = vmul.f32 %v1343_v36, %v1842_v12  ;;  %v960_v51 = vsel %vm1891_vm5, %v1839_v9, %v956_v34  ;;  %vm1003_vm12 = vweird.f32 %v1343_v36  ;;  %vm989_vm13 = vmor %vm987_vm11, %vm988_vm8  ;;  %v1030_v9 = vsel %vm1029_vm2, %v1021_v40, %v1022_v61 }
 0x134   : > { %v984_v43 = vsub.f32 1.0, %v983_v35  ;;  %v975_v52 = vsel %vm1898_vm7, %v1847_v14, %v971_v32  ;;  %v965_v59 = vsel %vm1905_vm9, %v964_v42, %v960_v51  ;;  %vm1004_vm0 = vmor %vm1002_vm14, %vm1003_vm12  ;;  %vm1031_vm5 = vcmask 1041408  }
 0x135   : > { %v999_v50 = vsub.f32 1.0, %v998_v44  ;;  %v980_v60 = vsel %vm977_vm10, %v979_v53, %v975_v52  ;;  %v1023_v3 = vrot.slane %v965_v59, 4  ;;  %vm1037_vm7 = vcmask 1045508  }
 0x136   : > { %v985_v49 = vmul.f32 %v1341_v31, %v984_v43  ;;  %v1024_v4 = vrot.slane %v980_v60, 3  ;;  %vm1039_vm8 = vcmask 1043456   ;;  %v1032_v13 = vsel %vm1031_vm5, %v1028_v7, %v1030_v9 }
 0x137   : > { %v1000_v57 = vmul.f32 %v1343_v36, %v999_v50 }
 0x138   : > { %v986_v56 = vadd.f32 %v1341_v31, %v985_v49  ;;  %v1034_v11 = vsel %vm1033_vm3, %v1023_v3, %v1024_v4 }
 0x139   : > { %v1001_v62 = vadd.f32 %v1343_v36, %v1000_v57 }
 0x13a   : > { %v990_v63 = vsel %vm989_vm13, %v1341_v31, %v986_v56 }
 0x13b   : > { %v995_v1 = vsel %vm992_vm15, %v994_v58, %v990_v63  ;;  %v1005_v2 = vsel %vm1004_vm0, %v1343_v36, %v1001_v62 }
 0x13c   : > { %v1025_v5 = vrot.slane %v995_v1, 2  ;;  %v1010_v6 = vsel %vm1007_vm1, %v1009_v0, %v1005_v2 }
 0x13d   : > { %v1026_v8 = vrot.slane %v1010_v6, 1 }
 0x13f   : > { %v1036_v12 = vsel %vm1035_vm4, %v1025_v5, %v1026_v8 }
 0x140   : > { %v1038_v14 = vsel %vm1037_vm7, %v1034_v11, %v1036_v12 }
 0x141   : > { %v1040_v15 = vsel %vm1039_vm8, %v1032_v13, %v1038_v14 }
 0x142   : > { %1042 = vst [vmem:[%s165_s12] sm:$0xff] %v1040_v15 }
 0x143   : > { %1371 = shalt.err (!%p1368_p3)
}
 0x144   : > { %1273 = dma.vmem_to_hbm [thread:$0]  (%p1469_p5), %s1057_s13, 128, %s1059_s2, %s1044_s18  }
 0x145 PF: > { %p1279_p4 = scmp.ge.s32.totalorder %s1406_s17, 2  ;;  %s1070_s30 = sand.u32 1, %s1394_s14  }
 0x146   : > { %s1071_s4 = scalar_lea.sflag [#allocation4], %s1070_s30 }
 0x147   : > { %p1276_p7 = pnand %p1279_p4, %p1473_p6 }
 0x149   : > { %p1277_p8 = pneg %p1276_p7 }
 0x14b   : > { %1389 = dma.done.wait (%p1277_p8), %s1071_s4, 128  }
 0x14c   : > { %1391 = vsyncadd (%p1277_p8), %s1071_s4, 4294967168  ;;  %p14_p9 = scmp.ge.s32.totalorder %s1456_s19, 6   ;;  %s1982_s14 = smov %s1398_s15 }
 0x14d   : > { %s1983_s15 = smov %s1402_s16  ;;  %s1984_s16 = smov %s1467_s22 }
 0x14e   : > { %s1985_s17 = smov %s1456_s19  ;;  %16 = sbr.rel (!%p14_p9) target bundleno = 5 (0x5), region = 67 }
 0x153   :  { %1077 = vsyncpa [#allocation4], 1 }
 0x154   :  { %1079 = vsyncpa [#allocation4 + $0x1], 1 }

// kernel: pixel_classifier_forward.3
= control target key start
LH: loop header
LB: loop body
LE: loop exit
PB: predicated region body
PF: predicated region fallthrough
CT: control target
= control target key end

     0   :  { %s3947_s15 = smov 0   ;;  %s4857_s0 = inlined_call_operand.vmem [shape: bf16[4096,256], index: 0, kind: input, shape index: {}]   ;;  %s4858_s1 = inlined_call_operand.vmem [shape: bf16[256,128], index: 1, kind: input, shape index: {}]   ;;  %s4859_s2 = inlined_call_operand.vmem [shape: f32[1,128], index: 2, kind: input, shape index: {}]   ;;  %s4860_s3 = inlined_call_operand.vmem [shape: bf16[4096,128], index: 3, kind: output, shape index: {0}]   ;;  %s4861_s4 = inlined_call_operand.vmem [shape: f32[4,2,128], index: 4, kind: output, shape index: {1}]  }
   0x1 LB: > { %s3953_s16 = sadd.s32 4294967295, %s3920_s15   ;;  %p2773_p0 = scmp.ge.s32.totalorder %s3920_s15, 1  ;;  %s3920_s15 = sphi %s3947_s15, %s15_s15  }
   0x2   : > { %p167_p1 = scmp.lt.s32.totalorder %s3920_s15, 5 }
   0x4   : > { %p168_p2 = pnand %p2773_p0, %p167_p1 }
   0x6   : > { %171 = sbr.rel (%p168_p2) target bundleno = 829 (0x33d), region = 32 }
   0xb   : > { %v3494_v0 = vld [vmem:[%s4858_s1 + $0x38] sm:$0xff]  ;;  %v3493_v2 = vld [vmem:[%s4858_s1 + $0x30] sm:$0xff]  ;;  %v3492_v4 = vld [vmem:[%s4858_s1 + $0x28] sm:$0xff]  ;;  %s2774_s29 = sshll.u32 %s3953_s16, 7  ;;  %p211_p4 = scmp.lt.s32.totalorder %s3953_s16, 3  ;;  %vm2679_vm0 = vcmask 1040384  }
   0xc   : > { %v3502_v1 = vld [vmem:[%s4858_s1 + $0x78] sm:$0xff]  ;;  %1115 = vmatpush.bf16.msra.mxu0 %v3494_v0  ;;  %v3501_v3 = vld [vmem:[%s4858_s1 + $0x70] sm:$0xff]  ;;  %3886 = vmatpush.bf16.msra.mxu2 %v3494_v0  ;;  %v3500_v5 = vld [vmem:[%s4858_s1 + $0x68] sm:$0xff]  ;;  %p199_p3 = scmp.lt.s32.totalorder %s2774_s29, 511 }
   0xd   : > { %1444 = vmatpush.bf16.msra.mxu1 %v3502_v1  ;;  %3894 = vmatpush.bf16.msra.mxu3 %v3502_v1  ;;  %v3491_v6 = vld [vmem:[%s4858_s1 + $0x20] sm:$0xff]  ;;  %v3490_v8 = vld [vmem:[%s4858_s1 + $0x18] sm:$0xff]  ;;  %v3489_v10 = vld [vmem:[%s4858_s1 + $0x10] sm:$0xff]  ;;  %s4928_s16 = smov (!%p211_p4, %s3953_s16), 3 }
   0xe   : > { %v3499_v7 = vld [vmem:[%s4858_s1 + $0x60] sm:$0xff]  ;;  %v3498_v9 = vld [vmem:[%s4858_s1 + $0x58] sm:$0xff]  ;;  %s4926_s29 = smov (!%p199_p3, %s2774_s29), 511  ;;  %v3497_v11 = vld [vmem:[%s4858_s1 + $0x50] sm:$0xff] }
   0xf   : > { %s3358_s18 = sshll.u32 %s4926_s29, 3  ;;  %v3488_v12 = vld [vmem:[%s4858_s1 + $0x8] sm:$0xff]  ;;  %v3487_v14 = vld [vmem:[%s4858_s1] sm:$0xff]  ;;  %s2778_s7 = sshll.u32 %s4926_s29, 2 }
  0x10   : > { %1116 = vmatpush.bf16.msra.mxu0 %v3493_v2  ;;  %3887 = vmatpush.bf16.msra.mxu2 %v3493_v2  ;;  %v3496_v13 = vld [vmem:[%s4858_s1 + $0x48] sm:$0xff]  ;;  %s4006_s25 = scalar_lea.vmem %s4857_s0, %s3358_s18  ;;  %v3495_v15 = vld [vmem:[%s4858_s1 + $0x40] sm:$0xff]  ;;  %s4081_s10 = scalar_lea.vmem %s4860_s3, %s2778_s7 }
  0x11   : > { %1445 = vmatpush.bf16.msra.mxu1 %v3501_v3  ;;  %3895 = vmatpush.bf16.msra.mxu3 %v3501_v3  ;;  %v2782_v16 = vld [vmem:[%s4006_s25] sm:$0xf]  ;;  %v3360_v17 = vld [vmem:[%s4006_s25 + $0x4] sm:$0xf0]  ;;  %v3359_v18 = vld [vmem:[%s4006_s25 + $0x4] sm:$0xf] }
  0x12   : > { %v2784_v19 = vld [vmem:[%s4006_s25 + $0x8] sm:$0xf0]  ;;  %v2783_v20 = vor.u32 %v3360_v17, %v2782_v16  ;;  %v2790_v22 = vld [vmem:[%s4006_s25 + $0x10] sm:$0xf]  ;;  %v3362_v23 = vld [vmem:[%s4006_s25 + $0x14] sm:$0xf0] }
  0x13   : > { %v2787_v21 = vor.u32 %v3359_v18, %v2784_v19  ;;  %v3361_v24 = vld [vmem:[%s4006_s25 + $0x14] sm:$0xf]  ;;  %v2792_v25 = vld [vmem:[%s4006_s25 + $0x18] sm:$0xf0]  ;;  %v2791_v26 = vor.u32 %v3362_v23, %v2790_v22  ;;  %v2798_v28 = vld [vmem:[%s4006_s25 + $0x20] sm:$0xf] }
  0x14   : > { %1117 = vmatpush.bf16.msra.mxu0 %v3492_v4  ;;  %3888 = vmatpush.bf16.msra.mxu2 %v3492_v4  ;;  %v2795_v27 = vor.u32 %v3361_v24, %v2792_v25  ;;  %v3364_v29 = vld [vmem:[%s4006_s25 + $0x24] sm:$0xf0]  ;;  %v3363_v30 = vld [vmem:[%s4006_s25 + $0x24] sm:$0xf]  ;;  %v2800_v31 = vld [vmem:[%s4006_s25 + $0x28] sm:$0xf0] }
  0x15   : > { %1446 = vmatpush.bf16.msra.mxu1 %v3500_v5  ;;  %3896 = vmatpush.bf16.msra.mxu3 %v3500_v5  ;;  %v2799_v32 = vor.u32 %v3364_v29, %v2798_v28  ;;  %v2803_v33 = vor.u32 %v3363_v30, %v2800_v31  ;;  %v2806_v34 = vld [vmem:[%s4006_s25 + $0x30] sm:$0xf]  ;;  %v3366_v35 = vld [vmem:[%s4006_s25 + $0x34] sm:$0xf0]  ;;  %v3365_v36 = vld [vmem:[%s4006_s25 + $0x34] sm:$0xf] }
  0x16   : > { %v2808_v37 = vld [vmem:[%s4006_s25 + $0x38] sm:$0xf0]  ;;  %v2807_v38 = vor.u32 %v3366_v35, %v2806_v34  ;;  %v2814_v40 = vld [vmem:[%s4006_s25 + $0x40] sm:$0xf]  ;;  %v3368_v41 = vld [vmem:[%s4006_s25 + $0x44] sm:$0xf0] }
  0x17   : > { %v2811_v39 = vor.u32 %v3365_v36, %v2808_v37  ;;  %v3367_v42 = vld [vmem:[%s4006_s25 + $0x44] sm:$0xf]  ;;  %v2816_v43 = vld [vmem:[%s4006_s25 + $0x48] sm:$0xf0]  ;;  %v2815_v44 = vor.u32 %v3368_v41, %v2814_v40  ;;  %v2822_v46 = vld [vmem:[%s4006_s25 + $0x50] sm:$0xf] }
  0x18   : > { %1118 = vmatpush.bf16.msra.mxu0 %v3491_v6  ;;  %3889 = vmatpush.bf16.msra.mxu2 %v3491_v6  ;;  %v2819_v45 = vor.u32 %v3367_v42, %v2816_v43  ;;  %v3370_v47 = vld [vmem:[%s4006_s25 + $0x54] sm:$0xf0]  ;;  %v3369_v48 = vld [vmem:[%s4006_s25 + $0x54] sm:$0xf]  ;;  %v2824_v49 = vld [vmem:[%s4006_s25 + $0x58] sm:$0xf0] }
  0x19   : > { %1447 = vmatpush.bf16.msra.mxu1 %v3499_v7  ;;  %3897 = vmatpush.bf16.msra.mxu3 %v3499_v7  ;;  %v2823_v50 = vor.u32 %v3370_v47, %v2822_v46  ;;  %v2827_v51 = vor.u32 %v3369_v48, %v2824_v49  ;;  %v3038_v52 = vld [vmem:[%s4006_s25 + $0x200] sm:$0xf]  ;;  %v3424_v53 = vld [vmem:[%s4006_s25 + $0x204] sm:$0xf0]  ;;  %v3423_v55 = vld [vmem:[%s4006_s25 + $0x204] sm:$0xf] }
  0x1a   : > { %v3039_v54 = vor.u32 %v3424_v53, %v3038_v52  ;;  %v3040_v56 = vld [vmem:[%s4006_s25 + $0x208] sm:$0xf0]  ;;  %v2830_v58 = vld [vmem:[%s4006_s25 + $0x60] sm:$0xf]  ;;  %v3372_v59 = vld [vmem:[%s4006_s25 + $0x64] sm:$0xf0] }
  0x1b   : > { %v3043_v57 = vor.u32 %v3423_v55, %v3040_v56  ;;  %v3371_v60 = vld [vmem:[%s4006_s25 + $0x64] sm:$0xf]  ;;  %v2832_v61 = vld [vmem:[%s4006_s25 + $0x68] sm:$0xf0]  ;;  %v2831_v62 = vor.u32 %v3372_v59, %v2830_v58  ;;  %v3046_v0 = vld [vmem:[%s4006_s25 + $0x210] sm:$0xf] }
  0x1c   : > { %1119 = vmatpush.bf16.msra.mxu0 %v3490_v8  ;;  %3890 = vmatpush.bf16.msra.mxu2 %v3490_v8  ;;  %v2835_v63 = vor.u32 %v3371_v60, %v2832_v61  ;;  %v3426_v1 = vld [vmem:[%s4006_s25 + $0x214] sm:$0xf0]  ;;  %v3425_v3 = vld [vmem:[%s4006_s25 + $0x214] sm:$0xf]  ;;  %v3048_v4 = vld [vmem:[%s4006_s25 + $0x218] sm:$0xf0] }
  0x1d   : > { %1448 = vmatpush.bf16.msra.mxu1 %v3498_v9  ;;  %3898 = vmatpush.bf16.msra.mxu3 %v3498_v9  ;;  %v3047_v2 = vor.u32 %v3426_v1, %v3046_v0  ;;  %v3051_v5 = vor.u32 %v3425_v3, %v3048_v4  ;;  %v2838_v6 = vld [vmem:[%s4006_s25 + $0x70] sm:$0xf]  ;;  %v3374_v7 = vld [vmem:[%s4006_s25 + $0x74] sm:$0xf0]  ;;  %v3373_v8 = vld [vmem:[%s4006_s25 + $0x74] sm:$0xf] }
  0x1e   : > { %v2840_v9 = vld [vmem:[%s4006_s25 + $0x78] sm:$0xf0]  ;;  %v3056_v16 = vld [vmem:[%s4006_s25 + $0x228] sm:$0xf0]  ;;  %v2846_v18 = vld [vmem:[%s4006_s25 + $0x80] sm:$0xf] }
  0x1f   : > { %v3376_v19 = vld [vmem:[%s4006_s25 + $0x84] sm:$0xf0]  ;;  %v4065_v22 = vld [vmem:[%s4859_s2] ss:$0 sm:$0xff]  ;;  %v3062_v28 = vld [vmem:[%s4006_s25 + $0x230] sm:$0xf] }
  0x20   : > { %1120 = vmatpush.bf16.msra.mxu0 %v3489_v10  ;;  %3891 = vmatpush.bf16.msra.mxu2 %v3489_v10  ;;  %v2839_v10 = vor.u32 %v3374_v7, %v2838_v6  ;;  %v2847_v23 = vor.u32 %v3376_v19, %v2846_v18  ;;  %v3430_v29 = vld [vmem:[%s4006_s25 + $0x234] sm:$0xf0]  ;;  %v2854_v41 = vld [vmem:[%s4006_s25 + $0x90] sm:$0xf]  ;;  %v3377_v43 = vld [vmem:[%s4006_s25 + $0x94] sm:$0xf] }
  0x21   : > { %1449 = vmatpush.bf16.msra.mxu1 %v3497_v11  ;;  %3899 = vmatpush.bf16.msra.mxu3 %v3497_v11  ;;  %v2843_v11 = vor.u32 %v3373_v8, %v2840_v9  ;;  %v3063_v31 = vor.u32 %v3430_v29, %v3062_v28  ;;  %v3378_v42 = vld [vmem:[%s4006_s25 + $0x94] sm:$0xf0]  ;;  %v3070_v56 = vld [vmem:[%s4006_s25 + $0x240] sm:$0xf]  ;;  %s2779_s18 = sshll.u32 %s4928_s16, 1 }
  0x22   : > { %v2855_v49 = vor.u32 %v3378_v42, %v2854_v41  ;;  %s214_s21 = scalar_lea.vmem %s4861_s4, %s2779_s18 }
  0x24   : > { %1121 = vmatpush.bf16.msra.mxu0 %v3488_v12  ;;  %3892 = vmatpush.bf16.msra.mxu2 %v3488_v12  ;;  %v3054_v12 = vld [vmem:[%s4006_s25 + $0x220] sm:$0xf] }
  0x25   : > { %1450 = vmatpush.bf16.msra.mxu1 %v3496_v13  ;;  %3900 = vmatpush.bf16.msra.mxu3 %v3496_v13  ;;  %v3428_v13 = vld [vmem:[%s4006_s25 + $0x224] sm:$0xf0] }
  0x28   : > { %1122 = vmatpush.bf16.msra.mxu0 %v3487_v14  ;;  %3893 = vmatpush.bf16.msra.mxu2 %v3487_v14  ;;  %v3055_v14 = vor.u32 %v3428_v13, %v3054_v12  ;;  %v3380_v12 = vld [vmem:[%s4006_s25 + $0xa4] sm:$0xf0]  ;;  %v3379_v13 = vld [vmem:[%s4006_s25 + $0xa4] sm:$0xf] }
  0x29   : > { %1451 = vmatpush.bf16.msra.mxu1 %v3495_v15  ;;  %3901 = vmatpush.bf16.msra.mxu3 %v3495_v15  ;;  %v3427_v15 = vld [vmem:[%s4006_s25 + $0x224] sm:$0xf] }
  0x2a   : > { %v3059_v17 = vor.u32 %v3427_v15, %v3056_v16 }
  0x2b   : > { %1123 = vmatmul.bf16.vlgmr.msra.gmra.mxu0 %v2783_v20  ;;  %1283 = vmatmul.bf16.vlgmr.msra.gmra.mxu2 %v3039_v54  ;;  %v3375_v20 = vld [vmem:[%s4006_s25 + $0x84] sm:$0xf] }
  0x2c   : > { %1452 = vmatmul.bf16.vlgmr.msra.gmra.mxu1 %v2787_v21  ;;  %1612 = vmatmul.bf16.vlgmr.msra.gmra.mxu3 %v3043_v57  ;;  %v2848_v21 = vld [vmem:[%s4006_s25 + $0x88] sm:$0xf0]  ;;  %v3432_v57 = vld [vmem:[%s4006_s25 + $0x244] sm:$0xf0] }
  0x2d   : > { %v2851_v24 = vor.u32 %v3375_v20, %v2848_v21  ;;  %v3071_v61 = vor.u32 %v3432_v57, %v3070_v56 }
  0x3b   : > { %1128 = vmatmul.bf16.gmra.mxu0 %v2791_v26  ;;  %1288 = vmatmul.bf16.gmra.mxu2 %v3047_v2 }
  0x3c   : > { %1457 = vmatmul.bf16.gmra.mxu1 %v2795_v27  ;;  %1617 = vmatmul.bf16.gmra.mxu3 %v3051_v5 }
  0x4b   : > { %1133 = vmatmul.bf16.gmra.mxu0 %v2799_v32  ;;  %1293 = vmatmul.bf16.gmra.mxu2 %v3055_v14  ;;  %v3429_v32 = vld [vmem:[%s4006_s25 + $0x234] sm:$0xf]  ;;  %v2864_v14 = vld [vmem:[%s4006_s25 + $0xa8] sm:$0xf0] }
  0x4c   : > { %1462 = vmatmul.bf16.gmra.mxu1 %v2803_v33  ;;  %1622 = vmatmul.bf16.gmra.mxu3 %v3059_v17  ;;  %v3064_v33 = vld [vmem:[%s4006_s25 + $0x238] sm:$0xf0]  ;;  %v2867_v20 = vor.u32 %v3379_v13, %v2864_v14  ;;  %v2878_v14 = vld [vmem:[%s4006_s25 + $0xc0] sm:$0xf] }
  0x4d   : > { %v3067_v34 = vor.u32 %v3429_v32, %v3064_v33  ;;  %v3433_v32 = vld [vmem:[%s4006_s25 + $0x254] sm:$0xf]  ;;  %v3080_v33 = vld [vmem:[%s4006_s25 + $0x258] sm:$0xf0] }
  0x5b   : > { %1138 = vmatmul.bf16.gmra.mxu0 %v2807_v38  ;;  %1298 = vmatmul.bf16.gmra.mxu2 %v3063_v31 }
  0x5c   : > { %1467 = vmatmul.bf16.gmra.mxu1 %v2811_v39  ;;  %1627 = vmatmul.bf16.gmra.mxu3 %v3067_v34 }
  0x6b   : > { %1143 = vmatmul.bf16.gmra.mxu0 %v2815_v44  ;;  %v2856_v44 = vld [vmem:[%s4006_s25 + $0x98] sm:$0xf0]  ;;  %1303 = vmatmul.bf16.gmra.mxu2 %v3071_v61 }
  0x6c   : > { %1472 = vmatmul.bf16.gmra.mxu1 %v2819_v45 }
  0x7b   : > { %1148 = vmatmul.bf16.gmra.mxu0 %v2823_v50  ;;  %v2859_v50 = vor.u32 %v3377_v43, %v2856_v44 }
  0x7c   : > { %1477 = vmatmul.bf16.gmra.mxu1 %v2827_v51 }
  0x8b   : > { %1153 = vmatmul.bf16.gmra.mxu0 %v2831_v62  ;;  %v3431_v62 = vld [vmem:[%s4006_s25 + $0x244] sm:$0xf] }
  0x8c   : > { %1482 = vmatmul.bf16.gmra.mxu1 %v2835_v63  ;;  %v3072_v63 = vld [vmem:[%s4006_s25 + $0x248] sm:$0xf0] }
  0x8d   : > { %v3075_v2 = vor.u32 %v3431_v62, %v3072_v63 }
  0x8f   : > { %1632 = vmatmul.bf16.gmra.mxu3 %v3075_v2  ;;  %v3088_v2 = vld [vmem:[%s4006_s25 + $0x268] sm:$0xf0] }
  0x9b   : > { %1158 = vmatmul.bf16.gmra.mxu0 %v2839_v10 }
  0x9c   : > { %1487 = vmatmul.bf16.gmra.mxu1 %v2843_v11  ;;  %v2862_v11 = vld [vmem:[%s4006_s25 + $0xa0] sm:$0xf] }
  0x9d   : > { %v2863_v19 = vor.u32 %v3380_v12, %v2862_v11 }
  0xa8   : > { %v1124_v25 = vpop.f32.mrf.mxu0 }
  0xa9   : > { %v1453_v26 = vpop.f32.mrf.mxu1  ;;  %v1125_v27 = vadd.f32 %v4065_v22, %v1124_v25 }
  0xab   : > { %v1454_v30 = vadd.f32 %v1453_v26, %v1125_v27  ;;  %1163 = vmatmul.bf16.gmra.mxu0 %v2847_v23  ;;  %v3078_v26 = vld [vmem:[%s4006_s25 + $0x250] sm:$0xf]  ;;  %v3434_v27 = vld [vmem:[%s4006_s25 + $0x254] sm:$0xf0] }
  0xac   : > { %1492 = vmatmul.bf16.gmra.mxu1 %v2851_v24  ;;  %v3079_v31 = vor.u32 %v3434_v27, %v3078_v26 }
  0xad   : > { %v1773_v35 = vmax.f32 %v1454_v30, 0.0 }
  0xae   : > { %1308 = vmatmul.bf16.gmra.mxu2 %v3079_v31 }
  0xaf   : > { %v1901_v39 = vpack.c.bf16 %v1773_v35, %v1773_v35 }
  0xb0   : > { %v1126_v36 = vpop.f32.mrf.mxu0 }
  0xb1   : > { %v1455_v37 = vpop.f32.mrf.mxu1  ;;  %v1127_v38 = vadd.f32 %v4065_v22, %v1126_v36  ;;  %v2157_v46 = vunpack.c.l.bf16 %v1901_v39  ;;  %v3083_v36 = vor.u32 %v3433_v32, %v3080_v33 }
  0xb3   : > { %v1456_v40 = vadd.f32 %v1455_v37, %v1127_v38  ;;  %v2418_v55 = vmul.f32 %v2157_v46, %v2157_v46  ;;  %1637 = vmatmul.bf16.gmra.mxu3 %v3083_v36  ;;  %v3096_v36 = vld [vmem:[%s4006_s25 + $0x278] sm:$0xf0] }
  0xb5   : > { %v1774_v45 = vmax.f32 %v1456_v40, 0.0 }
  0xb7   : > { %v1902_v47 = vpack.c.bf16 %v1774_v45, %v1774_v45  ;;  %v3506_v48 = vpack.c.bf16 %v1774_v45, %v1773_v35  ;;  %v2870_v45 = vld [vmem:[%s4006_s25 + $0xb0] sm:$0xf] }
  0xb8   : > { %v1129_v51 = vpop.f32.mrf.mxu0 }
  0xb9   : > { %v1458_v52 = vpop.f32.mrf.mxu1  ;;  %3507 = vst [vmem:[%s4081_s10] sm:$0xff] %v3506_v48   ;;  %v2158_v53 = vunpack.c.l.bf16 %v1902_v47  ;;  %v1130_v54 = vadd.f32 %v4065_v22, %v1129_v51  ;;  %v3381_v47 = vld [vmem:[%s4006_s25 + $0xb4] sm:$0xf]  ;;  %v2872_v48 = vld [vmem:[%s4006_s25 + $0xb8] sm:$0xf0] }
  0xbb   : > { %v2285_v58 = vadd.f32 %v2158_v53, %v2157_v46  ;;  %v2419_v59 = vmul.f32 %v2158_v53, %v2158_v53  ;;  %v1459_v60 = vadd.f32 %v1458_v52, %v1130_v54  ;;  %1168 = vmatmul.bf16.gmra.mxu0 %v2855_v49  ;;  %v3382_v46 = vld [vmem:[%s4006_s25 + $0xb4] sm:$0xf0]  ;;  %v2875_v54 = vor.u32 %v3381_v47, %v2872_v48  ;;  %v2886_v48 = vld [vmem:[%s4006_s25 + $0xd0] sm:$0xf] }
  0xbc   : > { %1497 = vmatmul.bf16.gmra.mxu1 %v2859_v50  ;;  %v2871_v53 = vor.u32 %v3382_v46, %v2870_v45 }
  0xbd   : > { %v2546_v0 = vadd.f32 %v2419_v59, %v2418_v55  ;;  %v1775_v1 = vmax.f32 %v1459_v60, 0.0  ;;  %v3086_v59 = vld [vmem:[%s4006_s25 + $0x260] sm:$0xf]  ;;  %v3436_v60 = vld [vmem:[%s4006_s25 + $0x264] sm:$0xf0] }
  0xbf   : > { %v1903_v3 = vpack.c.bf16 %v1775_v1, %v1775_v1 }
  0xc0   : > { %v1131_v4 = vpop.f32.mrf.mxu0 }
  0xc1   : > { %v1460_v5 = vpop.f32.mrf.mxu1  ;;  %v2159_v6 = vunpack.c.l.bf16 %v1903_v3  ;;  %v1132_v7 = vadd.f32 %v4065_v22, %v1131_v4 }
  0xc3   : > { %v2286_v8 = vadd.f32 %v2285_v58, %v2159_v6  ;;  %v2420_v9 = vmul.f32 %v2159_v6, %v2159_v6  ;;  %v1461_v10 = vadd.f32 %v1460_v5, %v1132_v7 }
  0xc5   : > { %v2547_v15 = vadd.f32 %v2546_v0, %v2420_v9  ;;  %v1776_v16 = vmax.f32 %v1461_v10, 0.0  ;;  %v3087_v0 = vor.u32 %v3436_v60, %v3086_v59 }
  0xc7   : > { %v1904_v17 = vpack.c.bf16 %v1776_v16, %v1776_v16  ;;  %v3511_v18 = vpack.c.bf16 %v1776_v16, %v1775_v1  ;;  %v3435_v1 = vld [vmem:[%s4006_s25 + $0x264] sm:$0xf]  ;;  %1313 = vmatmul.bf16.gmra.mxu2 %v3087_v0 }
  0xc8   : > { %v1134_v21 = vpop.f32.mrf.mxu0  ;;  %v3091_v5 = vor.u32 %v3435_v1, %v3088_v2  ;;  %v3383_v16 = vld [vmem:[%s4006_s25 + $0xc4] sm:$0xf] }
  0xc9   : > { %v1463_v23 = vpop.f32.mrf.mxu1  ;;  %3823 = vst [vmem:[%s4081_s10 + $0x8] sm:$0xff] %v3511_v18   ;;  %v2160_v24 = vunpack.c.l.bf16 %v1904_v17  ;;  %v1135_v25 = vadd.f32 %v4065_v22, %v1134_v21  ;;  %v2880_v17 = vld [vmem:[%s4006_s25 + $0xc8] sm:$0xf0] }
  0xca   : > { %1642 = vmatmul.bf16.gmra.mxu3 %v3091_v5  ;;  %v3104_v5 = vld [vmem:[%s4006_s25 + $0x288] sm:$0xf0] }
  0xcb   : > { %v2287_v28 = vadd.f32 %v2286_v8, %v2160_v24  ;;  %v2421_v29 = vmul.f32 %v2160_v24, %v2160_v24  ;;  %v1464_v30 = vadd.f32 %v1463_v23, %v1135_v25  ;;  %1173 = vmatmul.bf16.gmra.mxu0 %v2863_v19  ;;  %v2883_v24 = vor.u32 %v3383_v16, %v2880_v17 }
  0xcc   : > { %1502 = vmatmul.bf16.gmra.mxu1 %v2867_v20 }
  0xcd   : > { %v2548_v34 = vadd.f32 %v2547_v15, %v2421_v29  ;;  %v1777_v35 = vmax.f32 %v1464_v30, 0.0  ;;  %v3384_v15 = vld [vmem:[%s4006_s25 + $0xc4] sm:$0xf0]  ;;  %v3094_v29 = vld [vmem:[%s4006_s25 + $0x270] sm:$0xf] }
  0xce   : > { %v2879_v23 = vor.u32 %v3384_v15, %v2878_v14  ;;  %v3438_v30 = vld [vmem:[%s4006_s25 + $0x274] sm:$0xf0]  ;;  %v1284_v14 = vpop.f32.mrf.mxu2  ;;  %v1613_v15 = vpop.f32.mrf.mxu3 }
  0xcf   : > { %v1905_v37 = vpack.c.bf16 %v1777_v35, %v1777_v35 }
  0xd0   : > { %v1136_v38 = vpop.f32.mrf.mxu0 }
  0xd1   : > { %v1465_v39 = vpop.f32.mrf.mxu1  ;;  %v2161_v40 = vunpack.c.l.bf16 %v1905_v37  ;;  %v1137_v41 = vadd.f32 %v4065_v22, %v1136_v38 }
  0xd3   : > { %v2288_v42 = vadd.f32 %v2287_v28, %v2161_v40  ;;  %v2422_v43 = vmul.f32 %v2161_v40, %v2161_v40  ;;  %v1466_v44 = vadd.f32 %v1465_v39, %v1137_v41 }
  0xd5   : > { %v2549_v49 = vadd.f32 %v2548_v34, %v2422_v43  ;;  %v1778_v50 = vmax.f32 %v1466_v44, 0.0  ;;  %v3095_v34 = vor.u32 %v3438_v30, %v3094_v29 }
  0xd7   : > { %v1906_v51 = vpack.c.bf16 %v1778_v50, %v1778_v50  ;;  %v3516_v52 = vpack.c.bf16 %v1778_v50, %v1777_v35  ;;  %v3437_v35 = vld [vmem:[%s4006_s25 + $0x274] sm:$0xf]  ;;  %1318 = vmatmul.bf16.gmra.mxu2 %v3095_v34 }
  0xd8   : > { %v1139_v55 = vpop.f32.mrf.mxu0  ;;  %v3099_v39 = vor.u32 %v3437_v35, %v3096_v36  ;;  %v3385_v50 = vld [vmem:[%s4006_s25 + $0xd4] sm:$0xf]  ;;  %v1286_v35 = vpop.f32.mrf.mxu2 }
  0xd9   : > { %v1468_v56 = vpop.f32.mrf.mxu1  ;;  %3824 = vst [vmem:[%s4081_s10 + $0x10] sm:$0xff] %v3516_v52   ;;  %v2162_v57 = vunpack.c.l.bf16 %v1906_v51  ;;  %v1140_v58 = vadd.f32 %v4065_v22, %v1139_v55  ;;  %v2888_v51 = vld [vmem:[%s4006_s25 + $0xd8] sm:$0xf0]  ;;  %v1287_v36 = vadd.f32 %v4065_v22, %v1286_v35 }
  0xda   : > { %1647 = vmatmul.bf16.gmra.mxu3 %v3099_v39  ;;  %v3442_v39 = vld [vmem:[%s4006_s25 + $0x294] sm:$0xf0] }
  0xdb   : > { %v2289_v61 = vadd.f32 %v2288_v42, %v2162_v57  ;;  %v2423_v62 = vmul.f32 %v2162_v57, %v2162_v57  ;;  %v1469_v63 = vadd.f32 %v1468_v56, %v1140_v58  ;;  %1178 = vmatmul.bf16.gmra.mxu0 %v2871_v53  ;;  %v2891_v57 = vor.u32 %v3385_v50, %v2888_v51 }
  0xdc   : > { %1507 = vmatmul.bf16.gmra.mxu1 %v2875_v54 }
  0xdd   : > { %v2550_v3 = vadd.f32 %v2549_v49, %v2423_v62  ;;  %v1779_v4 = vmax.f32 %v1469_v63, 0.0  ;;  %v3386_v49 = vld [vmem:[%s4006_s25 + $0xd4] sm:$0xf0]  ;;  %v3102_v62 = vld [vmem:[%s4006_s25 + $0x280] sm:$0xf] }
  0xde   : > { %v2887_v56 = vor.u32 %v3386_v49, %v2886_v48  ;;  %v3440_v63 = vld [vmem:[%s4006_s25 + $0x284] sm:$0xf0] }
  0xdf   : > { %v1907_v6 = vpack.c.bf16 %v1779_v4, %v1779_v4 }
  0xe0   : > { %v1141_v7 = vpop.f32.mrf.mxu0 }
  0xe1   : > { %v1470_v8 = vpop.f32.mrf.mxu1  ;;  %v2163_v9 = vunpack.c.l.bf16 %v1907_v6  ;;  %v1142_v10 = vadd.f32 %v4065_v22, %v1141_v7 }
  0xe3   : > { %v2290_v11 = vadd.f32 %v2289_v61, %v2163_v9  ;;  %v2424_v12 = vmul.f32 %v2163_v9, %v2163_v9  ;;  %v1471_v13 = vadd.f32 %v1470_v8, %v1142_v10 }
  0xe5   : > { %v2551_v18 = vadd.f32 %v2550_v3, %v2424_v12  ;;  %v1780_v19 = vmax.f32 %v1471_v13, 0.0  ;;  %v3103_v3 = vor.u32 %v3440_v63, %v3102_v62 }
  0xe7   : > { %v1908_v20 = vpack.c.bf16 %v1780_v19, %v1780_v19  ;;  %v3521_v21 = vpack.c.bf16 %v1780_v19, %v1779_v4  ;;  %v3439_v4 = vld [vmem:[%s4006_s25 + $0x284] sm:$0xf]  ;;  %1323 = vmatmul.bf16.gmra.mxu2 %v3103_v3  ;;  %v2894_v19 = vld [vmem:[%s4006_s25 + $0xe0] sm:$0xf]  ;;  %v2904_v3 = vld [vmem:[%s4006_s25 + $0xf8] sm:$0xf0] }
  0xe8   : > { %v1144_v25 = vpop.f32.mrf.mxu0  ;;  %v3107_v8 = vor.u32 %v3439_v4, %v3104_v5 }
  0xe9   : > { %v1473_v26 = vpop.f32.mrf.mxu1  ;;  %3825 = vst [vmem:[%s4081_s10 + $0x18] sm:$0xff] %v3521_v21   ;;  %v2164_v27 = vunpack.c.l.bf16 %v1908_v20  ;;  %v1145_v28 = vadd.f32 %v4065_v22, %v1144_v25  ;;  %v3388_v20 = vld [vmem:[%s4006_s25 + $0xe4] sm:$0xf0]  ;;  %v3387_v21 = vld [vmem:[%s4006_s25 + $0xe4] sm:$0xf] }
  0xea   : > { %1652 = vmatmul.bf16.gmra.mxu3 %v3107_v8 }
  0xeb   : > { %v2291_v31 = vadd.f32 %v2290_v11, %v2164_v27  ;;  %v2425_v32 = vmul.f32 %v2164_v27, %v2164_v27  ;;  %v1474_v33 = vadd.f32 %v1473_v26, %v1145_v28  ;;  %1183 = vmatmul.bf16.gmra.mxu0 %v2879_v23  ;;  %v2896_v23 = vld [vmem:[%s4006_s25 + $0xe8] sm:$0xf0]  ;;  %v2895_v28 = vor.u32 %v3388_v20, %v2894_v19  ;;  %v3444_v19 = vld [vmem:[%s4006_s25 + $0x2a4] sm:$0xf0] }
  0xec   : > { %1512 = vmatmul.bf16.gmra.mxu1 %v2883_v24  ;;  %v2899_v29 = vor.u32 %v3387_v21, %v2896_v23 }
  0xed   : > { %v2552_v37 = vadd.f32 %v2551_v18, %v2425_v32  ;;  %v1781_v38 = vmax.f32 %v1474_v33, 0.0  ;;  %v1285_v32 = vadd.f32 %v4065_v22, %v1284_v14 }
  0xef   : > { %v1909_v40 = vpack.c.bf16 %v1781_v38, %v1781_v38 }
  0xf0   : > { %v1146_v41 = vpop.f32.mrf.mxu0 }
  0xf1   : > { %v1475_v42 = vpop.f32.mrf.mxu1  ;;  %v2165_v43 = vunpack.c.l.bf16 %v1909_v40  ;;  %v1147_v44 = vadd.f32 %v4065_v22, %v1146_v41 }
  0xf3   : > { %v2292_v45 = vadd.f32 %v2291_v31, %v2165_v43  ;;  %v2426_v46 = vmul.f32 %v2165_v43, %v2165_v43  ;;  %v1476_v47 = vadd.f32 %v1475_v42, %v1147_v44  ;;  %v1614_v43 = vadd.f32 %v1613_v15, %v1285_v32 }
  0xf5   : > { %v2553_v52 = vadd.f32 %v2552_v37, %v2426_v46  ;;  %v1782_v53 = vmax.f32 %v1476_v47, 0.0  ;;  %v1615_v37 = vpop.f32.mrf.mxu3  ;;  %v3441_v46 = vld [vmem:[%s4006_s25 + $0x294] sm:$0xf]  ;;  %v3112_v47 = vld [vmem:[%s4006_s25 + $0x298] sm:$0xf0]  ;;  %v4146_v51 = vmax.f32 %v1614_v43, 0.0 }
  0xf6   : > { %v1616_v44 = vadd.f32 %v1615_v37, %v1287_v36  ;;  %v3115_v50 = vor.u32 %v3441_v46, %v3112_v47  ;;  %v3392_v46 = vld [vmem:[%s4006_s25 + $0x104] sm:$0xf0]  ;;  %v3391_v47 = vld [vmem:[%s4006_s25 + $0x104] sm:$0xf] }
  0xf7   : > { %v1910_v54 = vpack.c.bf16 %v1782_v53, %v1782_v53  ;;  %v3526_v55 = vpack.c.bf16 %v1782_v53, %v1781_v38  ;;  %v3110_v38 = vld [vmem:[%s4006_s25 + $0x290] sm:$0xf] }
  0xf8   : > { %v1149_v58 = vpop.f32.mrf.mxu0 }
  0xf9   : > { %v1478_v59 = vpop.f32.mrf.mxu1  ;;  %3826 = vst [vmem:[%s4081_s10 + $0x20] sm:$0xff] %v3526_v55   ;;  %v2166_v60 = vunpack.c.l.bf16 %v1910_v54  ;;  %v1150_v61 = vadd.f32 %v4065_v22, %v1149_v58 }
  0xfa   : > { %1657 = vmatmul.bf16.gmra.mxu3 %v3115_v50 }
  0xfb   : > { %v2293_v0 = vadd.f32 %v2292_v45, %v2166_v60  ;;  %v2427_v1 = vmul.f32 %v2166_v60, %v2166_v60  ;;  %v1479_v2 = vadd.f32 %v1478_v59, %v1150_v61  ;;  %1188 = vmatmul.bf16.gmra.mxu0 %v2887_v56  ;;  %v3111_v45 = vor.u32 %v3442_v39, %v3110_v38  ;;  %v1289_v59 = vpop.f32.mrf.mxu2 }
  0xfc   : > { %1517 = vmatmul.bf16.gmra.mxu1 %v2891_v57 }
  0xfd   : > { %v2554_v6 = vadd.f32 %v2553_v52, %v2427_v1  ;;  %v1783_v7 = vmax.f32 %v1479_v2, 0.0  ;;  %v4148_v52 = vmax.f32 %v1616_v44, 0.0  ;;  %1328 = vmatmul.bf16.gmra.mxu2 %v3111_v45  ;;  %v1618_v60 = vpop.f32.mrf.mxu3  ;;  %v3390_v1 = vld [vmem:[%s4006_s25 + $0xf4] sm:$0xf0]  ;;  %v3389_v2 = vld [vmem:[%s4006_s25 + $0xf4] sm:$0xf] }
  0xfe   : > { %v2910_v45 = vld [vmem:[%s4006_s25 + $0x100] sm:$0xf] }
  0xff   : > { %v1911_v9 = vpack.c.bf16 %v1783_v7, %v1783_v7  ;;  %v3666_v56 = vpack.c.bf16 %v4148_v52, %v4146_v51 }
 0x100   : > { %v1151_v10 = vpop.f32.mrf.mxu0 }
 0x101   : > { %v1480_v11 = vpop.f32.mrf.mxu1  ;;  %v2167_v12 = vunpack.c.l.bf16 %v1911_v9  ;;  %v1152_v13 = vadd.f32 %v4065_v22, %v1151_v10  ;;  %3854 = vst [vmem:[%s4081_s10 + $0x100] sm:$0xff] %v3666_v56   ;;  %v2907_v9 = vor.u32 %v3389_v2, %v2904_v3  ;;  %v3446_v2 = vld [vmem:[%s4006_s25 + $0x2b4] sm:$0xf0] }
 0x103   : > { %v2294_v16 = vadd.f32 %v2293_v0, %v2167_v12  ;;  %v2428_v17 = vmul.f32 %v2167_v12, %v2167_v12  ;;  %v1481_v18 = vadd.f32 %v1480_v11, %v1152_v13  ;;  %v2902_v0 = vld [vmem:[%s4006_s25 + $0xf0] sm:$0xf]  ;;  %v1290_v12 = vadd.f32 %v4065_v22, %v1289_v59  ;;  %v1291_v15 = vpop.f32.mrf.mxu2 }
 0x104   : > { %v2903_v8 = vor.u32 %v3390_v1, %v2902_v0  ;;  %v3126_v1 = vld [vmem:[%s4006_s25 + $0x2b0] sm:$0xf] }
 0x105   : > { %v2555_v24 = vadd.f32 %v2554_v6, %v2428_v17  ;;  %v1784_v25 = vmax.f32 %v1481_v18, 0.0  ;;  %v1620_v17 = vpop.f32.mrf.mxu3  ;;  %v3118_v18 = vld [vmem:[%s4006_s25 + $0x2a0] sm:$0xf] }
 0x107   : > { %v1912_v26 = vpack.c.bf16 %v1784_v25, %v1784_v25  ;;  %v3531_v27 = vpack.c.bf16 %v1784_v25, %v1783_v7 }
 0x108   : > { %v1154_v30 = vpop.f32.mrf.mxu0 }
 0x109   : > { %v1483_v31 = vpop.f32.mrf.mxu1  ;;  %3827 = vst [vmem:[%s4081_s10 + $0x28] sm:$0xff] %v3531_v27   ;;  %v2168_v33 = vunpack.c.l.bf16 %v1912_v26  ;;  %v1155_v34 = vadd.f32 %v4065_v22, %v1154_v30  ;;  %v3119_v26 = vor.u32 %v3444_v19, %v3118_v18  ;;  %v3443_v27 = vld [vmem:[%s4006_s25 + $0x2a4] sm:$0xf] }
 0x10b   : > { %v2295_v40 = vadd.f32 %v2294_v16, %v2168_v33  ;;  %v2429_v41 = vmul.f32 %v2168_v33, %v2168_v33  ;;  %v1484_v42 = vadd.f32 %v1483_v31, %v1155_v34  ;;  %1193 = vmatmul.bf16.gmra.mxu0 %v2895_v28  ;;  %v1292_v16 = vadd.f32 %v4065_v22, %v1291_v15  ;;  %v3120_v28 = vld [vmem:[%s4006_s25 + $0x2a8] sm:$0xf0] }
 0x10c   : > { %1522 = vmatmul.bf16.gmra.mxu1 %v2899_v29  ;;  %v3123_v31 = vor.u32 %v3443_v27, %v3120_v28  ;;  %v2918_v28 = vld [vmem:[%s4006_s25 + $0x110] sm:$0xf] }
 0x10d   : > { %v2556_v48 = vadd.f32 %v2555_v24, %v2429_v41  ;;  %v1785_v49 = vmax.f32 %v1484_v42, 0.0  ;;  %v1619_v24 = vadd.f32 %v1618_v60, %v1290_v12  ;;  %v1621_v25 = vadd.f32 %v1620_v17, %v1292_v16  ;;  %1333 = vmatmul.bf16.gmra.mxu2 %v3119_v26  ;;  %v1623_v41 = vpop.f32.mrf.mxu3 }
 0x10e   : > { %1662 = vmatmul.bf16.gmra.mxu3 %v3123_v31  ;;  %v2920_v31 = vld [vmem:[%s4006_s25 + $0x118] sm:$0xf0] }
 0x10f   : > { %v1913_v53 = vpack.c.bf16 %v1785_v49, %v1785_v49  ;;  %v4166_v32 = vmax.f32 %v1619_v24, 0.0  ;;  %v4168_v33 = vmax.f32 %v1621_v25, 0.0 }
 0x110   : > { %v1156_v54 = vpop.f32.mrf.mxu0 }
 0x111   : > { %v1485_v55 = vpop.f32.mrf.mxu1  ;;  %v2169_v57 = vunpack.c.l.bf16 %v1913_v53  ;;  %v1157_v58 = vadd.f32 %v4065_v22, %v1156_v54  ;;  %v3671_v37 = vpack.c.bf16 %v4168_v33, %v4166_v32 }
 0x113   : > { %v2296_v61 = vadd.f32 %v2295_v40, %v2169_v57  ;;  %v2430_v62 = vmul.f32 %v2169_v57, %v2169_v57  ;;  %v1486_v63 = vadd.f32 %v1485_v55, %v1157_v58  ;;  %v1294_v40 = vpop.f32.mrf.mxu2  ;;  %3855 = vst [vmem:[%s4081_s10 + $0x108] sm:$0xff] %v3671_v37   ;;  %v2911_v55 = vor.u32 %v3392_v46, %v2910_v45 }
 0x114   : > { %v1295_v59 = vadd.f32 %v4065_v22, %v1294_v40 }
 0x115   : > { %v2557_v4 = vadd.f32 %v2556_v48, %v2430_v62  ;;  %v1786_v5 = vmax.f32 %v1486_v63, 0.0  ;;  %v2912_v48 = vld [vmem:[%s4006_s25 + $0x108] sm:$0xf0]  ;;  %v1625_v0 = vpop.f32.mrf.mxu3 }
 0x116   : > { %v2915_v56 = vor.u32 %v3391_v47, %v2912_v48  ;;  %v3134_v48 = vld [vmem:[%s4006_s25 + $0x2c0] sm:$0xf] }
 0x117   : > { %v1914_v6 = vpack.c.bf16 %v1786_v5, %v1786_v5  ;;  %v3536_v7 = vpack.c.bf16 %v1786_v5, %v1785_v49 }
 0x118   : > { %v1159_v10 = vpop.f32.mrf.mxu0 }
 0x119   : > { %v1488_v11 = vpop.f32.mrf.mxu1  ;;  %3828 = vst [vmem:[%s4081_s10 + $0x30] sm:$0xff] %v3536_v7   ;;  %v2170_v13 = vunpack.c.l.bf16 %v1914_v6  ;;  %v1160_v14 = vadd.f32 %v4065_v22, %v1159_v10  ;;  %v1624_v6 = vadd.f32 %v1623_v41, %v1295_v59  ;;  %v3128_v10 = vld [vmem:[%s4006_s25 + $0x2b8] sm:$0xf0]  ;;  %v3136_v59 = vld [vmem:[%s4006_s25 + $0x2c8] sm:$0xf0] }
 0x11b   : > { %v2297_v20 = vadd.f32 %v2296_v61, %v2170_v13  ;;  %v2431_v21 = vmul.f32 %v2170_v13, %v2170_v13  ;;  %v1489_v23 = vadd.f32 %v1488_v11, %v1160_v14  ;;  %1198 = vmatmul.bf16.gmra.mxu0 %v2903_v8  ;;  %v1296_v62 = vpop.f32.mrf.mxu2  ;;  %v3127_v8 = vor.u32 %v3446_v2, %v3126_v1 }
 0x11c   : > { %1527 = vmatmul.bf16.gmra.mxu1 %v2907_v9  ;;  %v1297_v63 = vadd.f32 %v4065_v22, %v1296_v62  ;;  %v3445_v9 = vld [vmem:[%s4006_s25 + $0x2b4] sm:$0xf]  ;;  %v4186_v14 = vmax.f32 %v1624_v6, 0.0 }
 0x11d   : > { %v2558_v29 = vadd.f32 %v2557_v4, %v2431_v21  ;;  %v1787_v30 = vmax.f32 %v1489_v23, 0.0  ;;  %v3131_v13 = vor.u32 %v3445_v9, %v3128_v10  ;;  %1338 = vmatmul.bf16.gmra.mxu2 %v3127_v8  ;;  %v1628_v24 = vpop.f32.mrf.mxu3 }
 0x11e   : > { %v1626_v7 = vadd.f32 %v1625_v0, %v1297_v63 }
 0x11f   : > { %v1915_v34 = vpack.c.bf16 %v1787_v30, %v1787_v30  ;;  %1667 = vmatmul.bf16.gmra.mxu3 %v3131_v13  ;;  %v3396_v13 = vld [vmem:[%s4006_s25 + $0x124] sm:$0xf0] }
 0x120   : > { %v1161_v35 = vpop.f32.mrf.mxu0  ;;  %v4188_v15 = vmax.f32 %v1626_v7, 0.0 }
 0x121   : > { %v1490_v36 = vpop.f32.mrf.mxu1  ;;  %v2171_v38 = vunpack.c.l.bf16 %v1915_v34  ;;  %v1162_v39 = vadd.f32 %v4065_v22, %v1161_v35 }
 0x122   : > { %v3676_v19 = vpack.c.bf16 %v4188_v15, %v4186_v14 }
 0x123   : > { %v2298_v42 = vadd.f32 %v2297_v20, %v2171_v38  ;;  %v2432_v43 = vmul.f32 %v2171_v38, %v2171_v38  ;;  %v1491_v44 = vadd.f32 %v1490_v36, %v1162_v39  ;;  %v1299_v23 = vpop.f32.mrf.mxu2 }
 0x124   : > { %3856 = vst [vmem:[%s4081_s10 + $0x110] sm:$0xff] %v3676_v19  }
 0x125   : > { %v2559_v49 = vadd.f32 %v2558_v29, %v2432_v43  ;;  %v1788_v50 = vmax.f32 %v1491_v44, 0.0  ;;  %v3394_v29 = vld [vmem:[%s4006_s25 + $0x114] sm:$0xf0]  ;;  %v1630_v47 = vpop.f32.mrf.mxu3 }
 0x126   : > { %v2919_v38 = vor.u32 %v3394_v29, %v2918_v28 }
 0x127   : > { %v1916_v53 = vpack.c.bf16 %v1788_v50, %v1788_v50  ;;  %v3541_v54 = vpack.c.bf16 %v1788_v50, %v1787_v30  ;;  %v3393_v30 = vld [vmem:[%s4006_s25 + $0x114] sm:$0xf] }
 0x128   : > { %v1164_v57 = vpop.f32.mrf.mxu0  ;;  %v2923_v39 = vor.u32 %v3393_v30, %v2920_v31 }
 0x129   : > { %v1493_v58 = vpop.f32.mrf.mxu1  ;;  %3829 = vst [vmem:[%s4081_s10 + $0x38] sm:$0xff] %v3541_v54   ;;  %v2172_v60 = vunpack.c.l.bf16 %v1916_v53  ;;  %v1165_v61 = vadd.f32 %v4065_v22, %v1164_v57 }
 0x12b   : > { %v2299_v3 = vadd.f32 %v2298_v42, %v2172_v60  ;;  %v2433_v4 = vmul.f32 %v2172_v60, %v2172_v60  ;;  %v1494_v5 = vadd.f32 %v1493_v58, %v1165_v61  ;;  %1203 = vmatmul.bf16.gmra.mxu0 %v2911_v55  ;;  %v1300_v42 = vadd.f32 %v4065_v22, %v1299_v23  ;;  %v1301_v45 = vpop.f32.mrf.mxu2  ;;  %v3447_v58 = vld [vmem:[%s4006_s25 + $0x2c4] sm:$0xf] }
 0x12c   : > { %1532 = vmatmul.bf16.gmra.mxu1 %v2915_v56  ;;  %v1302_v46 = vadd.f32 %v4065_v22, %v1301_v45  ;;  %v3139_v62 = vor.u32 %v3447_v58, %v3136_v59 }
 0x12d   : > { %v2560_v11 = vadd.f32 %v2559_v49, %v2433_v4  ;;  %v1789_v12 = vmax.f32 %v1494_v5, 0.0  ;;  %v3448_v49 = vld [vmem:[%s4006_s25 + $0x2c4] sm:$0xf0]  ;;  %v1629_v55 = vadd.f32 %v1628_v24, %v1300_v42  ;;  %v1633_v8 = vpop.f32.mrf.mxu3 }
 0x12e   : > { %v1631_v56 = vadd.f32 %v1630_v47, %v1302_v46  ;;  %v3135_v57 = vor.u32 %v3448_v49, %v3134_v48 }
 0x12f   : > { %v1917_v16 = vpack.c.bf16 %v1789_v12, %v1789_v12  ;;  %v4206_v63 = vmax.f32 %v1629_v55, 0.0  ;;  %1672 = vmatmul.bf16.gmra.mxu3 %v3139_v62 }
 0x130   : > { %v1166_v17 = vpop.f32.mrf.mxu0  ;;  %v4208_v0 = vmax.f32 %v1631_v56, 0.0  ;;  %1343 = vmatmul.bf16.gmra.mxu2 %v3135_v57 }
 0x131   : > { %v1495_v18 = vpop.f32.mrf.mxu1  ;;  %v2173_v20 = vunpack.c.l.bf16 %v1917_v16  ;;  %v1167_v21 = vadd.f32 %v4065_v22, %v1166_v17  ;;  %v3395_v16 = vld [vmem:[%s4006_s25 + $0x124] sm:$0xf]  ;;  %v2928_v17 = vld [vmem:[%s4006_s25 + $0x128] sm:$0xf0] }
 0x132   : > { %v3681_v4 = vpack.c.bf16 %v4208_v0, %v4206_v63  ;;  %v2931_v24 = vor.u32 %v3395_v16, %v2928_v17 }
 0x133   : > { %v2300_v25 = vadd.f32 %v2299_v3, %v2173_v20  ;;  %v2434_v26 = vmul.f32 %v2173_v20, %v2173_v20  ;;  %v1496_v27 = vadd.f32 %v1495_v18, %v1167_v21  ;;  %v1304_v7 = vpop.f32.mrf.mxu2 }
 0x134   : > { %3857 = vst [vmem:[%s4081_s10 + $0x118] sm:$0xff] %v3681_v4   ;;  %v2936_v4 = vld [vmem:[%s4006_s25 + $0x138] sm:$0xf0] }
 0x135   : > { %v2561_v34 = vadd.f32 %v2560_v11, %v2434_v26  ;;  %v1790_v35 = vmax.f32 %v1496_v27, 0.0  ;;  %v1305_v27 = vadd.f32 %v4065_v22, %v1304_v7 }
 0x137   : > { %v1918_v36 = vpack.c.bf16 %v1790_v35, %v1790_v35  ;;  %v3546_v37 = vpack.c.bf16 %v1790_v35, %v1789_v12  ;;  %v2926_v12 = vld [vmem:[%s4006_s25 + $0x120] sm:$0xf]  ;;  %v3142_v35 = vld [vmem:[%s4006_s25 + $0x2d0] sm:$0xf] }
 0x138   : > { %v1169_v40 = vpop.f32.mrf.mxu0  ;;  %v2927_v23 = vor.u32 %v3396_v13, %v2926_v12 }
 0x139   : > { %v1498_v41 = vpop.f32.mrf.mxu1  ;;  %3830 = vst [vmem:[%s4081_s10 + $0x40] sm:$0xff] %v3546_v37   ;;  %v2174_v43 = vunpack.c.l.bf16 %v1918_v36  ;;  %v1170_v44 = vadd.f32 %v4065_v22, %v1169_v40  ;;  %v3450_v36 = vld [vmem:[%s4006_s25 + $0x2d4] sm:$0xf0]  ;;  %v1634_v40 = vadd.f32 %v1633_v8, %v1305_v27 }
 0x13a   : > { %v3143_v42 = vor.u32 %v3450_v36, %v3142_v35 }
 0x13b   : > { %v2301_v50 = vadd.f32 %v2300_v25, %v2174_v43  ;;  %v2435_v53 = vmul.f32 %v2174_v43, %v2174_v43  ;;  %v1499_v54 = vadd.f32 %v1498_v41, %v1170_v44  ;;  %1208 = vmatmul.bf16.gmra.mxu0 %v2919_v38  ;;  %v1306_v30 = vpop.f32.mrf.mxu2  ;;  %v3449_v43 = vld [vmem:[%s4006_s25 + $0x2d4] sm:$0xf]  ;;  %v3144_v44 = vld [vmem:[%s4006_s25 + $0x2d8] sm:$0xf0]  ;;  %v4226_v48 = vmax.f32 %v1634_v40, 0.0 }
 0x13c   : > { %1537 = vmatmul.bf16.gmra.mxu1 %v2923_v39  ;;  %v1307_v31 = vadd.f32 %v4065_v22, %v1306_v30  ;;  %v3147_v47 = vor.u32 %v3449_v43, %v3144_v44  ;;  %v3451_v30 = vld [vmem:[%s4006_s25 + $0x2e4] sm:$0xf] }
 0x13d   : > { %v2562_v60 = vadd.f32 %v2561_v34, %v2435_v53  ;;  %v1791_v61 = vmax.f32 %v1499_v54, 0.0  ;;  %v1635_v34 = vpop.f32.mrf.mxu3 }
 0x13e   : > { %v1636_v41 = vadd.f32 %v1635_v34, %v1307_v31  ;;  %v3152_v31 = vld [vmem:[%s4006_s25 + $0x2e8] sm:$0xf0] }
 0x13f   : > { %v1919_v1 = vpack.c.bf16 %v1791_v61, %v1791_v61  ;;  %1677 = vmatmul.bf16.gmra.mxu3 %v3147_v47  ;;  %v3155_v36 = vor.u32 %v3451_v30, %v3152_v31 }
 0x140   : > { %v1171_v2 = vpop.f32.mrf.mxu0  ;;  %v4228_v49 = vmax.f32 %v1636_v41, 0.0  ;;  %1348 = vmatmul.bf16.gmra.mxu2 %v3143_v42 }
 0x141   : > { %v1500_v3 = vpop.f32.mrf.mxu1  ;;  %v2175_v5 = vunpack.c.l.bf16 %v1919_v1  ;;  %v1172_v6 = vadd.f32 %v4065_v22, %v1171_v2  ;;  %v2934_v1 = vld [vmem:[%s4006_s25 + $0x130] sm:$0xf]  ;;  %v3398_v2 = vld [vmem:[%s4006_s25 + $0x134] sm:$0xf0] }
 0x142   : > { %v3686_v55 = vpack.c.bf16 %v4228_v49, %v4226_v48 }
 0x143   : > { %v2302_v9 = vadd.f32 %v2301_v50, %v2175_v5  ;;  %v2436_v10 = vmul.f32 %v2175_v5, %v2175_v5  ;;  %v1501_v11 = vadd.f32 %v1500_v3, %v1172_v6  ;;  %v1309_v58 = vpop.f32.mrf.mxu2  ;;  %v3397_v3 = vld [vmem:[%s4006_s25 + $0x134] sm:$0xf] }
 0x144   : > { %3858 = vst [vmem:[%s4081_s10 + $0x120] sm:$0xff] %v3686_v55   ;;  %v1310_v13 = vadd.f32 %v4065_v22, %v1309_v58  ;;  %v3400_v55 = vld [vmem:[%s4006_s25 + $0x144] sm:$0xf0] }
 0x145   : > { %v2563_v18 = vadd.f32 %v2562_v60, %v2436_v10  ;;  %v1792_v19 = vmax.f32 %v1501_v11, 0.0  ;;  %v1638_v59 = vpop.f32.mrf.mxu3  ;;  %v2939_v10 = vor.u32 %v3397_v3, %v2936_v4  ;;  %v4261_v3 = vld [vmem:[%s4859_s2] ss:$0 sm:$0xff] }
 0x146   : > { %v1639_v27 = vadd.f32 %v1638_v59, %v1310_v13 }
 0x147   : > { %v1920_v20 = vpack.c.bf16 %v1792_v19, %v1792_v19  ;;  %v3551_v21 = vpack.c.bf16 %v1792_v19, %v1791_v61 }
 0x148   : > { %v1174_v25 = vpop.f32.mrf.mxu0 }
 0x149   : > { %v1503_v26 = vpop.f32.mrf.mxu1  ;;  %3831 = vst [vmem:[%s4081_s10 + $0x48] sm:$0xff] %v3551_v21   ;;  %v2176_v28 = vunpack.c.l.bf16 %v1920_v20  ;;  %v1175_v29 = vadd.f32 %v4065_v22, %v1174_v25  ;;  %v3150_v21 = vld [vmem:[%s4006_s25 + $0x2e0] sm:$0xf] }
 0x14b   : > { %v2303_v37 = vadd.f32 %v2302_v9, %v2176_v28  ;;  %v2437_v38 = vmul.f32 %v2176_v28, %v2176_v28  ;;  %v1504_v39 = vadd.f32 %v1503_v26, %v1175_v29  ;;  %1213 = vmatmul.bf16.gmra.mxu0 %v2927_v23  ;;  %v2935_v9 = vor.u32 %v3398_v2, %v2934_v1  ;;  %v3452_v23 = vld [vmem:[%s4006_s25 + $0x2e4] sm:$0xf0] }
 0x14c   : > { %1542 = vmatmul.bf16.gmra.mxu1 %v2931_v24  ;;  %v3151_v29 = vor.u32 %v3452_v23, %v3150_v21  ;;  %v3160_v21 = vld [vmem:[%s4006_s25 + $0x2f8] sm:$0xf0] }
 0x14d   : > { %v2564_v45 = vadd.f32 %v2563_v18, %v2437_v38  ;;  %v1793_v46 = vmax.f32 %v1504_v39, 0.0  ;;  %v1311_v18 = vpop.f32.mrf.mxu2  ;;  %v1640_v20 = vpop.f32.mrf.mxu3 }
 0x14e   : > { %v1312_v19 = vadd.f32 %v4065_v22, %v1311_v18 }
 0x14f   : > { %v1921_v50 = vpack.c.bf16 %v1793_v46, %v1793_v46  ;;  %1682 = vmatmul.bf16.gmra.mxu3 %v3155_v36 }
 0x150   : > { %v1176_v53 = vpop.f32.mrf.mxu0  ;;  %v1641_v28 = vadd.f32 %v1640_v20, %v1312_v19  ;;  %1353 = vmatmul.bf16.gmra.mxu2 %v3151_v29  ;;  %v3453_v20 = vld [vmem:[%s4006_s25 + $0x2f4] sm:$0xf] }
 0x151   : > { %v1505_v54 = vpop.f32.mrf.mxu1  ;;  %v2177_v56 = vunpack.c.l.bf16 %v1921_v50  ;;  %v1177_v57 = vadd.f32 %v4065_v22, %v1176_v53 }
 0x152   : > { %v4248_v38 = vmax.f32 %v1641_v28, 0.0 }
 0x153   : > { %v2304_v60 = vadd.f32 %v2303_v37, %v2177_v56  ;;  %v2438_v61 = vmul.f32 %v2177_v56, %v2177_v56  ;;  %v1506_v62 = vadd.f32 %v1505_v54, %v1177_v57  ;;  %v4246_v37 = vmax.f32 %v1639_v27, 0.0  ;;  %v2942_v54 = vld [vmem:[%s4006_s25 + $0x140] sm:$0xf]  ;;  %v3399_v56 = vld [vmem:[%s4006_s25 + $0x144] sm:$0xf] }
 0x154   : > { %v2944_v57 = vld [vmem:[%s4006_s25 + $0x148] sm:$0xf0] }
 0x155   : > { %v2565_v5 = vadd.f32 %v2564_v45, %v2438_v61  ;;  %v1794_v6 = vmax.f32 %v1506_v62, 0.0  ;;  %v3691_v42 = vpack.c.bf16 %v4248_v38, %v4246_v37  ;;  %v1314_v45 = vpop.f32.mrf.mxu2  ;;  %v2943_v62 = vor.u32 %v3400_v55, %v2942_v54 }
 0x156   : > { %v2947_v1 = vor.u32 %v3399_v56, %v2944_v57  ;;  %v1315_v4 = vadd.f32 %v4261_v3, %v1314_v45  ;;  %v3401_v45 = vld [vmem:[%s4006_s25 + $0x154] sm:$0xf] }
 0x157   : > { %v1922_v7 = vpack.c.bf16 %v1794_v6, %v1794_v6  ;;  %v3556_v8 = vpack.c.bf16 %v1794_v6, %v1793_v46  ;;  %3859 = vst [vmem:[%s4081_s10 + $0x128] sm:$0xff] %v3691_v42   ;;  %v1643_v46 = vpop.f32.mrf.mxu3 }
 0x158   : > { %v1179_v11 = vpop.f32.mrf.mxu0 }
 0x159   : > { %v1508_v12 = vpop.f32.mrf.mxu1  ;;  %3832 = vst [vmem:[%s4081_s10 + $0x50] sm:$0xff] %v3556_v8   ;;  %v2178_v16 = vunpack.c.l.bf16 %v1922_v7  ;;  %v1180_v17 = vadd.f32 %v4065_v22, %v1179_v11  ;;  %v3454_v11 = vld [vmem:[%s4006_s25 + $0x2f4] sm:$0xf0] }
 0x15b   : > { %v2305_v24 = vadd.f32 %v2304_v60, %v2178_v16  ;;  %v2439_v25 = vmul.f32 %v2178_v16, %v2178_v16  ;;  %v1509_v26 = vadd.f32 %v1508_v12, %v1180_v17  ;;  %1218 = vmatmul.bf16.gmra.mxu0 %v2935_v9  ;;  %v1644_v17 = vadd.f32 %v1643_v46, %v1315_v4  ;;  %v2952_v46 = vld [vmem:[%s4006_s25 + $0x158] sm:$0xf0]  ;;  %v3456_v4 = vld [vmem:[%s4006_s25 + $0x304] sm:$0xf0] }
 0x15c   : > { %1547 = vmatmul.bf16.gmra.mxu1 %v2939_v10  ;;  %v3158_v10 = vld [vmem:[%s4006_s25 + $0x2f0] sm:$0xf]  ;;  %v2955_v56 = vor.u32 %v3401_v45, %v2952_v46 }
 0x15d   : > { %v2566_v34 = vadd.f32 %v2565_v5, %v2439_v25  ;;  %v1795_v35 = vmax.f32 %v1509_v26, 0.0  ;;  %v1316_v7 = vpop.f32.mrf.mxu2  ;;  %v3159_v19 = vor.u32 %v3454_v11, %v3158_v10  ;;  %v3163_v25 = vor.u32 %v3453_v20, %v3160_v21  ;;  %v3455_v11 = vld [vmem:[%s4006_s25 + $0x304] sm:$0xf] }
 0x15e   : > { %v1317_v8 = vadd.f32 %v4261_v3, %v1316_v7  ;;  %v4271_v26 = vmax.f32 %v1644_v17, 0.0 }
 0x15f   : > { %v1923_v39 = vpack.c.bf16 %v1795_v35, %v1795_v35  ;;  %v1645_v9 = vpop.f32.mrf.mxu3  ;;  %1687 = vmatmul.bf16.gmra.mxu3 %v3163_v25 }
 0x160   : > { %v1181_v40 = vpop.f32.mrf.mxu0  ;;  %v1646_v18 = vadd.f32 %v1645_v9, %v1317_v8  ;;  %1358 = vmatmul.bf16.gmra.mxu2 %v3159_v19 }
 0x161   : > { %v1510_v41 = vpop.f32.mrf.mxu1  ;;  %v2179_v43 = vunpack.c.l.bf16 %v1923_v39  ;;  %v1182_v44 = vadd.f32 %v4065_v22, %v1181_v40 }
 0x162   : > { %v4273_v27 = vmax.f32 %v1646_v18, 0.0 }
 0x163   : > { %v2306_v47 = vadd.f32 %v2305_v24, %v2179_v43  ;;  %v2440_v50 = vmul.f32 %v2179_v43, %v2179_v43  ;;  %v1511_v53 = vadd.f32 %v1510_v41, %v1182_v44  ;;  %v2950_v43 = vld [vmem:[%s4006_s25 + $0x150] sm:$0xf]  ;;  %v3402_v44 = vld [vmem:[%s4006_s25 + $0x154] sm:$0xf0] }
 0x164   : > { %v3696_v31 = vpack.c.bf16 %v4273_v27, %v4271_v26  ;;  %v2951_v55 = vor.u32 %v3402_v44, %v2950_v43 }
 0x165   : > { %v2567_v58 = vadd.f32 %v2566_v34, %v2440_v50  ;;  %v1796_v59 = vmax.f32 %v1511_v53, 0.0  ;;  %v1319_v36 = vpop.f32.mrf.mxu2 }
 0x166   : > { %3860 = vst [vmem:[%s4081_s10 + $0x130] sm:$0xff] %v3696_v31  }
 0x167   : > { %v1924_v60 = vpack.c.bf16 %v1796_v59, %v1796_v59  ;;  %v3561_v61 = vpack.c.bf16 %v1796_v59, %v1795_v35  ;;  %v1648_v39 = vpop.f32.mrf.mxu3  ;;  %v1320_v59 = vadd.f32 %v4261_v3, %v1319_v36  ;;  %v2958_v36 = vld [vmem:[%s4006_s25 + $0x160] sm:$0xf] }
 0x168   : > { %v1184_v22 = vpop.f32.mrf.mxu0 }
 0x169   : > { %v1513_v2 = vpop.f32.mrf.mxu1  ;;  %3833 = vst [vmem:[%s4081_s10 + $0x58] sm:$0xff] %v3561_v61   ;;  %v2180_v5 = vunpack.c.l.bf16 %v1924_v60  ;;  %v1185_v6 = vadd.f32 %v4261_v3, %v1184_v22  ;;  %v1649_v8 = vadd.f32 %v1648_v39, %v1320_v59  ;;  %v3404_v39 = vld [vmem:[%s4006_s25 + $0x164] sm:$0xf0] }
 0x16a   : > { %v2959_v46 = vor.u32 %v3404_v39, %v2958_v36  ;;  %v2968_v36 = vld [vmem:[%s4006_s25 + $0x178] sm:$0xf0] }
 0x16b   : > { %v2307_v12 = vadd.f32 %v2306_v47, %v2180_v5  ;;  %v2441_v13 = vmul.f32 %v2180_v5, %v2180_v5  ;;  %v1514_v16 = vadd.f32 %v1513_v2, %v1185_v6  ;;  %1223 = vmatmul.bf16.gmra.mxu0 %v2943_v62  ;;  %v3166_v2 = vld [vmem:[%s4006_s25 + $0x300] sm:$0xf]  ;;  %v4291_v18 = vmax.f32 %v1649_v8, 0.0 }
 0x16c   : > { %1552 = vmatmul.bf16.gmra.mxu1 %v2947_v1  ;;  %v3167_v10 = vor.u32 %v3456_v4, %v3166_v2 }
 0x16d   : > { %v2568_v23 = vadd.f32 %v2567_v58, %v2441_v13  ;;  %v1797_v24 = vmax.f32 %v1514_v16, 0.0  ;;  %v1321_v62 = vpop.f32.mrf.mxu2 }
 0x16e   : > { %v1322_v1 = vadd.f32 %v4261_v3, %v1321_v62 }
 0x16f   : > { %v1925_v28 = vpack.c.bf16 %v1797_v24, %v1797_v24  ;;  %v1650_v22 = vpop.f32.mrf.mxu3 }
 0x170   : > { %v1186_v29 = vpop.f32.mrf.mxu0  ;;  %v1651_v9 = vadd.f32 %v1650_v22, %v1322_v1  ;;  %1363 = vmatmul.bf16.gmra.mxu2 %v3167_v10 }
 0x171   : > { %v1515_v30 = vpop.f32.mrf.mxu1  ;;  %v2181_v34 = vunpack.c.l.bf16 %v1925_v28  ;;  %v1187_v35 = vadd.f32 %v4261_v3, %v1186_v29 }
 0x172   : > { %v4293_v19 = vmax.f32 %v1651_v9, 0.0 }
 0x173   : > { %v2308_v40 = vadd.f32 %v2307_v12, %v2181_v34  ;;  %v2442_v41 = vmul.f32 %v2181_v34, %v2181_v34  ;;  %v1516_v42 = vadd.f32 %v1515_v30, %v1187_v35  ;;  %v3168_v12 = vld [vmem:[%s4006_s25 + $0x308] sm:$0xf0] }
 0x174   : > { %v3171_v17 = vor.u32 %v3455_v11, %v3168_v12 }
 0x175   : > { %v2569_v47 = vadd.f32 %v2568_v23, %v2442_v41  ;;  %v1798_v50 = vmax.f32 %v1516_v42, 0.0  ;;  %v1324_v29 = vpop.f32.mrf.mxu2  ;;  %v2960_v41 = vld [vmem:[%s4006_s25 + $0x168] sm:$0xf0] }
 0x176   : > { %1692 = vmatmul.bf16.gmra.mxu3 %v3171_v17 }
 0x177   : > { %v1926_v53 = vpack.c.bf16 %v1798_v50, %v1798_v50  ;;  %v3566_v54 = vpack.c.bf16 %v1798_v50, %v1797_v24  ;;  %v3701_v24 = vpack.c.bf16 %v4293_v19, %v4291_v18  ;;  %v1653_v30 = vpop.f32.mrf.mxu3 }
 0x178   : > { %v1189_v57 = vpop.f32.mrf.mxu0 }
 0x179   : > { %v1518_v58 = vpop.f32.mrf.mxu1  ;;  %3834 = vst [vmem:[%s4081_s10 + $0x60] sm:$0xff] %v3566_v54   ;;  %v2182_v60 = vunpack.c.l.bf16 %v1926_v53  ;;  %v1190_v61 = vadd.f32 %v4261_v3, %v1189_v57  ;;  %v1325_v54 = vadd.f32 %v4261_v3, %v1324_v29 }
 0x17a   : > { %3861 = vst [vmem:[%s4081_s10 + $0x138] sm:$0xff] %v3701_v24  }
 0x17b   : > { %v2309_v5 = vadd.f32 %v2308_v40, %v2182_v60  ;;  %v2443_v6 = vmul.f32 %v2182_v60, %v2182_v60  ;;  %v1519_v7 = vadd.f32 %v1518_v58, %v1190_v61  ;;  %1228 = vmatmul.bf16.gmra.mxu0 %v2951_v55  ;;  %v3403_v40 = vld [vmem:[%s4006_s25 + $0x164] sm:$0xf]  ;;  %v3174_v60 = vld [vmem:[%s4006_s25 + $0x310] sm:$0xf]  ;;  %v3458_v61 = vld [vmem:[%s4006_s25 + $0x314] sm:$0xf0]  ;;  %v1654_v2 = vadd.f32 %v1653_v30, %v1325_v54 }
 0x17c   : > { %1557 = vmatmul.bf16.gmra.mxu1 %v2955_v56 }
 0x17d   : > { %v2570_v13 = vadd.f32 %v2569_v47, %v2443_v6  ;;  %v1799_v16 = vmax.f32 %v1519_v7, 0.0  ;;  %v2963_v47 = vor.u32 %v3403_v40, %v2960_v41  ;;  %v1326_v57 = vpop.f32.mrf.mxu2  ;;  %v3457_v6 = vld [vmem:[%s4006_s25 + $0x314] sm:$0xf]  ;;  %v3176_v7 = vld [vmem:[%s4006_s25 + $0x318] sm:$0xf0]  ;;  %v4311_v11 = vmax.f32 %v1654_v2, 0.0 }
 0x17e   : > { %v1327_v58 = vadd.f32 %v4261_v3, %v1326_v57  ;;  %v3179_v10 = vor.u32 %v3457_v6, %v3176_v7  ;;  %v3182_v57 = vld [vmem:[%s4006_s25 + $0x320] sm:$0xf]  ;;  %v3459_v2 = vld [vmem:[%s4006_s25 + $0x324] sm:$0xf] }
 0x17f   : > { %v1927_v20 = vpack.c.bf16 %v1799_v16, %v1799_v16  ;;  %v1655_v59 = vpop.f32.mrf.mxu3 }
 0x180   : > { %v1191_v21 = vpop.f32.mrf.mxu0  ;;  %v1656_v4 = vadd.f32 %v1655_v59, %v1327_v58  ;;  %v3460_v58 = vld [vmem:[%s4006_s25 + $0x324] sm:$0xf0] }
 0x181   : > { %v1520_v23 = vpop.f32.mrf.mxu1  ;;  %v2183_v25 = vunpack.c.l.bf16 %v1927_v20  ;;  %v1192_v28 = vadd.f32 %v4261_v3, %v1191_v21 }
 0x182   : > { %v4313_v12 = vmax.f32 %v1656_v4, 0.0  ;;  %v3184_v4 = vld [vmem:[%s4006_s25 + $0x328] sm:$0xf0] }
 0x183   : > { %v2310_v31 = vadd.f32 %v2309_v5, %v2183_v25  ;;  %v2444_v34 = vmul.f32 %v2183_v25, %v2183_v25  ;;  %v1521_v35 = vadd.f32 %v1520_v23, %v1192_v28  ;;  %v3175_v5 = vor.u32 %v3458_v61, %v3174_v60 }
 0x184   : > { %v3706_v20 = vpack.c.bf16 %v4313_v12, %v4311_v11  ;;  %v3187_v7 = vor.u32 %v3459_v2, %v3184_v4  ;;  %v3192_v2 = vld [vmem:[%s4006_s25 + $0x338] sm:$0xf0] }
 0x185   : > { %v2571_v42 = vadd.f32 %v2570_v13, %v2444_v34  ;;  %v1800_v43 = vmax.f32 %v1521_v35, 0.0  ;;  %1368 = vmatmul.bf16.gmra.mxu2 %v3175_v5  ;;  %v1329_v24 = vpop.f32.mrf.mxu2  ;;  %v3406_v34 = vld [vmem:[%s4006_s25 + $0x174] sm:$0xf0]  ;;  %v3405_v35 = vld [vmem:[%s4006_s25 + $0x174] sm:$0xf] }
 0x186   : > { %1697 = vmatmul.bf16.gmra.mxu3 %v3179_v10  ;;  %3862 = vst [vmem:[%s4081_s10 + $0x140] sm:$0xff] %v3706_v20  }
 0x187   : > { %v1928_v44 = vpack.c.bf16 %v1800_v43, %v1800_v43  ;;  %v3571_v45 = vpack.c.bf16 %v1800_v43, %v1799_v16  ;;  %v1658_v25 = vpop.f32.mrf.mxu3 }
 0x188   : > { %v1194_v50 = vpop.f32.mrf.mxu0 }
 0x189   : > { %v1523_v53 = vpop.f32.mrf.mxu1  ;;  %3835 = vst [vmem:[%s4081_s10 + $0x68] sm:$0xff] %v3571_v45   ;;  %v2184_v55 = vunpack.c.l.bf16 %v1928_v44  ;;  %v1195_v56 = vadd.f32 %v4261_v3, %v1194_v50  ;;  %v2971_v44 = vor.u32 %v3405_v35, %v2968_v36  ;;  %v2976_v35 = vld [vmem:[%s4006_s25 + $0x188] sm:$0xf0] }
 0x18b   : > { %v2311_v62 = vadd.f32 %v2310_v31, %v2184_v55  ;;  %v2445_v1 = vmul.f32 %v2184_v55, %v2184_v55  ;;  %v1524_v22 = vadd.f32 %v1523_v53, %v1195_v56  ;;  %1233 = vmatmul.bf16.gmra.mxu0 %v2959_v46  ;;  %v2966_v31 = vld [vmem:[%s4006_s25 + $0x170] sm:$0xf] }
 0x18c   : > { %1562 = vmatmul.bf16.gmra.mxu1 %v2963_v47  ;;  %v2967_v43 = vor.u32 %v3406_v34, %v2966_v31  ;;  %v1330_v47 = vadd.f32 %v4261_v3, %v1329_v24  ;;  %v3408_v31 = vld [vmem:[%s4006_s25 + $0x184] sm:$0xf0]  ;;  %v3407_v34 = vld [vmem:[%s4006_s25 + $0x184] sm:$0xf] }
 0x18d   : > { %v2572_v8 = vadd.f32 %v2571_v42, %v2445_v1  ;;  %v1801_v9 = vmax.f32 %v1524_v22, 0.0  ;;  %v1331_v54 = vpop.f32.mrf.mxu2  ;;  %v3183_v22 = vor.u32 %v3460_v58, %v3182_v57  ;;  %v3462_v57 = vld [vmem:[%s4006_s25 + $0x334] sm:$0xf0] }
 0x18e   : > { %v1332_v55 = vadd.f32 %v4261_v3, %v1331_v54 }
 0x18f   : > { %v1929_v13 = vpack.c.bf16 %v1801_v9, %v1801_v9  ;;  %v1660_v56 = vpop.f32.mrf.mxu3 }
 0x190   : > { %v1196_v16 = vpop.f32.mrf.mxu0  ;;  %v1661_v1 = vadd.f32 %v1660_v56, %v1332_v55  ;;  %v3190_v56 = vld [vmem:[%s4006_s25 + $0x330] sm:$0xf] }
 0x191   : > { %v1525_v17 = vpop.f32.mrf.mxu1  ;;  %v2185_v21 = vunpack.c.l.bf16 %v1929_v13  ;;  %v1197_v23 = vadd.f32 %v4261_v3, %v1196_v16 }
 0x193   : > { %v2312_v28 = vadd.f32 %v2311_v62, %v2185_v21  ;;  %v2446_v29 = vmul.f32 %v2185_v21, %v2185_v21  ;;  %v1526_v30 = vadd.f32 %v1525_v17, %v1197_v23  ;;  %v1659_v62 = vadd.f32 %v1658_v25, %v1330_v47 }
 0x195   : > { %v2573_v39 = vadd.f32 %v2572_v8, %v2446_v29  ;;  %v1802_v40 = vmax.f32 %v1526_v30, 0.0  ;;  %v4331_v8 = vmax.f32 %v1659_v62, 0.0  ;;  %1373 = vmatmul.bf16.gmra.mxu2 %v3183_v22  ;;  %v1334_v23 = vpop.f32.mrf.mxu2  ;;  %v2974_v30 = vld [vmem:[%s4006_s25 + $0x180] sm:$0xf]  ;;  %v3461_v22 = vld [vmem:[%s4006_s25 + $0x334] sm:$0xf] }
 0x196   : > { %1702 = vmatmul.bf16.gmra.mxu3 %v3187_v7 }
 0x197   : > { %v1930_v41 = vpack.c.bf16 %v1802_v40, %v1802_v40  ;;  %v3576_v42 = vpack.c.bf16 %v1802_v40, %v1801_v9  ;;  %v4333_v9 = vmax.f32 %v1661_v1, 0.0  ;;  %v1663_v24 = vpop.f32.mrf.mxu3  ;;  %v3191_v1 = vor.u32 %v3462_v57, %v3190_v56  ;;  %v3198_v57 = vld [vmem:[%s4006_s25 + $0x340] sm:$0xf] }
 0x198   : > { %v1199_v45 = vpop.f32.mrf.mxu0 }
 0x199   : > { %v1528_v46 = vpop.f32.mrf.mxu1  ;;  %3836 = vst [vmem:[%s4081_s10 + $0x70] sm:$0xff] %v3576_v42   ;;  %v2186_v50 = vunpack.c.l.bf16 %v1930_v41  ;;  %v1200_v53 = vadd.f32 %v4261_v3, %v1199_v45  ;;  %v3711_v17 = vpack.c.bf16 %v4333_v9, %v4331_v8  ;;  %v2975_v42 = vor.u32 %v3408_v31, %v2974_v30  ;;  %v2982_v31 = vld [vmem:[%s4006_s25 + $0x190] sm:$0xf] }
 0x19b   : > { %v2313_v59 = vadd.f32 %v2312_v28, %v2186_v50  ;;  %v2447_v60 = vmul.f32 %v2186_v50, %v2186_v50  ;;  %v1529_v61 = vadd.f32 %v1528_v46, %v1200_v53  ;;  %1238 = vmatmul.bf16.gmra.mxu0 %v2967_v43  ;;  %3863 = vst [vmem:[%s4081_s10 + $0x148] sm:$0xff] %v3711_v17  }
 0x19c   : > { %1567 = vmatmul.bf16.gmra.mxu1 %v2971_v44  ;;  %v2979_v43 = vor.u32 %v3407_v34, %v2976_v35  ;;  %v1335_v46 = vadd.f32 %v4261_v3, %v1334_v23  ;;  %v3410_v34 = vld [vmem:[%s4006_s25 + $0x194] sm:$0xf0]  ;;  %v3409_v35 = vld [vmem:[%s4006_s25 + $0x194] sm:$0xf] }
 0x19d   : > { %v2574_v5 = vadd.f32 %v2573_v39, %v2447_v60  ;;  %v1803_v6 = vmax.f32 %v1529_v61, 0.0  ;;  %v1336_v53 = vpop.f32.mrf.mxu2 }
 0x19e   : > { %v1337_v54 = vadd.f32 %v4261_v3, %v1336_v53  ;;  %v1664_v61 = vadd.f32 %v1663_v24, %v1335_v46 }
 0x19f   : > { %v1931_v10 = vpack.c.bf16 %v1803_v6, %v1803_v6  ;;  %v1665_v55 = vpop.f32.mrf.mxu3 }
 0x1a0   : > { %v1201_v13 = vpop.f32.mrf.mxu0  ;;  %v1666_v62 = vadd.f32 %v1665_v55, %v1337_v54  ;;  %v4351_v7 = vmax.f32 %v1664_v61, 0.0 }
 0x1a1   : > { %v1530_v16 = vpop.f32.mrf.mxu1  ;;  %v2187_v20 = vunpack.c.l.bf16 %v1931_v10  ;;  %v1202_v21 = vadd.f32 %v4261_v3, %v1201_v13 }
 0x1a2   : > { %v4353_v10 = vmax.f32 %v1666_v62, 0.0 }
 0x1a3   : > { %v2314_v25 = vadd.f32 %v2313_v59, %v2187_v20  ;;  %v2448_v28 = vmul.f32 %v2187_v20, %v2187_v20  ;;  %v1531_v29 = vadd.f32 %v1530_v16, %v1202_v21 }
 0x1a4   : > { %v3716_v20 = vpack.c.bf16 %v4353_v10, %v4351_v7 }
 0x1a5   : > { %v2575_v36 = vadd.f32 %v2574_v5, %v2448_v28  ;;  %v1804_v39 = vmax.f32 %v1531_v29, 0.0  ;;  %1378 = vmatmul.bf16.gmra.mxu2 %v3191_v1  ;;  %v1339_v24 = vpop.f32.mrf.mxu2 }
 0x1a6   : > { %3864 = vst [vmem:[%s4081_s10 + $0x150] sm:$0xff] %v3716_v20  }
 0x1a7   : > { %v1932_v40 = vpack.c.bf16 %v1804_v39, %v1804_v39  ;;  %v3581_v41 = vpack.c.bf16 %v1804_v39, %v1803_v6  ;;  %v3195_v6 = vor.u32 %v3461_v22, %v3192_v2  ;;  %v3463_v2 = vld [vmem:[%s4006_s25 + $0x344] sm:$0xf] }
 0x1a8   : > { %v1204_v44 = vpop.f32.mrf.mxu0 }
 0x1a9   : > { %v1533_v45 = vpop.f32.mrf.mxu1  ;;  %3837 = vst [vmem:[%s4081_s10 + $0x78] sm:$0xff] %v3581_v41   ;;  %v2188_v47 = vunpack.c.l.bf16 %v1932_v40  ;;  %v1205_v50 = vadd.f32 %v4261_v3, %v1204_v44  ;;  %1707 = vmatmul.bf16.gmra.mxu3 %v3195_v6 }
 0x1ab   : > { %v2315_v58 = vadd.f32 %v2314_v25, %v2188_v47  ;;  %v2449_v59 = vmul.f32 %v2188_v47, %v2188_v47  ;;  %v1534_v60 = vadd.f32 %v1533_v45, %v1205_v50  ;;  %1243 = vmatmul.bf16.gmra.mxu0 %v2975_v42  ;;  %v1668_v25 = vpop.f32.mrf.mxu3  ;;  %v1340_v47 = vadd.f32 %v4261_v3, %v1339_v24 }
 0x1ac   : > { %1572 = vmatmul.bf16.gmra.mxu1 %v2979_v43  ;;  %v2983_v43 = vor.u32 %v3410_v34, %v2982_v31 }
 0x1ad   : > { %v2576_v4 = vadd.f32 %v2575_v36, %v2449_v59  ;;  %v1805_v5 = vmax.f32 %v1534_v60, 0.0  ;;  %v2984_v36 = vld [vmem:[%s4006_s25 + $0x198] sm:$0xf0]  ;;  %v1341_v54 = vpop.f32.mrf.mxu2  ;;  %v1669_v62 = vadd.f32 %v1668_v25, %v1340_v47 }
 0x1ae   : > { %v2987_v44 = vor.u32 %v3409_v35, %v2984_v36  ;;  %v1342_v55 = vadd.f32 %v4261_v3, %v1341_v54  ;;  %v2990_v36 = vld [vmem:[%s4006_s25 + $0x1a0] sm:$0xf] }
 0x1af   : > { %v1933_v13 = vpack.c.bf16 %v1805_v5, %v1805_v5 }
 0x1b0   : > { %v1206_v16 = vpop.f32.mrf.mxu0 }
 0x1b1   : > { %v1535_v17 = vpop.f32.mrf.mxu1  ;;  %v2189_v21 = vunpack.c.l.bf16 %v1933_v13  ;;  %v1207_v23 = vadd.f32 %v4261_v3, %v1206_v16  ;;  %v4371_v16 = vmax.f32 %v1669_v62, 0.0 }
 0x1b3   : > { %v2316_v28 = vadd.f32 %v2315_v58, %v2189_v21  ;;  %v2450_v29 = vmul.f32 %v2189_v21, %v2189_v21  ;;  %v1536_v30 = vadd.f32 %v1535_v17, %v1207_v23  ;;  %v1670_v56 = vpop.f32.mrf.mxu3  ;;  %v3464_v58 = vld [vmem:[%s4006_s25 + $0x344] sm:$0xf0] }
 0x1b4   : > { %v1671_v1 = vadd.f32 %v1670_v56, %v1342_v55  ;;  %v3199_v22 = vor.u32 %v3464_v58, %v3198_v57 }
 0x1b5   : > { %v2577_v39 = vadd.f32 %v2576_v4, %v2450_v29  ;;  %v1806_v40 = vmax.f32 %v1536_v30, 0.0  ;;  %v3200_v4 = vld [vmem:[%s4006_s25 + $0x348] sm:$0xf0]  ;;  %v1344_v29 = vpop.f32.mrf.mxu2 }
 0x1b6   : > { %v3203_v13 = vor.u32 %v3463_v2, %v3200_v4  ;;  %v4373_v17 = vmax.f32 %v1671_v1, 0.0  ;;  %1383 = vmatmul.bf16.gmra.mxu2 %v3199_v22  ;;  %v1345_v54 = vadd.f32 %v4261_v3, %v1344_v29 }
 0x1b7   : > { %v1934_v41 = vpack.c.bf16 %v1806_v40, %v1806_v40  ;;  %v3586_v42 = vpack.c.bf16 %v1806_v40, %v1805_v5  ;;  %v3411_v40 = vld [vmem:[%s4006_s25 + $0x1a4] sm:$0xf] }
 0x1b8   : > { %v1209_v45 = vpop.f32.mrf.mxu0  ;;  %v3721_v24 = vpack.c.bf16 %v4373_v17, %v4371_v16 }
 0x1b9   : > { %v1538_v46 = vpop.f32.mrf.mxu1  ;;  %3838 = vst [vmem:[%s4081_s10 + $0x80] sm:$0xff] %v3586_v42   ;;  %v2190_v50 = vunpack.c.l.bf16 %v1934_v41  ;;  %v1210_v53 = vadd.f32 %v4261_v3, %v1209_v45  ;;  %1712 = vmatmul.bf16.gmra.mxu3 %v3203_v13  ;;  %v2992_v41 = vld [vmem:[%s4006_s25 + $0x1a8] sm:$0xf0]  ;;  %v3208_v13 = vld [vmem:[%s4006_s25 + $0x358] sm:$0xf0] }
 0x1ba   : > { %3865 = vst [vmem:[%s4081_s10 + $0x158] sm:$0xff] %v3721_v24   ;;  %v2995_v47 = vor.u32 %v3411_v40, %v2992_v41 }
 0x1bb   : > { %v2317_v59 = vadd.f32 %v2316_v28, %v2190_v50  ;;  %v2451_v60 = vmul.f32 %v2190_v50, %v2190_v50  ;;  %v1539_v61 = vadd.f32 %v1538_v46, %v1210_v53  ;;  %1248 = vmatmul.bf16.gmra.mxu0 %v2983_v43  ;;  %v1673_v30 = vpop.f32.mrf.mxu3 }
 0x1bc   : > { %1577 = vmatmul.bf16.gmra.mxu1 %v2987_v44  ;;  %v1674_v2 = vadd.f32 %v1673_v30, %v1345_v54 }
 0x1bd   : > { %v2578_v5 = vadd.f32 %v2577_v39, %v2451_v60  ;;  %v1807_v6 = vmax.f32 %v1539_v61, 0.0  ;;  %v3412_v39 = vld [vmem:[%s4006_s25 + $0x1a4] sm:$0xf0]  ;;  %v1346_v57 = vpop.f32.mrf.mxu2  ;;  %v3206_v60 = vld [vmem:[%s4006_s25 + $0x350] sm:$0xf] }
 0x1be   : > { %v2991_v46 = vor.u32 %v3412_v39, %v2990_v36  ;;  %v1347_v58 = vadd.f32 %v4261_v3, %v1346_v57  ;;  %v3466_v61 = vld [vmem:[%s4006_s25 + $0x354] sm:$0xf0]  ;;  %v4391_v24 = vmax.f32 %v1674_v2, 0.0  ;;  %v3214_v2 = vld [vmem:[%s4006_s25 + $0x360] sm:$0xf] }
 0x1bf   : > { %v1935_v20 = vpack.c.bf16 %v1807_v6, %v1807_v6 }
 0x1c0   : > { %v1211_v21 = vpop.f32.mrf.mxu0 }
 0x1c1   : > { %v1540_v23 = vpop.f32.mrf.mxu1  ;;  %v2191_v25 = vunpack.c.l.bf16 %v1935_v20  ;;  %v1212_v28 = vadd.f32 %v4261_v3, %v1211_v21 }
 0x1c3   : > { %v2318_v31 = vadd.f32 %v2317_v59, %v2191_v25  ;;  %v2452_v34 = vmul.f32 %v2191_v25, %v2191_v25  ;;  %v1541_v35 = vadd.f32 %v1540_v23, %v1212_v28  ;;  %v1675_v59 = vpop.f32.mrf.mxu3 }
 0x1c4   : > { %v1676_v4 = vadd.f32 %v1675_v59, %v1347_v58 }
 0x1c5   : > { %v2579_v42 = vadd.f32 %v2578_v5, %v2452_v34  ;;  %v1808_v43 = vmax.f32 %v1541_v35, 0.0  ;;  %v3207_v5 = vor.u32 %v3466_v61, %v3206_v60  ;;  %v1349_v36 = vpop.f32.mrf.mxu2 }
 0x1c6   : > { %v4393_v25 = vmax.f32 %v1676_v4, 0.0  ;;  %v1350_v59 = vadd.f32 %v4261_v3, %v1349_v36  ;;  %v3468_v4 = vld [vmem:[%s4006_s25 + $0x364] sm:$0xf0] }
 0x1c7   : > { %v1936_v44 = vpack.c.bf16 %v1808_v43, %v1808_v43  ;;  %v3591_v45 = vpack.c.bf16 %v1808_v43, %v1807_v6  ;;  %v3465_v6 = vld [vmem:[%s4006_s25 + $0x354] sm:$0xf]  ;;  %1388 = vmatmul.bf16.gmra.mxu2 %v3207_v5  ;;  %v2998_v43 = vld [vmem:[%s4006_s25 + $0x1b0] sm:$0xf] }
 0x1c8   : > { %v1214_v50 = vpop.f32.mrf.mxu0  ;;  %v3211_v23 = vor.u32 %v3465_v6, %v3208_v13 }
 0x1c9   : > { %v1543_v53 = vpop.f32.mrf.mxu1  ;;  %3839 = vst [vmem:[%s4081_s10 + $0x88] sm:$0xff] %v3591_v45   ;;  %v2192_v55 = vunpack.c.l.bf16 %v1936_v44  ;;  %v1215_v56 = vadd.f32 %v4261_v3, %v1214_v50  ;;  %v3414_v44 = vld [vmem:[%s4006_s25 + $0x1b4] sm:$0xf0]  ;;  %v3413_v45 = vld [vmem:[%s4006_s25 + $0x1b4] sm:$0xf] }
 0x1ca   : > { %1717 = vmatmul.bf16.gmra.mxu3 %v3211_v23  ;;  %v3215_v23 = vor.u32 %v3468_v4, %v3214_v2 }
 0x1cb   : > { %v2319_v62 = vadd.f32 %v2318_v31, %v2192_v55  ;;  %v2453_v1 = vmul.f32 %v2192_v55, %v2192_v55  ;;  %v1544_v22 = vadd.f32 %v1543_v53, %v1215_v56  ;;  %1253 = vmatmul.bf16.gmra.mxu0 %v2991_v46  ;;  %v3726_v31 = vpack.c.bf16 %v4393_v25, %v4391_v24  ;;  %v1678_v39 = vpop.f32.mrf.mxu3  ;;  %v3000_v46 = vld [vmem:[%s4006_s25 + $0x1b8] sm:$0xf0] }
 0x1cc   : > { %1582 = vmatmul.bf16.gmra.mxu1 %v2995_v47  ;;  %v2999_v55 = vor.u32 %v3414_v44, %v2998_v43  ;;  %v3003_v56 = vor.u32 %v3413_v45, %v3000_v46 }
 0x1cd   : > { %v2580_v20 = vadd.f32 %v2579_v42, %v2453_v1  ;;  %v1809_v21 = vmax.f32 %v1544_v22, 0.0  ;;  %3866 = vst [vmem:[%s4081_s10 + $0x160] sm:$0xff] %v3726_v31  }
 0x1cf   : > { %v1937_v28 = vpack.c.bf16 %v1809_v21, %v1809_v21 }
 0x1d0   : > { %v1216_v29 = vpop.f32.mrf.mxu0 }
 0x1d1   : > { %v1545_v30 = vpop.f32.mrf.mxu1  ;;  %v2193_v34 = vunpack.c.l.bf16 %v1937_v28  ;;  %v1217_v35 = vadd.f32 %v4261_v3, %v1216_v29  ;;  %v3467_v28 = vld [vmem:[%s4006_s25 + $0x364] sm:$0xf]  ;;  %v3216_v29 = vld [vmem:[%s4006_s25 + $0x368] sm:$0xf0] }
 0x1d3   : > { %v2320_v40 = vadd.f32 %v2319_v62, %v2193_v34  ;;  %v2454_v41 = vmul.f32 %v2193_v34, %v2193_v34  ;;  %v1546_v42 = vadd.f32 %v1545_v30, %v1217_v35  ;;  %v1351_v62 = vpop.f32.mrf.mxu2  ;;  %v1680_v22 = vpop.f32.mrf.mxu3  ;;  %v3219_v34 = vor.u32 %v3467_v28, %v3216_v29  ;;  %v3470_v28 = vld [vmem:[%s4006_s25 + $0x374] sm:$0xf0] }
 0x1d4   : > { %v1352_v1 = vadd.f32 %v4261_v3, %v1351_v62 }
 0x1d5   : > { %v2581_v47 = vadd.f32 %v2580_v20, %v2454_v41  ;;  %v1810_v50 = vmax.f32 %v1546_v42, 0.0  ;;  %v1679_v20 = vadd.f32 %v1678_v39, %v1350_v59 }
 0x1d7   : > { %v1938_v53 = vpack.c.bf16 %v1810_v50, %v1810_v50  ;;  %v3596_v54 = vpack.c.bf16 %v1810_v50, %v1809_v21  ;;  %v1681_v21 = vadd.f32 %v1680_v22, %v1352_v1  ;;  %v4411_v35 = vmax.f32 %v1679_v20, 0.0  ;;  %1393 = vmatmul.bf16.gmra.mxu2 %v3215_v23  ;;  %v3222_v23 = vld [vmem:[%s4006_s25 + $0x370] sm:$0xf] }
 0x1d8   : > { %v1219_v57 = vpop.f32.mrf.mxu0 }
 0x1d9   : > { %v1548_v58 = vpop.f32.mrf.mxu1  ;;  %3840 = vst [vmem:[%s4081_s10 + $0x90] sm:$0xff] %v3596_v54   ;;  %v2194_v60 = vunpack.c.l.bf16 %v1938_v53  ;;  %v1220_v61 = vadd.f32 %v4261_v3, %v1219_v57  ;;  %v4413_v36 = vmax.f32 %v1681_v21, 0.0  ;;  %v3006_v54 = vld [vmem:[%s4006_s25 + $0x1c0] sm:$0xf]  ;;  %v3008_v57 = vld [vmem:[%s4006_s25 + $0x1c8] sm:$0xf0] }
 0x1da   : > { %1722 = vmatmul.bf16.gmra.mxu3 %v3219_v34 }
 0x1db   : > { %v2321_v5 = vadd.f32 %v2320_v40, %v2194_v60  ;;  %v2455_v6 = vmul.f32 %v2194_v60, %v2194_v60  ;;  %v1549_v13 = vadd.f32 %v1548_v58, %v1220_v61  ;;  %1258 = vmatmul.bf16.gmra.mxu0 %v2999_v55  ;;  %v3731_v42 = vpack.c.bf16 %v4413_v36, %v4411_v35  ;;  %v1354_v45 = vpop.f32.mrf.mxu2  ;;  %v1683_v46 = vpop.f32.mrf.mxu3  ;;  %v3416_v55 = vld [vmem:[%s4006_s25 + $0x1c4] sm:$0xf0] }
 0x1dc   : > { %1587 = vmatmul.bf16.gmra.mxu1 %v3003_v56  ;;  %v3415_v56 = vld [vmem:[%s4006_s25 + $0x1c4] sm:$0xf]  ;;  %v3007_v62 = vor.u32 %v3416_v55, %v3006_v54  ;;  %v1355_v4 = vadd.f32 %v4261_v3, %v1354_v45 }
 0x1dd   : > { %v2582_v30 = vadd.f32 %v2581_v47, %v2455_v6  ;;  %v1811_v31 = vmax.f32 %v1549_v13, 0.0  ;;  %3867 = vst [vmem:[%s4081_s10 + $0x168] sm:$0xff] %v3731_v42   ;;  %v3011_v1 = vor.u32 %v3415_v56, %v3008_v57  ;;  %v3224_v42 = vld [vmem:[%s4006_s25 + $0x378] sm:$0xf0] }
 0x1de   : > { %v1684_v34 = vadd.f32 %v1683_v46, %v1355_v4  ;;  %v3016_v4 = vld [vmem:[%s4006_s25 + $0x1d8] sm:$0xf0] }
 0x1df   : > { %v1939_v40 = vpack.c.bf16 %v1811_v31, %v1811_v31 }
 0x1e0   : > { %v1221_v39 = vpop.f32.mrf.mxu0 }
 0x1e1   : > { %v1550_v41 = vpop.f32.mrf.mxu1  ;;  %v2195_v43 = vunpack.c.l.bf16 %v1939_v40  ;;  %v1222_v44 = vadd.f32 %v4261_v3, %v1221_v39  ;;  %v3223_v39 = vor.u32 %v3470_v28, %v3222_v23 }
 0x1e3   : > { %v2322_v47 = vadd.f32 %v2321_v5, %v2195_v43  ;;  %v2456_v50 = vmul.f32 %v2195_v43, %v2195_v43  ;;  %v1551_v53 = vadd.f32 %v1550_v41, %v1222_v44  ;;  %v1356_v13 = vpop.f32.mrf.mxu2  ;;  %v1685_v21 = vpop.f32.mrf.mxu3  ;;  %v3469_v41 = vld [vmem:[%s4006_s25 + $0x374] sm:$0xf] }
 0x1e4   : > { %v1357_v20 = vadd.f32 %v4261_v3, %v1356_v13  ;;  %v3227_v45 = vor.u32 %v3469_v41, %v3224_v42  ;;  %v3230_v42 = vld [vmem:[%s4006_s25 + $0x380] sm:$0xf] }
 0x1e5   : > { %v2583_v58 = vadd.f32 %v2582_v30, %v2456_v50  ;;  %v1812_v59 = vmax.f32 %v1551_v53, 0.0  ;;  %v4431_v50 = vmax.f32 %v1684_v34, 0.0 }
 0x1e6   : > { %v1686_v40 = vadd.f32 %v1685_v21, %v1357_v20 }
 0x1e7   : > { %v1940_v60 = vpack.c.bf16 %v1812_v59, %v1812_v59  ;;  %v3601_v61 = vpack.c.bf16 %v1812_v59, %v1811_v31  ;;  %1398 = vmatmul.bf16.gmra.mxu2 %v3223_v39 }
 0x1e8   : > { %v1224_v22 = vpop.f32.mrf.mxu0  ;;  %v4433_v53 = vmax.f32 %v1686_v40, 0.0 }
 0x1e9   : > { %v1553_v2 = vpop.f32.mrf.mxu1  ;;  %3841 = vst [vmem:[%s4081_s10 + $0x98] sm:$0xff] %v3601_v61   ;;  %v2196_v5 = vunpack.c.l.bf16 %v1940_v60  ;;  %v1225_v6 = vadd.f32 %v4261_v3, %v1224_v22  ;;  %v3418_v22 = vld [vmem:[%s4006_s25 + $0x1d4] sm:$0xf0] }
 0x1ea   : > { %4883 = vst [vmem:[#allocation2_spill] sm:$0xff] %v4433_v53  ;;  %1727 = vmatmul.bf16.gmra.mxu3 %v3227_v45  ;;  %v3736_v55 = vpack.c.bf16 %v4433_v53, %v4431_v50 }
 0x1eb   : > { %v2323_v29 = vadd.f32 %v2322_v47, %v2196_v5  ;;  %v2457_v30 = vmul.f32 %v2196_v5, %v2196_v5  ;;  %v1554_v31 = vadd.f32 %v1553_v2, %v1225_v6  ;;  %1263 = vmatmul.bf16.gmra.mxu0 %v3007_v62  ;;  %v1688_v59 = vpop.f32.mrf.mxu3  ;;  %v3417_v2 = vld [vmem:[%s4006_s25 + $0x1d4] sm:$0xf] }
 0x1ec   : > { %1592 = vmatmul.bf16.gmra.mxu1 %v3011_v1  ;;  %3868 = vst [vmem:[%s4081_s10 + $0x170] sm:$0xff] %v3736_v55   ;;  %v3014_v1 = vld [vmem:[%s4006_s25 + $0x1d0] sm:$0xf]  ;;  %v3019_v23 = vor.u32 %v3417_v2, %v3016_v4 }
 0x1ed   : > { %v2584_v43 = vadd.f32 %v2583_v58, %v2457_v30  ;;  %v1813_v44 = vmax.f32 %v1554_v31, 0.0  ;;  %v1359_v58 = vpop.f32.mrf.mxu2  ;;  %v3015_v21 = vor.u32 %v3418_v22, %v3014_v1 }
 0x1ee   : > { %v1360_v31 = vadd.f32 %v4261_v3, %v1359_v58 }
 0x1ef   : > { %v1941_v47 = vpack.c.bf16 %v1813_v44, %v1813_v44 }
 0x1f0   : > { %v1226_v46 = vpop.f32.mrf.mxu0 }
 0x1f1   : > { %v1555_v54 = vpop.f32.mrf.mxu1  ;;  %v2197_v56 = vunpack.c.l.bf16 %v1941_v47  ;;  %v1227_v57 = vadd.f32 %v4261_v3, %v1226_v46  ;;  %v1689_v46 = vadd.f32 %v1688_v59, %v1360_v31  ;;  %v3420_v31 = vld [vmem:[%s4006_s25 + $0x1e4] sm:$0xf0] }
 0x1f3   : > { %v2324_v60 = vadd.f32 %v2323_v29, %v2197_v56  ;;  %v2458_v61 = vmul.f32 %v2197_v56, %v2197_v56  ;;  %v1556_v62 = vadd.f32 %v1555_v54, %v1227_v57  ;;  %v1690_v41 = vpop.f32.mrf.mxu3  ;;  %v3471_v56 = vld [vmem:[%s4006_s25 + $0x384] sm:$0xf]  ;;  %v3232_v57 = vld [vmem:[%s4006_s25 + $0x388] sm:$0xf0]  ;;  %v4451_v1 = vmax.f32 %v1689_v46, 0.0 }
 0x1f5   : > { %v2585_v5 = vadd.f32 %v2584_v43, %v2458_v61  ;;  %v1814_v6 = vmax.f32 %v1556_v62, 0.0  ;;  %v1361_v40 = vpop.f32.mrf.mxu2  ;;  %v3472_v43 = vld [vmem:[%s4006_s25 + $0x384] sm:$0xf0]  ;;  %v3235_v62 = vor.u32 %v3471_v56, %v3232_v57  ;;  %4884 = vst [vmem:[#allocation3_spill] sm:$0xff] %v4451_v1 }
 0x1f6   : > { %v1362_v39 = vadd.f32 %v4261_v3, %v1361_v40  ;;  %v3231_v55 = vor.u32 %v3472_v43, %v3230_v42 }
 0x1f7   : > { %v1942_v13 = vpack.c.bf16 %v1814_v6, %v1814_v6  ;;  %v3606_v20 = vpack.c.bf16 %v1814_v6, %v1813_v44 }
 0x1f8   : > { %v1229_v28 = vpop.f32.mrf.mxu0  ;;  %v1691_v54 = vadd.f32 %v1690_v41, %v1362_v39  ;;  %1403 = vmatmul.bf16.gmra.mxu2 %v3231_v55 }
 0x1f9   : > { %v1558_v30 = vpop.f32.mrf.mxu1  ;;  %3842 = vst [vmem:[%s4081_s10 + $0xa0] sm:$0xff] %v3606_v20   ;;  %v2198_v29 = vunpack.c.l.bf16 %v1942_v13  ;;  %v1230_v34 = vadd.f32 %v4261_v3, %v1229_v28 }
 0x1fa   : > { %v4453_v22 = vmax.f32 %v1691_v54, 0.0  ;;  %1732 = vmatmul.bf16.gmra.mxu3 %v3235_v62  ;;  %v3238_v62 = vld [vmem:[%s4006_s25 + $0x390] sm:$0xf] }
 0x1fb   : > { %v2325_v45 = vadd.f32 %v2324_v60, %v2198_v29  ;;  %v2459_v44 = vmul.f32 %v2198_v29, %v2198_v29  ;;  %v1559_v47 = vadd.f32 %v1558_v30, %v1230_v34  ;;  %1268 = vmatmul.bf16.gmra.mxu0 %v3015_v21  ;;  %v1693_v20 = vpop.f32.mrf.mxu3  ;;  %v3022_v30 = vld [vmem:[%s4006_s25 + $0x1e0] sm:$0xf]  ;;  %v3419_v29 = vld [vmem:[%s4006_s25 + $0x1e4] sm:$0xf]  ;;  %v3024_v34 = vld [vmem:[%s4006_s25 + $0x1e8] sm:$0xf0] }
 0x1fc   : > { %1597 = vmatmul.bf16.gmra.mxu1 %v3019_v23  ;;  %4885 = vst [vmem:[#allocation4_spill] sm:$0xff] %v4453_v22  ;;  %v3741_v4 = vpack.c.bf16 %v4453_v22, %v4451_v1  ;;  %v3023_v43 = vor.u32 %v3420_v31, %v3022_v30 }
 0x1fd   : > { %v2586_v58 = vadd.f32 %v2585_v5, %v2459_v44  ;;  %v1815_v61 = vmax.f32 %v1559_v47, 0.0  ;;  %v1364_v13 = vpop.f32.mrf.mxu2  ;;  %v3027_v44 = vor.u32 %v3419_v29, %v3024_v34 }
 0x1fe   : > { %3869 = vst [vmem:[%s4081_s10 + $0x178] sm:$0xff] %v3741_v4   ;;  %v1365_v54 = vadd.f32 %v4261_v3, %v1364_v13  ;;  %v3473_v13 = vld [vmem:[%s4006_s25 + $0x394] sm:$0xf] }
 0x1ff   : > { %v1943_v60 = vpack.c.bf16 %v1815_v61, %v1815_v61 }
 0x200   : > { %v1231_v59 = vpop.f32.mrf.mxu0  ;;  %v1694_v4 = vadd.f32 %v1693_v20, %v1365_v54 }
 0x201   : > { %v1560_v2 = vpop.f32.mrf.mxu1  ;;  %v2199_v6 = vunpack.c.l.bf16 %v1943_v60  ;;  %v1232_v5 = vadd.f32 %v4261_v3, %v1231_v59  ;;  %v3474_v60 = vld [vmem:[%s4006_s25 + $0x394] sm:$0xf0] }
 0x202   : > { %v4471_v29 = vmax.f32 %v1694_v4, 0.0 }
 0x203   : > { %v2326_v21 = vadd.f32 %v2325_v45, %v2199_v6  ;;  %v2460_v23 = vmul.f32 %v2199_v6, %v2199_v6  ;;  %v1561_v28 = vadd.f32 %v1560_v2, %v1232_v5  ;;  %v3239_v5 = vor.u32 %v3474_v60, %v3238_v62 }
 0x204   : > { %4886 = vst [vmem:[#allocation5_spill] sm:$0xff] %v4471_v29 }
 0x205   : > { %v2587_v40 = vadd.f32 %v2586_v58, %v2460_v23  ;;  %v1816_v39 = vmax.f32 %v1561_v28, 0.0  ;;  %v1366_v56 = vpop.f32.mrf.mxu2  ;;  %v1695_v58 = vpop.f32.mrf.mxu3  ;;  %v3240_v23 = vld [vmem:[%s4006_s25 + $0x398] sm:$0xf0] }
 0x206   : > { %v1367_v57 = vadd.f32 %v4261_v3, %v1366_v56  ;;  %v3243_v31 = vor.u32 %v3473_v13, %v3240_v23  ;;  %v3421_v56 = vld [vmem:[%s4006_s25 + $0x1f4] sm:$0xf] }
 0x207   : > { %v1944_v41 = vpack.c.bf16 %v1816_v39, %v1816_v39  ;;  %v3611_v42 = vpack.c.bf16 %v1816_v39, %v1815_v61 }
 0x208   : > { %v1234_v47 = vpop.f32.mrf.mxu0  ;;  %v1696_v6 = vadd.f32 %v1695_v58, %v1367_v57  ;;  %1408 = vmatmul.bf16.gmra.mxu2 %v3239_v5  ;;  %v3032_v57 = vld [vmem:[%s4006_s25 + $0x1f8] sm:$0xf0] }
 0x209   : > { %v1563_v46 = vpop.f32.mrf.mxu1  ;;  %3843 = vst [vmem:[%s4081_s10 + $0xa8] sm:$0xff] %v3611_v42   ;;  %v2200_v45 = vunpack.c.l.bf16 %v1944_v41  ;;  %v1235_v55 = vadd.f32 %v4261_v3, %v1234_v47  ;;  %v3035_v4 = vor.u32 %v3421_v56, %v3032_v57 }
 0x20a   : > { %v4473_v3 = vmax.f32 %v1696_v6, 0.0  ;;  %1737 = vmatmul.bf16.gmra.mxu3 %v3243_v31 }
 0x20b   : > { %v2327_v59 = vadd.f32 %v2326_v21, %v2200_v45  ;;  %v2461_v61 = vmul.f32 %v2200_v45, %v2200_v45  ;;  %v1564_v2 = vadd.f32 %v1563_v46, %v1235_v55  ;;  %1273 = vmatmul.bf16.gmra.mxu0 %v3023_v43  ;;  %v3030_v45 = vld [vmem:[%s4006_s25 + $0x1f0] sm:$0xf]  ;;  %v3422_v55 = vld [vmem:[%s4006_s25 + $0x1f4] sm:$0xf0] }
 0x20c   : > { %1602 = vmatmul.bf16.gmra.mxu1 %v3027_v44  ;;  %4887 = vst [vmem:[#allocation6_spill] sm:$0xff] %v4473_v3  ;;  %v3746_v39 = vpack.c.bf16 %v4473_v3, %v4471_v29 }
 0x20d   : > { %v2588_v28 = vadd.f32 %v2587_v40, %v2461_v61  ;;  %v1817_v30 = vmax.f32 %v1564_v2, 0.0  ;;  %v4480_v40 = vld [vmem:[%s4859_s2] ss:$0 sm:$0xff]  ;;  %v1369_v43 = vpop.f32.mrf.mxu2  ;;  %v1698_v44 = vpop.f32.mrf.mxu3  ;;  %v3031_v2 = vor.u32 %v3422_v55, %v3030_v45  ;;  %v3248_v45 = vld [vmem:[%s4006_s25 + $0x3a8] sm:$0xf0] }
 0x20e   : > { %3870 = vst [vmem:[%s4081_s10 + $0x180] sm:$0xff] %v3746_v39   ;;  %v1370_v13 = vadd.f32 %v4480_v40, %v1369_v43 }
 0x20f   : > { %v1945_v21 = vpack.c.bf16 %v1817_v30, %v1817_v30 }
 0x210   : > { %v1236_v20 = vpop.f32.mrf.mxu0 }
 0x211   : > { %v1565_v34 = vpop.f32.mrf.mxu1  ;;  %v2201_v41 = vunpack.c.l.bf16 %v1945_v21  ;;  %v1237_v42 = vadd.f32 %v4480_v40, %v1236_v20  ;;  %v3246_v20 = vld [vmem:[%s4006_s25 + $0x3a0] sm:$0xf] }
 0x213   : > { %v2328_v47 = vadd.f32 %v2327_v59, %v2201_v41  ;;  %v2462_v46 = vmul.f32 %v2201_v41, %v2201_v41  ;;  %v1566_v54 = vadd.f32 %v1565_v34, %v1237_v42  ;;  %v3476_v34 = vld [vmem:[%s4006_s25 + $0x3a4] sm:$0xf0]  ;;  %v1699_v42 = vadd.f32 %v1698_v44, %v1370_v13 }
 0x214   : > { %v3247_v43 = vor.u32 %v3476_v34, %v3246_v20 }
 0x215   : > { %v2589_v58 = vadd.f32 %v2588_v28, %v2462_v46  ;;  %v1818_v62 = vmax.f32 %v1566_v54, 0.0  ;;  %v1371_v31 = vpop.f32.mrf.mxu2  ;;  %v1700_v28 = vpop.f32.mrf.mxu3  ;;  %v3475_v54 = vld [vmem:[%s4006_s25 + $0x3a4] sm:$0xf] }
 0x216   : > { %v1372_v21 = vadd.f32 %v4480_v40, %v1371_v31  ;;  %v3251_v57 = vor.u32 %v3475_v54, %v3248_v45  ;;  %v3254_v45 = vld [vmem:[%s4006_s25 + $0x3b0] sm:$0xf] }
 0x217   : > { %v1946_v60 = vpack.c.bf16 %v1818_v62, %v1818_v62  ;;  %v3616_v61 = vpack.c.bf16 %v1818_v62, %v1817_v30  ;;  %v4496_v62 = vmax.f32 %v1699_v42, 0.0 }
 0x218   : > { %v1239_v6 = vpop.f32.mrf.mxu0  ;;  %v1701_v46 = vadd.f32 %v1700_v28, %v1372_v21  ;;  %1413 = vmatmul.bf16.gmra.mxu2 %v3247_v43 }
 0x219   : > { %v1568_v5 = vpop.f32.mrf.mxu1  ;;  %3844 = vst [vmem:[%s4081_s10 + $0xb0] sm:$0xff] %v3616_v61   ;;  %v2202_v59 = vunpack.c.l.bf16 %v1946_v60  ;;  %v1240_v23 = vadd.f32 %v4480_v40, %v1239_v6 }
 0x21a   : > { %4888 = vst [vmem:[#allocation7_spill] sm:$0xff] %v4496_v62  ;;  %v4498_v60 = vmax.f32 %v1701_v46, 0.0  ;;  %1742 = vmatmul.bf16.gmra.mxu3 %v3251_v57  ;;  %v3478_v57 = vld [vmem:[%s4006_s25 + $0x3b4] sm:$0xf0] }
 0x21b   : > { %v2329_v39 = vadd.f32 %v2328_v47, %v2202_v59  ;;  %v2463_v30 = vmul.f32 %v2202_v59, %v2202_v59  ;;  %v1569_v41 = vadd.f32 %v1568_v5, %v1240_v23  ;;  %1278 = vmatmul.bf16.gmra.mxu0 %v3031_v2 }
 0x21c   : > { %1607 = vmatmul.bf16.gmra.mxu1 %v3035_v4  ;;  %4889 = vst [vmem:[#allocation8_spill] sm:$0xff] %v4498_v60  ;;  %v3751_v44 = vpack.c.bf16 %v4498_v60, %v4496_v62 }
 0x21d   : > { %v2590_v55 = vadd.f32 %v2589_v58, %v2463_v30  ;;  %v1819_v56 = vmax.f32 %v1569_v41, 0.0  ;;  %v1374_v5 = vpop.f32.mrf.mxu2  ;;  %v1703_v58 = vpop.f32.mrf.mxu3 }
 0x21e   : > { %3871 = vst [vmem:[%s4081_s10 + $0x188] sm:$0xff] %v3751_v44   ;;  %v1375_v34 = vadd.f32 %v4480_v40, %v1374_v5  ;;  %v3255_v44 = vor.u32 %v3478_v57, %v3254_v45 }
 0x21f   : > { %v1947_v61 = vpack.c.bf16 %v1819_v56, %v1819_v56 }
 0x220   : > { %v1241_v47 = vpop.f32.mrf.mxu0 }
 0x221   : > { %v1570_v6 = vpop.f32.mrf.mxu1  ;;  %v2203_v2 = vunpack.c.l.bf16 %v1947_v61  ;;  %v1242_v4 = vadd.f32 %v4480_v40, %v1241_v47 }
 0x223   : > { %v2330_v13 = vadd.f32 %v2329_v39, %v2203_v2  ;;  %v2464_v59 = vmul.f32 %v2203_v2, %v2203_v2  ;;  %v1571_v23 = vadd.f32 %v1570_v6, %v1242_v4  ;;  %v3477_v2 = vld [vmem:[%s4006_s25 + $0x3b4] sm:$0xf]  ;;  %v3256_v4 = vld [vmem:[%s4006_s25 + $0x3b8] sm:$0xf0] }
 0x225   : > { %v2591_v31 = vadd.f32 %v2590_v55, %v2464_v59  ;;  %v1820_v21 = vmax.f32 %v1571_v23, 0.0  ;;  %v1376_v43 = vpop.f32.mrf.mxu2  ;;  %v1705_v54 = vpop.f32.mrf.mxu3 }
 0x226   : > { %v1377_v39 = vadd.f32 %v4480_v40, %v1376_v43 }
 0x227   : > { %v1948_v28 = vpack.c.bf16 %v1820_v21, %v1820_v21  ;;  %v3621_v20 = vpack.c.bf16 %v1820_v21, %v1819_v56  ;;  %v1704_v56 = vadd.f32 %v1703_v58, %v1375_v34  ;;  %v3259_v21 = vor.u32 %v3477_v2, %v3256_v4 }
 0x228   : > { %v1244_v30 = vpop.f32.mrf.mxu0  ;;  %v1706_v6 = vadd.f32 %v1705_v54, %v1377_v39  ;;  %1418 = vmatmul.bf16.gmra.mxu2 %v3255_v44 }
 0x229   : > { %v1573_v41 = vpop.f32.mrf.mxu1  ;;  %3845 = vst [vmem:[%s4081_s10 + $0xb8] sm:$0xff] %v3621_v20   ;;  %v2204_v42 = vunpack.c.l.bf16 %v1948_v28  ;;  %v1245_v46 = vadd.f32 %v4480_v40, %v1244_v30  ;;  %v4512_v23 = vmax.f32 %v1704_v56, 0.0 }
 0x22a   : > { %v4514_v28 = vmax.f32 %v1706_v6, 0.0  ;;  %1747 = vmatmul.bf16.gmra.mxu3 %v3259_v21 }
 0x22b   : > { %v2331_v55 = vadd.f32 %v2330_v13, %v2204_v42  ;;  %v2465_v61 = vmul.f32 %v2204_v42, %v2204_v42  ;;  %v1574_v47 = vadd.f32 %v1573_v41, %v1245_v46  ;;  %4890 = vst [vmem:[#allocation9_spill] sm:$0xff] %v4512_v23 }
 0x22c   : > { %4891 = vst [vmem:[#allocation10_spill] sm:$0xff] %v4514_v28  ;;  %v3756_v58 = vpack.c.bf16 %v4514_v28, %v4512_v23 }
 0x22d   : > { %v2592_v5 = vadd.f32 %v2591_v31, %v2465_v61  ;;  %v1821_v59 = vmax.f32 %v1574_v47, 0.0  ;;  %v1379_v42 = vpop.f32.mrf.mxu2  ;;  %v1708_v31 = vpop.f32.mrf.mxu3 }
 0x22e   : > { %3872 = vst [vmem:[%s4081_s10 + $0x190] sm:$0xff] %v3756_v58   ;;  %v1380_v47 = vadd.f32 %v4480_v40, %v1379_v42  ;;  %v3479_v42 = vld [vmem:[%s4006_s25 + $0x3c4] sm:$0xf] }
 0x22f   : > { %v1949_v20 = vpack.c.bf16 %v1821_v59, %v1821_v59 }
 0x230   : > { %v1246_v30 = vpop.f32.mrf.mxu0 }
 0x231   : > { %v1575_v13 = vpop.f32.mrf.mxu1  ;;  %v2205_v34 = vunpack.c.l.bf16 %v1949_v20  ;;  %v1247_v41 = vadd.f32 %v4480_v40, %v1246_v30  ;;  %v3262_v20 = vld [vmem:[%s4006_s25 + $0x3c0] sm:$0xf]  ;;  %v3480_v30 = vld [vmem:[%s4006_s25 + $0x3c4] sm:$0xf0] }
 0x233   : > { %v2332_v46 = vadd.f32 %v2331_v55, %v2205_v34  ;;  %v2466_v43 = vmul.f32 %v2205_v34, %v2205_v34  ;;  %v1576_v39 = vadd.f32 %v1575_v13, %v1247_v41  ;;  %v3263_v41 = vor.u32 %v3480_v30, %v3262_v20 }
 0x235   : > { %v2593_v54 = vadd.f32 %v2592_v5, %v2466_v43  ;;  %v1822_v45 = vmax.f32 %v1576_v39, 0.0  ;;  %v1381_v4 = vpop.f32.mrf.mxu2  ;;  %v1710_v21 = vpop.f32.mrf.mxu3  ;;  %v3264_v43 = vld [vmem:[%s4006_s25 + $0x3c8] sm:$0xf0] }
 0x236   : > { %v1382_v55 = vadd.f32 %v4480_v40, %v1381_v4 }
 0x237   : > { %v1950_v57 = vpack.c.bf16 %v1822_v45, %v1822_v45  ;;  %v3626_v61 = vpack.c.bf16 %v1822_v45, %v1821_v59  ;;  %v1709_v59 = vadd.f32 %v1708_v31, %v1380_v47 }
 0x238   : > { %v1249_v56 = vpop.f32.mrf.mxu0  ;;  %v1711_v34 = vadd.f32 %v1710_v21, %v1382_v55  ;;  %1423 = vmatmul.bf16.gmra.mxu2 %v3263_v41 }
 0x239   : > { %v1578_v6 = vpop.f32.mrf.mxu1  ;;  %3846 = vst [vmem:[%s4081_s10 + $0xc0] sm:$0xff] %v3626_v61   ;;  %v2206_v44 = vunpack.c.l.bf16 %v1950_v57  ;;  %v1250_v2 = vadd.f32 %v4480_v40, %v1249_v56  ;;  %v4528_v57 = vmax.f32 %v1709_v59, 0.0  ;;  %v3267_v61 = vor.u32 %v3479_v42, %v3264_v43 }
 0x23a   : > { %v4530_v56 = vmax.f32 %v1711_v34, 0.0 }
 0x23b   : > { %v2333_v5 = vadd.f32 %v2332_v46, %v2206_v44  ;;  %v2467_v13 = vmul.f32 %v2206_v44, %v2206_v44  ;;  %v1579_v58 = vadd.f32 %v1578_v6, %v1250_v2  ;;  %4892 = vst [vmem:[#allocation11_spill] sm:$0xff] %v4528_v57  ;;  %1752 = vmatmul.bf16.gmra.mxu3 %v3267_v61 }
 0x23c   : > { %4893 = vst [vmem:[#allocation12_spill] sm:$0xff] %v4530_v56  ;;  %v3761_v31 = vpack.c.bf16 %v4530_v56, %v4528_v57 }
 0x23d   : > { %v2594_v39 = vadd.f32 %v2593_v54, %v2467_v13  ;;  %v1823_v45 = vmax.f32 %v1579_v58, 0.0  ;;  %v1384_v44 = vpop.f32.mrf.mxu2  ;;  %v1713_v54 = vpop.f32.mrf.mxu3 }
 0x23e   : > { %3873 = vst [vmem:[%s4081_s10 + $0x198] sm:$0xff] %v3761_v31   ;;  %v1385_v59 = vadd.f32 %v4480_v40, %v1384_v44  ;;  %v3272_v44 = vld [vmem:[%s4006_s25 + $0x3d8] sm:$0xf0] }
 0x23f   : > { %v1951_v4 = vpack.c.bf16 %v1823_v45, %v1823_v45 }
 0x240   : > { %v1251_v28 = vpop.f32.mrf.mxu0 }
 0x241   : > { %v1580_v46 = vpop.f32.mrf.mxu1  ;;  %v2207_v47 = vunpack.c.l.bf16 %v1951_v4  ;;  %v1252_v6 = vadd.f32 %v4480_v40, %v1251_v28  ;;  %v3482_v4 = vld [vmem:[%s4006_s25 + $0x3d4] sm:$0xf0] }
 0x243   : > { %v2334_v2 = vadd.f32 %v2333_v5, %v2207_v47  ;;  %v2468_v55 = vmul.f32 %v2207_v47, %v2207_v47  ;;  %v1581_v21 = vadd.f32 %v1580_v46, %v1252_v6  ;;  %v3270_v5 = vld [vmem:[%s4006_s25 + $0x3d0] sm:$0xf]  ;;  %v1714_v46 = vadd.f32 %v1713_v54, %v1385_v59  ;;  %v3481_v6 = vld [vmem:[%s4006_s25 + $0x3d4] sm:$0xf] }
 0x245   : > { %v2595_v20 = vadd.f32 %v2594_v39, %v2468_v55  ;;  %v1824_v30 = vmax.f32 %v1581_v21, 0.0  ;;  %v1386_v42 = vpop.f32.mrf.mxu2  ;;  %v1715_v61 = vpop.f32.mrf.mxu3 }
 0x246   : > { %v1387_v43 = vadd.f32 %v4480_v40, %v1386_v42 }
 0x247   : > { %v1952_v13 = vpack.c.bf16 %v1824_v30, %v1824_v30  ;;  %v3631_v58 = vpack.c.bf16 %v1824_v30, %v1823_v45  ;;  %v3271_v45 = vor.u32 %v3482_v4, %v3270_v5  ;;  %v4548_v30 = vmax.f32 %v1714_v46, 0.0 }
 0x248   : > { %v1254_v34 = vpop.f32.mrf.mxu0  ;;  %v1716_v47 = vadd.f32 %v1715_v61, %v1387_v43 }
 0x249   : > { %v1583_v41 = vpop.f32.mrf.mxu1  ;;  %3847 = vst [vmem:[%s4081_s10 + $0xc8] sm:$0xff] %v3631_v58   ;;  %v2208_v28 = vunpack.c.l.bf16 %v1952_v13  ;;  %v1255_v21 = vadd.f32 %v4480_v40, %v1254_v34  ;;  %v3275_v13 = vor.u32 %v3481_v6, %v3272_v44  ;;  %1428 = vmatmul.bf16.gmra.mxu2 %v3271_v45  ;;  %v3278_v44 = vld [vmem:[%s4006_s25 + $0x3e0] sm:$0xf] }
 0x24a   : > { %4894 = vst [vmem:[#allocation13_spill] sm:$0xff] %v4548_v30  ;;  %v4550_v58 = vmax.f32 %v1716_v47, 0.0 }
 0x24b   : > { %v4541_v31 = vadd.f32 %v2334_v2, %v2208_v28  ;;  %v2469_v39 = vmul.f32 %v2208_v28, %v2208_v28  ;;  %1757 = vmatmul.bf16.gmra.mxu3 %v3275_v13  ;;  %v1584_v59 = vadd.f32 %v1583_v41, %v1255_v21  ;;  %v3484_v21 = vld [vmem:[%s4006_s25 + $0x3e4] sm:$0xf0] }
 0x24c   : > { %4895 = vst [vmem:[#allocation14_spill] sm:$0xff] %v4550_v58  ;;  %v3766_v54 = vpack.c.bf16 %v4550_v58, %v4548_v30 }
 0x24d   : > { %v4545_v55 = vadd.f32 %v2595_v20, %v2469_v39  ;;  %v1389_v42 = vpop.f32.mrf.mxu2  ;;  %v1718_v34 = vpop.f32.mrf.mxu3  ;;  %v4556_v61 = vmax.f32 %v1584_v59, 0.0  ;;  %v3280_v59 = vld [vmem:[%s4006_s25 + $0x3e8] sm:$0xf0] }
 0x24e   : > { %3874 = vst [vmem:[%s4081_s10 + $0x1a0] sm:$0xff] %v3766_v54   ;;  %v1390_v39 = vadd.f32 %v4480_v40, %v1389_v42  ;;  %v3483_v54 = vld [vmem:[%s4006_s25 + $0x3e4] sm:$0xf] }
 0x24f   : > { %v3283_v42 = vor.u32 %v3483_v54, %v3280_v59  ;;  %v1953_v23 = vpack.c.bf16 %v4556_v61, %v4556_v61 }
 0x250   : > { %v1256_v2 = vpop.f32.mrf.mxu0  ;;  %v1719_v13 = vadd.f32 %v1718_v34, %v1390_v39 }
 0x251   : > { %v1585_v28 = vpop.f32.mrf.mxu1  ;;  %v1257_v20 = vadd.f32 %v4480_v40, %v1256_v2 }
 0x253   : > { %v1586_v43 = vadd.f32 %v1585_v28, %v1257_v20  ;;  %v3279_v28 = vor.u32 %v3484_v21, %v3278_v44 }
 0x255   : > { %v4558_v5 = vmax.f32 %v1586_v43, 0.0  ;;  %v1391_v47 = vpop.f32.mrf.mxu2  ;;  %v1720_v6 = vpop.f32.mrf.mxu3  ;;  %v4570_v43 = vmax.f32 %v1719_v13, 0.0 }
 0x256   : > { %v1392_v45 = vadd.f32 %v4480_v40, %v1391_v47 }
 0x257   : > { %v3636_v4 = vpack.c.bf16 %v4558_v5, %v4556_v61  ;;  %4896 = vst [vmem:[#allocation15_spill] sm:$0xff] %v4570_v43 }
 0x258   : > { %v1259_v41 = vpop.f32.mrf.mxu0  ;;  %v1721_v2 = vadd.f32 %v1720_v6, %v1392_v45 }
 0x259   : > { %v1588_v46 = vpop.f32.mrf.mxu1  ;;  %3848 = vst [vmem:[%s4081_s10 + $0xd0] sm:$0xff] %v3636_v4   ;;  %v1260_v20 = vadd.f32 %v4480_v40, %v1259_v41  ;;  %1433 = vmatmul.bf16.gmra.mxu2 %v3279_v28 }
 0x25a   : > { %v4572_v58 = vmax.f32 %v1721_v2, 0.0 }
 0x25b   : > { %1762 = vmatmul.bf16.gmra.mxu3 %v3283_v42  ;;  %v1589_v39 = vadd.f32 %v1588_v46, %v1260_v20 }
 0x25c   : > { %4897 = vst [vmem:[#allocation16_spill] sm:$0xff] %v4572_v58  ;;  %v3771_v34 = vpack.c.bf16 %v4572_v58, %v4570_v43  ;;  %v3288_v58 = vld [vmem:[%s4006_s25 + $0x3f8] sm:$0xf0] }
 0x25d   : > { %v1394_v6 = vpop.f32.mrf.mxu2  ;;  %v1723_v41 = vpop.f32.mrf.mxu3  ;;  %v4578_v21 = vmax.f32 %v1589_v39, 0.0 }
 0x25e   : > { %3875 = vst [vmem:[%s4081_s10 + $0x1a8] sm:$0xff] %v3771_v34   ;;  %v1395_v28 = vadd.f32 %v4480_v40, %v1394_v6 }
 0x260   : > { %v1261_v4 = vpop.f32.mrf.mxu0  ;;  %v1724_v34 = vadd.f32 %v1723_v41, %v1395_v28 }
 0x261   : > { %v1590_v47 = vpop.f32.mrf.mxu1  ;;  %v1262_v45 = vadd.f32 %v4480_v40, %v1261_v4  ;;  %v3286_v4 = vld [vmem:[%s4006_s25 + $0x3f0] sm:$0xf] }
 0x262   : > { %v4592_v30 = vmax.f32 %v1724_v34, 0.0 }
 0x263   : > { %v1591_v44 = vadd.f32 %v1590_v47, %v1262_v45  ;;  %v3486_v47 = vld [vmem:[%s4006_s25 + $0x3f4] sm:$0xf0] }
 0x264   : > { %v3287_v45 = vor.u32 %v3486_v47, %v3286_v4  ;;  %4898 = vst [vmem:[#allocation17_spill] sm:$0xff] %v4592_v30 }
 0x265   : > { %v4580_v13 = vmax.f32 %v1591_v44, 0.0  ;;  %v1396_v59 = vpop.f32.mrf.mxu2  ;;  %v1725_v42 = vpop.f32.mrf.mxu3  ;;  %v3485_v44 = vld [vmem:[%s4006_s25 + $0x3f4] sm:$0xf] }
 0x266   : > { %v1397_v20 = vadd.f32 %v4480_v40, %v1396_v59  ;;  %v3291_v6 = vor.u32 %v3485_v44, %v3288_v58 }
 0x267   : > { %v3641_v2 = vpack.c.bf16 %v4580_v13, %v4578_v21 }
 0x268   : > { %v1264_v46 = vpop.f32.mrf.mxu0  ;;  %v1726_v39 = vadd.f32 %v1725_v42, %v1397_v20 }
 0x269   : > { %v1593_v54 = vpop.f32.mrf.mxu1  ;;  %3849 = vst [vmem:[%s4081_s10 + $0xd8] sm:$0xff] %v3641_v2   ;;  %v1265_v43 = vadd.f32 %v4480_v40, %v1264_v46  ;;  %1438 = vmatmul.bf16.gmra.mxu2 %v3287_v45 }
 0x26a   : > { %v4594_v56 = vmax.f32 %v1726_v39, 0.0 }
 0x26b   : > { %1767 = vmatmul.bf16.gmra.mxu3 %v3291_v6  ;;  %v1594_v28 = vadd.f32 %v1593_v54, %v1265_v43 }
 0x26c   : > { %4899 = vst [vmem:[#allocation18_spill] sm:$0xff] %v4594_v56  ;;  %v3776_v41 = vpack.c.bf16 %v4594_v56, %v4592_v30 }
 0x26d   : > { %v1399_v42 = vpop.f32.mrf.mxu2  ;;  %v1728_v4 = vpop.f32.mrf.mxu3  ;;  %v4600_v47 = vmax.f32 %v1594_v28, 0.0 }
 0x26e   : > { %3876 = vst [vmem:[%s4081_s10 + $0x1b0] sm:$0xff] %v3776_v41   ;;  %v1400_v39 = vadd.f32 %v4480_v40, %v1399_v42 }
 0x270   : > { %v1266_v2 = vpop.f32.mrf.mxu0 }
 0x271   : > { %v1595_v59 = vpop.f32.mrf.mxu1  ;;  %v1267_v20 = vadd.f32 %v4480_v40, %v1266_v2  ;;  %v1729_v2 = vadd.f32 %v1728_v4, %v1400_v39 }
 0x273   : > { %v1596_v46 = vadd.f32 %v1595_v59, %v1267_v20  ;;  %v4610_v28 = vmax.f32 %v1729_v2, 0.0 }
 0x275   : > { %v4602_v58 = vmax.f32 %v1596_v46, 0.0  ;;  %v1401_v43 = vpop.f32.mrf.mxu2  ;;  %v1730_v6 = vpop.f32.mrf.mxu3  ;;  %4900 = vst [vmem:[#allocation19_spill] sm:$0xff] %v4610_v28 }
 0x276   : > { %v1402_v54 = vadd.f32 %v4480_v40, %v1401_v43 }
 0x277   : > { %v3646_v34 = vpack.c.bf16 %v4602_v58, %v4600_v47  ;;  %v1958_v62 = vpack.c.bf16 %v4602_v58, %v4602_v58 }
 0x278   : > { %v1269_v45 = vpop.f32.mrf.mxu0  ;;  %v1731_v41 = vadd.f32 %v1730_v6, %v1402_v54 }
 0x279   : > { %v1598_v44 = vpop.f32.mrf.mxu1  ;;  %3850 = vst [vmem:[%s4081_s10 + $0xe0] sm:$0xff] %v3646_v34   ;;  %v1270_v59 = vadd.f32 %v4480_v40, %v1269_v45  ;;  %v2214_v22 = vunpack.c.l.bf16 %v1958_v62 }
 0x27a   : > { %v4612_v20 = vmax.f32 %v1731_v41, 0.0 }
 0x27b   : > { %v1599_v30 = vadd.f32 %v1598_v44, %v1270_v59 }
 0x27c   : > { %4901 = vst [vmem:[#allocation20_spill] sm:$0xff] %v4612_v20  ;;  %v3781_v42 = vpack.c.bf16 %v4612_v20, %v4610_v28 }
 0x27d   : > { %v1404_v57 = vpop.f32.mrf.mxu2  ;;  %v1733_v43 = vpop.f32.mrf.mxu3  ;;  %v1831_v39 = vmax.f32 %v1599_v30, 0.0 }
 0x27e   : > { %3877 = vst [vmem:[%s4081_s10 + $0x1b8] sm:$0xff] %v3781_v42   ;;  %v1405_v6 = vadd.f32 %v4480_v40, %v1404_v57  ;;  %v1955_v57 = vpack.c.bf16 %v4578_v21, %v4578_v21 }
 0x280   : > { %v1271_v46 = vpop.f32.mrf.mxu0  ;;  %v1734_v30 = vadd.f32 %v1733_v43, %v1405_v6  ;;  %v2211_v43 = vunpack.c.l.bf16 %v1955_v57 }
 0x281   : > { %v1600_v56 = vpop.f32.mrf.mxu1  ;;  %v1272_v34 = vadd.f32 %v4480_v40, %v1271_v46 }
 0x282   : > { %v4631_v20 = vmax.f32 %v1734_v30, 0.0 }
 0x283   : > { %v1601_v4 = vadd.f32 %v1600_v56, %v1272_v34  ;;  %v1954_v56 = vpack.c.bf16 %v4558_v5, %v4558_v5  ;;  %v2209_v34 = vunpack.c.l.bf16 %v1953_v23 }
 0x284   : > { %4902 = vst [vmem:[#allocation21_spill] sm:$0xff] %v4631_v20 }
 0x285   : > { %v4618_v54 = vmax.f32 %v1601_v4, 0.0  ;;  %v1406_v44 = vpop.f32.mrf.mxu2  ;;  %v1735_v46 = vpop.f32.mrf.mxu3  ;;  %v2470_v23 = vmul.f32 %v2209_v34, %v2209_v34 }
 0x286   : > { %v1407_v59 = vadd.f32 %v4480_v40, %v1406_v44  ;;  %v1956_v44 = vpack.c.bf16 %v4580_v13, %v4580_v13  ;;  %v2336_v13 = vadd.f32 %v4541_v31, %v2209_v34 }
 0x287   : > { %v3651_v45 = vpack.c.bf16 %v4618_v54, %v1831_v39 }
 0x288   : > { %v1274_v2 = vpop.f32.mrf.mxu0  ;;  %v1736_v42 = vadd.f32 %v1735_v46, %v1407_v59 }
 0x289   : > { %v1603_v41 = vpop.f32.mrf.mxu1  ;;  %3851 = vst [vmem:[%s4081_s10 + $0xe8] sm:$0xff] %v3651_v45   ;;  %v1275_v4 = vadd.f32 %v4480_v40, %v1274_v2  ;;  %v2210_v45 = vunpack.c.l.bf16 %v1954_v56  ;;  %v1957_v2 = vpack.c.bf16 %v4600_v47, %v4600_v47 }
 0x28a   : > { %v4633_v61 = vmax.f32 %v1736_v42, 0.0  ;;  %v2212_v42 = vunpack.c.l.bf16 %v1956_v44 }
 0x28b   : > { %v1604_v6 = vadd.f32 %v1603_v41, %v1275_v4  ;;  %v2471_v56 = vmul.f32 %v2210_v45, %v2210_v45  ;;  %v2472_v41 = vmul.f32 %v2211_v43, %v2211_v43  ;;  %v2213_v4 = vunpack.c.l.bf16 %v1957_v2 }
 0x28c   : > { %4903 = vst [vmem:[#allocation22_spill] sm:$0xff] %v4633_v61  ;;  %v3786_v5 = vpack.c.bf16 %v4633_v61, %v4631_v20  ;;  %v2597_v61 = vadd.f32 %v4545_v55, %v2470_v23  ;;  %v1959_v20 = vpack.c.bf16 %v1831_v39, %v1831_v39  ;;  %v2337_v3 = vadd.f32 %v2336_v13, %v2210_v45 }
 0x28d   : > { %v1409_v59 = vpop.f32.mrf.mxu2  ;;  %v1738_v46 = vpop.f32.mrf.mxu3  ;;  %v1833_v57 = vmax.f32 %v1604_v6, 0.0  ;;  %v2473_v29 = vmul.f32 %v2212_v42, %v2212_v42  ;;  %v2475_v13 = vmul.f32 %v2214_v22, %v2214_v22 }
 0x28e   : > { %3878 = vst [vmem:[%s4081_s10 + $0x1c0] sm:$0xff] %v3786_v5   ;;  %v2598_v47 = vadd.f32 %v2597_v61, %v2471_v56  ;;  %v2338_v44 = vadd.f32 %v2337_v3, %v2211_v43  ;;  %v1410_v23 = vadd.f32 %v4480_v40, %v1409_v59  ;;  %v2215_v39 = vunpack.c.l.bf16 %v1959_v20 }
 0x28f   : > { %v1961_v45 = vpack.c.bf16 %v1833_v57, %v1833_v57 }
 0x290   : > { %v1276_v28 = vpop.f32.mrf.mxu0  ;;  %v2599_v58 = vadd.f32 %v2598_v47, %v2472_v41  ;;  %v2339_v62 = vadd.f32 %v2338_v44, %v2212_v42 }
 0x291   : > { %v1605_v60 = vpop.f32.mrf.mxu1  ;;  %v1277_v21 = vadd.f32 %v4480_v40, %v1276_v28  ;;  %v2217_v20 = vunpack.c.l.bf16 %v1961_v45 }
 0x292   : > { %v2340_v43 = vadd.f32 %v2339_v62, %v2213_v4 }
 0x293   : > { %v1606_v30 = vadd.f32 %v1605_v60, %v1277_v21  ;;  %v1960_v60 = vpack.c.bf16 %v4618_v54, %v4618_v54  ;;  %v2474_v21 = vmul.f32 %v2213_v4, %v2213_v4  ;;  %v2600_v54 = vadd.f32 %v2599_v58, %v2473_v29 }
 0x295   : > { %v1834_v28 = vmax.f32 %v1606_v30, 0.0  ;;  %v1411_v6 = vpop.f32.mrf.mxu2  ;;  %v1740_v2 = vpop.f32.mrf.mxu3  ;;  %v1739_v30 = vadd.f32 %v1738_v46, %v1410_v23  ;;  %v2216_v1 = vunpack.c.l.bf16 %v1960_v60  ;;  %v2601_v59 = vadd.f32 %v2600_v54, %v2474_v21 }
 0x296   : > { %v1412_v61 = vadd.f32 %v4480_v40, %v1411_v6  ;;  %v2341_v6 = vadd.f32 %v2340_v43, %v2214_v22  ;;  %v1966_v54 = vpack.c.bf16 %v4148_v52, %v4148_v52  ;;  %v1968_v52 = vpack.c.bf16 %v4168_v33, %v4168_v33 }
 0x297   : > { %v3656_v5 = vpack.c.bf16 %v1834_v28, %v1833_v57  ;;  %v1962_v41 = vpack.c.bf16 %v1834_v28, %v1834_v28  ;;  %v2602_v42 = vadd.f32 %v2601_v59, %v2475_v13 }
 0x298   : > { %v1279_v31 = vpop.f32.mrf.mxu0  ;;  %v1741_v3 = vadd.f32 %v1740_v2, %v1412_v61  ;;  %v2342_v60 = vadd.f32 %v2341_v6, %v2215_v39  ;;  %v1965_v2 = vpack.c.bf16 %v4146_v51, %v4146_v51 }
 0x299   : > { %v1608_v34 = vpop.f32.mrf.mxu1  ;;  %3852 = vst [vmem:[%s4081_s10 + $0xf0] sm:$0xff] %v3656_v5   ;;  %v1280_v55 = vadd.f32 %v4480_v40, %v1279_v31  ;;  %v4653_v5 = vmax.f32 %v1739_v30, 0.0  ;;  %v2476_v31 = vmul.f32 %v2215_v39, %v2215_v39  ;;  %v2218_v4 = vunpack.c.l.bf16 %v1962_v41 }
 0x29a   : > { %v4655_v57 = vmax.f32 %v1741_v3, 0.0  ;;  %v2343_v45 = vadd.f32 %v2342_v60, %v2216_v1 }
 0x29b   : > { %v1609_v56 = vadd.f32 %v1608_v34, %v1280_v55  ;;  %v2477_v34 = vmul.f32 %v2216_v1, %v2216_v1  ;;  %v2603_v58 = vadd.f32 %v2602_v42, %v2476_v31  ;;  %v2478_v55 = vmul.f32 %v2217_v20, %v2217_v20 }
 0x29c   : > { %v3791_v29 = vpack.c.bf16 %v4655_v57, %v4653_v5  ;;  %v2479_v30 = vmul.f32 %v2218_v4, %v2218_v4  ;;  %v2221_v31 = vunpack.c.l.bf16 %v1965_v2  ;;  %v2224_v2 = vunpack.c.l.bf16 %v1968_v52 }
 0x29d   : > { %v1835_v47 = vmax.f32 %v1609_v56, 0.0  ;;  %v1414_v44 = vpop.f32.mrf.mxu2  ;;  %v1743_v21 = vpop.f32.mrf.mxu3  ;;  %v2604_v62 = vadd.f32 %v2603_v58, %v2477_v34  ;;  %v2344_v56 = vadd.f32 %v2343_v45, %v2217_v20  ;;  %v2222_v34 = vunpack.c.l.bf16 %v1966_v54 }
 0x29e   : > { %3879 = vst [vmem:[%s4081_s10 + $0x1c8] sm:$0xff] %v3791_v29   ;;  %v1415_v20 = vadd.f32 %v4480_v40, %v1414_v44  ;;  %v2482_v58 = vmul.f32 %v2221_v31, %v2221_v31  ;;  %v1974_v52 = vpack.c.bf16 %v4228_v49, %v4228_v49  ;;  %v1976_v49 = vpack.c.bf16 %v4248_v38, %v4248_v38 }
 0x29f   : > { %v1963_v53 = vpack.c.bf16 %v1835_v47, %v1835_v47  ;;  %v2605_v13 = vadd.f32 %v2604_v62, %v2478_v55  ;;  %v2345_v3 = vadd.f32 %v2344_v56, %v2218_v4  ;;  %v1970_v62 = vpack.c.bf16 %v4188_v15, %v4188_v15 }
 0x2a0   : > { %v1281_v46 = vpop.f32.mrf.mxu0  ;;  %v1978_v38 = vpack.c.bf16 %v4273_v27, %v4273_v27 }
 0x2a1   : > { %v1282_v28 = vadd.f32 %v4480_v40, %v1281_v46  ;;  %v1610_v23 = vpop.f32.mrf.mxu1  ;;  %v2219_v61 = vunpack.c.l.bf16 %v1963_v53  ;;  %v1967_v53 = vpack.c.bf16 %v4166_v32, %v4166_v32  ;;  %v2606_v1 = vadd.f32 %v2605_v13, %v2479_v30 }
 0x2a2   : > { %v2226_v15 = vunpack.c.l.bf16 %v1970_v62  ;;  %v2234_v27 = vunpack.c.l.bf16 %v1978_v38 }
 0x2a3   : > { %v1611_v22 = vadd.f32 %v1610_v23, %v1282_v28  ;;  %v2480_v43 = vmul.f32 %v2219_v61, %v2219_v61  ;;  %v2346_v6 = vadd.f32 %v2345_v3, %v2219_v61  ;;  %v1744_v28 = vadd.f32 %v1743_v21, %v1415_v20 }
 0x2a4   : > { %v2223_v32 = vunpack.c.l.bf16 %v1967_v53  ;;  %v1969_v23 = vpack.c.bf16 %v4186_v14, %v4186_v14  ;;  %v1971_v14 = vpack.c.bf16 %v4206_v63, %v4206_v63 }
 0x2a5   : > { %v1836_v39 = vmax.f32 %v1611_v22, 0.0  ;;  %v1416_v42 = vpop.f32.mrf.mxu2  ;;  %v1745_v29 = vpop.f32.mrf.mxu3  ;;  %v2607_v60 = vadd.f32 %v2606_v1, %v2480_v43  ;;  %v4674_v61 = vmax.f32 %v1744_v28, 0.0  ;;  %v2483_v22 = vmul.f32 %v2222_v34, %v2222_v34 }
 0x2a6   : > { %v1417_v46 = vadd.f32 %v4480_v40, %v1416_v42  ;;  %v2484_v30 = vmul.f32 %v2223_v32, %v2223_v32  ;;  %v2225_v54 = vunpack.c.l.bf16 %v1969_v23  ;;  %v2227_v20 = vunpack.c.l.bf16 %v1971_v14 }
 0x2a7   : > { %v1964_v41 = vpack.c.bf16 %v1836_v39, %v1836_v39  ;;  %v3661_v59 = vpack.c.bf16 %v1836_v39, %v1835_v47  ;;  %v2230_v23 = vunpack.c.l.bf16 %v1974_v52 }
 0x2a8   : > { %v1746_v55 = vadd.f32 %v1745_v29, %v1417_v46  ;;  %v2487_v46 = vmul.f32 %v2226_v15, %v2226_v15 }
 0x2a9   : > { %3853 = vst [vmem:[%s4081_s10 + $0xf8] sm:$0xff] %v3661_v59   ;;  %v2220_v51 = vunpack.c.l.bf16 %v1964_v41  ;;  %v1972_v41 = vpack.c.bf16 %v4208_v0, %v4208_v0 }
 0x2aa   : > { %v4676_v33 = vmax.f32 %v1746_v55, 0.0 }
 0x2ab   : > { %v2347_v47 = vadd.f32 %v2346_v6, %v2220_v51  ;;  %v2481_v4 = vmul.f32 %v2220_v51, %v2220_v51  ;;  %v1973_v6 = vpack.c.bf16 %v4226_v48, %v4226_v48  ;;  %v2486_v51 = vmul.f32 %v2225_v54, %v2225_v54 }
 0x2ac   : > { %v3796_v39 = vpack.c.bf16 %v4676_v33, %v4674_v61  ;;  %v2228_v63 = vunpack.c.l.bf16 %v1972_v41 }
 0x2ad   : > { %v2348_v45 = vadd.f32 %v2347_v47, %v2221_v31  ;;  %v2608_v44 = vadd.f32 %v2607_v60, %v2481_v4  ;;  %v1419_v43 = vpop.f32.mrf.mxu2  ;;  %v1748_v59 = vpop.f32.mrf.mxu3  ;;  %v2485_v31 = vmul.f32 %v2224_v2, %v2224_v2  ;;  %v2229_v60 = vunpack.c.l.bf16 %v1973_v6 }
 0x2ae   : > { %3880 = vst [vmem:[%s4081_s10 + $0x1d0] sm:$0xff] %v3796_v39   ;;  %v1975_v47 = vpack.c.bf16 %v4246_v37, %v4246_v37  ;;  %v2488_v4 = vmul.f32 %v2227_v20, %v2227_v20  ;;  %v1420_v48 = vadd.f32 %v4480_v40, %v1419_v43  ;;  %v2489_v55 = vmul.f32 %v2228_v63, %v2228_v63 }
 0x2af   : > { %v2349_v56 = vadd.f32 %v2348_v45, %v2222_v34  ;;  %v2609_v21 = vadd.f32 %v2608_v44, %v2482_v58  ;;  %v2232_v43 = vunpack.c.l.bf16 %v1976_v49 }
 0x2b0   : > { %v1749_v62 = vadd.f32 %v1748_v59, %v1420_v48 }
 0x2b1   : > { %v2350_v13 = vadd.f32 %v2349_v56, %v2223_v32  ;;  %v2610_v3 = vadd.f32 %v2609_v21, %v2483_v22  ;;  %v2490_v56 = vmul.f32 %v2229_v60, %v2229_v60  ;;  %v2231_v21 = vunpack.c.l.bf16 %v1975_v47 }
 0x2b2   : > { %v4699_v14 = vmax.f32 %v1749_v62, 0.0 }
 0x2b3   : > { %v2351_v53 = vadd.f32 %v2350_v13, %v2224_v2  ;;  %v2611_v1 = vadd.f32 %v2610_v3, %v2484_v30  ;;  %v1977_v30 = vpack.c.bf16 %v4271_v26, %v4271_v26  ;;  %v2491_v13 = vmul.f32 %v2230_v23, %v2230_v23 }
 0x2b4   : > { %v1979_v26 = vpack.c.bf16 %v4291_v18, %v4291_v18 }
 0x2b5   : > { %v2352_v42 = vadd.f32 %v2351_v53, %v2225_v54  ;;  %v2612_v34 = vadd.f32 %v2611_v1, %v2485_v31  ;;  %v1421_v32 = vpop.f32.mrf.mxu2  ;;  %v1750_v44 = vpop.f32.mrf.mxu3  ;;  %v2492_v31 = vmul.f32 %v2231_v21, %v2231_v21  ;;  %v2233_v53 = vunpack.c.l.bf16 %v1977_v30 }
 0x2b6   : > { %v1422_v45 = vadd.f32 %v4480_v40, %v1421_v32  ;;  %v1983_v32 = vpack.c.bf16 %v4331_v8, %v4331_v8 }
 0x2b7   : > { %v2353_v29 = vadd.f32 %v2352_v42, %v2226_v15  ;;  %v2613_v0 = vadd.f32 %v2612_v34, %v2486_v51  ;;  %v2493_v34 = vmul.f32 %v2232_v43, %v2232_v43 }
 0x2b8   : > { %v1751_v37 = vadd.f32 %v1750_v44, %v1422_v45 }
 0x2b9   : > { %v2354_v28 = vadd.f32 %v2353_v29, %v2227_v20  ;;  %v2614_v58 = vadd.f32 %v2613_v0, %v2487_v46  ;;  %v1980_v20 = vpack.c.bf16 %v4293_v19, %v4293_v19  ;;  %v1981_v46 = vpack.c.bf16 %v4311_v11, %v4311_v11 }
 0x2ba   : > { %v4701_v3 = vmax.f32 %v1751_v37, 0.0  ;;  %v2494_v29 = vmul.f32 %v2233_v53, %v2233_v53  ;;  %v2235_v0 = vunpack.c.l.bf16 %v1979_v26 }
 0x2bb   : > { %v2355_v22 = vadd.f32 %v2354_v28, %v2228_v63  ;;  %v2615_v2 = vadd.f32 %v2614_v58, %v2488_v4  ;;  %v2236_v18 = vunpack.c.l.bf16 %v1980_v20  ;;  %v1982_v4 = vpack.c.bf16 %v4313_v12, %v4313_v12 }
 0x2bc   : > { %v3801_v15 = vpack.c.bf16 %v4701_v3, %v4699_v14  ;;  %v2495_v28 = vmul.f32 %v2234_v27, %v2234_v27  ;;  %v2237_v48 = vunpack.c.l.bf16 %v1981_v46  ;;  %v1984_v12 = vpack.c.bf16 %v4333_v9, %v4333_v9 }
 0x2bd   : > { %v2356_v39 = vadd.f32 %v2355_v22, %v2229_v60  ;;  %v2616_v54 = vadd.f32 %v2615_v2, %v2489_v55  ;;  %v1424_v51 = vpop.f32.mrf.mxu2  ;;  %v2496_v55 = vmul.f32 %v2235_v0, %v2235_v0  ;;  %v2497_v49 = vmul.f32 %v2236_v18, %v2236_v18 }
 0x2be   : > { %3881 = vst [vmem:[%s4081_s10 + $0x1d8] sm:$0xff] %v3801_v15   ;;  %v1753_v42 = vpop.f32.mrf.mxu3  ;;  %v1425_v11 = vadd.f32 %v4480_v40, %v1424_v51  ;;  %v2238_v22 = vunpack.c.l.bf16 %v1982_v4  ;;  %v2498_v30 = vmul.f32 %v2237_v48, %v2237_v48  ;;  %v1986_v9 = vpack.c.bf16 %v4353_v10, %v4353_v10 }
 0x2bf   : > { %v2357_v41 = vadd.f32 %v2356_v39, %v2230_v23  ;;  %v2617_v59 = vadd.f32 %v2616_v54, %v2490_v56  ;;  %v2239_v39 = vunpack.c.l.bf16 %v1983_v32  ;;  %v1985_v54 = vpack.c.bf16 %v4351_v7, %v4351_v7 }
 0x2c0   : > { %v1754_v37 = vadd.f32 %v1753_v42, %v1425_v11  ;;  %v1987_v7 = vpack.c.bf16 %v4371_v16, %v4371_v16  ;;  %v1988_v42 = vpack.c.bf16 %v4373_v17, %v4373_v17  ;;  %v2242_v10 = vunpack.c.l.bf16 %v1986_v9 }
 0x2c1   : > { %v2358_v1 = vadd.f32 %v2357_v41, %v2231_v21  ;;  %v2618_v6 = vadd.f32 %v2617_v59, %v2491_v13  ;;  %v2499_v41 = vmul.f32 %v2238_v22, %v2238_v22  ;;  %v2240_v59 = vunpack.c.l.bf16 %v1984_v12 }
 0x2c2   : > { %v4724_v38 = vmax.f32 %v1754_v37, 0.0  ;;  %v1989_v46 = vpack.c.bf16 %v4391_v24, %v4391_v24  ;;  %v2244_v16 = vunpack.c.l.bf16 %v1988_v42  ;;  %v2503_v4 = vmul.f32 %v2242_v10, %v2242_v10  ;;  %v4746_v24 = vld [vmem:[%s4859_s2] ss:$0 sm:$0xff] }
 0x2c3   : > { %v2359_v63 = vadd.f32 %v2358_v1, %v2232_v43  ;;  %v2619_v52 = vadd.f32 %v2618_v6, %v2492_v31  ;;  %v2241_v1 = vunpack.c.l.bf16 %v1985_v54  ;;  %v1993_v37 = vpack.c.bf16 %v4431_v50, %v4431_v50  ;;  %v4905_v50 = vld [vmem:[#allocation3_spill] sm:$0xff] }
 0x2c4   : > { %v2505_v11 = vmul.f32 %v2244_v16, %v2244_v16 }
 0x2c5   : > { %v2360_v60 = vadd.f32 %v2359_v63, %v2233_v53  ;;  %v2620_v47 = vadd.f32 %v2619_v52, %v2493_v34  ;;  %v1426_v44 = vpop.f32.mrf.mxu2  ;;  %v2500_v53 = vmul.f32 %v2239_v39, %v2239_v39 }
 0x2c6   : > { %v1427_v2 = vadd.f32 %v4480_v40, %v1426_v44  ;;  %v1755_v62 = vpop.f32.mrf.mxu3 }
 0x2c7   : > { %v2361_v58 = vadd.f32 %v2360_v60, %v2234_v27  ;;  %v2621_v19 = vadd.f32 %v2620_v47, %v2494_v29  ;;  %v2501_v27 = vmul.f32 %v2240_v59, %v2240_v59  ;;  %v2502_v29 = vmul.f32 %v2241_v1, %v2241_v1 }
 0x2c8   : > { %v1756_v8 = vadd.f32 %v1755_v62, %v1427_v2 }
 0x2c9   : > { %v2362_v23 = vadd.f32 %v2361_v58, %v2235_v0  ;;  %v2622_v45 = vadd.f32 %v2621_v19, %v2495_v28  ;;  %v2243_v0 = vunpack.c.l.bf16 %v1987_v7  ;;  %v2245_v58 = vunpack.c.l.bf16 %v1989_v46 }
 0x2ca   : > { %v4726_v40 = vmax.f32 %v1756_v8, 0.0  ;;  %v1991_v19 = vpack.c.bf16 %v4411_v35, %v4411_v35 }
 0x2cb   : > { %v2363_v56 = vadd.f32 %v2362_v23, %v2236_v18  ;;  %v2623_v21 = vadd.f32 %v2622_v45, %v2496_v55  ;;  %v1990_v18 = vpack.c.bf16 %v4393_v25, %v4393_v25  ;;  %v2506_v12 = vmul.f32 %v2245_v58, %v2245_v58 }
 0x2cc   : > { %v3806_v26 = vpack.c.bf16 %v4726_v40, %v4724_v38 }
 0x2cd   : > { %v2364_v13 = vadd.f32 %v2363_v56, %v2237_v48  ;;  %v2624_v43 = vadd.f32 %v2623_v21, %v2497_v49  ;;  %v1429_v20 = vpop.f32.mrf.mxu2  ;;  %v2504_v48 = vmul.f32 %v2243_v0, %v2243_v0  ;;  %v2246_v25 = vunpack.c.l.bf16 %v1990_v18  ;;  %v4908_v18 = vld [vmem:[#allocation6_spill] sm:$0xff] }
 0x2ce   : > { %3882 = vst [vmem:[%s4081_s10 + $0x1e0] sm:$0xff] %v3806_v26   ;;  %v1758_v34 = vpop.f32.mrf.mxu3  ;;  %v1430_v23 = vadd.f32 %v4746_v24, %v1429_v20  ;;  %v2247_v56 = vunpack.c.l.bf16 %v1991_v19  ;;  %v1995_v26 = vpack.c.bf16 %v4905_v50, %v4905_v50 }
 0x2cf   : > { %v2365_v31 = vadd.f32 %v2364_v13, %v2238_v22  ;;  %v2625_v15 = vadd.f32 %v2624_v43, %v2498_v30  ;;  %v1992_v22 = vpack.c.bf16 %v4413_v36, %v4413_v36  ;;  %v2507_v54 = vmul.f32 %v2246_v25, %v2246_v25 }
 0x2d0   : > { %v1759_v62 = vadd.f32 %v1758_v34, %v1430_v23 }
 0x2d1   : > { %v2366_v6 = vadd.f32 %v2365_v31, %v2239_v39  ;;  %v2626_v51 = vadd.f32 %v2625_v15, %v2499_v41  ;;  %v2248_v43 = vunpack.c.l.bf16 %v1992_v22  ;;  %v4904_v41 = vld [vmem:[#allocation2_spill] sm:$0xff]  ;;  %v2508_v31 = vmul.f32 %v2247_v56, %v2247_v56 }
 0x2d2   : > { %v4754_v8 = vmax.f32 %v1759_v62, 0.0  ;;  %v1994_v36 = vpack.c.bf16 %v4904_v41, %v4904_v41 }
 0x2d3   : > { %v2367_v63 = vadd.f32 %v2366_v6, %v2240_v59  ;;  %v2627_v52 = vadd.f32 %v2626_v51, %v2500_v53  ;;  %v2249_v53 = vunpack.c.l.bf16 %v1993_v37  ;;  %v4906_v51 = vld [vmem:[#allocation4_spill] sm:$0xff]  ;;  %v2509_v34 = vmul.f32 %v2248_v43, %v2248_v43 }
 0x2d4   : > { %v1996_v20 = vpack.c.bf16 %v4906_v51, %v4906_v51 }
 0x2d5   : > { %v2368_v60 = vadd.f32 %v2367_v63, %v2241_v1  ;;  %v2628_v47 = vadd.f32 %v2627_v52, %v2501_v27  ;;  %v1431_v45 = vpop.f32.mrf.mxu2  ;;  %v2250_v27 = vunpack.c.l.bf16 %v1994_v36  ;;  %v4907_v52 = vld [vmem:[#allocation5_spill] sm:$0xff] }
 0x2d6   : > { %v1432_v44 = vadd.f32 %v4746_v24, %v1431_v45  ;;  %v1760_v49 = vpop.f32.mrf.mxu3  ;;  %v1997_v46 = vpack.c.bf16 %v4907_v52, %v4907_v52 }
 0x2d7   : > { %v2369_v28 = vadd.f32 %v2368_v60, %v2242_v10  ;;  %v2629_v17 = vadd.f32 %v2628_v47, %v2502_v29  ;;  %v2510_v29 = vmul.f32 %v2249_v53, %v2249_v53 }
 0x2d8   : > { %v1761_v21 = vadd.f32 %v1760_v49, %v1432_v44  ;;  %v2253_v19 = vunpack.c.l.bf16 %v1997_v46 }
 0x2d9   : > { %v2370_v32 = vadd.f32 %v2369_v28, %v2243_v0  ;;  %v2630_v55 = vadd.f32 %v2629_v17, %v2503_v4  ;;  %v2251_v0 = vunpack.c.l.bf16 %v1995_v26  ;;  %v1998_v4 = vpack.c.bf16 %v4908_v18, %v4908_v18 }
 0x2da   : > { %v4756_v13 = vmax.f32 %v1761_v21, 0.0  ;;  %v2511_v28 = vmul.f32 %v2250_v27, %v2250_v27  ;;  %v2514_v37 = vmul.f32 %v2253_v19, %v2253_v19 }
 0x2db   : > { %v2371_v35 = vadd.f32 %v2370_v32, %v2244_v16  ;;  %v2631_v2 = vadd.f32 %v2630_v55, %v2504_v48  ;;  %v2252_v16 = vunpack.c.l.bf16 %v1996_v20  ;;  %v4909_v48 = vld [vmem:[#allocation7_spill] sm:$0xff]  ;;  %v2512_v55 = vmul.f32 %v2251_v0, %v2251_v0 }
 0x2dc   : > { %v3811_v15 = vpack.c.bf16 %v4756_v13, %v4754_v8  ;;  %v1999_v32 = vpack.c.bf16 %v4909_v48, %v4909_v48  ;;  %v2254_v49 = vunpack.c.l.bf16 %v1998_v4  ;;  %v4913_v20 = vld [vmem:[#allocation11_spill] sm:$0xff]  ;;  %v4916_v48 = vld [vmem:[#allocation14_spill] sm:$0xff] }
 0x2dd   : > { %v2632_v30 = vadd.f32 %v2631_v2, %v2505_v11  ;;  %v2372_v39 = vadd.f32 %v2371_v35, %v2245_v58  ;;  %v1434_v6 = vpop.f32.mrf.mxu2  ;;  %v2513_v44 = vmul.f32 %v2252_v16, %v2252_v16  ;;  %v4910_v2 = vld [vmem:[#allocation8_spill] sm:$0xff] }
 0x2de   : > { %3883 = vst [vmem:[%s4081_s10 + $0x1e8] sm:$0xff] %v3811_v15   ;;  %v1763_v42 = vpop.f32.mrf.mxu3  ;;  %v1435_v11 = vadd.f32 %v4746_v24, %v1434_v6  ;;  %v2000_v62 = vpack.c.bf16 %v4910_v2, %v4910_v2 }
 0x2df   : > { %v2373_v59 = vadd.f32 %v2372_v39, %v2246_v25  ;;  %v2633_v9 = vadd.f32 %v2632_v30, %v2506_v12  ;;  %v2255_v30 = vunpack.c.l.bf16 %v1999_v32  ;;  %v2006_v32 = vpack.c.bf16 %v4916_v48, %v4916_v48  ;;  %v4923_v48 = vld [vmem:[#allocation21_spill] sm:$0xff] }
 0x2e0   : > { %v1764_v21 = vadd.f32 %v1763_v42, %v1435_v11  ;;  %v2256_v15 = vunpack.c.l.bf16 %v2000_v62  ;;  %v2003_v42 = vpack.c.bf16 %v4913_v20, %v4913_v20  ;;  %v4920_v20 = vld [vmem:[#allocation18_spill] sm:$0xff] }
 0x2e1   : > { %v2374_v1 = vadd.f32 %v2373_v59, %v2247_v56  ;;  %v2634_v7 = vadd.f32 %v2633_v9, %v2507_v54  ;;  %v4911_v54 = vld [vmem:[#allocation9_spill] sm:$0xff]  ;;  %v2515_v9 = vmul.f32 %v2254_v49, %v2254_v49 }
 0x2e2   : > { %v4779_v59 = vmax.f32 %v1764_v21, 0.0 }
 0x2e3   : > { %v2375_v10 = vadd.f32 %v2374_v1, %v2248_v43  ;;  %v2635_v63 = vadd.f32 %v2634_v7, %v2508_v31  ;;  %v2001_v43 = vpack.c.bf16 %v4911_v54, %v4911_v54  ;;  %v2516_v7 = vmul.f32 %v2255_v30, %v2255_v30 }
 0x2e5   : > { %v2376_v60 = vadd.f32 %v2375_v10, %v2249_v53  ;;  %v2636_v47 = vadd.f32 %v2635_v63, %v2509_v34  ;;  %v1436_v25 = vpop.f32.mrf.mxu2  ;;  %v4912_v53 = vld [vmem:[#allocation10_spill] sm:$0xff]  ;;  %v2257_v51 = vunpack.c.l.bf16 %v2001_v43  ;;  %v4914_v63 = vld [vmem:[#allocation12_spill] sm:$0xff] }
 0x2e6   : > { %v1437_v22 = vadd.f32 %v4746_v24, %v1436_v25  ;;  %v1765_v35 = vpop.f32.mrf.mxu3  ;;  %v2002_v50 = vpack.c.bf16 %v4912_v53, %v4912_v53  ;;  %v2004_v52 = vpack.c.bf16 %v4914_v63, %v4914_v63  ;;  %v4917_v25 = vld [vmem:[#allocation15_spill] sm:$0xff]  ;;  %v4919_v53 = vld [vmem:[#allocation17_spill] sm:$0xff] }
 0x2e7   : > { %v2377_v17 = vadd.f32 %v2376_v60, %v2250_v27  ;;  %v2637_v58 = vadd.f32 %v2636_v47, %v2510_v29  ;;  %v2517_v29 = vmul.f32 %v2256_v15, %v2256_v15  ;;  %v2518_v4 = vmul.f32 %v2257_v51, %v2257_v51 }
 0x2e8   : > { %v1766_v39 = vadd.f32 %v1765_v35, %v1437_v22 }
 0x2e9   : > { %v2378_v23 = vadd.f32 %v2377_v17, %v2251_v0  ;;  %v2638_v45 = vadd.f32 %v2637_v58, %v2511_v28  ;;  %v2258_v0 = vunpack.c.l.bf16 %v2002_v50  ;;  %v2259_v28 = vunpack.c.l.bf16 %v2003_v42 }
 0x2ea   : > { %v4781_v31 = vmax.f32 %v1766_v39, 0.0  ;;  %v2009_v50 = vpack.c.bf16 %v4919_v53, %v4919_v53  ;;  %v2010_v42 = vpack.c.bf16 %v4920_v20, %v4920_v20  ;;  %v2018_v53 = vpack.c.bf16 %v4676_v33, %v4676_v33 }
 0x2eb   : > { %v2379_v12 = vadd.f32 %v2378_v23, %v2252_v16  ;;  %v2639_v56 = vadd.f32 %v2638_v45, %v2512_v55  ;;  %v4915_v16 = vld [vmem:[#allocation13_spill] sm:$0xff]  ;;  %v2519_v55 = vmul.f32 %v2258_v0, %v2258_v0 }
 0x2ec   : > { %v3816_v6 = vpack.c.bf16 %v4781_v31, %v4779_v59  ;;  %v2005_v18 = vpack.c.bf16 %v4915_v16, %v4915_v16 }
 0x2ed   : > { %v2380_v41 = vadd.f32 %v2379_v12, %v2253_v19  ;;  %v2640_v36 = vadd.f32 %v2639_v56, %v2513_v44  ;;  %v1439_v10 = vpop.f32.mrf.mxu2  ;;  %v2260_v19 = vunpack.c.l.bf16 %v2004_v52  ;;  %v2007_v44 = vpack.c.bf16 %v4917_v25, %v4917_v25 }
 0x2ee   : > { %3884 = vst [vmem:[%s4081_s10 + $0x1f0] sm:$0xff] %v3816_v6   ;;  %v1768_v46 = vpop.f32.mrf.mxu3  ;;  %v2261_v11 = vunpack.c.l.bf16 %v2005_v18  ;;  %v1440_v2 = vadd.f32 %v4746_v24, %v1439_v10  ;;  %v2262_v56 = vunpack.c.l.bf16 %v2006_v32  ;;  %v4921_v10 = vld [vmem:[#allocation19_spill] sm:$0xff]  ;;  %v2013_v32 = vpack.c.bf16 %v4923_v48, %v4923_v48 }
 0x2ef   : > { %v2381_v26 = vadd.f32 %v2380_v41, %v2254_v49  ;;  %v2641_v1 = vadd.f32 %v2640_v36, %v2514_v37  ;;  %v2520_v49 = vmul.f32 %v2259_v28, %v2259_v28  ;;  %v2521_v12 = vmul.f32 %v2260_v19, %v2260_v19 }
 0x2f0   : > { %v1769_v41 = vadd.f32 %v1768_v46, %v1440_v2  ;;  %v2522_v36 = vmul.f32 %v2261_v11, %v2261_v11  ;;  %v2523_v6 = vmul.f32 %v2262_v56, %v2262_v56  ;;  %v2011_v63 = vpack.c.bf16 %v4921_v10, %v4921_v10 }
 0x2f1   : > { %v2382_v34 = vadd.f32 %v2381_v26, %v2255_v30  ;;  %v2642_v27 = vadd.f32 %v2641_v1, %v2515_v9  ;;  %v4918_v30 = vld [vmem:[#allocation16_spill] sm:$0xff]  ;;  %v2263_v9 = vunpack.c.l.bf16 %v2007_v44  ;;  %v2269_v2 = vunpack.c.l.bf16 %v2013_v32 }
 0x2f2   : > { %v2008_v39 = vpack.c.bf16 %v4918_v30, %v4918_v30 }
 0x2f3   : > { %v2383_v60 = vadd.f32 %v2382_v34, %v2256_v15  ;;  %v2643_v47 = vadd.f32 %v2642_v27, %v2516_v7  ;;  %v4804_v7 = vmax.f32 %v1769_v41, 0.0  ;;  %v2524_v46 = vmul.f32 %v2263_v9, %v2263_v9 }
 0x2f5   : > { %v2384_v17 = vadd.f32 %v2383_v60, %v2257_v51  ;;  %v2644_v58 = vadd.f32 %v2643_v47, %v2517_v29  ;;  %v1441_v62 = vpop.f32.mrf.mxu2  ;;  %v2264_v51 = vunpack.c.l.bf16 %v2008_v39  ;;  %v2265_v29 = vunpack.c.l.bf16 %v2009_v50  ;;  %v4922_v47 = vld [vmem:[#allocation20_spill] sm:$0xff] }
 0x2f6   : > { %v1442_v21 = vadd.f32 %v4746_v24, %v1441_v62  ;;  %v1770_v37 = vpop.f32.mrf.mxu3  ;;  %v2012_v16 = vpack.c.bf16 %v4922_v47, %v4922_v47 }
 0x2f7   : > { %v2385_v23 = vadd.f32 %v2384_v17, %v2258_v0  ;;  %v2645_v45 = vadd.f32 %v2644_v58, %v2518_v4  ;;  %v2525_v18 = vmul.f32 %v2264_v51, %v2264_v51  ;;  %v2266_v4 = vunpack.c.l.bf16 %v2010_v42 }
 0x2f8   : > { %v1771_v15 = vadd.f32 %v1770_v37, %v1442_v21  ;;  %v2267_v58 = vunpack.c.l.bf16 %v2011_v63  ;;  %v2020_v63 = vpack.c.bf16 %v4701_v3, %v4701_v3 }
 0x2f9   : > { %v2386_v22 = vadd.f32 %v2385_v23, %v2259_v28  ;;  %v2646_v35 = vadd.f32 %v2645_v45, %v2519_v55  ;;  %v2268_v45 = vunpack.c.l.bf16 %v2012_v16 }
 0x2fa   : > { %v4806_v24 = vmax.f32 %v1771_v15, 0.0 }
 0x2fb   : > { %v2387_v54 = vadd.f32 %v2386_v22, %v2260_v19  ;;  %v2647_v43 = vadd.f32 %v2646_v35, %v2520_v49  ;;  %v2526_v19 = vmul.f32 %v2265_v29, %v2265_v29  ;;  %v4924_v49 = vld [vmem:[#allocation22_spill] sm:$0xff]  ;;  %v2528_v35 = vmul.f32 %v2267_v58, %v2267_v58 }
 0x2fc   : > { %v3821_v52 = vpack.c.bf16 %v4806_v24, %v4804_v7  ;;  %v2014_v22 = vpack.c.bf16 %v4924_v49, %v4924_v49  ;;  %v2529_v21 = vmul.f32 %v2268_v45, %v2268_v45 }
 0x2fd   : > { %v2388_v26 = vadd.f32 %v2387_v54, %v2261_v11  ;;  %v2648_v1 = vadd.f32 %v2647_v43, %v2521_v12  ;;  %v2527_v11 = vmul.f32 %v2266_v4, %v2266_v4  ;;  %v2016_v54 = vpack.c.bf16 %v4655_v57, %v4655_v57 }
 0x2fe   : > { %3885 = vst [vmem:[%s4081_s10 + $0x1f8] sm:$0xff] %v3821_v52   ;;  %v2270_v39 = vunpack.c.l.bf16 %v2014_v22  ;;  %v2017_v43 = vpack.c.bf16 %v4674_v61, %v4674_v61  ;;  %v2019_v57 = vpack.c.bf16 %v4699_v14, %v4699_v14  ;;  %v2022_v14 = vpack.c.bf16 %v4726_v40, %v4726_v40 }
 0x2ff   : > { %v2389_v34 = vadd.f32 %v2388_v26, %v2262_v56  ;;  %v2649_v27 = vadd.f32 %v2648_v1, %v2522_v36  ;;  %v2015_v56 = vpack.c.bf16 %v4653_v5, %v4653_v5  ;;  %v2530_v36 = vmul.f32 %v2269_v2, %v2269_v2 }
 0x300   : > { %v2531_v5 = vmul.f32 %v2270_v39, %v2270_v39  ;;  %v2272_v1 = vunpack.c.l.bf16 %v2016_v54  ;;  %v2025_v40 = vpack.c.bf16 %v4779_v59, %v4779_v59  ;;  %v2028_v59 = vpack.c.bf16 %v4806_v24, %v4806_v24 }
 0x301   : > { %v2390_v0 = vadd.f32 %v2389_v34, %v2263_v9  ;;  %v2650_v60 = vadd.f32 %v2649_v27, %v2523_v6  ;;  %v2271_v15 = vunpack.c.l.bf16 %v2015_v56  ;;  %v2273_v6 = vunpack.c.l.bf16 %v2017_v43 }
 0x302   : > { %v2274_v34 = vunpack.c.l.bf16 %v2018_v53  ;;  %v2533_v10 = vmul.f32 %v2272_v1, %v2272_v1  ;;  %v2027_v56 = vpack.c.bf16 %v4804_v7, %v4804_v7  ;;  %v2284_v53 = vunpack.c.l.bf16 %v2028_v59 }
 0x303   : > { %v2391_v28 = vadd.f32 %v2390_v0, %v2264_v51  ;;  %v2651_v17 = vadd.f32 %v2650_v60, %v2524_v46  ;;  %v2532_v42 = vmul.f32 %v2271_v15, %v2271_v15  ;;  %v2534_v52 = vmul.f32 %v2273_v6, %v2273_v6 }
 0x304   : > { %v2021_v0 = vpack.c.bf16 %v4724_v38, %v4724_v38  ;;  %v2535_v60 = vmul.f32 %v2274_v34, %v2274_v34 }
 0x305   : > { %v2392_v55 = vadd.f32 %v2391_v28, %v2265_v29  ;;  %v2652_v23 = vadd.f32 %v2651_v17, %v2525_v18  ;;  %v2275_v29 = vunpack.c.l.bf16 %v2019_v57  ;;  %v2276_v18 = vunpack.c.l.bf16 %v2020_v63 }
 0x307   : > { %v2393_v25 = vadd.f32 %v2392_v55, %v2266_v4  ;;  %v2653_v44 = vadd.f32 %v2652_v23, %v2526_v19  ;;  %v2023_v4 = vpack.c.bf16 %v4754_v8, %v4754_v8  ;;  %v2536_v3 = vmul.f32 %v2275_v29, %v2275_v29 }
 0x308   : > { %v2024_v19 = vpack.c.bf16 %v4756_v13, %v4756_v13  ;;  %v2537_v38 = vmul.f32 %v2276_v18, %v2276_v18  ;;  %v2278_v55 = vunpack.c.l.bf16 %v2022_v14 }
 0x309   : > { %v2394_v62 = vadd.f32 %v2393_v25, %v2267_v58  ;;  %v2654_v12 = vadd.f32 %v2653_v44, %v2527_v11  ;;  %v2277_v58 = vunpack.c.l.bf16 %v2021_v0  ;;  %v2279_v23 = vunpack.c.l.bf16 %v2023_v4 }
 0x30a   : > { %v2280_v44 = vunpack.c.l.bf16 %v2024_v19  ;;  %v2539_v22 = vmul.f32 %v2278_v55, %v2278_v55 }
 0x30b   : > { %v2395_v37 = vadd.f32 %v2394_v62, %v2268_v45  ;;  %v2655_v30 = vadd.f32 %v2654_v12, %v2528_v35  ;;  %v2538_v25 = vmul.f32 %v2277_v58, %v2277_v58  ;;  %v2026_v35 = vpack.c.bf16 %v4781_v31, %v4781_v31 }
 0x30c   : > { %v2281_v12 = vunpack.c.l.bf16 %v2025_v40 }
 0x30d   : > { %v2396_v41 = vadd.f32 %v2395_v37, %v2269_v2  ;;  %v2656_v9 = vadd.f32 %v2655_v30, %v2529_v21  ;;  %v2540_v2 = vmul.f32 %v2279_v23, %v2279_v23  ;;  %v2541_v21 = vmul.f32 %v2280_v44, %v2280_v44 }
 0x30f   : > { %v2657_v50 = vadd.f32 %v2656_v9, %v2530_v36  ;;  %v2397_v26 = vadd.f32 %v2396_v41, %v2270_v39  ;;  %v2282_v39 = vunpack.c.l.bf16 %v2026_v35  ;;  %v2542_v41 = vmul.f32 %v2281_v12, %v2281_v12 }
 0x310   : > { %v2283_v36 = vunpack.c.l.bf16 %v2027_v56 }
 0x311   : > { %v2658_v51 = vadd.f32 %v2657_v50, %v2531_v5  ;;  %v2398_v20 = vadd.f32 %v2397_v26, %v2271_v15  ;;  %v2543_v15 = vmul.f32 %v2282_v39, %v2282_v39 }
 0x312   : > { %v2544_v7 = vmul.f32 %v2283_v36, %v2283_v36 }
 0x313   : > { %v2659_v61 = vadd.f32 %v2658_v51, %v2532_v42  ;;  %v2399_v27 = vadd.f32 %v2398_v20, %v2272_v1 }
 0x315   : > { %v2660_v33 = vadd.f32 %v2659_v61, %v2533_v10  ;;  %v2400_v46 = vadd.f32 %v2399_v27, %v2273_v6  ;;  %v2545_v6 = vmul.f32 %v2284_v53, %v2284_v53 }
 0x317   : > { %v2661_v47 = vadd.f32 %v2660_v33, %v2534_v52  ;;  %v2401_v16 = vadd.f32 %v2400_v46, %v2274_v34 }
 0x319   : > { %v2662_v28 = vadd.f32 %v2661_v47, %v2535_v60  ;;  %v2402_v17 = vadd.f32 %v2401_v16, %v2275_v29 }
 0x31b   : > { %v2663_v48 = vadd.f32 %v2662_v28, %v2536_v3  ;;  %v2403_v32 = vadd.f32 %v2402_v17, %v2276_v18 }
 0x31d   : > { %v2664_v45 = vadd.f32 %v2663_v48, %v2537_v38  ;;  %v2404_v11 = vadd.f32 %v2403_v32, %v2277_v58 }
 0x31f   : > { %v2665_v8 = vadd.f32 %v2664_v45, %v2538_v25  ;;  %v2405_v49 = vadd.f32 %v2404_v11, %v2278_v55 }
 0x321   : > { %v2666_v13 = vadd.f32 %v2665_v8, %v2539_v22  ;;  %v2406_v62 = vadd.f32 %v2405_v49, %v2279_v23 }
 0x323   : > { %v2667_v37 = vadd.f32 %v2666_v13, %v2540_v2  ;;  %v2407_v30 = vadd.f32 %v2406_v62, %v2280_v44 }
 0x325   : > { %v2668_v54 = vadd.f32 %v2667_v37, %v2541_v21  ;;  %v2408_v43 = vadd.f32 %v2407_v30, %v2281_v12 }
 0x327   : > { %v2669_v31 = vadd.f32 %v2668_v54, %v2542_v41  ;;  %v2409_v9 = vadd.f32 %v2408_v43, %v2282_v39 }
 0x329   : > { %v2670_v50 = vadd.f32 %v2669_v31, %v2543_v15  ;;  %v2410_v26 = vadd.f32 %v2409_v9, %v2283_v36 }
 0x32b   : > { %v2671_v5 = vadd.f32 %v2670_v50, %v2544_v7  ;;  %v2411_v1 = vadd.f32 %v2410_v26, %v2284_v53 }
 0x32d   : > { %v2412_v51 = vrot.slane %v2411_v1, 4  ;;  %v2672_v20 = vadd.f32 %v2671_v5, %v2545_v6 }
 0x32f   : > { %v2413_v24 = vadd.f32 %v2412_v51, %v2411_v1  ;;  %v2673_v42 = vrot.slane %v2672_v20, 4 }
 0x331   : > { %v2414_v57 = vrot.slane %v2413_v24, 2  ;;  %v2674_v34 = vadd.f32 %v2673_v42, %v2672_v20 }
 0x333   : > { %v2415_v61 = vadd.f32 %v2414_v57, %v2413_v24  ;;  %v2675_v27 = vrot.slane %v2674_v34, 2 }
 0x335   : > { %v2416_v10 = vrot.slane %v2415_v61, 1  ;;  %v2676_v63 = vadd.f32 %v2675_v27, %v2674_v34 }
 0x337   : > { %v2677_v52 = vrot.slane %v2676_v63, 1  ;;  %v2417_v33 = vadd.f32 %v2416_v10, %v2415_v61 }
 0x339   : > { %v2678_v46 = vadd.f32 %v2677_v52, %v2676_v63 }
 0x33b   : > { %v2680_v29 = vsel %vm2679_vm0, %v2417_v33, %v2678_v46 }
 0x33c   : > { %2681 = vst [vmem:[%s214_s21] sm:$0x3] %v2680_v29 }
 0x33d PF: > { %s15_s15 = sadd.s32 1, %s3920_s15  }
 0x33e   : > { %p12_p5 = scmp.ge.s32.totalorder %s15_s15, 6  }
 0x340   :  { %14 = sbr.rel (!%p12_p5) target bundleno = 1 (0x1), region = 74 }

// kernel: pixel_classifier_forward.4
= control target key start
LH: loop header
LB: loop body
LE: loop exit
PB: predicated region body
PF: predicated region fallthrough
CT: control target
= control target key end

     0   :  { %s2559_s15 = smov 0   ;;  %s3965_s0 = inlined_call_operand.vmem [shape: bf16[4096,128], index: 0, kind: input, shape index: {}]   ;;  %s3966_s1 = inlined_call_operand.vmem [shape: bf16[128,32], index: 1, kind: input, shape index: {}]   ;;  %s3967_s2 = inlined_call_operand.vmem [shape: f32[1,32], index: 2, kind: input, shape index: {}]   ;;  %s3968_s3 = inlined_call_operand.vmem [shape: f32[4096,32], index: 3, kind: output, shape index: {0}]   ;;  %s3969_s4 = inlined_call_operand.vmem [shape: f32[4,2,32], index: 4, kind: output, shape index: {1}]  }
   0x1 LB: > { %s2565_s16 = sadd.s32 4294967295, %s2532_s15   ;;  %p2123_p0 = scmp.ge.s32.totalorder %s2532_s15, 1  ;;  %s2532_s15 = sphi %s2559_s15, %s15_s15  }
   0x2   : > { %p166_p1 = scmp.lt.s32.totalorder %s2532_s15, 5 }
   0x4   : > { %p167_p2 = pnand %p2123_p0, %p166_p1 }
   0x6   : > { %170 = sbr.rel (%p167_p2) target bundleno = 632 (0x278), region = 32 }
   0xb   : > { %v2490_v0 = vld [vmem:[%s3966_s1 + $0x38] sm:$0xff]  ;;  %v2489_v1 = vld [vmem:[%s3966_s1 + $0x30] sm:$0xff]  ;;  %v2488_v2 = vld [vmem:[%s3966_s1 + $0x28] sm:$0xff]  ;;  %s2124_s25 = sshll.u32 %s2565_s16, 7  ;;  %vm1249_vm0 = vcmask 261120   ;;  %p208_p4 = scmp.lt.s32.totalorder %s2565_s16, 3 }
   0xc   : > { %792 = vmatpush.bf16.msra.mxu0 %v2490_v0  ;;  %2491 = vmatpush.bf16.msra.mxu1 %v2490_v0  ;;  %v2487_v3 = vld [vmem:[%s3966_s1 + $0x20] sm:$0xff]  ;;  %v2486_v4 = vld [vmem:[%s3966_s1 + $0x18] sm:$0xff]  ;;  %p197_p3 = scmp.lt.s32.totalorder %s2124_s25, 511  ;;  %v2485_v5 = vld [vmem:[%s3966_s1 + $0x10] sm:$0xff]  ;;  %vm2028_vm1 = vcmask 1040384   ;;  %vm2030_vm2 = vcmask 254976  }
   0xd   : > { %2492 = vmatpush.bf16.msra.mxu2 %v2490_v0  ;;  %2493 = vmatpush.bf16.msra.mxu3 %v2490_v0  ;;  %v2484_v6 = vld [vmem:[%s3966_s1 + $0x8] sm:$0xff]  ;;  %v2483_v7 = vld [vmem:[%s3966_s1] sm:$0xff]  ;;  %s4049_s16 = smov (!%p208_p4, %s2565_s16), 3 }
   0xe   : > { %s4047_s25 = smov (!%p197_p3, %s2124_s25), 511  ;;  %v2623_v26 = vld [vmem:[%s3967_s2] ss:$0 sm:$0xff]  ;;  %s2128_s24 = sshll.u32 %s4049_s16, 1 }
   0xf   : > { %s2125_s6 = sshll.u32 %s4047_s25, 2  ;;  %s2127_s14 = sshll.u32 %s4047_s25, 3 }
  0x10   : > { %793 = vmatpush.bf16.msra.mxu0 %v2489_v1  ;;  %2494 = vmatpush.bf16.msra.mxu1 %v2489_v1  ;;  %s2600_s11 = scalar_lea.vmem %s3965_s0, %s2125_s6  ;;  %s2631_s19 = scalar_lea.vmem %s3968_s3, %s2127_s14 }
  0x11   : > { %2495 = vmatpush.bf16.msra.mxu2 %v2489_v1  ;;  %2496 = vmatpush.bf16.msra.mxu3 %v2489_v1  ;;  %v2419_v8 = vld [vmem:[%s2600_s11] sm:$0xff]  ;;  %v2420_v9 = vld [vmem:[%s2600_s11 + $0x8] sm:$0xff]  ;;  %v2421_v11 = vld [vmem:[%s2600_s11 + $0x10] sm:$0xff]  ;;  %s211_s27 = scalar_lea.vmem %s3969_s4, %s2128_s24 }
  0x12   : > { %v2435_v10 = vld [vmem:[%s2600_s11 + $0x80] sm:$0xff]  ;;  %v2436_v12 = vld [vmem:[%s2600_s11 + $0x88] sm:$0xff]  ;;  %v2422_v13 = vld [vmem:[%s2600_s11 + $0x18] sm:$0xff] }
  0x13   : > { %v2437_v14 = vld [vmem:[%s2600_s11 + $0x90] sm:$0xff]  ;;  %v2423_v15 = vld [vmem:[%s2600_s11 + $0x20] sm:$0xff]  ;;  %v2438_v16 = vld [vmem:[%s2600_s11 + $0x98] sm:$0xff] }
  0x14   : > { %794 = vmatpush.bf16.msra.mxu0 %v2488_v2  ;;  %2497 = vmatpush.bf16.msra.mxu1 %v2488_v2  ;;  %v2424_v17 = vld [vmem:[%s2600_s11 + $0x28] sm:$0xff]  ;;  %v2451_v18 = vld [vmem:[%s2600_s11 + $0x100] sm:$0xff]  ;;  %v2425_v20 = vld [vmem:[%s2600_s11 + $0x30] sm:$0xff] }
  0x15   : > { %2498 = vmatpush.bf16.msra.mxu2 %v2488_v2  ;;  %2499 = vmatpush.bf16.msra.mxu3 %v2488_v2  ;;  %v2439_v19 = vld [vmem:[%s2600_s11 + $0xa0] sm:$0xff]  ;;  %v2452_v21 = vld [vmem:[%s2600_s11 + $0x108] sm:$0xff]  ;;  %v2426_v23 = vld [vmem:[%s2600_s11 + $0x38] sm:$0xff] }
  0x16   : > { %v2440_v22 = vld [vmem:[%s2600_s11 + $0xa8] sm:$0xff]  ;;  %v2453_v24 = vld [vmem:[%s2600_s11 + $0x110] sm:$0xff]  ;;  %v2427_v27 = vld [vmem:[%s2600_s11 + $0x40] sm:$0xff] }
  0x17   : > { %v2441_v25 = vld [vmem:[%s2600_s11 + $0xb0] sm:$0xff]  ;;  %v2454_v31 = vld [vmem:[%s2600_s11 + $0x118] sm:$0xff]  ;;  %v2428_v43 = vld [vmem:[%s2600_s11 + $0x48] sm:$0xff] }
  0x18   : > { %795 = vmatpush.bf16.msra.mxu0 %v2487_v3  ;;  %2500 = vmatpush.bf16.msra.mxu1 %v2487_v3  ;;  %v2442_v34 = vld [vmem:[%s2600_s11 + $0xb8] sm:$0xff]  ;;  %v2455_v48 = vld [vmem:[%s2600_s11 + $0x120] sm:$0xff]  ;;  %v2429_v0 = vld [vmem:[%s2600_s11 + $0x50] sm:$0xff] }
  0x19   : > { %2501 = vmatpush.bf16.msra.mxu2 %v2487_v3  ;;  %2502 = vmatpush.bf16.msra.mxu3 %v2487_v3  ;;  %v2467_v49 = vld [vmem:[%s2600_s11 + $0x180] sm:$0xff] }
  0x1a   : > { %v2443_v58 = vld [vmem:[%s2600_s11 + $0xc0] sm:$0xff] }
  0x1c   : > { %796 = vmatpush.bf16.msra.mxu0 %v2486_v4  ;;  %2503 = vmatpush.bf16.msra.mxu1 %v2486_v4 }
  0x1d   : > { %2504 = vmatpush.bf16.msra.mxu2 %v2486_v4  ;;  %2505 = vmatpush.bf16.msra.mxu3 %v2486_v4 }
  0x20   : > { %797 = vmatpush.bf16.msra.mxu0 %v2485_v5  ;;  %2506 = vmatpush.bf16.msra.mxu1 %v2485_v5 }
  0x21   : > { %2507 = vmatpush.bf16.msra.mxu2 %v2485_v5  ;;  %2508 = vmatpush.bf16.msra.mxu3 %v2485_v5 }
  0x24   : > { %798 = vmatpush.bf16.msra.mxu0 %v2484_v6  ;;  %2509 = vmatpush.bf16.msra.mxu1 %v2484_v6 }
  0x25   : > { %2510 = vmatpush.bf16.msra.mxu2 %v2484_v6  ;;  %2511 = vmatpush.bf16.msra.mxu3 %v2484_v6 }
  0x28   : > { %799 = vmatpush.bf16.msra.mxu0 %v2483_v7  ;;  %2512 = vmatpush.bf16.msra.mxu1 %v2483_v7 }
  0x29   : > { %2513 = vmatpush.bf16.msra.mxu2 %v2483_v7  ;;  %2514 = vmatpush.bf16.msra.mxu3 %v2483_v7 }
  0x2b   : > { %800 = vmatmul.bf16.vlgmr.msra.gmra.mxu0 %v2419_v8  ;;  %880 = vmatmul.bf16.vlgmr.msra.gmra.mxu1 %v2435_v10  ;;  %v2456_v10 = vld [vmem:[%s2600_s11 + $0x128] sm:$0xff] }
  0x2c   : > { %960 = vmatmul.bf16.vlgmr.msra.gmra.mxu2 %v2451_v18  ;;  %1040 = vmatmul.bf16.vlgmr.msra.gmra.mxu3 %v2467_v49 }
  0x3b   : > { %805 = vmatmul.bf16.gmra.mxu0 %v2420_v9  ;;  %885 = vmatmul.bf16.gmra.mxu1 %v2436_v12 }
  0x3c   : > { %965 = vmatmul.bf16.gmra.mxu2 %v2452_v21 }
  0x4b   : > { %810 = vmatmul.bf16.gmra.mxu0 %v2421_v11  ;;  %890 = vmatmul.bf16.gmra.mxu1 %v2437_v14  ;;  %v2468_v11 = vld [vmem:[%s2600_s11 + $0x188] sm:$0xff] }
  0x4c   : > { %970 = vmatmul.bf16.gmra.mxu2 %v2453_v24  ;;  %1045 = vmatmul.bf16.gmra.mxu3 %v2468_v11  ;;  %v2446_v11 = vld [vmem:[%s2600_s11 + $0xd8] sm:$0xff] }
  0x5b   : > { %815 = vmatmul.bf16.gmra.mxu0 %v2422_v13  ;;  %895 = vmatmul.bf16.gmra.mxu1 %v2438_v16 }
  0x5c   : > { %975 = vmatmul.bf16.gmra.mxu2 %v2454_v31 }
  0x6b   : > { %820 = vmatmul.bf16.gmra.mxu0 %v2423_v15  ;;  %900 = vmatmul.bf16.gmra.mxu1 %v2439_v19 }
  0x6c   : > { %980 = vmatmul.bf16.gmra.mxu2 %v2455_v48 }
  0x7b   : > { %825 = vmatmul.bf16.gmra.mxu0 %v2424_v17  ;;  %905 = vmatmul.bf16.gmra.mxu1 %v2440_v22 }
  0x7c   : > { %985 = vmatmul.bf16.gmra.mxu2 %v2456_v10 }
  0x8b   : > { %830 = vmatmul.bf16.gmra.mxu0 %v2425_v20  ;;  %910 = vmatmul.bf16.gmra.mxu1 %v2441_v25  ;;  %v2444_v20 = vld [vmem:[%s2600_s11 + $0xc8] sm:$0xff] }
  0x9b   : > { %835 = vmatmul.bf16.gmra.mxu0 %v2426_v23  ;;  %915 = vmatmul.bf16.gmra.mxu1 %v2442_v34 }
  0xa8   : > { %v801_v28 = vpop.f32.mrf.mxu0  ;;  %v881_v56 = vpop.f32.mrf.mxu1 }
  0xa9   : > { %v802_v29 = vadd.f32 %v2623_v26, %v801_v28  ;;  %v882_v3 = vadd.f32 %v2623_v26, %v881_v56 }
  0xab   : > { %v1121_v30 = vmax.f32 %v802_v29, 0.0  ;;  %840 = vmatmul.bf16.gmra.mxu0 %v2427_v27  ;;  %920 = vmatmul.bf16.gmra.mxu1 %v2443_v58  ;;  %v2662_v7 = vmax.f32 %v882_v3, 0.0  ;;  %v2430_v27 = vld [vmem:[%s2600_s11 + $0x58] sm:$0xff] }
  0xad   : > { %1250 = vst.msk [vmem:[%s2631_s19] sm:$0xff] %vm1249_vm0, %v1121_v30  ;;  %v1639_v35 = vmul.f32 %v1121_v30, %v1121_v30  ;;  %v1378_v37 = vsel %vm1249_vm0, %v1121_v30, 0.0 }
  0xae   : > { %1282 = vst.msk [vmem:[%s2631_s19 + $0x100] sm:$0xff] %vm1249_vm0, %v2662_v7 }
  0xaf   : > { %v1767_v41 = vsel %vm1249_vm0, %v1639_v35, 0.0 }
  0xb0   : > { %v803_v32 = vpop.f32.mrf.mxu0  ;;  %v883_v4 = vpop.f32.mrf.mxu1 }
  0xb1   : > { %v804_v33 = vadd.f32 %v2623_v26, %v803_v32  ;;  %v884_v6 = vadd.f32 %v2623_v26, %v883_v4 }
  0xb3   : > { %v1122_v36 = vmax.f32 %v804_v33, 0.0  ;;  %v2664_v9 = vmax.f32 %v884_v6, 0.0 }
  0xb5   : > { %1251 = vst.msk [vmem:[%s2631_s19 + $0x8] sm:$0xff] %vm1249_vm0, %v1122_v36  ;;  %v1379_v38 = vsel %vm1249_vm0, %v1122_v36, 0.0  ;;  %v1640_v39 = vmul.f32 %v1122_v36, %v1122_v36 }
  0xb6   : > { %v1380_v40 = vadd.f32 %v1379_v38, %v1378_v37  ;;  %1283 = vst.msk [vmem:[%s2631_s19 + $0x108] sm:$0xff] %vm1249_vm0, %v2664_v9  ;;  %v2457_v37 = vld [vmem:[%s2600_s11 + $0x130] sm:$0xff] }
  0xb7   : > { %v1768_v42 = vsel %vm1249_vm0, %v1640_v39, 0.0  ;;  %v2469_v38 = vld [vmem:[%s2600_s11 + $0x190] sm:$0xff]  ;;  %990 = vmatmul.bf16.gmra.mxu2 %v2457_v37 }
  0xb8   : > { %v1769_v44 = vadd.f32 %v1768_v42, %v1767_v41  ;;  %v806_v45 = vpop.f32.mrf.mxu0  ;;  %v886_v18 = vpop.f32.mrf.mxu1  ;;  %1050 = vmatmul.bf16.gmra.mxu3 %v2469_v38 }
  0xb9   : > { %v807_v46 = vadd.f32 %v2623_v26, %v806_v45  ;;  %v887_v30 = vadd.f32 %v2623_v26, %v886_v18 }
  0xbb   : > { %v1123_v47 = vmax.f32 %v807_v46, 0.0  ;;  %845 = vmatmul.bf16.gmra.mxu0 %v2428_v43  ;;  %925 = vmatmul.bf16.gmra.mxu1 %v2444_v20  ;;  %v2688_v34 = vmax.f32 %v887_v30, 0.0 }
  0xbd   : > { %1252 = vst.msk [vmem:[%s2631_s19 + $0x10] sm:$0xff] %vm1249_vm0, %v1123_v47  ;;  %v1381_v50 = vsel %vm1249_vm0, %v1123_v47, 0.0  ;;  %v1641_v51 = vmul.f32 %v1123_v47, %v1123_v47  ;;  %v2445_v47 = vld [vmem:[%s2600_s11 + $0xd0] sm:$0xff] }
  0xbe   : > { %v1382_v52 = vadd.f32 %v1381_v50, %v1380_v40  ;;  %1284 = vst.msk [vmem:[%s2631_s19 + $0x110] sm:$0xff] %vm1249_vm0, %v2688_v34 }
  0xbf   : > { %v1770_v53 = vsel %vm1249_vm0, %v1641_v51, 0.0 }
  0xc0   : > { %v1771_v54 = vadd.f32 %v1770_v53, %v1769_v44  ;;  %v808_v55 = vpop.f32.mrf.mxu0  ;;  %v888_v31 = vpop.f32.mrf.mxu1  ;;  %v2431_v53 = vld [vmem:[%s2600_s11 + $0x60] sm:$0xff] }
  0xc1   : > { %v809_v57 = vadd.f32 %v2623_v26, %v808_v55  ;;  %v889_v33 = vadd.f32 %v2623_v26, %v888_v31 }
  0xc3   : > { %v1124_v59 = vmax.f32 %v809_v57, 0.0  ;;  %v2690_v36 = vmax.f32 %v889_v33, 0.0 }
  0xc5   : > { %1253 = vst.msk [vmem:[%s2631_s19 + $0x18] sm:$0xff] %vm1249_vm0, %v1124_v59  ;;  %v1383_v60 = vsel %vm1249_vm0, %v1124_v59, 0.0  ;;  %v1642_v61 = vmul.f32 %v1124_v59, %v1124_v59 }
  0xc6   : > { %v1384_v62 = vadd.f32 %v1383_v60, %v1382_v52  ;;  %1285 = vst.msk [vmem:[%s2631_s19 + $0x118] sm:$0xff] %vm1249_vm0, %v2690_v36 }
  0xc7   : > { %v1772_v63 = vsel %vm1249_vm0, %v1642_v61, 0.0 }
  0xc8   : > { %v1773_v1 = vadd.f32 %v1772_v63, %v1771_v54  ;;  %v811_v2 = vpop.f32.mrf.mxu0  ;;  %v891_v45 = vpop.f32.mrf.mxu1  ;;  %v2458_v63 = vld [vmem:[%s2600_s11 + $0x138] sm:$0xff] }
  0xc9   : > { %v812_v5 = vadd.f32 %v2623_v26, %v811_v2  ;;  %v892_v56 = vadd.f32 %v2623_v26, %v891_v45  ;;  %995 = vmatmul.bf16.gmra.mxu2 %v2458_v63  ;;  %v2460_v63 = vld [vmem:[%s2600_s11 + $0x148] sm:$0xff] }
  0xcb   : > { %v1125_v8 = vmax.f32 %v812_v5, 0.0  ;;  %850 = vmatmul.bf16.gmra.mxu0 %v2429_v0  ;;  %930 = vmatmul.bf16.gmra.mxu1 %v2445_v47  ;;  %v2714_v60 = vmax.f32 %v892_v56, 0.0  ;;  %v2470_v0 = vld [vmem:[%s2600_s11 + $0x198] sm:$0xff]  ;;  %v2433_v47 = vld [vmem:[%s2600_s11 + $0x70] sm:$0xff] }
  0xcc   : > { %1055 = vmatmul.bf16.gmra.mxu3 %v2470_v0  ;;  %v2472_v0 = vld [vmem:[%s2600_s11 + $0x1a8] sm:$0xff] }
  0xcd   : > { %1254 = vst.msk [vmem:[%s2631_s19 + $0x20] sm:$0xff] %vm1249_vm0, %v1125_v8  ;;  %v1385_v12 = vsel %vm1249_vm0, %v1125_v8, 0.0  ;;  %v1643_v13 = vmul.f32 %v1125_v8, %v1125_v8 }
  0xce   : > { %v1386_v14 = vadd.f32 %v1385_v12, %v1384_v62  ;;  %1286 = vst.msk [vmem:[%s2631_s19 + $0x120] sm:$0xff] %vm1249_vm0, %v2714_v60 }
  0xcf   : > { %v1774_v15 = vsel %vm1249_vm0, %v1643_v13, 0.0 }
  0xd0   : > { %v1775_v16 = vadd.f32 %v1774_v15, %v1773_v1  ;;  %v813_v17 = vpop.f32.mrf.mxu0  ;;  %v893_v57 = vpop.f32.mrf.mxu1 }
  0xd1   : > { %v814_v19 = vadd.f32 %v2623_v26, %v813_v17  ;;  %v894_v59 = vadd.f32 %v2623_v26, %v893_v57  ;;  %v2432_v17 = vld [vmem:[%s2600_s11 + $0x68] sm:$0xff] }
  0xd3   : > { %v1126_v21 = vmax.f32 %v814_v19, 0.0  ;;  %v2716_v62 = vmax.f32 %v894_v59, 0.0 }
  0xd5   : > { %1255 = vst.msk [vmem:[%s2631_s19 + $0x28] sm:$0xff] %vm1249_vm0, %v1126_v21  ;;  %v1387_v22 = vsel %vm1249_vm0, %v1126_v21, 0.0  ;;  %v1644_v23 = vmul.f32 %v1126_v21, %v1126_v21 }
  0xd6   : > { %v1388_v24 = vadd.f32 %v1387_v22, %v1386_v14  ;;  %1287 = vst.msk [vmem:[%s2631_s19 + $0x128] sm:$0xff] %vm1249_vm0, %v2716_v62 }
  0xd7   : > { %v1776_v25 = vsel %vm1249_vm0, %v1644_v23, 0.0 }
  0xd8   : > { %v1777_v28 = vadd.f32 %v1776_v25, %v1775_v16  ;;  %v816_v29 = vpop.f32.mrf.mxu0  ;;  %v896_v8 = vpop.f32.mrf.mxu1 }
  0xd9   : > { %v817_v32 = vadd.f32 %v2623_v26, %v816_v29  ;;  %v897_v20 = vadd.f32 %v2623_v26, %v896_v8  ;;  %v2471_v29 = vld [vmem:[%s2600_s11 + $0x1a0] sm:$0xff] }
  0xdb   : > { %v1127_v35 = vmax.f32 %v817_v32, 0.0  ;;  %855 = vmatmul.bf16.gmra.mxu0 %v2430_v27  ;;  %935 = vmatmul.bf16.gmra.mxu1 %v2446_v11 }
  0xdc   : > { %1060 = vmatmul.bf16.gmra.mxu3 %v2471_v29 }
  0xdd   : > { %1256 = vst.msk [vmem:[%s2631_s19 + $0x30] sm:$0xff] %vm1249_vm0, %v1127_v35  ;;  %v1389_v39 = vsel %vm1249_vm0, %v1127_v35, 0.0  ;;  %v1645_v40 = vmul.f32 %v1127_v35, %v1127_v35 }
  0xde   : > { %v1390_v41 = vadd.f32 %v1389_v39, %v1388_v24  ;;  %v2740_v24 = vmax.f32 %v897_v20, 0.0 }
  0xdf   : > { %v1778_v42 = vsel %vm1249_vm0, %v1645_v40, 0.0  ;;  %v961_v40 = vpop.f32.mrf.mxu2 }
  0xe0   : > { %v1779_v43 = vadd.f32 %v1778_v42, %v1777_v28  ;;  %v818_v44 = vpop.f32.mrf.mxu0  ;;  %v898_v21 = vpop.f32.mrf.mxu1  ;;  %v2459_v28 = vld [vmem:[%s2600_s11 + $0x140] sm:$0xff]  ;;  %1288 = vst.msk [vmem:[%s2631_s19 + $0x130] sm:$0xff] %vm1249_vm0, %v2740_v24 }
  0xe1   : > { %v819_v46 = vadd.f32 %v2623_v26, %v818_v44  ;;  %v899_v23 = vadd.f32 %v2623_v26, %v898_v21  ;;  %1000 = vmatmul.bf16.gmra.mxu2 %v2459_v28 }
  0xe3   : > { %v1128_v48 = vmax.f32 %v819_v46, 0.0  ;;  %v2742_v27 = vmax.f32 %v899_v23, 0.0 }
  0xe5   : > { %1257 = vst.msk [vmem:[%s2631_s19 + $0x38] sm:$0xff] %vm1249_vm0, %v1128_v48  ;;  %v1391_v49 = vsel %vm1249_vm0, %v1128_v48, 0.0  ;;  %v1646_v50 = vmul.f32 %v1128_v48, %v1128_v48 }
  0xe6   : > { %v1392_v51 = vadd.f32 %v1391_v49, %v1390_v41  ;;  %1289 = vst.msk [vmem:[%s2631_s19 + $0x138] sm:$0xff] %vm1249_vm0, %v2742_v27  ;;  %v2447_v41 = vld [vmem:[%s2600_s11 + $0xe0] sm:$0xff] }
  0xe7   : > { %v1780_v52 = vsel %vm1249_vm0, %v1646_v50, 0.0 }
  0xe8   : > { %v1781_v54 = vadd.f32 %v1780_v52, %v1779_v43  ;;  %v821_v55 = vpop.f32.mrf.mxu0  ;;  %v901_v38 = vpop.f32.mrf.mxu1 }
  0xe9   : > { %v822_v58 = vadd.f32 %v2623_v26, %v821_v55  ;;  %v902_v50 = vadd.f32 %v2623_v26, %v901_v38  ;;  %v963_v55 = vpop.f32.mrf.mxu2  ;;  %v2461_v38 = vld [vmem:[%s2600_s11 + $0x150] sm:$0xff] }
  0xeb   : > { %v1129_v61 = vmax.f32 %v822_v58, 0.0  ;;  %860 = vmatmul.bf16.gmra.mxu0 %v2431_v53  ;;  %940 = vmatmul.bf16.gmra.mxu1 %v2447_v41  ;;  %v2767_v56 = vmax.f32 %v902_v50, 0.0  ;;  %v964_v58 = vadd.f32 %v2623_v26, %v963_v55  ;;  %v2449_v50 = vld [vmem:[%s2600_s11 + $0xf0] sm:$0xff] }
  0xec   : > { %1065 = vmatmul.bf16.gmra.mxu3 %v2472_v0 }
  0xed   : > { %1258 = vst.msk [vmem:[%s2631_s19 + $0x40] sm:$0xff] %vm1249_vm0, %v1129_v61  ;;  %v1393_v1 = vsel %vm1249_vm0, %v1129_v61, 0.0  ;;  %v1647_v2 = vmul.f32 %v1129_v61, %v1129_v61 }
  0xee   : > { %v1394_v3 = vadd.f32 %v1393_v1, %v1392_v51  ;;  %v962_v51 = vadd.f32 %v2623_v26, %v961_v40  ;;  %1290 = vst.msk [vmem:[%s2631_s19 + $0x140] sm:$0xff] %vm1249_vm0, %v2767_v56 }
  0xef   : > { %v1782_v4 = vsel %vm1249_vm0, %v1647_v2, 0.0 }
  0xf0   : > { %v1783_v5 = vadd.f32 %v1782_v4, %v1781_v54  ;;  %v823_v6 = vpop.f32.mrf.mxu0  ;;  %v903_v52 = vpop.f32.mrf.mxu1  ;;  %v2769_v57 = vmax.f32 %v962_v51, 0.0  ;;  %v2785_v4 = vmax.f32 %v964_v58, 0.0 }
  0xf1   : > { %v824_v10 = vadd.f32 %v2623_v26, %v823_v6  ;;  %v904_v54 = vadd.f32 %v2623_v26, %v903_v52  ;;  %1005 = vmatmul.bf16.gmra.mxu2 %v2460_v63 }
  0xf2   : > { %1314 = vst.msk [vmem:[%s2631_s19 + $0x200] sm:$0xff] %vm1249_vm0, %v2769_v57 }
  0xf3   : > { %v1130_v12 = vmax.f32 %v824_v10, 0.0  ;;  %v2772_v61 = vmax.f32 %v904_v54, 0.0  ;;  %1315 = vst.msk [vmem:[%s2631_s19 + $0x208] sm:$0xff] %vm1249_vm0, %v2785_v4 }
  0xf5   : > { %1259 = vst.msk [vmem:[%s2631_s19 + $0x48] sm:$0xff] %vm1249_vm0, %v1130_v12  ;;  %v1395_v13 = vsel %vm1249_vm0, %v1130_v12, 0.0  ;;  %v1648_v14 = vmul.f32 %v1130_v12, %v1130_v12  ;;  %v966_v12 = vpop.f32.mrf.mxu2 }
  0xf6   : > { %v1396_v15 = vadd.f32 %v1395_v13, %v1394_v3  ;;  %1291 = vst.msk [vmem:[%s2631_s19 + $0x148] sm:$0xff] %vm1249_vm0, %v2772_v61  ;;  %v2448_v13 = vld [vmem:[%s2600_s11 + $0xe8] sm:$0xff]  ;;  %v967_v23 = vadd.f32 %v2623_v26, %v966_v12 }
  0xf7   : > { %v1784_v16 = vsel %vm1249_vm0, %v1648_v14, 0.0 }
  0xf8   : > { %v1785_v18 = vadd.f32 %v1784_v16, %v1783_v5  ;;  %v826_v19 = vpop.f32.mrf.mxu0  ;;  %v906_v10 = vpop.f32.mrf.mxu1 }
  0xf9   : > { %v827_v22 = vadd.f32 %v2623_v26, %v826_v19  ;;  %v2434_v19 = vld [vmem:[%s2600_s11 + $0x78] sm:$0xff] }
  0xfb   : > { %v1131_v25 = vmax.f32 %v827_v22, 0.0  ;;  %865 = vmatmul.bf16.gmra.mxu0 %v2432_v17  ;;  %945 = vmatmul.bf16.gmra.mxu1 %v2448_v13  ;;  %v907_v22 = vadd.f32 %v2623_v26, %v906_v10  ;;  %v2462_v13 = vld [vmem:[%s2600_s11 + $0x158] sm:$0xff] }
  0xfd   : > { %1260 = vst.msk [vmem:[%s2631_s19 + $0x50] sm:$0xff] %vm1249_vm0, %v1131_v25  ;;  %v1397_v30 = vsel %vm1249_vm0, %v1131_v25, 0.0  ;;  %v1649_v31 = vmul.f32 %v1131_v25, %v1131_v25 }
  0xfe   : > { %v1398_v32 = vadd.f32 %v1397_v30, %v1396_v15  ;;  %v968_v30 = vpop.f32.mrf.mxu2 }
  0xff   : > { %v1786_v33 = vsel %vm1249_vm0, %v1649_v31, 0.0  ;;  %v2805_v31 = vmax.f32 %v907_v22, 0.0 }
 0x100   : > { %v1787_v35 = vadd.f32 %v1786_v33, %v1785_v18  ;;  %v828_v37 = vpop.f32.mrf.mxu0  ;;  %v908_v25 = vpop.f32.mrf.mxu1  ;;  %v969_v33 = vadd.f32 %v2623_v26, %v968_v30 }
 0x101   : > { %v829_v39 = vadd.f32 %v2623_v26, %v828_v37  ;;  %v909_v29 = vadd.f32 %v2623_v26, %v908_v25  ;;  %1292 = vst.msk [vmem:[%s2631_s19 + $0x150] sm:$0xff] %vm1249_vm0, %v2805_v31  ;;  %1010 = vmatmul.bf16.gmra.mxu2 %v2461_v38 }
 0x103   : > { %v1132_v42 = vmax.f32 %v829_v39, 0.0  ;;  %v2810_v37 = vmax.f32 %v909_v29, 0.0  ;;  %v2473_v39 = vld [vmem:[%s2600_s11 + $0x1b0] sm:$0xff] }
 0x104   : > { %1070 = vmatmul.bf16.gmra.mxu3 %v2473_v39 }
 0x105   : > { %1261 = vst.msk [vmem:[%s2631_s19 + $0x58] sm:$0xff] %vm1249_vm0, %v1132_v42  ;;  %v1399_v43 = vsel %vm1249_vm0, %v1132_v42, 0.0  ;;  %v1650_v44 = vmul.f32 %v1132_v42, %v1132_v42 }
 0x106   : > { %v1400_v45 = vadd.f32 %v1399_v43, %v1398_v32  ;;  %v2807_v32 = vmax.f32 %v967_v23, 0.0  ;;  %v2823_v43 = vmax.f32 %v969_v33, 0.0  ;;  %1293 = vst.msk [vmem:[%s2631_s19 + $0x158] sm:$0xff] %vm1249_vm0, %v2810_v37 }
 0x107   : > { %v1788_v46 = vsel %vm1249_vm0, %v1650_v44, 0.0 }
 0x108   : > { %v1789_v48 = vadd.f32 %v1788_v46, %v1787_v35  ;;  %v831_v49 = vpop.f32.mrf.mxu0  ;;  %1316 = vst.msk [vmem:[%s2631_s19 + $0x210] sm:$0xff] %vm1249_vm0, %v2807_v32 }
 0x109   : > { %v832_v53 = vadd.f32 %v2623_v26, %v831_v49  ;;  %1317 = vst.msk [vmem:[%s2631_s19 + $0x218] sm:$0xff] %vm1249_vm0, %v2823_v43  ;;  %v971_v49 = vpop.f32.mrf.mxu2 }
 0x10a   : > { %v972_v0 = vadd.f32 %v2623_v26, %v971_v49 }
 0x10b   : > { %v1133_v59 = vmax.f32 %v832_v53, 0.0  ;;  %870 = vmatmul.bf16.gmra.mxu0 %v2433_v47  ;;  %v911_v47 = vpop.f32.mrf.mxu1  ;;  %950 = vmatmul.bf16.gmra.mxu1 %v2449_v50 }
 0x10c   : > { %v912_v63 = vadd.f32 %v2623_v26, %v911_v47 }
 0x10d   : > { %1262 = vst.msk [vmem:[%s2631_s19 + $0x60] sm:$0xff] %vm1249_vm0, %v1133_v59  ;;  %v1401_v1 = vsel %vm1249_vm0, %v1133_v59, 0.0  ;;  %v1651_v2 = vmul.f32 %v1133_v59, %v1133_v59 }
 0x10e   : > { %v1402_v3 = vadd.f32 %v1401_v1, %v1400_v45 }
 0x10f   : > { %v1790_v5 = vsel %vm1249_vm0, %v1651_v2, 0.0 }
 0x110   : > { %v1791_v6 = vadd.f32 %v1790_v5, %v1789_v48  ;;  %v833_v8 = vpop.f32.mrf.mxu0 }
 0x111   : > { %v834_v11 = vadd.f32 %v2623_v26, %v833_v8  ;;  %v973_v5 = vpop.f32.mrf.mxu2  ;;  %v2844_v8 = vmax.f32 %v972_v0, 0.0  ;;  %1015 = vmatmul.bf16.gmra.mxu2 %v2462_v13 }
 0x112   : > { %v974_v10 = vadd.f32 %v2623_v26, %v973_v5 }
 0x113   : > { %v1134_v14 = vmax.f32 %v834_v11, 0.0  ;;  %v913_v1 = vpop.f32.mrf.mxu1  ;;  %1318 = vst.msk [vmem:[%s2631_s19 + $0x220] sm:$0xff] %vm1249_vm0, %v2844_v8 }
 0x115   : > { %1263 = vst.msk [vmem:[%s2631_s19 + $0x68] sm:$0xff] %vm1249_vm0, %v1134_v14  ;;  %v1403_v15 = vsel %vm1249_vm0, %v1134_v14, 0.0  ;;  %v1652_v16 = vmul.f32 %v1134_v14, %v1134_v14  ;;  %v2474_v14 = vld [vmem:[%s2600_s11 + $0x1b8] sm:$0xff] }
 0x116   : > { %v1404_v17 = vadd.f32 %v1403_v15, %v1402_v3  ;;  %v914_v3 = vadd.f32 %v2623_v26, %v913_v1  ;;  %1075 = vmatmul.bf16.gmra.mxu3 %v2474_v14 }
 0x117   : > { %v1792_v18 = vsel %vm1249_vm0, %v1652_v16, 0.0 }
 0x118   : > { %v1793_v20 = vadd.f32 %v1792_v18, %v1791_v6  ;;  %v836_v21 = vpop.f32.mrf.mxu0  ;;  %v2842_v6 = vmax.f32 %v912_v63, 0.0  ;;  %v2847_v12 = vmax.f32 %v914_v3, 0.0  ;;  %v2860_v18 = vmax.f32 %v974_v10, 0.0 }
 0x119   : > { %v837_v28 = vadd.f32 %v2623_v26, %v836_v21  ;;  %v976_v25 = vpop.f32.mrf.mxu2 }
 0x11a   : > { %1294 = vst.msk [vmem:[%s2631_s19 + $0x160] sm:$0xff] %vm1249_vm0, %v2842_v6 }
 0x11b   : > { %v1135_v35 = vmax.f32 %v837_v28, 0.0  ;;  %875 = vmatmul.bf16.gmra.mxu0 %v2434_v19  ;;  %1295 = vst.msk [vmem:[%s2631_s19 + $0x168] sm:$0xff] %vm1249_vm0, %v2847_v12  ;;  %v916_v22 = vpop.f32.mrf.mxu1  ;;  %v2450_v28 = vld [vmem:[%s2600_s11 + $0xf8] sm:$0xff] }
 0x11c   : > { %1319 = vst.msk [vmem:[%s2631_s19 + $0x228] sm:$0xff] %vm1249_vm0, %v2860_v18  ;;  %955 = vmatmul.bf16.gmra.mxu1 %v2450_v28 }
 0x11d   : > { %1264 = vst.msk [vmem:[%s2631_s19 + $0x70] sm:$0xff] %vm1249_vm0, %v1135_v35  ;;  %v1405_v40 = vsel %vm1249_vm0, %v1135_v35, 0.0  ;;  %v1653_v41 = vmul.f32 %v1135_v35, %v1135_v35 }
 0x11e   : > { %v1406_v42 = vadd.f32 %v1405_v40, %v1404_v17 }
 0x11f   : > { %v1794_v44 = vsel %vm1249_vm0, %v1653_v41, 0.0  ;;  %v917_v41 = vadd.f32 %v2623_v26, %v916_v22 }
 0x120   : > { %v1795_v45 = vadd.f32 %v1794_v44, %v1793_v20  ;;  %v838_v46 = vpop.f32.mrf.mxu0 }
 0x121   : > { %v839_v48 = vadd.f32 %v2623_v26, %v838_v46  ;;  %v978_v47 = vpop.f32.mrf.mxu2 }
 0x122   : > { %v979_v50 = vadd.f32 %v2623_v26, %v978_v47 }
 0x123   : > { %v1136_v51 = vmax.f32 %v839_v48, 0.0  ;;  %v918_v44 = vpop.f32.mrf.mxu1  ;;  %v2879_v48 = vmax.f32 %v917_v41, 0.0 }
 0x124   : > { %v919_v46 = vadd.f32 %v2623_v26, %v918_v44  ;;  %v2897_v63 = vmax.f32 %v979_v50, 0.0  ;;  %v2476_v44 = vld [vmem:[%s2600_s11 + $0x1c8] sm:$0xff] }
 0x125   : > { %1265 = vst.msk [vmem:[%s2631_s19 + $0x78] sm:$0xff] %vm1249_vm0, %v1136_v51  ;;  %v1407_v52 = vsel %vm1249_vm0, %v1136_v51, 0.0  ;;  %v1654_v53 = vmul.f32 %v1136_v51, %v1136_v51 }
 0x126   : > { %v1408_v54 = vadd.f32 %v1407_v52, %v1406_v42  ;;  %v977_v42 = vadd.f32 %v2623_v26, %v976_v25  ;;  %v2884_v52 = vmax.f32 %v919_v46, 0.0  ;;  %1296 = vst.msk [vmem:[%s2631_s19 + $0x170] sm:$0xff] %vm1249_vm0, %v2879_v48 }
 0x127   : > { %v1796_v55 = vsel %vm1249_vm0, %v1654_v53, 0.0  ;;  %v2463_v53 = vld [vmem:[%s2600_s11 + $0x160] sm:$0xff]  ;;  %1321 = vst.msk [vmem:[%s2631_s19 + $0x238] sm:$0xff] %vm1249_vm0, %v2897_v63 }
 0x128   : > { %v1797_v58 = vadd.f32 %v1796_v55, %v1795_v45  ;;  %v841_v59 = vpop.f32.mrf.mxu0  ;;  %v2881_v49 = vmax.f32 %v977_v42, 0.0  ;;  %1020 = vmatmul.bf16.gmra.mxu2 %v2463_v53  ;;  %1297 = vst.msk [vmem:[%s2631_s19 + $0x178] sm:$0xff] %vm1249_vm0, %v2884_v52  ;;  %v2464_v42 = vld [vmem:[%s2600_s11 + $0x168] sm:$0xff] }
 0x129   : > { %v842_v2 = vadd.f32 %v2623_v26, %v841_v59  ;;  %v981_v10 = vpop.f32.mrf.mxu2 }
 0x12a   : > { %1320 = vst.msk [vmem:[%s2631_s19 + $0x230] sm:$0xff] %vm1249_vm0, %v2881_v49  ;;  %v982_v22 = vadd.f32 %v2623_v26, %v981_v10 }
 0x12b   : > { %v1137_v11 = vmax.f32 %v842_v2, 0.0  ;;  %v921_v3 = vpop.f32.mrf.mxu1 }
 0x12d   : > { %1266 = vst.msk [vmem:[%s2631_s19 + $0x80] sm:$0xff] %vm1249_vm0, %v1137_v11  ;;  %v1409_v15 = vsel %vm1249_vm0, %v1137_v11, 0.0  ;;  %v1655_v16 = vmul.f32 %v1137_v11, %v1137_v11  ;;  %v1041_v11 = vpop.f32.mrf.mxu3 }
 0x12e   : > { %v1410_v17 = vadd.f32 %v1409_v15, %v1408_v54  ;;  %v2475_v54 = vld [vmem:[%s2600_s11 + $0x1c0] sm:$0xff] }
 0x12f   : > { %v1798_v19 = vsel %vm1249_vm0, %v1655_v16, 0.0  ;;  %1080 = vmatmul.bf16.gmra.mxu3 %v2475_v54 }
 0x130   : > { %v1799_v20 = vadd.f32 %v1798_v19, %v1797_v58  ;;  %v843_v21 = vpop.f32.mrf.mxu0 }
 0x131   : > { %v844_v23 = vadd.f32 %v2623_v26, %v843_v21  ;;  %v922_v21 = vadd.f32 %v2623_v26, %v921_v3 }
 0x133   : > { %v1138_v29 = vmax.f32 %v844_v23, 0.0  ;;  %v1042_v23 = vadd.f32 %v2623_v26, %v1041_v11  ;;  %v923_v25 = vpop.f32.mrf.mxu1 }
 0x135   : > { %1267 = vst.msk [vmem:[%s2631_s19 + $0x88] sm:$0xff] %vm1249_vm0, %v1138_v29  ;;  %v1411_v30 = vsel %vm1249_vm0, %v1138_v29, 0.0  ;;  %v1656_v33 = vmul.f32 %v1138_v29, %v1138_v29  ;;  %v924_v29 = vadd.f32 %v2623_v26, %v923_v25 }
 0x136   : > { %v1412_v35 = vadd.f32 %v1411_v30, %v1410_v17  ;;  %v983_v30 = vpop.f32.mrf.mxu2 }
 0x137   : > { %v1800_v38 = vsel %vm1249_vm0, %v1656_v33, 0.0  ;;  %v1043_v33 = vpop.f32.mrf.mxu3  ;;  %v984_v41 = vadd.f32 %v2623_v26, %v983_v30  ;;  %v2477_v30 = vld [vmem:[%s2600_s11 + $0x1d0] sm:$0xff] }
 0x138   : > { %v1801_v39 = vadd.f32 %v1800_v38, %v1799_v20  ;;  %v846_v40 = vpop.f32.mrf.mxu0  ;;  %v2918_v38 = vmax.f32 %v982_v22, 0.0  ;;  %v1044_v46 = vadd.f32 %v2623_v26, %v1043_v33  ;;  %1025 = vmatmul.bf16.gmra.mxu2 %v2464_v42 }
 0x139   : > { %v847_v45 = vadd.f32 %v2623_v26, %v846_v40  ;;  %v2920_v40 = vmax.f32 %v1042_v23, 0.0  ;;  %v2943_v54 = vmax.f32 %v984_v41, 0.0 }
 0x13a   : > { %1322 = vst.msk [vmem:[%s2631_s19 + $0x240] sm:$0xff] %vm1249_vm0, %v2918_v38 }
 0x13b   : > { %v1139_v51 = vmax.f32 %v847_v45, 0.0  ;;  %4008 = vst [vmem:[#allocation2_spill] sm:$0xff] %v2920_v40  ;;  %v2928_v45 = vmax.f32 %v924_v29, 0.0  ;;  %v2465_v29 = vld [vmem:[%s2600_s11 + $0x170] sm:$0xff] }
 0x13c   : > { %1346 = vst.msk [vmem:[%s2631_s19 + $0x300] sm:$0xff] %vm1249_vm0, %v2920_v40 }
 0x13d   : > { %1268 = vst.msk [vmem:[%s2631_s19 + $0x90] sm:$0xff] %vm1249_vm0, %v1139_v51  ;;  %v1413_v55 = vsel %vm1249_vm0, %v1139_v51, 0.0  ;;  %v1657_v58 = vmul.f32 %v1139_v51, %v1139_v51 }
 0x13e   : > { %v1414_v59 = vadd.f32 %v1413_v55, %v1412_v35  ;;  %v2916_v35 = vmax.f32 %v922_v21, 0.0  ;;  %4009 = vst [vmem:[#allocation3_spill] sm:$0xff] %v2943_v54 }
 0x13f   : > { %v1802_v0 = vsel %vm1249_vm0, %v1657_v58, 0.0  ;;  %1085 = vmatmul.bf16.gmra.mxu3 %v2476_v44  ;;  %1299 = vst.msk [vmem:[%s2631_s19 + $0x188] sm:$0xff] %vm1249_vm0, %v2928_v45  ;;  %v1046_v3 = vpop.f32.mrf.mxu3 }
 0x140   : > { %v1803_v1 = vadd.f32 %v1802_v0, %v1801_v39  ;;  %v848_v2 = vpop.f32.mrf.mxu0  ;;  %1298 = vst.msk [vmem:[%s2631_s19 + $0x180] sm:$0xff] %vm1249_vm0, %v2916_v35  ;;  %v926_v0 = vpop.f32.mrf.mxu1 }
 0x141   : > { %v849_v5 = vadd.f32 %v2623_v26, %v848_v2  ;;  %1323 = vst.msk [vmem:[%s2631_s19 + $0x248] sm:$0xff] %vm1249_vm0, %v2943_v54  ;;  %v986_v2 = vpop.f32.mrf.mxu2  ;;  %v927_v11 = vadd.f32 %v2623_v26, %v926_v0 }
 0x143   : > { %v1140_v13 = vmax.f32 %v849_v5, 0.0  ;;  %v2969_v21 = vmax.f32 %v927_v11, 0.0 }
 0x145   : > { %1269 = vst.msk [vmem:[%s2631_s19 + $0x98] sm:$0xff] %vm1249_vm0, %v1140_v13  ;;  %v1415_v14 = vsel %vm1249_vm0, %v1140_v13, 0.0  ;;  %v1658_v15 = vmul.f32 %v1140_v13, %v1140_v13  ;;  %v987_v13 = vadd.f32 %v2623_v26, %v986_v2 }
 0x146   : > { %v1416_v16 = vadd.f32 %v1415_v14, %v1414_v59  ;;  %v2950_v59 = vmax.f32 %v1044_v46, 0.0  ;;  %v1047_v14 = vadd.f32 %v2623_v26, %v1046_v3  ;;  %1300 = vst.msk [vmem:[%s2631_s19 + $0x190] sm:$0xff] %vm1249_vm0, %v2969_v21 }
 0x147   : > { %v1804_v17 = vsel %vm1249_vm0, %v1658_v15, 0.0  ;;  %v2971_v22 = vmax.f32 %v987_v13, 0.0 }
 0x148   : > { %v1805_v19 = vadd.f32 %v1804_v17, %v1803_v1  ;;  %v851_v20 = vpop.f32.mrf.mxu0  ;;  %4010 = vst [vmem:[#allocation4_spill] sm:$0xff] %v2950_v59  ;;  %v928_v15 = vpop.f32.mrf.mxu1  ;;  %v2975_v25 = vmax.f32 %v1047_v14, 0.0  ;;  %1030 = vmatmul.bf16.gmra.mxu2 %v2465_v29  ;;  %v2466_v29 = vld [vmem:[%s2600_s11 + $0x178] sm:$0xff] }
 0x149   : > { %v852_v28 = vadd.f32 %v2623_v26, %v851_v20  ;;  %1347 = vst.msk [vmem:[%s2631_s19 + $0x308] sm:$0xff] %vm1249_vm0, %v2950_v59  ;;  %v929_v17 = vadd.f32 %v2623_v26, %v928_v15  ;;  %v1048_v20 = vpop.f32.mrf.mxu3 }
 0x14a   : > { %4011 = vst [vmem:[#allocation5_spill] sm:$0xff] %v2971_v22 }
 0x14b   : > { %v1141_v39 = vmax.f32 %v852_v28, 0.0  ;;  %4012 = vst [vmem:[#allocation6_spill] sm:$0xff] %v2975_v25  ;;  %v2983_v33 = vmax.f32 %v929_v17, 0.0 }
 0x14c   : > { %1324 = vst.msk [vmem:[%s2631_s19 + $0x250] sm:$0xff] %vm1249_vm0, %v2971_v22 }
 0x14d   : > { %1270 = vst.msk [vmem:[%s2631_s19 + $0xa0] sm:$0xff] %vm1249_vm0, %v1141_v39  ;;  %v1417_v47 = vsel %vm1249_vm0, %v1141_v39, 0.0  ;;  %v1659_v50 = vmul.f32 %v1141_v39, %v1141_v39  ;;  %v1049_v39 = vadd.f32 %v2623_v26, %v1048_v20 }
 0x14e   : > { %v2934_v51 = vadd.f32 %v1417_v47, %v1416_v16  ;;  %1348 = vst.msk [vmem:[%s2631_s19 + $0x310] sm:$0xff] %vm1249_vm0, %v2975_v25 }
 0x14f   : > { %v1806_v53 = vsel %vm1249_vm0, %v1659_v50, 0.0  ;;  %1090 = vmatmul.bf16.gmra.mxu3 %v2477_v30  ;;  %1301 = vst.msk [vmem:[%s2631_s19 + $0x198] sm:$0xff] %vm1249_vm0, %v2983_v33  ;;  %v3000_v44 = vmax.f32 %v1049_v39, 0.0  ;;  %v2478_v30 = vld [vmem:[%s2600_s11 + $0x1d8] sm:$0xff] }
 0x150   : > { %v2945_v55 = vadd.f32 %v1806_v53, %v1805_v19  ;;  %v853_v58 = vpop.f32.mrf.mxu0  ;;  %v988_v19 = vpop.f32.mrf.mxu2 }
 0x151   : > { %v854_v1 = vadd.f32 %v2623_v26, %v853_v58  ;;  %v989_v28 = vadd.f32 %v2623_v26, %v988_v19  ;;  %4014 = vst [vmem:[#allocation8_spill] sm:$0xff] %v3000_v44  ;;  %v931_v46 = vpop.f32.mrf.mxu1  ;;  %v1051_v53 = vpop.f32.mrf.mxu3 }
 0x152   : > { %1349 = vst.msk [vmem:[%s2631_s19 + $0x318] sm:$0xff] %vm1249_vm0, %v3000_v44  ;;  %v1052_v3 = vadd.f32 %v2623_v26, %v1051_v53 }
 0x153   : > { %v2959_v5 = vmax.f32 %v854_v1, 0.0  ;;  %v2995_v41 = vmax.f32 %v989_v28, 0.0  ;;  %v932_v1 = vadd.f32 %v2623_v26, %v931_v46 }
 0x154   : > { %v3025_v20 = vmax.f32 %v1052_v3, 0.0 }
 0x155   : > { %1271 = vst.msk [vmem:[%s2631_s19 + $0xa8] sm:$0xff] %vm1249_vm0, %v2959_v5 }
 0x156   : > { %4013 = vst [vmem:[#allocation7_spill] sm:$0xff] %v2995_v41 }
 0x157   : > { %1325 = vst.msk [vmem:[%s2631_s19 + $0x258] sm:$0xff] %vm1249_vm0, %v2995_v41 }
 0x158   : > { %v856_v10 = vpop.f32.mrf.mxu0  ;;  %v991_v50 = vpop.f32.mrf.mxu2  ;;  %4016 = vst [vmem:[#allocation10_spill] sm:$0xff] %v3025_v20  ;;  %1035 = vmatmul.bf16.gmra.mxu2 %v2466_v29 }
 0x159   : > { %v857_v16 = vadd.f32 %v2623_v26, %v856_v10  ;;  %v992_v2 = vadd.f32 %v2623_v26, %v991_v50  ;;  %v933_v10 = vpop.f32.mrf.mxu1  ;;  %v1053_v15 = vpop.f32.mrf.mxu3  ;;  %1350 = vst.msk [vmem:[%s2631_s19 + $0x320] sm:$0xff] %vm1249_vm0, %v3025_v20 }
 0x15a   : > { %v934_v13 = vadd.f32 %v2623_v26, %v933_v10 }
 0x15b   : > { %v2973_v23 = vmax.f32 %v857_v16, 0.0  ;;  %v3019_v16 = vmax.f32 %v932_v1, 0.0  ;;  %v3021_v17 = vmax.f32 %v992_v2, 0.0 }
 0x15c   : > { %v3033_v39 = vmax.f32 %v934_v13, 0.0 }
 0x15d   : > { %1272 = vst.msk [vmem:[%s2631_s19 + $0xb0] sm:$0xff] %vm1249_vm0, %v2973_v23 }
 0x15e   : > { %4015 = vst [vmem:[#allocation9_spill] sm:$0xff] %v3021_v17 }
 0x15f   : > { %1302 = vst.msk [vmem:[%s2631_s19 + $0x1a0] sm:$0xff] %vm1249_vm0, %v3019_v16  ;;  %1095 = vmatmul.bf16.gmra.mxu3 %v2478_v30 }
 0x160   : > { %v858_v42 = vpop.f32.mrf.mxu0  ;;  %v993_v14 = vpop.f32.mrf.mxu2  ;;  %1326 = vst.msk [vmem:[%s2631_s19 + $0x260] sm:$0xff] %vm1249_vm0, %v3021_v17 }
 0x161   : > { %v859_v47 = vadd.f32 %v2623_v26, %v858_v42  ;;  %v994_v28 = vadd.f32 %v2623_v26, %v993_v14  ;;  %v1054_v42 = vadd.f32 %v2623_v26, %v1053_v15  ;;  %1303 = vst.msk [vmem:[%s2631_s19 + $0x1a8] sm:$0xff] %vm1249_vm0, %v3033_v39  ;;  %v936_v53 = vpop.f32.mrf.mxu1  ;;  %v1056_v2 = vpop.f32.mrf.mxu3 }
 0x162   : > { %v1057_v14 = vadd.f32 %v2623_v26, %v1056_v2 }
 0x163   : > { %v3009_v58 = vmax.f32 %v859_v47, 0.0  ;;  %v3045_v46 = vmax.f32 %v994_v28, 0.0  ;;  %v3050_v50 = vmax.f32 %v1054_v42, 0.0 }
 0x165   : > { %1273 = vst.msk [vmem:[%s2631_s19 + $0xb8] sm:$0xff] %vm1249_vm0, %v3009_v58 }
 0x166   : > { %4017 = vst [vmem:[#allocation11_spill] sm:$0xff] %v3045_v46 }
 0x167   : > { %4018 = vst [vmem:[#allocation12_spill] sm:$0xff] %v3050_v50 }
 0x168   : > { %v861_v0 = vpop.f32.mrf.mxu0  ;;  %1327 = vst.msk [vmem:[%s2631_s19 + $0x268] sm:$0xff] %vm1249_vm0, %v3045_v46  ;;  %v996_v1 = vpop.f32.mrf.mxu2 }
 0x169   : > { %v862_v11 = vadd.f32 %v2623_v26, %v861_v0  ;;  %1351 = vst.msk [vmem:[%s2631_s19 + $0x328] sm:$0xff] %vm1249_vm0, %v3050_v50  ;;  %v997_v13 = vadd.f32 %v2623_v26, %v996_v1  ;;  %v938_v15 = vpop.f32.mrf.mxu1  ;;  %v1058_v42 = vpop.f32.mrf.mxu3  ;;  %v3075_v1 = vmax.f32 %v1057_v14, 0.0  ;;  %v2479_v50 = vld [vmem:[%s2600_s11 + $0x1e0] sm:$0xff] }
 0x16a   : > { %v939_v29 = vadd.f32 %v2623_v26, %v938_v15  ;;  %v1059_v15 = vadd.f32 %v2623_v26, %v1058_v42 }
 0x16b   : > { %v3023_v19 = vmax.f32 %v862_v11, 0.0  ;;  %v937_v11 = vadd.f32 %v2623_v26, %v936_v53  ;;  %4020 = vst [vmem:[#allocation14_spill] sm:$0xff] %v3075_v1 }
 0x16c   : > { %1352 = vst.msk [vmem:[%s2631_s19 + $0x330] sm:$0xff] %vm1249_vm0, %v3075_v1  ;;  %v3099_v14 = vmax.f32 %v1059_v15, 0.0 }
 0x16d   : > { %1274 = vst.msk [vmem:[%s2631_s19 + $0xc0] sm:$0xff] %vm1249_vm0, %v3023_v19  ;;  %v1425_v17 = vsel %vm1249_vm0, %v3023_v19, 0.0 }
 0x16e   : > { %4022 = vst [vmem:[#allocation16_spill] sm:$0xff] %v3099_v14 }
 0x16f   : > { %1100 = vmatmul.bf16.gmra.mxu3 %v2479_v50  ;;  %1353 = vst.msk [vmem:[%s2631_s19 + $0x338] sm:$0xff] %vm1249_vm0, %v3099_v14 }
 0x170   : > { %v863_v47 = vpop.f32.mrf.mxu0  ;;  %v998_v30 = vpop.f32.mrf.mxu2 }
 0x171   : > { %v864_v0 = vadd.f32 %v2623_v26, %v863_v47  ;;  %v3069_v47 = vmax.f32 %v937_v11, 0.0  ;;  %v999_v2 = vadd.f32 %v2623_v26, %v998_v30  ;;  %v1061_v30 = vpop.f32.mrf.mxu3 }
 0x172   : > { %v1062_v44 = vadd.f32 %v2623_v26, %v1061_v30 }
 0x173   : > { %v3059_v3 = vmax.f32 %v864_v0, 0.0  ;;  %v3071_v0 = vmax.f32 %v997_v13, 0.0  ;;  %1304 = vst.msk [vmem:[%s2631_s19 + $0x1b0] sm:$0xff] %vm1249_vm0, %v3069_v47  ;;  %v3094_v11 = vmax.f32 %v999_v2, 0.0 }
 0x175   : > { %1275 = vst.msk [vmem:[%s2631_s19 + $0xc8] sm:$0xff] %vm1249_vm0, %v3059_v3 }
 0x176   : > { %4019 = vst [vmem:[#allocation13_spill] sm:$0xff] %v3071_v0 }
 0x177   : > { %1328 = vst.msk [vmem:[%s2631_s19 + $0x270] sm:$0xff] %vm1249_vm0, %v3071_v0  ;;  %v2480_v0 = vld [vmem:[%s2600_s11 + $0x1e8] sm:$0xff] }
 0x178   : > { %v866_v10 = vpop.f32.mrf.mxu0  ;;  %4021 = vst [vmem:[#allocation15_spill] sm:$0xff] %v3094_v11  ;;  %v1001_v50 = vpop.f32.mrf.mxu2 }
 0x179   : > { %v867_v28 = vadd.f32 %v2623_v26, %v866_v10  ;;  %v3082_v10 = vmax.f32 %v939_v29, 0.0  ;;  %1329 = vst.msk [vmem:[%s2631_s19 + $0x278] sm:$0xff] %vm1249_vm0, %v3094_v11  ;;  %v1002_v20 = vadd.f32 %v2623_v26, %v1001_v50  ;;  %v1063_v59 = vpop.f32.mrf.mxu3  ;;  %v3130_v50 = vld [vmem:[%s3967_s2] ss:$0 sm:$0xff] }
 0x17a   : > { %v1064_v30 = vadd.f32 %v3130_v50, %v1063_v59  ;;  %v1421_v59 = vsel %vm1249_vm0, %v2973_v23, 0.0 }
 0x17b   : > { %v3073_v53 = vmax.f32 %v867_v28, 0.0  ;;  %1305 = vst.msk [vmem:[%s2631_s19 + $0x1b8] sm:$0xff] %vm1249_vm0, %v3082_v10  ;;  %v941_v28 = vpop.f32.mrf.mxu1 }
 0x17d   : > { %1276 = vst.msk [vmem:[%s2631_s19 + $0xd0] sm:$0xff] %vm1249_vm0, %v3073_v53 }
 0x17f   : > { %1105 = vmatmul.bf16.gmra.mxu3 %v2480_v0  ;;  %v3159_v0 = vmax.f32 %v1064_v30, 0.0 }
 0x180   : > { %v868_v13 = vpop.f32.mrf.mxu0  ;;  %v1003_v25 = vpop.f32.mrf.mxu2 }
 0x181   : > { %v869_v29 = vadd.f32 %v2623_v26, %v868_v13  ;;  %v942_v13 = vadd.f32 %v2623_v26, %v941_v28  ;;  %v1004_v40 = vadd.f32 %v2623_v26, %v1003_v25  ;;  %v3125_v28 = vmax.f32 %v1002_v20, 0.0  ;;  %4026 = vst [vmem:[#allocation20_spill] sm:$0xff] %v3159_v0 }
 0x182   : > { %v3138_v25 = vmax.f32 %v1062_v44, 0.0  ;;  %1355 = vst.msk [vmem:[%s2631_s19 + $0x348] sm:$0xff] %vm1249_vm0, %v3159_v0 }
 0x183   : > { %v3108_v42 = vmax.f32 %v869_v29, 0.0  ;;  %v943_v15 = vpop.f32.mrf.mxu1  ;;  %v1660_v29 = vmul.f32 %v2959_v5, %v2959_v5  ;;  %4023 = vst [vmem:[#allocation17_spill] sm:$0xff] %v3125_v28  ;;  %v3153_v44 = vmax.f32 %v1004_v40, 0.0 }
 0x184   : > { %v944_v14 = vadd.f32 %v2623_v26, %v943_v15  ;;  %v1419_v15 = vsel %vm1249_vm0, %v2959_v5, 0.0  ;;  %4024 = vst [vmem:[#allocation18_spill] sm:$0xff] %v3138_v25  ;;  %v1662_v5 = vmul.f32 %v3009_v58, %v3009_v58 }
 0x185   : > { %1277 = vst.msk [vmem:[%s2631_s19 + $0xd8] sm:$0xff] %vm1249_vm0, %v3108_v42 }
 0x186   : > { %v3143_v20 = vmax.f32 %v944_v14, 0.0  ;;  %4025 = vst [vmem:[#allocation19_spill] sm:$0xff] %v3153_v44 }
 0x187   : > { %1330 = vst.msk [vmem:[%s2631_s19 + $0x280] sm:$0xff] %vm1249_vm0, %v3125_v28  ;;  %v1812_v28 = vsel %vm1249_vm0, %v1662_v5, 0.0 }
 0x188   : > { %v871_v2 = vpop.f32.mrf.mxu0  ;;  %1354 = vst.msk [vmem:[%s2631_s19 + $0x340] sm:$0xff] %vm1249_vm0, %v3138_v25 }
 0x189   : > { %v872_v1 = vadd.f32 %v2623_v26, %v871_v2  ;;  %v3123_v2 = vmax.f32 %v942_v13, 0.0  ;;  %v1661_v26 = vmul.f32 %v2973_v23, %v2973_v23  ;;  %v1420_v13 = vadd.f32 %v1419_v15, %v2934_v51  ;;  %1307 = vst.msk [vmem:[%s2631_s19 + $0x1c8] sm:$0xff] %vm1249_vm0, %v3143_v20 }
 0x18a   : > { %v1423_v23 = vsel %vm1249_vm0, %v3009_v58, 0.0  ;;  %v1066_v58 = vpop.f32.mrf.mxu3  ;;  %1331 = vst.msk [vmem:[%s2631_s19 + $0x288] sm:$0xff] %vm1249_vm0, %v3153_v44 }
 0x18b   : > { %v3121_v11 = vmax.f32 %v872_v1, 0.0  ;;  %v1808_v1 = vsel %vm1249_vm0, %v1660_v29, 0.0  ;;  %1306 = vst.msk [vmem:[%s2631_s19 + $0x1c0] sm:$0xff] %vm1249_vm0, %v3123_v2  ;;  %v1810_v14 = vsel %vm1249_vm0, %v1661_v26, 0.0  ;;  %v1663_v29 = vmul.f32 %v3023_v19, %v3023_v19  ;;  %v946_v40 = vpop.f32.mrf.mxu1  ;;  %v1006_v26 = vpop.f32.mrf.mxu2 }
 0x18c   : > { %v1809_v51 = vadd.f32 %v1808_v1, %v2945_v55  ;;  %v1422_v15 = vadd.f32 %v1421_v59, %v1420_v13  ;;  %v1427_v1 = vsel %vm1249_vm0, %v3059_v3, 0.0  ;;  %v1664_v59 = vmul.f32 %v3059_v3, %v3059_v3 }
 0x18d   : > { %1278 = vst.msk [vmem:[%s2631_s19 + $0xe0] sm:$0xff] %vm1249_vm0, %v3121_v11  ;;  %v1665_v19 = vmul.f32 %v3073_v53, %v3073_v53 }
 0x18e   : > { %v1811_v25 = vadd.f32 %v1810_v14, %v1809_v51  ;;  %v1424_v41 = vadd.f32 %v1423_v23, %v1422_v15  ;;  %v1816_v51 = vsel %vm1249_vm0, %v1664_v59, 0.0  ;;  %v1667_v59 = vmul.f32 %v3121_v11, %v3121_v11 }
 0x18f   : > { %v1818_v15 = vsel %vm1249_vm0, %v1665_v19, 0.0 }
 0x190   : > { %v873_v46 = vpop.f32.mrf.mxu0  ;;  %v1813_v5 = vadd.f32 %v1812_v28, %v1811_v25  ;;  %v1426_v13 = vadd.f32 %v1425_v17, %v1424_v41  ;;  %v947_v41 = vadd.f32 %v3130_v50, %v946_v40  ;;  %v1007_v17 = vadd.f32 %v3130_v50, %v1006_v26 }
 0x191   : > { %v874_v30 = vadd.f32 %v3130_v50, %v873_v46  ;;  %v1814_v46 = vsel %vm1249_vm0, %v1663_v29, 0.0  ;;  %v1429_v29 = vsel %vm1249_vm0, %v3073_v53, 0.0  ;;  %v1067_v25 = vadd.f32 %v3130_v50, %v1066_v58 }
 0x192   : > { %v1815_v14 = vadd.f32 %v1814_v46, %v1813_v5  ;;  %v1428_v23 = vadd.f32 %v1427_v1, %v1426_v13  ;;  %v1068_v1 = vpop.f32.mrf.mxu3  ;;  %v1431_v53 = vsel %vm1249_vm0, %v3108_v42, 0.0  ;;  %v3208_v40 = vmax.f32 %v947_v41, 0.0 }
 0x193   : > { %v1150_v55 = vmax.f32 %v874_v30, 0.0  ;;  %v1666_v30 = vmul.f32 %v3108_v42, %v3108_v42  ;;  %v948_v0 = vpop.f32.mrf.mxu1  ;;  %v1008_v46 = vpop.f32.mrf.mxu2  ;;  %v3210_v26 = vmax.f32 %v1007_v17, 0.0  ;;  %v1069_v58 = vadd.f32 %v3130_v50, %v1068_v1 }
 0x194   : > { %v949_v19 = vadd.f32 %v3130_v50, %v948_v0  ;;  %v1009_v5 = vadd.f32 %v3130_v50, %v1008_v46  ;;  %v1817_v44 = vadd.f32 %v1816_v51, %v1815_v14  ;;  %v1430_v22 = vadd.f32 %v1429_v29, %v1428_v23  ;;  %1308 = vst.msk [vmem:[%s2631_s19 + $0x1d0] sm:$0xff] %vm1249_vm0, %v3208_v40 }
 0x195   : > { %1279 = vst.msk [vmem:[%s2631_s19 + $0xe8] sm:$0xff] %vm1249_vm0, %v1150_v55  ;;  %v3214_v42 = vmax.f32 %v1067_v25, 0.0  ;;  %v1820_v54 = vsel %vm1249_vm0, %v1666_v30, 0.0  ;;  %v1433_v0 = vsel %vm1249_vm0, %v3121_v11, 0.0  ;;  %v1668_v46 = vmul.f32 %v1150_v55, %v1150_v55 }
 0x196   : > { %v1819_v41 = vadd.f32 %v1818_v15, %v1817_v44  ;;  %v1432_v17 = vadd.f32 %v1431_v53, %v1430_v22  ;;  %v3226_v14 = vmax.f32 %v1009_v5, 0.0  ;;  %v1822_v23 = vsel %vm1249_vm0, %v1667_v59, 0.0  ;;  %1332 = vst.msk [vmem:[%s2631_s19 + $0x290] sm:$0xff] %vm1249_vm0, %v3210_v26 }
 0x197   : > { %v1435_v51 = vsel %vm1249_vm0, %v1150_v55, 0.0  ;;  %v3233_v29 = vmax.f32 %v1069_v58, 0.0  ;;  %1356 = vst.msk [vmem:[%s2631_s19 + $0x350] sm:$0xff] %vm1249_vm0, %v3214_v42  ;;  %v1824_v25 = vsel %vm1249_vm0, %v1668_v46, 0.0  ;;  %v1671_v5 = vmul.f32 %v2662_v7, %v2662_v7 }
 0x198   : > { %v876_v3 = vpop.f32.mrf.mxu0  ;;  %v1821_v30 = vadd.f32 %v1820_v54, %v1819_v41  ;;  %v1434_v44 = vadd.f32 %v1433_v0, %v1432_v17  ;;  %1333 = vst.msk [vmem:[%s2631_s19 + $0x298] sm:$0xff] %vm1249_vm0, %v3226_v14  ;;  %v1672_v58 = vmul.f32 %v2664_v9, %v2664_v9 }
 0x199   : > { %v877_v28 = vadd.f32 %v3130_v50, %v876_v3  ;;  %v2481_v3 = vld [vmem:[%s2600_s11 + $0x1f0] sm:$0xff]  ;;  %1357 = vst.msk [vmem:[%s2631_s19 + $0x358] sm:$0xff] %vm1249_vm0, %v3233_v29 }
 0x19a   : > { %1110 = vmatmul.bf16.gmra.mxu3 %v2481_v3  ;;  %v1071_v59 = vpop.f32.mrf.mxu3  ;;  %v1823_v54 = vadd.f32 %v1822_v23, %v1821_v30  ;;  %v1441_v23 = vsel %vm1249_vm0, %v2662_v7, 0.0 }
 0x19b   : > { %v1151_v13 = vmax.f32 %v877_v28, 0.0  ;;  %v3221_v28 = vmax.f32 %v949_v19, 0.0  ;;  %v951_v15 = vpop.f32.mrf.mxu1  ;;  %v1011_v53 = vpop.f32.mrf.mxu2  ;;  %v1436_v19 = vadd.f32 %v1435_v51, %v1434_v44  ;;  %v1830_v44 = vsel %vm1249_vm0, %v1671_v5, 0.0 }
 0x19c   : > { %v1825_v0 = vadd.f32 %v1824_v25, %v1823_v54  ;;  %v1012_v5 = vadd.f32 %v3130_v50, %v1011_v53 }
 0x19d   : > { %1280 = vst.msk [vmem:[%s2631_s19 + $0xf0] sm:$0xff] %vm1249_vm0, %v1151_v13  ;;  %v1669_v11 = vmul.f32 %v1151_v13, %v1151_v13  ;;  %v1437_v55 = vsel %vm1249_vm0, %v1151_v13, 0.0 }
 0x19e   : > { %1309 = vst.msk [vmem:[%s2631_s19 + $0x1d8] sm:$0xff] %vm1249_vm0, %v3221_v28  ;;  %v1438_v46 = vadd.f32 %v1437_v55, %v1436_v19  ;;  %v1445_v55 = vsel %vm1249_vm0, %v2688_v34, 0.0  ;;  %v3279_v53 = vmax.f32 %v1012_v5, 0.0  ;;  %v1676_v5 = vmul.f32 %v2716_v62, %v2716_v62 }
 0x19f   : > { %v1826_v13 = vsel %vm1249_vm0, %v1669_v11, 0.0  ;;  %v1443_v11 = vsel %vm1249_vm0, %v2664_v9, 0.0  ;;  %v1072_v9 = vadd.f32 %v3130_v50, %v1071_v59 }
 0x1a0   : > { %v878_v22 = vpop.f32.mrf.mxu0  ;;  %v1827_v51 = vadd.f32 %v1826_v13, %v1825_v0  ;;  %v952_v13 = vadd.f32 %v3130_v50, %v951_v15  ;;  %1334 = vst.msk [vmem:[%s2631_s19 + $0x2a0] sm:$0xff] %vm1249_vm0, %v3279_v53 }
 0x1a1   : > { %v879_v1 = vadd.f32 %v3130_v50, %v878_v22  ;;  %v1832_v22 = vsel %vm1249_vm0, %v1672_v58, 0.0  ;;  %v3281_v59 = vmax.f32 %v1072_v9, 0.0 }
 0x1a2   : > { %v1073_v0 = vpop.f32.mrf.mxu3  ;;  %v3277_v15 = vmax.f32 %v952_v13, 0.0 }
 0x1a3   : > { %v1152_v3 = vmax.f32 %v879_v1, 0.0  ;;  %v1673_v1 = vmul.f32 %v2688_v34, %v2688_v34  ;;  %v953_v7 = vpop.f32.mrf.mxu1  ;;  %v1074_v34 = vadd.f32 %v3130_v50, %v1073_v0  ;;  %1358 = vst.msk [vmem:[%s2631_s19 + $0x360] sm:$0xff] %vm1249_vm0, %v3281_v59 }
 0x1a4   : > { %v954_v58 = vadd.f32 %v3130_v50, %v953_v7  ;;  %1310 = vst.msk [vmem:[%s2631_s19 + $0x1e0] sm:$0xff] %vm1249_vm0, %v3277_v15 }
 0x1a5   : > { %1281 = vst.msk [vmem:[%s2631_s19 + $0xf8] sm:$0xff] %vm1249_vm0, %v1152_v3  ;;  %v1439_v41 = vsel %vm1249_vm0, %v1152_v3, 0.0  ;;  %v1670_v17 = vmul.f32 %v1152_v3, %v1152_v3  ;;  %v1013_v3 = vpop.f32.mrf.mxu2 }
 0x1a6   : > { %v1440_v30 = vadd.f32 %v1439_v41, %v1438_v46 }
 0x1a7   : > { %v1828_v25 = vsel %vm1249_vm0, %v1670_v17, 0.0  ;;  %v1014_v17 = vadd.f32 %v3130_v50, %v1013_v3 }
 0x1a8   : > { %v1442_v54 = vadd.f32 %v1441_v23, %v1440_v30  ;;  %v1829_v19 = vadd.f32 %v1828_v25, %v1827_v51  ;;  %v1674_v23 = vmul.f32 %v2690_v36, %v2690_v36  ;;  %v2482_v51 = vld [vmem:[%s2600_s11 + $0x1f8] sm:$0xff] }
 0x1a9   : > { %v3294_v7 = vmax.f32 %v1014_v17, 0.0 }
 0x1aa   : > { %v1444_v46 = vadd.f32 %v1443_v11, %v1442_v54  ;;  %v1831_v41 = vadd.f32 %v1830_v44, %v1829_v19  ;;  %v3284_v11 = vmax.f32 %v954_v58, 0.0  ;;  %v1834_v44 = vsel %vm1249_vm0, %v1673_v1, 0.0  ;;  %1115 = vmatmul.bf16.gmra.mxu3 %v2482_v51  ;;  %v1076_v17 = vpop.f32.mrf.mxu3 }
 0x1ab   : > { %v1447_v54 = vsel %vm1249_vm0, %v2690_v36, 0.0  ;;  %v1675_v19 = vmul.f32 %v2714_v60, %v2714_v60  ;;  %v3299_v1 = vmax.f32 %v1074_v34, 0.0  ;;  %v1836_v13 = vsel %vm1249_vm0, %v1674_v23, 0.0  ;;  %v956_v3 = vpop.f32.mrf.mxu1  ;;  %1335 = vst.msk [vmem:[%s2631_s19 + $0x2a8] sm:$0xff] %vm1249_vm0, %v3294_v7 }
 0x1ac   : > { %v1446_v30 = vadd.f32 %v1445_v55, %v1444_v46  ;;  %v1833_v25 = vadd.f32 %v1832_v22, %v1831_v41  ;;  %v1449_v36 = vsel %vm1249_vm0, %v2714_v60, 0.0  ;;  %1311 = vst.msk [vmem:[%s2631_s19 + $0x1e8] sm:$0xff] %vm1249_vm0, %v3284_v11  ;;  %v1451_v46 = vsel %vm1249_vm0, %v2716_v62, 0.0 }
 0x1ad   : > { %v1838_v0 = vsel %vm1249_vm0, %v1675_v19, 0.0  ;;  %v1677_v60 = vmul.f32 %v2740_v24, %v2740_v24  ;;  %v1016_v41 = vpop.f32.mrf.mxu2  ;;  %v1678_v34 = vmul.f32 %v2742_v27, %v2742_v27  ;;  %1359 = vst.msk [vmem:[%s2631_s19 + $0x368] sm:$0xff] %vm1249_vm0, %v3299_v1  ;;  %v1453_v62 = vsel %vm1249_vm0, %v2740_v24, 0.0 }
 0x1ae   : > { %v1448_v55 = vadd.f32 %v1447_v54, %v1446_v30  ;;  %v1835_v22 = vadd.f32 %v1834_v44, %v1833_v25  ;;  %v1840_v30 = vsel %vm1249_vm0, %v1676_v5, 0.0  ;;  %v1679_v25 = vmul.f32 %v2767_v56, %v2767_v56 }
 0x1af   : > { %v1680_v44 = vmul.f32 %v2772_v61, %v2772_v61  ;;  %v1457_v24 = vsel %vm1249_vm0, %v2767_v56, 0.0  ;;  %v1017_v56 = vadd.f32 %v3130_v50, %v1016_v41 }
 0x1b0   : > { %v1450_v9 = vadd.f32 %v1449_v36, %v1448_v55  ;;  %v1837_v58 = vadd.f32 %v1836_v13, %v1835_v22  ;;  %v1842_v55 = vsel %vm1249_vm0, %v1677_v60, 0.0  ;;  %v1455_v22 = vsel %vm1249_vm0, %v2742_v27, 0.0 }
 0x1b1   : > { %v1844_v13 = vsel %vm1249_vm0, %v1678_v34, 0.0  ;;  %v1681_v27 = vmul.f32 %v2805_v31, %v2805_v31  ;;  %v3356_v41 = vmax.f32 %v1017_v56, 0.0 }
 0x1b2   : > { %v1452_v23 = vadd.f32 %v1451_v46, %v1450_v9  ;;  %v1839_v51 = vadd.f32 %v1838_v0, %v1837_v58  ;;  %v1846_v9 = vsel %vm1249_vm0, %v1679_v25, 0.0  ;;  %v1459_v58 = vsel %vm1249_vm0, %v2772_v61, 0.0  ;;  %v1078_v25 = vpop.f32.mrf.mxu3 }
 0x1b3   : > { %v1848_v0 = vsel %vm1249_vm0, %v1680_v44, 0.0  ;;  %v1461_v46 = vsel %vm1249_vm0, %v2805_v31, 0.0  ;;  %v1079_v31 = vadd.f32 %v3130_v50, %v1078_v25  ;;  %1336 = vst.msk [vmem:[%s2631_s19 + $0x2b0] sm:$0xff] %vm1249_vm0, %v3356_v41 }
 0x1b4   : > { %v1454_v54 = vadd.f32 %v1453_v62, %v1452_v23  ;;  %v1841_v19 = vadd.f32 %v1840_v30, %v1839_v51  ;;  %v958_v23 = vpop.f32.mrf.mxu1  ;;  %v957_v51 = vadd.f32 %v3130_v50, %v956_v3  ;;  %v1077_v30 = vadd.f32 %v3130_v50, %v1076_v17 }
 0x1b5   : > { %v959_v62 = vadd.f32 %v3130_v50, %v958_v23  ;;  %v1018_v61 = vpop.f32.mrf.mxu2 }
 0x1b6   : > { %v1456_v36 = vadd.f32 %v1455_v22, %v1454_v54  ;;  %v1843_v5 = vadd.f32 %v1842_v55, %v1841_v19  ;;  %v1019_v19 = vadd.f32 %v3130_v50, %v1018_v61  ;;  %v1682_v55 = vmul.f32 %v2810_v37, %v2810_v37 }
 0x1b7   : > { %v3354_v3 = vmax.f32 %v957_v51, 0.0  ;;  %v3358_v17 = vmax.f32 %v1077_v30, 0.0  ;;  %v1467_v30 = vsel %vm1249_vm0, %v2847_v12, 0.0 }
 0x1b8   : > { %v1458_v60 = vadd.f32 %v1457_v24, %v1456_v36  ;;  %v1845_v34 = vadd.f32 %v1844_v13, %v1843_v5  ;;  %v3360_v36 = vmax.f32 %v959_v62, 0.0  ;;  %v1850_v5 = vsel %vm1249_vm0, %v1681_v27, 0.0 }
 0x1b9   : > { %v1463_v24 = vsel %vm1249_vm0, %v2810_v37, 0.0  ;;  %1312 = vst.msk [vmem:[%s2631_s19 + $0x1f0] sm:$0xff] %vm1249_vm0, %v3354_v3  ;;  %v1852_v27 = vsel %vm1249_vm0, %v1682_v55, 0.0  ;;  %v1465_v37 = vsel %vm1249_vm0, %v2842_v6, 0.0  ;;  %v1685_v62 = vmul.f32 %v2879_v48, %v2879_v48 }
 0x1ba   : > { %v1460_v44 = vadd.f32 %v1459_v58, %v1458_v60  ;;  %v1847_v54 = vadd.f32 %v1846_v9, %v1845_v34  ;;  %v1683_v9 = vmul.f32 %v2842_v6, %v2842_v6  ;;  %v3370_v58 = vmax.f32 %v1019_v19, 0.0  ;;  %1360 = vst.msk [vmem:[%s2631_s19 + $0x370] sm:$0xff] %vm1249_vm0, %v3358_v17  ;;  %v1081_v61 = vpop.f32.mrf.mxu3 }
 0x1bb   : > { %v1684_v34 = vmul.f32 %v2847_v12, %v2847_v12  ;;  %1313 = vst.msk [vmem:[%s2631_s19 + $0x1f8] sm:$0xff] %vm1249_vm0, %v3360_v36  ;;  %v1469_v19 = vsel %vm1249_vm0, %v2879_v48, 0.0  ;;  %v1686_v12 = vmul.f32 %v2884_v52, %v2884_v52 }
 0x1bc   : > { %v1462_v22 = vadd.f32 %v1461_v46, %v1460_v44  ;;  %v1849_v13 = vadd.f32 %v1848_v0, %v1847_v54  ;;  %v3375_v0 = vmax.f32 %v1079_v31, 0.0  ;;  %v1854_v56 = vsel %vm1249_vm0, %v1683_v9, 0.0  ;;  %1337 = vst.msk [vmem:[%s2631_s19 + $0x2b8] sm:$0xff] %vm1249_vm0, %v3370_v58 }
 0x1bd   : > { %v1021_v6 = vpop.f32.mrf.mxu2  ;;  %v1856_v54 = vsel %vm1249_vm0, %v1684_v34, 0.0  ;;  %v1687_v31 = vmul.f32 %v2916_v35, %v2916_v35  ;;  %v1860_v48 = vsel %vm1249_vm0, %v1686_v12, 0.0  ;;  %v1690_v12 = vmul.f32 %v2983_v33, %v2983_v33 }
 0x1be   : > { %v1464_v60 = vadd.f32 %v1463_v24, %v1462_v22  ;;  %v1851_v46 = vadd.f32 %v1850_v5, %v1849_v13  ;;  %1361 = vst.msk [vmem:[%s2631_s19 + $0x378] sm:$0xff] %vm1249_vm0, %v3375_v0  ;;  %v1858_v13 = vsel %vm1249_vm0, %v1685_v62, 0.0  ;;  %v1471_v5 = vsel %vm1249_vm0, %v2884_v52, 0.0 }
 0x1bf   : > { %v1688_v24 = vmul.f32 %v2928_v45, %v2928_v45  ;;  %v1689_v52 = vmul.f32 %v2969_v21, %v2969_v21 }
 0x1c0   : > { %v1853_v23 = vadd.f32 %v1852_v27, %v1851_v46  ;;  %v1466_v51 = vadd.f32 %v1465_v37, %v1464_v60  ;;  %v1473_v46 = vsel %vm1249_vm0, %v2916_v35, 0.0  ;;  %v1862_v27 = vsel %vm1249_vm0, %v1687_v31, 0.0 }
 0x1c1   : > { %v1475_v37 = vsel %vm1249_vm0, %v2928_v45, 0.0 }
 0x1c2   : > { %v1468_v25 = vadd.f32 %v1467_v30, %v1466_v51  ;;  %v1855_v44 = vadd.f32 %v1854_v56, %v1853_v23  ;;  %v1864_v51 = vsel %vm1249_vm0, %v1688_v24, 0.0  ;;  %v1022_v56 = vadd.f32 %v3130_v50, %v1021_v6 }
 0x1c3   : > { %v1082_v30 = vadd.f32 %v3130_v50, %v1081_v61  ;;  %v1691_v24 = vmul.f32 %v3019_v16, %v3019_v16 }
 0x1c4   : > { %v1470_v55 = vadd.f32 %v1469_v19, %v1468_v25  ;;  %v1857_v22 = vadd.f32 %v1856_v54, %v1855_v44  ;;  %v1083_v25 = vpop.f32.mrf.mxu3  ;;  %v1477_v19 = vsel %vm1249_vm0, %v2969_v21, 0.0  ;;  %v3428_v31 = vmax.f32 %v1022_v56, 0.0 }
 0x1c5   : > { %v1023_v62 = vpop.f32.mrf.mxu2  ;;  %v1084_v45 = vadd.f32 %v3130_v50, %v1083_v25  ;;  %v3430_v6 = vmax.f32 %v1082_v30, 0.0  ;;  %v1479_v21 = vsel %vm1249_vm0, %v2983_v33, 0.0  ;;  %v1485_v25 = vsel %vm1249_vm0, %v3069_v47, 0.0 }
 0x1c6   : > { %v1472_v9 = vadd.f32 %v1471_v5, %v1470_v55  ;;  %v1859_v60 = vadd.f32 %v1858_v13, %v1857_v22  ;;  %v1024_v54 = vadd.f32 %v3130_v50, %v1023_v62  ;;  %v1866_v5 = vsel %vm1249_vm0, %v1689_v52, 0.0  ;;  %1338 = vst.msk [vmem:[%s2631_s19 + $0x2c0] sm:$0xff] %vm1249_vm0, %v3428_v31 }
 0x1c7   : > { %v3434_v13 = vmax.f32 %v1084_v45, 0.0  ;;  %1362 = vst.msk [vmem:[%s2631_s19 + $0x380] sm:$0xff] %vm1249_vm0, %v3430_v6 }
 0x1c8   : > { %v1474_v34 = vadd.f32 %v1473_v46, %v1472_v9  ;;  %v1861_v23 = vadd.f32 %v1860_v48, %v1859_v60  ;;  %v3432_v22 = vmax.f32 %v1024_v54, 0.0  ;;  %v1868_v48 = vsel %vm1249_vm0, %v1690_v12, 0.0 }
 0x1c9   : > { %v1481_v46 = vsel %vm1249_vm0, %v3019_v16, 0.0  ;;  %1363 = vst.msk [vmem:[%s2631_s19 + $0x388] sm:$0xff] %vm1249_vm0, %v3434_v13  ;;  %v1695_v54 = vmul.f32 %v3123_v2, %v3123_v2  ;;  %v1696_v12 = vmul.f32 %v3143_v20, %v3143_v20 }
 0x1ca   : > { %v1476_v35 = vadd.f32 %v1475_v37, %v1474_v34  ;;  %v1863_v44 = vadd.f32 %v1862_v27, %v1861_v23  ;;  %v1692_v27 = vmul.f32 %v3033_v39, %v3033_v39  ;;  %1339 = vst.msk [vmem:[%s2631_s19 + $0x2c8] sm:$0xff] %vm1249_vm0, %v3432_v22  ;;  %v1870_v34 = vsel %vm1249_vm0, %v1691_v24, 0.0 }
 0x1cb   : > { %v1483_v23 = vsel %vm1249_vm0, %v3033_v39, 0.0 }
 0x1cc   : > { %v1478_v61 = vadd.f32 %v1477_v19, %v1476_v35  ;;  %v1865_v55 = vadd.f32 %v1864_v51, %v1863_v44  ;;  %v1693_v51 = vmul.f32 %v3069_v47, %v3069_v47  ;;  %v1086_v52 = vpop.f32.mrf.mxu3  ;;  %v1872_v62 = vsel %vm1249_vm0, %v1692_v27, 0.0 }
 0x1cd   : > { %v1026_v16 = vpop.f32.mrf.mxu2  ;;  %v1694_v35 = vmul.f32 %v3082_v10, %v3082_v10  ;;  %v1487_v19 = vsel %vm1249_vm0, %v3082_v10, 0.0  ;;  %v1697_v10 = vmul.f32 %v3208_v40, %v3208_v40  ;;  %v1087_v27 = vadd.f32 %v3130_v50, %v1086_v52 }
 0x1ce   : > { %v1480_v9 = vadd.f32 %v1479_v21, %v1478_v61  ;;  %v1867_v60 = vadd.f32 %v1866_v5, %v1865_v55  ;;  %v1874_v45 = vsel %vm1249_vm0, %v1693_v51, 0.0  ;;  %v1489_v5 = vsel %vm1249_vm0, %v3123_v2, 0.0 }
 0x1cf   : > { %v1876_v47 = vsel %vm1249_vm0, %v1694_v35, 0.0 }
 0x1d0   : > { %v1482_v33 = vadd.f32 %v1481_v46, %v1480_v9  ;;  %v1869_v37 = vadd.f32 %v1868_v48, %v1867_v60  ;;  %v1878_v9 = vsel %vm1249_vm0, %v1695_v54, 0.0  ;;  %v1491_v60 = vsel %vm1249_vm0, %v3143_v20, 0.0 }
 0x1d1   : > { %v1880_v48 = vsel %vm1249_vm0, %v1696_v12, 0.0  ;;  %v1027_v46 = vadd.f32 %v3130_v50, %v1026_v16  ;;  %v1493_v20 = vsel %vm1249_vm0, %v3208_v40, 0.0  ;;  %v3494_v16 = vmax.f32 %v1087_v27, 0.0 }
 0x1d2   : > { %v1484_v56 = vadd.f32 %v1483_v23, %v1482_v33  ;;  %v1871_v30 = vadd.f32 %v1870_v34, %v1869_v37  ;;  %v1495_v40 = vsel %vm1249_vm0, %v3221_v28, 0.0  ;;  %v1699_v54 = vmul.f32 %v3277_v15, %v3277_v15 }
 0x1d3   : > { %1364 = vst.msk [vmem:[%s2631_s19 + $0x390] sm:$0xff] %vm1249_vm0, %v3494_v16  ;;  %v1497_v12 = vsel %vm1249_vm0, %v3277_v15, 0.0  ;;  %v1703_v27 = vmul.f32 %v2769_v57, %v2769_v57 }
 0x1d4   : > { %v1486_v44 = vadd.f32 %v1485_v25, %v1484_v56  ;;  %v1873_v39 = vadd.f32 %v1872_v62, %v1871_v30  ;;  %v1088_v37 = vpop.f32.mrf.mxu3  ;;  %v1698_v56 = vmul.f32 %v3221_v28, %v3221_v28  ;;  %v3492_v30 = vmax.f32 %v1027_v46, 0.0 }
 0x1d5   : > { %v1028_v33 = vpop.f32.mrf.mxu2  ;;  %v1089_v51 = vadd.f32 %v3130_v50, %v1088_v37  ;;  %v1702_v46 = vmul.f32 %v3360_v36, %v3360_v36  ;;  %v1704_v37 = vmul.f32 %v2785_v4, %v2785_v4 }
 0x1d6   : > { %v1488_v61 = vadd.f32 %v1487_v19, %v1486_v44  ;;  %v1875_v55 = vadd.f32 %v1874_v45, %v1873_v39  ;;  %v1029_v23 = vadd.f32 %v3130_v50, %v1028_v33  ;;  %v1882_v44 = vsel %vm1249_vm0, %v1697_v10, 0.0  ;;  %1340 = vst.msk [vmem:[%s2631_s19 + $0x2d0] sm:$0xff] %vm1249_vm0, %v3492_v30 }
 0x1d7   : > { %v3498_v35 = vmax.f32 %v1089_v51, 0.0  ;;  %v1884_v19 = vsel %vm1249_vm0, %v1698_v56, 0.0  ;;  %v1501_v10 = vsel %vm1249_vm0, %v3354_v3, 0.0  ;;  %v1894_v56 = vsel %vm1249_vm0, %v1703_v27, 0.0 }
 0x1d8   : > { %v1490_v21 = vadd.f32 %v1489_v5, %v1488_v61  ;;  %v1877_v24 = vadd.f32 %v1876_v47, %v1875_v55  ;;  %v3496_v25 = vmax.f32 %v1029_v23, 0.0  ;;  %v1700_v61 = vmul.f32 %v3284_v11, %v3284_v11 }
 0x1d9   : > { %1365 = vst.msk [vmem:[%s2631_s19 + $0x398] sm:$0xff] %vm1249_vm0, %v3498_v35  ;;  %v1886_v47 = vsel %vm1249_vm0, %v1699_v54, 0.0  ;;  %v1499_v5 = vsel %vm1249_vm0, %v3284_v11, 0.0  ;;  %v1705_v54 = vmul.f32 %v2807_v32, %v2807_v32 }
 0x1da   : > { %v1879_v2 = vadd.f32 %v1878_v9, %v1877_v24  ;;  %v1492_v34 = vadd.f32 %v1491_v60, %v1490_v21  ;;  %1341 = vst.msk [vmem:[%s2631_s19 + $0x2d8] sm:$0xff] %vm1249_vm0, %v3496_v25  ;;  %v1701_v21 = vmul.f32 %v3354_v3, %v3354_v3  ;;  %v1505_v3 = vsel %vm1249_vm0, %v2769_v57, 0.0 }
 0x1dc   : > { %v1881_v52 = vadd.f32 %v1880_v48, %v1879_v2  ;;  %v1494_v62 = vadd.f32 %v1493_v20, %v1492_v34  ;;  %v1091_v24 = vpop.f32.mrf.mxu3  ;;  %v1888_v48 = vsel %vm1249_vm0, %v1700_v61, 0.0  ;;  %v1890_v2 = vsel %vm1249_vm0, %v1701_v21, 0.0 }
 0x1dd   : > { %v1031_v15 = vpop.f32.mrf.mxu2  ;;  %v1503_v34 = vsel %vm1249_vm0, %v3360_v36, 0.0  ;;  %v1892_v20 = vsel %vm1249_vm0, %v1702_v46, 0.0 }
 0x1de   : > { %v1883_v39 = vadd.f32 %v1882_v44, %v1881_v52  ;;  %v1496_v45 = vadd.f32 %v1495_v40, %v1494_v62  ;;  %v1507_v52 = vsel %vm1249_vm0, %v2785_v4, 0.0  ;;  %v1896_v40 = vsel %vm1249_vm0, %v1704_v37, 0.0 }
 0x1df   : > { %v1032_v36 = vadd.f32 %v3130_v50, %v1031_v15 }
 0x1e0   : > { %v1885_v28 = vadd.f32 %v1884_v19, %v1883_v39  ;;  %v1498_v55 = vadd.f32 %v1497_v12, %v1496_v45  ;;  %v1092_v39 = vadd.f32 %v3130_v50, %v1091_v24 }
 0x1e2   : > { %v1887_v9 = vadd.f32 %v1886_v47, %v1885_v28  ;;  %v1500_v60 = vadd.f32 %v1499_v5, %v1498_v55  ;;  %v1509_v28 = vsel %vm1249_vm0, %v2807_v32, 0.0  ;;  %v1706_v55 = vmul.f32 %v2823_v43, %v2823_v43 }
 0x1e3   : > { %v3556_v47 = vmax.f32 %v1032_v36, 0.0  ;;  %v3558_v5 = vmax.f32 %v1092_v39, 0.0  ;;  %v1511_v32 = vsel %vm1249_vm0, %v2823_v43, 0.0  ;;  %v1519_v36 = vsel %vm1249_vm0, %v2897_v63, 0.0  ;;  %v4027_v39 = vld [vmem:[#allocation3_spill] sm:$0xff] }
 0x1e4   : > { %v1889_v33 = vadd.f32 %v1888_v48, %v1887_v9  ;;  %v1502_v11 = vadd.f32 %v1501_v10, %v1500_v60  ;;  %v1093_v57 = vpop.f32.mrf.mxu3  ;;  %v1898_v60 = vsel %vm1249_vm0, %v1705_v54, 0.0  ;;  %v1707_v48 = vmul.f32 %v2844_v8, %v2844_v8 }
 0x1e5   : > { %v1033_v45 = vpop.f32.mrf.mxu2  ;;  %v1094_v4 = vadd.f32 %v3130_v50, %v1093_v57  ;;  %1342 = vst.msk [vmem:[%s2631_s19 + $0x2e0] sm:$0xff] %vm1249_vm0, %v3556_v47  ;;  %v1900_v27 = vsel %vm1249_vm0, %v1706_v55, 0.0 }
 0x1e6   : > { %v1891_v23 = vadd.f32 %v1890_v2, %v1889_v33  ;;  %v1504_v51 = vadd.f32 %v1503_v34, %v1502_v11  ;;  %v1034_v61 = vadd.f32 %v3130_v50, %v1033_v45  ;;  %1366 = vst.msk [vmem:[%s2631_s19 + $0x3a0] sm:$0xff] %vm1249_vm0, %v3558_v5  ;;  %v1513_v33 = vsel %vm1249_vm0, %v2844_v8, 0.0 }
 0x1e7   : > { %v3562_v9 = vmax.f32 %v1094_v4, 0.0  ;;  %v1708_v11 = vmul.f32 %v2860_v18, %v2860_v18  ;;  %v1902_v2 = vsel %vm1249_vm0, %v1707_v48, 0.0  ;;  %v1515_v34 = vsel %vm1249_vm0, %v2860_v18, 0.0 }
 0x1e8   : > { %v1506_v62 = vadd.f32 %v1505_v3, %v1504_v51  ;;  %v1893_v44 = vadd.f32 %v1892_v20, %v1891_v23  ;;  %v3560_v24 = vmax.f32 %v1034_v61, 0.0  ;;  %v1709_v23 = vmul.f32 %v2881_v49, %v2881_v49 }
 0x1e9   : > { %1367 = vst.msk [vmem:[%s2631_s19 + $0x3a8] sm:$0xff] %vm1249_vm0, %v3562_v9  ;;  %v1712_v45 = vmul.f32 %v4027_v39, %v4027_v39  ;;  %v1523_v4 = vsel %vm1249_vm0, %v4027_v39, 0.0 }
 0x1ea   : > { %v1508_v19 = vadd.f32 %v1507_v52, %v1506_v62  ;;  %v1895_v12 = vadd.f32 %v1894_v56, %v1893_v44  ;;  %1343 = vst.msk [vmem:[%s2631_s19 + $0x2e8] sm:$0xff] %vm1249_vm0, %v3560_v24  ;;  %v1904_v56 = vsel %vm1249_vm0, %v1708_v11, 0.0  ;;  %v1517_v52 = vsel %vm1249_vm0, %v2881_v49, 0.0 }
 0x1eb   : > { %v1710_v62 = vmul.f32 %v2897_v63, %v2897_v63  ;;  %v1711_v44 = vmul.f32 %v2918_v38, %v2918_v38  ;;  %v1906_v54 = vsel %vm1249_vm0, %v1709_v23, 0.0  ;;  %v4028_v63 = vld [vmem:[#allocation5_spill] sm:$0xff] }
 0x1ec   : > { %v1510_v21 = vadd.f32 %v1509_v28, %v1508_v19  ;;  %v1897_v15 = vadd.f32 %v1896_v40, %v1895_v12  ;;  %v1096_v51 = vpop.f32.mrf.mxu3  ;;  %v1521_v12 = vsel %vm1249_vm0, %v2918_v38, 0.0  ;;  %v1525_v11 = vsel %vm1249_vm0, %v4028_v63, 0.0 }
 0x1ed   : > { %v1036_v8 = vpop.f32.mrf.mxu2  ;;  %v1908_v49 = vsel %vm1249_vm0, %v1710_v62, 0.0  ;;  %v1910_v61 = vsel %vm1249_vm0, %v1711_v44, 0.0 }
 0x1ee   : > { %v1512_v10 = vadd.f32 %v1511_v32, %v1510_v21  ;;  %v1899_v46 = vadd.f32 %v1898_v60, %v1897_v15  ;;  %v1912_v21 = vsel %vm1249_vm0, %v1712_v45, 0.0  ;;  %v1713_v15 = vmul.f32 %v4028_v63, %v4028_v63 }
 0x1ef   : > { %v1037_v60 = vadd.f32 %v3130_v50, %v1036_v8  ;;  %v1097_v32 = vadd.f32 %v3130_v50, %v1096_v51 }
 0x1f0   : > { %v1514_v43 = vadd.f32 %v1513_v33, %v1512_v10  ;;  %v1901_v37 = vadd.f32 %v1900_v27, %v1899_v46 }
 0x1f2   : > { %v1516_v3 = vadd.f32 %v1515_v34, %v1514_v43  ;;  %v1903_v20 = vadd.f32 %v1902_v2, %v1901_v37  ;;  %v4029_v43 = vld [vmem:[#allocation7_spill] sm:$0xff]  ;;  %v3620_v2 = vmax.f32 %v1037_v60, 0.0  ;;  %v3622_v34 = vmax.f32 %v1097_v32, 0.0 }
 0x1f3   : > { %v1714_v37 = vmul.f32 %v4029_v43, %v4029_v43 }
 0x1f4   : > { %v1518_v40 = vadd.f32 %v1517_v52, %v1516_v3  ;;  %v1905_v18 = vadd.f32 %v1904_v56, %v1903_v20  ;;  %v1098_v10 = vpop.f32.mrf.mxu3  ;;  %v1914_v20 = vsel %vm1249_vm0, %v1713_v15, 0.0  ;;  %v1527_v56 = vsel %vm1249_vm0, %v4029_v43, 0.0  ;;  %v4030_v52 = vld [vmem:[#allocation9_spill] sm:$0xff]  ;;  %1344 = vst.msk [vmem:[%s2631_s19 + $0x2f0] sm:$0xff] %vm1249_vm0, %v3620_v2  ;;  %v4033_v15 = vld [vmem:[#allocation15_spill] sm:$0xff] }
 0x1f5   : > { %v1038_v48 = vpop.f32.mrf.mxu2  ;;  %v1099_v33 = vadd.f32 %v3130_v50, %v1098_v10  ;;  %v1715_v62 = vmul.f32 %v4030_v52, %v4030_v52  ;;  %1368 = vst.msk [vmem:[%s2631_s19 + $0x3b0] sm:$0xff] %vm1249_vm0, %v3622_v34  ;;  %v1718_v60 = vmul.f32 %v4033_v15, %v4033_v15 }
 0x1f6   : > { %v1520_v57 = vadd.f32 %v1519_v36, %v1518_v40  ;;  %v1907_v19 = vadd.f32 %v1906_v54, %v1905_v18  ;;  %v1039_v27 = vadd.f32 %v3130_v50, %v1038_v48  ;;  %v1916_v18 = vsel %vm1249_vm0, %v1714_v37, 0.0  ;;  %v4031_v36 = vld [vmem:[#allocation11_spill] sm:$0xff] }
 0x1f7   : > { %v3626_v3 = vmax.f32 %v1099_v33, 0.0  ;;  %v1529_v54 = vsel %vm1249_vm0, %v4030_v52, 0.0  ;;  %v1716_v39 = vmul.f32 %v4031_v36, %v4031_v36  ;;  %v1924_v43 = vsel %vm1249_vm0, %v1718_v60, 0.0 }
 0x1f8   : > { %v1522_v28 = vadd.f32 %v1521_v12, %v1520_v57  ;;  %v1909_v55 = vadd.f32 %v1908_v49, %v1907_v19  ;;  %v3624_v51 = vmax.f32 %v1039_v27, 0.0  ;;  %v1918_v19 = vsel %vm1249_vm0, %v1715_v62, 0.0  ;;  %v4032_v12 = vld [vmem:[#allocation13_spill] sm:$0xff] }
 0x1f9   : > { %1369 = vst.msk [vmem:[%s2631_s19 + $0x3b8] sm:$0xff] %vm1249_vm0, %v3626_v3  ;;  %v1531_v49 = vsel %vm1249_vm0, %v4031_v36, 0.0  ;;  %v1533_v63 = vsel %vm1249_vm0, %v4032_v12, 0.0  ;;  %v1724_v60 = vmul.f32 %v3294_v7, %v3294_v7 }
 0x1fa   : > { %v1524_v38 = vadd.f32 %v1523_v4, %v1522_v28  ;;  %v1911_v46 = vadd.f32 %v1910_v61, %v1909_v55  ;;  %1345 = vst.msk [vmem:[%s2631_s19 + $0x2f8] sm:$0xff] %vm1249_vm0, %v3624_v51  ;;  %v1717_v61 = vmul.f32 %v4032_v12, %v4032_v12 }
 0x1fc   : > { %v1526_v23 = vadd.f32 %v1525_v11, %v1524_v38  ;;  %v1913_v8 = vadd.f32 %v1912_v21, %v1911_v46  ;;  %v1101_v4 = vpop.f32.mrf.mxu3  ;;  %v1920_v21 = vsel %vm1249_vm0, %v1716_v39, 0.0  ;;  %v1922_v10 = vsel %vm1249_vm0, %v1717_v61, 0.0  ;;  %v4034_v46 = vld [vmem:[#allocation17_spill] sm:$0xff] }
 0x1fd   : > { %v1535_v38 = vsel %vm1249_vm0, %v4033_v15, 0.0  ;;  %v1719_v27 = vmul.f32 %v4034_v46, %v4034_v46  ;;  %v1537_v37 = vsel %vm1249_vm0, %v4034_v46, 0.0  ;;  %v1545_v15 = vsel %vm1249_vm0, %v3279_v53, 0.0 }
 0x1fe   : > { %v1915_v44 = vadd.f32 %v1914_v20, %v1913_v8  ;;  %v1528_v40 = vadd.f32 %v1527_v56, %v1526_v23  ;;  %v4035_v23 = vld [vmem:[#allocation19_spill] sm:$0xff] }
 0x1ff   : > { %v1720_v8 = vmul.f32 %v4035_v23, %v4035_v23  ;;  %v1926_v52 = vsel %vm1249_vm0, %v1719_v27, 0.0  ;;  %v1539_v62 = vsel %vm1249_vm0, %v4035_v23, 0.0 }
 0x200   : > { %v1530_v45 = vadd.f32 %v1529_v54, %v1528_v40  ;;  %v1917_v57 = vadd.f32 %v1916_v18, %v1915_v44  ;;  %v1721_v44 = vmul.f32 %v3210_v26, %v3210_v26  ;;  %v1102_v40 = vadd.f32 %v3130_v50, %v1101_v4 }
 0x202   : > { %v1532_v28 = vadd.f32 %v1531_v49, %v1530_v45  ;;  %v1919_v55 = vadd.f32 %v1918_v19, %v1917_v57  ;;  %v1928_v45 = vsel %vm1249_vm0, %v1720_v8, 0.0  ;;  %v1541_v57 = vsel %vm1249_vm0, %v3210_v26, 0.0 }
 0x203   : > { %v1722_v19 = vmul.f32 %v3226_v14, %v3226_v14  ;;  %v3682_v49 = vmax.f32 %v1102_v40, 0.0  ;;  %v1930_v4 = vsel %vm1249_vm0, %v1721_v44, 0.0  ;;  %v1728_v44 = vmul.f32 %v3432_v22, %v3432_v22 }
 0x204   : > { %v1534_v32 = vadd.f32 %v1533_v63, %v1532_v28  ;;  %v1921_v48 = vadd.f32 %v1920_v21, %v1919_v55  ;;  %v1103_v18 = vpop.f32.mrf.mxu3  ;;  %v1543_v55 = vsel %vm1249_vm0, %v3226_v14, 0.0 }
 0x205   : > { %v1104_v39 = vadd.f32 %v3130_v50, %v1103_v18  ;;  %v1723_v50 = vmul.f32 %v3279_v53, %v3279_v53  ;;  %1370 = vst.msk [vmem:[%s2631_s19 + $0x3c0] sm:$0xff] %vm1249_vm0, %v3682_v49  ;;  %v1932_v63 = vsel %vm1249_vm0, %v1722_v19, 0.0  ;;  %v1549_v53 = vsel %vm1249_vm0, %v3356_v41, 0.0 }
 0x206   : > { %v1536_v33 = vadd.f32 %v1535_v38, %v1534_v32  ;;  %v1923_v11 = vadd.f32 %v1922_v10, %v1921_v48  ;;  %v1547_v10 = vsel %vm1249_vm0, %v3294_v7, 0.0  ;;  %v1725_v38 = vmul.f32 %v3356_v41, %v3356_v41 }
 0x207   : > { %v3684_v28 = vmax.f32 %v1104_v39, 0.0  ;;  %v1934_v48 = vsel %vm1249_vm0, %v1723_v50, 0.0  ;;  %v1551_v7 = vsel %vm1249_vm0, %v3370_v58, 0.0  ;;  %v1553_v41 = vsel %vm1249_vm0, %v3428_v31, 0.0  ;;  %v3730_v39 = vld [vmem:[%s3967_s2] ss:$0 sm:$0xff] }
 0x208   : > { %v1538_v20 = vadd.f32 %v1537_v37, %v1536_v33  ;;  %v1925_v56 = vadd.f32 %v1924_v43, %v1923_v11  ;;  %v1936_v11 = vsel %vm1249_vm0, %v1724_v60, 0.0  ;;  %v1726_v43 = vmul.f32 %v3370_v58, %v3370_v58 }
 0x209   : > { %1371 = vst.msk [vmem:[%s2631_s19 + $0x3c8] sm:$0xff] %vm1249_vm0, %v3684_v28  ;;  %v1938_v8 = vsel %vm1249_vm0, %v1725_v38, 0.0  ;;  %v1555_v58 = vsel %vm1249_vm0, %v3432_v22, 0.0  ;;  %v1557_v22 = vsel %vm1249_vm0, %v3492_v30, 0.0  ;;  %v1731_v60 = vmul.f32 %v3556_v47, %v3556_v47 }
 0x20a   : > { %v1540_v54 = vadd.f32 %v1539_v62, %v1538_v20  ;;  %v1927_v36 = vadd.f32 %v1926_v52, %v1925_v56  ;;  %v1727_v20 = vmul.f32 %v3428_v31, %v3428_v31  ;;  %v1940_v62 = vsel %vm1249_vm0, %v1726_v43, 0.0 }
 0x20c   : > { %v1542_v12 = vadd.f32 %v1541_v57, %v1540_v54  ;;  %v1929_v61 = vadd.f32 %v1928_v45, %v1927_v36  ;;  %v1106_v46 = vpop.f32.mrf.mxu3  ;;  %v1942_v54 = vsel %vm1249_vm0, %v1727_v20, 0.0  ;;  %v1729_v36 = vmul.f32 %v3492_v30, %v3492_v30  ;;  %v4036_v20 = vld [vmem:[#allocation2_spill] sm:$0xff] }
 0x20d   : > { %v1107_v31 = vadd.f32 %v3730_v39, %v1106_v46  ;;  %v1950_v46 = vsel %vm1249_vm0, %v1731_v60, 0.0 }
 0x20e   : > { %v1544_v26 = vadd.f32 %v1543_v55, %v1542_v12  ;;  %v1931_v21 = vadd.f32 %v1930_v4, %v1929_v61  ;;  %v1944_v61 = vsel %vm1249_vm0, %v1728_v44, 0.0  ;;  %v1730_v4 = vmul.f32 %v3496_v25, %v3496_v25 }
 0x20f   : > { %v3739_v55 = vmax.f32 %v1107_v31, 0.0  ;;  %v1569_v44 = vsel %vm1249_vm0, %v4036_v20, 0.0 }
 0x210   : > { %v1546_v14 = vadd.f32 %v1545_v15, %v1544_v26  ;;  %v1933_v32 = vadd.f32 %v1932_v63, %v1931_v21  ;;  %v1946_v63 = vsel %vm1249_vm0, %v1729_v36, 0.0  ;;  %v1559_v15 = vsel %vm1249_vm0, %v3496_v25, 0.0 }
 0x211   : > { %1372 = vst.msk [vmem:[%s2631_s19 + $0x3d0] sm:$0xff] %vm1249_vm0, %v3739_v55 }
 0x212   : > { %v1548_v27 = vadd.f32 %v1547_v10, %v1546_v14  ;;  %v1935_v33 = vadd.f32 %v1934_v48, %v1933_v32  ;;  %v1948_v32 = vsel %vm1249_vm0, %v1730_v4, 0.0  ;;  %v1561_v48 = vsel %vm1249_vm0, %v3556_v47, 0.0 }
 0x213   : > { %v1732_v10 = vmul.f32 %v3560_v24, %v3560_v24  ;;  %v1565_v47 = vsel %vm1249_vm0, %v3620_v2, 0.0 }
 0x214   : > { %v1550_v37 = vadd.f32 %v1549_v53, %v1548_v27  ;;  %v1937_v23 = vadd.f32 %v1936_v11, %v1935_v33  ;;  %v1108_v45 = vpop.f32.mrf.mxu3  ;;  %v1563_v27 = vsel %vm1249_vm0, %v3560_v24, 0.0  ;;  %v1733_v33 = vmul.f32 %v3620_v2, %v3620_v2 }
 0x215   : > { %v1109_v12 = vadd.f32 %v3730_v39, %v1108_v45  ;;  %v4038_v45 = vld [vmem:[#allocation6_spill] sm:$0xff] }
 0x216   : > { %v1552_v56 = vadd.f32 %v1551_v7, %v1550_v37  ;;  %v1939_v52 = vadd.f32 %v1938_v8, %v1937_v23  ;;  %v1952_v37 = vsel %vm1249_vm0, %v1732_v10, 0.0  ;;  %v1734_v23 = vmul.f32 %v3624_v51, %v3624_v51  ;;  %v4040_v10 = vld [vmem:[#allocation10_spill] sm:$0xff] }
 0x217   : > { %v3741_v21 = vmax.f32 %v1109_v12, 0.0  ;;  %v1954_v24 = vsel %vm1249_vm0, %v1733_v33, 0.0  ;;  %v1577_v33 = vsel %vm1249_vm0, %v4040_v10, 0.0 }
 0x218   : > { %v1941_v40 = vadd.f32 %v1940_v62, %v1939_v52  ;;  %v1554_v18 = vadd.f32 %v1553_v41, %v1552_v56  ;;  %v1735_v56 = vmul.f32 %v4036_v20, %v4036_v20  ;;  %v1567_v52 = vsel %vm1249_vm0, %v3624_v51, 0.0 }
 0x219   : > { %1373 = vst.msk [vmem:[%s2631_s19 + $0x3d8] sm:$0xff] %vm1249_vm0, %v3741_v21  ;;  %v1737_v51 = vmul.f32 %v4038_v45, %v4038_v45 }
 0x21a   : > { %v1943_v57 = vadd.f32 %v1942_v54, %v1941_v40  ;;  %v1556_v19 = vadd.f32 %v1555_v58, %v1554_v18  ;;  %v4037_v40 = vld [vmem:[#allocation4_spill] sm:$0xff]  ;;  %v1956_v18 = vsel %vm1249_vm0, %v1734_v23, 0.0  ;;  %v1958_v36 = vsel %vm1249_vm0, %v1735_v56, 0.0 }
 0x21b   : > { %v1736_v2 = vmul.f32 %v4037_v40, %v4037_v40  ;;  %v1571_v31 = vsel %vm1249_vm0, %v4037_v40, 0.0 }
 0x21c   : > { %v1945_v50 = vadd.f32 %v1944_v61, %v1943_v57  ;;  %v1558_v26 = vadd.f32 %v1557_v22, %v1556_v19 }
 0x21d   : > { %v1111_v11 = vpop.f32.mrf.mxu3  ;;  %v1960_v4 = vsel %vm1249_vm0, %v1736_v2, 0.0 }
 0x21e   : > { %v1947_v30 = vadd.f32 %v1946_v63, %v1945_v50  ;;  %v1560_v14 = vadd.f32 %v1559_v15, %v1558_v26  ;;  %v1112_v57 = vadd.f32 %v3730_v39, %v1111_v11  ;;  %v1573_v50 = vsel %vm1249_vm0, %v4038_v45, 0.0  ;;  %v4039_v26 = vld [vmem:[#allocation8_spill] sm:$0xff] }
 0x21f   : > { %v1738_v63 = vmul.f32 %v4039_v26, %v4039_v26  ;;  %v4041_v11 = vld [vmem:[#allocation12_spill] sm:$0xff] }
 0x220   : > { %v1949_v25 = vadd.f32 %v1948_v32, %v1947_v30  ;;  %v1562_v38 = vadd.f32 %v1561_v48, %v1560_v14  ;;  %v3791_v15 = vmax.f32 %v1112_v57, 0.0  ;;  %v1962_v32 = vsel %vm1249_vm0, %v1737_v51, 0.0 }
 0x221   : > { %v1575_v48 = vsel %vm1249_vm0, %v4039_v26, 0.0  ;;  %v1579_v23 = vsel %vm1249_vm0, %v4041_v11, 0.0  ;;  %v1745_v26 = vmul.f32 %v3214_v42, %v3214_v42 }
 0x222   : > { %v1951_v53 = vadd.f32 %v1950_v46, %v1949_v25  ;;  %v1564_v43 = vadd.f32 %v1563_v27, %v1562_v38  ;;  %v1739_v25 = vmul.f32 %v4040_v10, %v4040_v10  ;;  %1374 = vst.msk [vmem:[%s2631_s19 + $0x3e0] sm:$0xff] %vm1249_vm0, %v3791_v15  ;;  %v1964_v27 = vsel %vm1249_vm0, %v1738_v63, 0.0 }
 0x224   : > { %v1953_v8 = vadd.f32 %v1952_v37, %v1951_v53  ;;  %v1566_v7 = vadd.f32 %v1565_v47, %v1564_v43  ;;  %v1740_v53 = vmul.f32 %v4041_v11, %v4041_v11  ;;  %v1966_v47 = vsel %vm1249_vm0, %v1739_v25, 0.0 }
 0x225   : > { %v1113_v19 = vpop.f32.mrf.mxu3  ;;  %v1589_v25 = vsel %vm1249_vm0, %v3214_v42, 0.0 }
 0x226   : > { %v1955_v62 = vadd.f32 %v1954_v24, %v1953_v8  ;;  %v1568_v41 = vadd.f32 %v1567_v52, %v1566_v7  ;;  %v1114_v22 = vadd.f32 %v3730_v39, %v1113_v19  ;;  %v4042_v8 = vld [vmem:[#allocation14_spill] sm:$0xff]  ;;  %v1968_v52 = vsel %vm1249_vm0, %v1740_v53, 0.0  ;;  %v4045_v19 = vld [vmem:[#allocation20_spill] sm:$0xff] }
 0x227   : > { %v1741_v7 = vmul.f32 %v4042_v8, %v4042_v8  ;;  %v1978_v53 = vsel %vm1249_vm0, %v1745_v26, 0.0 }
 0x228   : > { %v1570_v54 = vadd.f32 %v1569_v44, %v1568_v41  ;;  %v1957_v58 = vadd.f32 %v1956_v18, %v1955_v62  ;;  %v3793_v14 = vmax.f32 %v1114_v22, 0.0  ;;  %v1581_v62 = vsel %vm1249_vm0, %v4042_v8, 0.0  ;;  %v4043_v41 = vld [vmem:[#allocation16_spill] sm:$0xff] }
 0x229   : > { %v1742_v44 = vmul.f32 %v4043_v41, %v4043_v41  ;;  %v1970_v18 = vsel %vm1249_vm0, %v1741_v7, 0.0  ;;  %v1748_v8 = vmul.f32 %v3299_v1, %v3299_v1 }
 0x22a   : > { %v1572_v12 = vadd.f32 %v1571_v31, %v1570_v54  ;;  %v1959_v61 = vadd.f32 %v1958_v36, %v1957_v58  ;;  %1375 = vst.msk [vmem:[%s2631_s19 + $0x3e8] sm:$0xff] %vm1249_vm0, %v3793_v14  ;;  %v1583_v54 = vsel %vm1249_vm0, %v4043_v41, 0.0  ;;  %v4044_v58 = vld [vmem:[#allocation18_spill] sm:$0xff] }
 0x22b   : > { %v1743_v36 = vmul.f32 %v4044_v58, %v4044_v58  ;;  %v1972_v51 = vsel %vm1249_vm0, %v1742_v44, 0.0  ;;  %v1585_v57 = vsel %vm1249_vm0, %v4044_v58, 0.0  ;;  %v1984_v41 = vsel %vm1249_vm0, %v1748_v8, 0.0 }
 0x22c   : > { %v1574_v60 = vadd.f32 %v1573_v50, %v1572_v12  ;;  %v1961_v30 = vadd.f32 %v1960_v4, %v1959_v61  ;;  %v1744_v12 = vmul.f32 %v4045_v19, %v4045_v19  ;;  %v1587_v50 = vsel %vm1249_vm0, %v4045_v19, 0.0 }
 0x22d   : > { %v1116_v20 = vpop.f32.mrf.mxu3  ;;  %v1974_v4 = vsel %vm1249_vm0, %v1743_v36, 0.0  ;;  %v1750_v44 = vmul.f32 %v3375_v0, %v3375_v0 }
 0x22e   : > { %v1576_v38 = vadd.f32 %v1575_v48, %v1574_v60  ;;  %v1963_v46 = vadd.f32 %v1962_v32, %v1961_v30  ;;  %v1117_v63 = vadd.f32 %v3730_v39, %v1116_v20  ;;  %v1976_v10 = vsel %vm1249_vm0, %v1744_v12, 0.0 }
 0x22f   : > { %v1753_v12 = vmul.f32 %v3494_v16, %v3494_v16 }
 0x230   : > { %v1578_v43 = vadd.f32 %v1577_v33, %v1576_v38  ;;  %v1965_v37 = vadd.f32 %v1964_v27, %v1963_v46  ;;  %v1746_v38 = vmul.f32 %v3233_v29, %v3233_v29  ;;  %v3843_v46 = vmax.f32 %v1117_v63, 0.0 }
 0x232   : > { %v1580_v56 = vadd.f32 %v1579_v23, %v1578_v43  ;;  %v1967_v24 = vadd.f32 %v1966_v47, %v1965_v37  ;;  %v1591_v43 = vsel %vm1249_vm0, %v3233_v29, 0.0  ;;  %1376 = vst.msk [vmem:[%s2631_s19 + $0x3f0] sm:$0xff] %vm1249_vm0, %v3843_v46  ;;  %v1980_v47 = vsel %vm1249_vm0, %v1746_v38, 0.0 }
 0x233   : > { %v1593_v23 = vsel %vm1249_vm0, %v3281_v59, 0.0 }
 0x234   : > { %v1582_v40 = vadd.f32 %v1581_v62, %v1580_v56  ;;  %v1969_v2 = vadd.f32 %v1968_v52, %v1967_v24  ;;  %v1595_v56 = vsel %vm1249_vm0, %v3299_v1, 0.0  ;;  %v1749_v24 = vmul.f32 %v3358_v17, %v3358_v17 }
 0x235   : > { %v1118_v60 = vpop.f32.mrf.mxu3  ;;  %v1599_v1 = vsel %vm1249_vm0, %v3375_v0, 0.0  ;;  %v1603_v0 = vsel %vm1249_vm0, %v3434_v13, 0.0 }
 0x236   : > { %v1584_v31 = vadd.f32 %v1583_v54, %v1582_v40  ;;  %v1971_v45 = vadd.f32 %v1970_v18, %v1969_v2  ;;  %v1119_v48 = vadd.f32 %v3730_v39, %v1118_v60  ;;  %v1747_v39 = vmul.f32 %v3281_v59, %v3281_v59 }
 0x237   : > { %v1597_v59 = vsel %vm1249_vm0, %v3358_v17, 0.0  ;;  %v1986_v18 = vsel %vm1249_vm0, %v1749_v24, 0.0  ;;  %v1751_v54 = vmul.f32 %v3430_v6, %v3430_v6  ;;  %v1601_v17 = vsel %vm1249_vm0, %v3430_v6, 0.0 }
 0x238   : > { %v1586_v61 = vadd.f32 %v1585_v57, %v1584_v31  ;;  %v1973_v22 = vadd.f32 %v1972_v51, %v1971_v45  ;;  %v3845_v11 = vmax.f32 %v1119_v48, 0.0  ;;  %v1982_v20 = vsel %vm1249_vm0, %v1747_v39, 0.0 }
 0x239   : > { %v1988_v31 = vsel %vm1249_vm0, %v1750_v44, 0.0  ;;  %v1752_v45 = vmul.f32 %v3434_v13, %v3434_v13  ;;  %v1990_v19 = vsel %vm1249_vm0, %v1751_v54, 0.0  ;;  %v1605_v6 = vsel %vm1249_vm0, %v3494_v16, 0.0 }
 0x23a   : > { %v1588_v30 = vadd.f32 %v1587_v50, %v1586_v61  ;;  %v1975_v32 = vadd.f32 %v1974_v4, %v1973_v22  ;;  %1377 = vst.msk [vmem:[%s2631_s19 + $0x3f8] sm:$0xff] %vm1249_vm0, %v3845_v11  ;;  %v1754_v50 = vmul.f32 %v3498_v35, %v3498_v35  ;;  %v1994_v60 = vsel %vm1249_vm0, %v1753_v12, 0.0 }
 0x23b   : > { %v1992_v4 = vsel %vm1249_vm0, %v1752_v45, 0.0  ;;  %v1607_v13 = vsel %vm1249_vm0, %v3498_v35, 0.0  ;;  %v1609_v16 = vsel %vm1249_vm0, %v3558_v5, 0.0  ;;  %v1611_v35 = vsel %vm1249_vm0, %v3562_v9, 0.0 }
 0x23c   : > { %v1590_v27 = vadd.f32 %v1589_v25, %v1588_v30  ;;  %v1977_v33 = vadd.f32 %v1976_v10, %v1975_v32  ;;  %v1755_v30 = vmul.f32 %v3558_v5, %v3558_v5  ;;  %v1996_v10 = vsel %vm1249_vm0, %v1754_v50, 0.0 }
 0x23d   : > { %v1756_v25 = vmul.f32 %v3562_v9, %v3562_v9  ;;  %v1613_v5 = vsel %vm1249_vm0, %v3622_v34, 0.0  ;;  %v1615_v9 = vsel %vm1249_vm0, %v3626_v3, 0.0  ;;  %v1760_v24 = vmul.f32 %v3684_v28, %v3684_v28 }
 0x23e   : > { %v1979_v42 = vadd.f32 %v1978_v53, %v1977_v33  ;;  %v1592_v37 = vadd.f32 %v1591_v43, %v1590_v27  ;;  %v1998_v33 = vsel %vm1249_vm0, %v1755_v30, 0.0  ;;  %v1757_v53 = vmul.f32 %v3622_v34, %v3622_v34 }
 0x23f   : > { %v1617_v34 = vsel %vm1249_vm0, %v3682_v49, 0.0  ;;  %v1765_v12 = vmul.f32 %v3843_v46, %v3843_v46 }
 0x240   : > { %v1594_v29 = vadd.f32 %v1593_v23, %v1592_v37  ;;  %v1981_v7 = vadd.f32 %v1980_v47, %v1979_v42  ;;  %v2000_v42 = vsel %vm1249_vm0, %v1756_v25, 0.0  ;;  %v1758_v37 = vmul.f32 %v3626_v3, %v3626_v3 }
 0x241   : > { %v2002_v8 = vsel %vm1249_vm0, %v1757_v53, 0.0  ;;  %v1619_v3 = vsel %vm1249_vm0, %v3684_v28, 0.0  ;;  %v1623_v28 = vsel %vm1249_vm0, %v3741_v21, 0.0 }
 0x242   : > { %v1596_v52 = vadd.f32 %v1595_v56, %v1594_v29  ;;  %v1983_v62 = vadd.f32 %v1982_v20, %v1981_v7  ;;  %v1759_v29 = vmul.f32 %v3682_v49, %v3682_v49  ;;  %v2004_v56 = vsel %vm1249_vm0, %v1758_v37, 0.0 }
 0x243   : > { %v1621_v49 = vsel %vm1249_vm0, %v3739_v55, 0.0 }
 0x244   : > { %v1598_v40 = vadd.f32 %v1597_v59, %v1596_v52  ;;  %v1985_v2 = vadd.f32 %v1984_v41, %v1983_v62  ;;  %v2006_v41 = vsel %vm1249_vm0, %v1759_v29, 0.0  ;;  %v1761_v59 = vmul.f32 %v3739_v55, %v3739_v55 }
 0x245   : > { %v1625_v55 = vsel %vm1249_vm0, %v3791_v15, 0.0 }
 0x246   : > { %v1600_v58 = vadd.f32 %v1599_v1, %v1598_v40  ;;  %v1987_v36 = vadd.f32 %v1986_v18, %v1985_v2  ;;  %v2008_v2 = vsel %vm1249_vm0, %v1760_v24, 0.0  ;;  %v1762_v18 = vmul.f32 %v3741_v21, %v3741_v21 }
 0x247   : > { %v1627_v21 = vsel %vm1249_vm0, %v3793_v14, 0.0 }
 0x248   : > { %v1602_v51 = vadd.f32 %v1601_v17, %v1600_v58  ;;  %v1989_v57 = vadd.f32 %v1988_v31, %v1987_v36  ;;  %v2010_v58 = vsel %vm1249_vm0, %v1761_v59, 0.0  ;;  %v1763_v36 = vmul.f32 %v3791_v15, %v3791_v15 }
 0x249   : > { %v2012_v45 = vsel %vm1249_vm0, %v1762_v18, 0.0  ;;  %v1629_v15 = vsel %vm1249_vm0, %v3843_v46, 0.0 }
 0x24a   : > { %v1604_v61 = vadd.f32 %v1603_v0, %v1602_v51  ;;  %v1991_v22 = vadd.f32 %v1990_v19, %v1989_v57  ;;  %v1764_v51 = vmul.f32 %v3793_v14, %v3793_v14  ;;  %v2014_v0 = vsel %vm1249_vm0, %v1763_v36, 0.0 }
 0x24b   : > { %v1631_v14 = vsel %vm1249_vm0, %v3845_v11, 0.0 }
 0x24c   : > { %v1606_v26 = vadd.f32 %v1605_v6, %v1604_v61  ;;  %v1993_v63 = vadd.f32 %v1992_v4, %v1991_v22  ;;  %v2016_v4 = vsel %vm1249_vm0, %v1764_v51, 0.0  ;;  %v1766_v6 = vmul.f32 %v3845_v11, %v3845_v11 }
 0x24e   : > { %v1608_v32 = vadd.f32 %v1607_v13, %v1606_v26  ;;  %v1995_v48 = vadd.f32 %v1994_v60, %v1993_v63  ;;  %v2018_v63 = vsel %vm1249_vm0, %v1765_v12, 0.0  ;;  %v2020_v30 = vsel %vm1249_vm0, %v1766_v6, 0.0 }
 0x250   : > { %v1610_v38 = vadd.f32 %v1609_v16, %v1608_v32  ;;  %v1997_v27 = vadd.f32 %v1996_v10, %v1995_v48 }
 0x252   : > { %v1612_v43 = vadd.f32 %v1611_v35, %v1610_v38  ;;  %v1999_v39 = vadd.f32 %v1998_v33, %v1997_v27 }
 0x254   : > { %v1614_v47 = vadd.f32 %v1613_v5, %v1612_v43  ;;  %v2001_v23 = vadd.f32 %v2000_v42, %v1999_v39 }
 0x256   : > { %v1616_v7 = vadd.f32 %v1615_v9, %v1614_v47  ;;  %v2003_v20 = vadd.f32 %v2002_v8, %v2001_v23 }
 0x258   : > { %v2005_v52 = vadd.f32 %v2004_v56, %v2003_v20  ;;  %v1618_v62 = vadd.f32 %v1617_v34, %v1616_v7 }
 0x25a   : > { %v2007_v44 = vadd.f32 %v2006_v41, %v2005_v52  ;;  %v1620_v40 = vadd.f32 %v1619_v3, %v1618_v62 }
 0x25c   : > { %v2009_v1 = vadd.f32 %v2008_v2, %v2007_v44  ;;  %v1622_v54 = vadd.f32 %v1621_v49, %v1620_v40 }
 0x25e   : > { %v2011_v31 = vadd.f32 %v2010_v58, %v2009_v1  ;;  %v1624_v17 = vadd.f32 %v1623_v28, %v1622_v54 }
 0x260   : > { %v2013_v57 = vadd.f32 %v2012_v45, %v2011_v31  ;;  %v1626_v19 = vadd.f32 %v1625_v55, %v1624_v17 }
 0x262   : > { %v2015_v61 = vadd.f32 %v2014_v0, %v2013_v57  ;;  %v1628_v22 = vadd.f32 %v1627_v21, %v1626_v19 }
 0x264   : > { %v2017_v50 = vadd.f32 %v2016_v4, %v2015_v61  ;;  %v1630_v26 = vadd.f32 %v1629_v15, %v1628_v22 }
 0x266   : > { %v2019_v60 = vadd.f32 %v2018_v63, %v2017_v50  ;;  %v1632_v13 = vadd.f32 %v1631_v14, %v1630_v26 }
 0x268   : > { %v1633_v32 = vrot.slane %v1632_v13, 4  ;;  %v2021_v48 = vadd.f32 %v2020_v30, %v2019_v60 }
 0x26a   : > { %v1634_v10 = vadd.f32 %v1633_v32, %v1632_v13  ;;  %v2022_v46 = vrot.slane %v2021_v48, 4 }
 0x26c   : > { %v1635_v16 = vrot.slane %v1634_v10, 2  ;;  %v2023_v25 = vadd.f32 %v2022_v46, %v2021_v48 }
 0x26e   : > { %v1636_v38 = vadd.f32 %v1635_v16, %v1634_v10  ;;  %v2024_v27 = vrot.slane %v2023_v25, 2 }
 0x270   : > { %v1637_v33 = vrot.slane %v1636_v38, 1  ;;  %v2025_v35 = vadd.f32 %v2024_v27, %v2023_v25 }
 0x272   : > { %v2026_v53 = vrot.slane %v2025_v35, 1  ;;  %v1638_v11 = vadd.f32 %v1637_v33, %v1636_v38 }
 0x274   : > { %v2027_v43 = vadd.f32 %v2026_v53, %v2025_v35 }
 0x276   : > { %v2029_v39 = vsel %vm2028_vm1, %v1638_v11, %v2027_v43 }
 0x277   : > { %2031 = vst.msk [vmem:[%s211_s27] sm:$0x3] %vm2030_vm2, %v2029_v39 }
 0x278 PF: > { %s15_s15 = sadd.s32 1, %s2532_s15  }
 0x279   : > { %p12_p5 = scmp.ge.s32.totalorder %s15_s15, 6  }
 0x27b   :  { %14 = sbr.rel (!%p12_p5) target bundleno = 1 (0x1), region = 74 }

</bundles_post_ra>
